<compile_context>
chip_gen: v7x
topology: tpu7x:2x2x1
jax: 0.10.0
libtpu: 0.0.40
codegen_flags: <defaults>
</compile_context>

<pallas_src>
import jax
import jax.numpy as jnp
from jax import lax
from jax.experimental import pallas as pl
from jax.experimental.pallas import tpu as pltpu


# ---------------------------------------------------------------------------
# In-kernel helpers
# ---------------------------------------------------------------------------
def _store_with_halo(pad_ref, interior):
    """pad_ref[:, 1:-1, 1:-1, :] = interior; zero only the 1-pixel halo.

    Static slice stores only (no int / strided ref indexing); writes ~1/3
    fewer elements than zeroing the whole buffer first.
    """
    n, hp, wp, c = pad_ref.shape
    zrow = jnp.zeros((n, 1, wp, c), jnp.float32)
    zcol = jnp.zeros((n, hp - 2, 1, c), jnp.float32)
    pad_ref[:, 0:1, :, :] = zrow
    pad_ref[:, hp - 1:hp, :, :] = zrow
    pad_ref[:, 1:hp - 1, 0:1, :] = zcol
    pad_ref[:, 1:hp - 1, wp - 1:wp, :] = zcol
    pad_ref[:, 1:hp - 1, 1:wp - 1, :] = interior


def _max_even_odd_rows(q, out_rows):
    """out[r, :] = max(q[2r, :], q[2r+1, :]).

    Even/odd row decimation expressed as two tiny 0/1 selection-matrix matmuls
    on the (otherwise idle) MXU: avoids strided sublane gathers and sub-8-row
    reshapes, which keeps both Mosaic lowering and the interpreter happy.
    """
    src_rows = q.shape[0]
    r_idx = lax.broadcasted_iota(jnp.int32, (out_rows, src_rows), 0)
    c_idx = lax.broadcasted_iota(jnp.int32, (out_rows, src_rows), 1)
    sel_even = jnp.where(c_idx == 2 * r_idx, 1.0, 0.0).astype(q.dtype)
    sel_odd = jnp.where(c_idx == 2 * r_idx + 1, 1.0, 0.0).astype(q.dtype)
    even = jnp.dot(sel_even, q, preferred_element_type=jnp.float32)
    odd = jnp.dot(sel_odd, q, preferred_element_type=jnp.float32)
    return jnp.maximum(even, odd)


# ---------------------------------------------------------------------------
# Fused Pallas kernel: entire autoencoder forward, everything VMEM-resident.
# ---------------------------------------------------------------------------
def _fused_autoencoder_kernel(x_ref,                  # (bn, 16, 16, 3)  NHWC input block
                              w1_ref, b1_ref,         # (27, 16), (1, 16)
                              w2_ref, b2_ref,         # (144, 4), (1, 4)
                              w3_ref, b3_ref,         # (4, 64),  (1, 64)
                              w4_ref, b4_ref,         # (64, 128), (1, 128)  block-diag, lane-padded
                              o_ref,                  # (16*bn, 128) rows=(n,ip,jp), cols=(kh,kw,kh2,kw2,c)+pad
                              xp1_ref,                # scratch (bn, 18, 18, 3)   padded input
                              xp2_ref):               # scratch (bn, 10, 10, 16)  padded pool1 output
    f32 = jnp.float32
    bn = x_ref.shape[0]

    # -------- conv1 (3x3, pad=1) + ReLU: one im2col GEMM, K = 27 --------------
    _store_with_halo(xp1_ref, x_ref[...])                   # pad folded into kernel
    xp1 = xp1_ref[...]                                       # (bn, 18, 18, 3)
    wins = [xp1[:, dh:dh + 16, dw:dw + 16, :]                # shifted 3x3 windows
            for dh in range(3) for dw in range(3)]
    col1 = jnp.concatenate(wins, axis=3).reshape(bn * 256, 27)
    a1 = jnp.dot(col1, w1_ref[...], preferred_element_type=f32) + b1_ref[...]
    a1 = jnp.maximum(a1, 0.0)                                # (256*bn, 16) rows=(n,i,j)

    # -------- maxpool 2x2 / stride 2 -------------------------------------------
    a1 = a1.reshape(bn, 8, 2, 16, 16)                        # (n, i//2, i%2, j, c)
    qh = jnp.maximum(a1[:, :, 0, :, :], a1[:, :, 1, :, :])   # H-direction max
    p1 = _max_even_odd_rows(qh.reshape(bn * 128, 16), bn * 64)   # W-direction -> (64*bn, 16)

    # -------- conv2 (3x3, pad=1) + ReLU: one im2col GEMM, K = 144 --------------
    _store_with_halo(xp2_ref, p1.reshape(bn, 8, 8, 16))
    xp2 = xp2_ref[...]                                       # (bn, 10, 10, 16)
    wins2 = [xp2[:, dh:dh + 8, dw:dw + 8, :]
             for dh in range(3) for dw in range(3)]
    col2 = jnp.concatenate(wins2, axis=3).reshape(bn * 64, 144)
    a2 = jnp.dot(col2, w2_ref[...], preferred_element_type=f32) + b2_ref[...]
    a2 = jnp.maximum(a2, 0.0)                                # (64*bn, 4) rows=(n,i,j)

    # -------- maxpool 2x2 / stride 2 -------------------------------------------
    a2 = a2.reshape(bn, 4, 2, 8, 4)
    q2 = jnp.maximum(a2[:, :, 0, :, :], a2[:, :, 1, :, :])
    x3 = _max_even_odd_rows(q2.reshape(bn * 32, 4), bn * 16)     # (16*bn, 4) rows=(n,ip,jp)

    # -------- t_conv1 (2x2, stride 2) + ReLU: one GEMM, taps in the lane dim ---
    d1 = jnp.dot(x3, w3_ref[...], preferred_element_type=f32) + b3_ref[...]
    d1 = jnp.maximum(d1, 0.0)                                # (16*bn, 64) cols=(kh,kw,co)

    # -------- t_conv2 (2x2, stride 2) + sigmoid: one block-diagonal GEMM -------
    y = jnp.dot(d1, w4_ref[...], preferred_element_type=f32) + b4_ref[...]
    o_ref[...] = 1.0 / (1.0 + jnp.exp(-y))                   # lane-dense (16*bn, 128)


# ---------------------------------------------------------------------------
# One-time parameter preprocessing (hoisted out of the jitted forward).
# ---------------------------------------------------------------------------
def preprocess_params(params):
    f32 = jnp.float32
    # conv weights (Cout, Cin, kh, kw) -> im2col matrices, row order (kh, kw, cin)
    w1 = jnp.transpose(params["conv1_w"], (2, 3, 1, 0)).reshape(27, 16).astype(f32)
    b1 = params["conv1_b"].reshape(1, 16).astype(f32)
    w2 = jnp.transpose(params["conv2_w"], (2, 3, 1, 0)).reshape(144, 4).astype(f32)
    b2 = params["conv2_b"].reshape(1, 4).astype(f32)
    # t_conv1 (Cin, Cout, kh, kw) -> (Cin, (kh, kw, Cout)) : all 4 taps in one GEMM
    w3 = jnp.transpose(params["t_conv1_w"], (0, 2, 3, 1)).reshape(4, 64).astype(f32)
    b3 = jnp.tile(params["t_conv1_b"], 4).reshape(1, 64).astype(f32)
    # t_conv2 as one block-diagonal GEMM: block t=(kh,kw) maps d1's 16 channels
    # to 12 output cols ordered (kh2, kw2, cout); lane-padded to 128 columns.
    w4s = jnp.transpose(params["t_conv2_w"], (0, 2, 3, 1)).reshape(16, 12).astype(f32)
    w4 = jnp.zeros((64, 128), f32)
    for t in range(4):
        w4 = w4.at[16 * t:16 * (t + 1), 12 * t:12 * (t + 1)].set(w4s)
    b4 = jnp.zeros((1, 128), f32)
    b4 = b4.at[:, :48].set(jnp.tile(params["t_conv2_b"], 16).reshape(1, 48))
    return {"w1": w1, "b1": b1, "w2": w2, "b2": b2,
            "w3": w3, "b3": b3, "w4": w4, "b4": b4}


# ---------------------------------------------------------------------------
# Forward pass: one fused pallas_call + tiny XLA layout glue on input/output.
# ---------------------------------------------------------------------------
def conv_autoencoder_forward(x_nchw, pp, *, batch_block=None):
    n = x_nchw.shape[0]
    bn = n if batch_block is None else batch_block
    assert n % bn == 0, "batch must be divisible by the batch block"
    x = jnp.transpose(x_nchw, (0, 2, 3, 1)).astype(jnp.float32)    # NCHW -> NHWC (tiny)

    def _full(shape):
        return pl.BlockSpec(shape, lambda i, _s=shape: (0,) * len(_s))

    out = pl.pallas_call(
        _fused_autoencoder_kernel,
        out_shape=jax.ShapeDtypeStruct((16 * n, 128), jnp.float32),
        grid=(n // bn,),
        in_specs=[
            pl.BlockSpec((bn, 16, 16, 3), lambda i: (i, 0, 0, 0)),
            _full((27, 16)), _full((1, 16)),
            _full((144, 4)), _full((1, 4)),
            _full((4, 64)), _full((1, 64)),
            _full((64, 128)), _full((1, 128)),
        ],
        out_specs=pl.BlockSpec((16 * bn, 128), lambda i: (i, 0)),
        scratch_shapes=[
            pltpu.VMEM((bn, 18, 18, 3), jnp.float32),     # padded input
            pltpu.VMEM((bn, 10, 10, 16), jnp.float32),    # padded pool1 output
        ],
        compiler_params=pltpu.CompilerParams(
            dimension_semantics=("parallel",)),
    )(x, pp["w1"], pp["b1"], pp["w2"], pp["b2"],
      pp["w3"], pp["b3"], pp["w4"], pp["b4"])

    # Un-permute the single 6 KiB result:
    # rows = (n, ip, jp), cols = (kh, kw, kh2, kw2, c);
    # H = 4*ip + 2*kh + kh2,  W = 4*jp + 2*kw + kw2.
    y = out[:, :48].reshape(n, 4, 4, 2, 2, 2, 2, 3)
    y = jnp.transpose(y, (0, 7, 1, 3, 5, 2, 4, 6)).reshape(n, 3, 16, 16)
    return y


# ---------------------------------------------------------------------------
# Pure-JAX reference (for numeric verification of the fused kernel).
# ---------------------------------------------------------------------------
def reference_forward(x_nchw, params):
    x = jnp.transpose(x_nchw, (0, 2, 3, 1))

    def conv3x3_relu(x, w_pt, b):
        n, h, wd, _ = x.shape
        xp = jnp.pad(x, ((0, 0), (1, 1), (1, 1), (0, 0)))
        acc = jnp.zeros((n, h, wd, w_pt.shape[0]), jnp.float32)
        for dh in range(3):
            for dw in range(3):
                acc = acc + jnp.einsum("nhwc,oc->nhwo",
                                       xp[:, dh:dh + h, dw:dw + wd, :],
                                       w_pt[:, :, dh, dw], precision="highest")
        return jnp.maximum(acc + b, 0.0)

    def pool2x2(x):
        n, h, wd, c = x.shape
        return jnp.max(x.reshape(n, h // 2, 2, wd // 2, 2, c), axis=(2, 4))

    def tconv2x2(x, w_pt, b):
        n, h, wd, _ = x.shape
        cout = w_pt.shape[1]
        t = jnp.einsum("nhwc,coKL->nhKwLo", x, w_pt, precision="highest")
        return t.reshape(n, 2 * h, 2 * wd, cout) + b

    h1 = pool2x2(conv3x3_relu(x, params["conv1_w"], params["conv1_b"]))
    h2 = pool2x2(conv3x3_relu(h1, params["conv2_w"], params["conv2_b"]))
    d1 = jnp.maximum(tconv2x2(h2, params["t_conv1_w"], params["t_conv1_b"]), 0.0)
    d2 = jax.nn.sigmoid(tconv2x2(d1, params["t_conv2_w"], params["t_conv2_b"]))
    return jnp.transpose(d2, (0, 3, 1, 2))


# ---------------------------------------------------------------------------
# Deterministic PyTorch-layout parameter initialization
# ---------------------------------------------------------------------------
def init_params(key):
    ks = jax.random.split(key, 8)

    def u(k, shape, fan_in):
        bound = 1.0 / jnp.sqrt(jnp.float32(fan_in))
        return jax.random.uniform(k, shape, jnp.float32, -bound, bound)

    return {
        "conv1_w":   u(ks[0], (16, 3, 3, 3), 3 * 9),    # Conv2d(3, 16, 3, pad=1)
        "conv1_b":   u(ks[1], (16,),         3 * 9),
        "conv2_w":   u(ks[2], (4, 16, 3, 3), 16 * 9),   # Conv2d(16, 4, 3, pad=1)
        "conv2_b":   u(ks[3], (4,),          16 * 9),
        "t_conv1_w": u(ks[4], (4, 16, 2, 2), 16 * 4),   # ConvTranspose2d(4, 16, 2, s=2)
        "t_conv1_b": u(ks[5], (16,),         16 * 4),
        "t_conv2_w": u(ks[6], (16, 3, 2, 2), 3 * 4),    # ConvTranspose2d(16, 3, 2, s=2)
        "t_conv2_b": u(ks[7], (3,),          3 * 4),
    }


if __name__ == "__main__":
    key = jax.random.PRNGKey(0)
    k_p, k_x = jax.random.split(key)
    params = init_params(k_p)
    x = jax.random.normal(k_x, (2, 3, 16, 16), dtype=jnp.float32)   # NCHW like PyTorch

    prepped = preprocess_params(params)                 # one-time weight prep (outside jit)
    fwd = jax.jit(conv_autoencoder_forward)
    out = jax.block_until_ready(fwd(x, prepped))

    assert out.shape == (2, 3, 16, 16), out.shape
    assert out.dtype == jnp.float32
    assert bool(jnp.all(out >= 0.0)) and bool(jnp.all(out <= 1.0))  # sigmoid range

    ref = reference_forward(x, params)
    err = float(jnp.max(jnp.abs(out - ref)))
    # Gap vs the "highest"-precision reference comes from default (bf16-input)
    # matmul precision / accumulation order, not from a layout defect.
    assert err < 5e-3, f"max abs error vs reference: {err}"
    print("KERNEL_OK")
</pallas_src>

<mosaic_0001>
module attributes {stable_mosaic.version = 11 : i64} {
  func.func @_fused_autoencoder_kernel(%arg0: i32, %arg1: memref<2x16x16x3xf32, #tpu.memory_space<vmem>>, %arg2: memref<27x16xf32, #tpu.memory_space<vmem>>, %arg3: memref<1x16xf32, #tpu.memory_space<vmem>>, %arg4: memref<144x4xf32, #tpu.memory_space<vmem>>, %arg5: memref<1x4xf32, #tpu.memory_space<vmem>>, %arg6: memref<4x64xf32, #tpu.memory_space<vmem>>, %arg7: memref<1x64xf32, #tpu.memory_space<vmem>>, %arg8: memref<64x128xf32, #tpu.memory_space<vmem>>, %arg9: memref<1x128xf32, #tpu.memory_space<vmem>>, %arg10: memref<32x128xf32, #tpu.memory_space<vmem>>, %arg11: memref<2x18x18x3xf32, #tpu.memory_space<vmem>>, %arg12: memref<2x10x10x16xf32, #tpu.memory_space<vmem>>) attributes {dimension_semantics = [#tpu.dimension_semantics<parallel>], iteration_bounds = array<i64: 1>, scalar_prefetch = 0 : i64, scratch_operands = 2 : i64, tpu.core_type = #tpu.core_type<tc>, window_params = [{transform_indices = @transform_0, window_bounds = array<i64: 2, 16, 16, 3>}, {pipeline_mode = #tpu.pipeline_mode<synchronous>, transform_indices = @transform_1, window_bounds = array<i64: 27, 16>}, {pipeline_mode = #tpu.pipeline_mode<synchronous>, transform_indices = @transform_2, window_bounds = array<i64: 1, 16>}, {pipeline_mode = #tpu.pipeline_mode<synchronous>, transform_indices = @transform_3, window_bounds = array<i64: 144, 4>}, {pipeline_mode = #tpu.pipeline_mode<synchronous>, transform_indices = @transform_4, window_bounds = array<i64: 1, 4>}, {pipeline_mode = #tpu.pipeline_mode<synchronous>, transform_indices = @transform_5, window_bounds = array<i64: 4, 64>}, {pipeline_mode = #tpu.pipeline_mode<synchronous>, transform_indices = @transform_6, window_bounds = array<i64: 1, 64>}, {pipeline_mode = #tpu.pipeline_mode<synchronous>, transform_indices = @transform_7, window_bounds = array<i64: 64, 128>}, {pipeline_mode = #tpu.pipeline_mode<synchronous>, transform_indices = @transform_8, window_bounds = array<i64: 1, 128>}, {transform_indices = @transform_9, window_bounds = array<i64: 32, 128>}]} {
    %c0 = arith.constant 0 : index
    %c0_0 = arith.constant 0 : index
    %c0_1 = arith.constant 0 : index
    %c0_2 = arith.constant 0 : index
    %0 = vector.load %arg1[%c0, %c0_0, %c0_1, %c0_2] : memref<2x16x16x3xf32, #tpu.memory_space<vmem>>, vector<2x16x16x3xf32>
    %cst = arith.constant 0.000000e+00 : f32
    %1 = vector.broadcast %cst : f32 to vector<2x1x18x3xf32>
    %cst_3 = arith.constant 0.000000e+00 : f32
    %2 = vector.broadcast %cst_3 : f32 to vector<2x16x1x3xf32>
    %c0_4 = arith.constant 0 : index
    %c0_5 = arith.constant 0 : index
    %c0_6 = arith.constant 0 : index
    %c0_7 = arith.constant 0 : index
    %3 = vector.load %arg11[%c0_4, %c0_5, %c0_6, %c0_7] : memref<2x18x18x3xf32, #tpu.memory_space<vmem>>, vector<2x1x18x3xf32>
    tpu.vector_store %arg11[%c0_4, %c0_5, %c0_6, %c0_7], %1 {strides = array<i32>} : memref<2x18x18x3xf32, #tpu.memory_space<vmem>>, vector<2x1x18x3xf32>,
    %c0_8 = arith.constant 0 : index
    %c17 = arith.constant 17 : index
    %c0_9 = arith.constant 0 : index
    %c0_10 = arith.constant 0 : index
    %4 = vector.load %arg11[%c0_8, %c17, %c0_9, %c0_10] : memref<2x18x18x3xf32, #tpu.memory_space<vmem>>, vector<2x1x18x3xf32>
    tpu.vector_store %arg11[%c0_8, %c17, %c0_9, %c0_10], %1 {strides = array<i32>} : memref<2x18x18x3xf32, #tpu.memory_space<vmem>>, vector<2x1x18x3xf32>,
    %c0_11 = arith.constant 0 : index
    %c1 = arith.constant 1 : index
    %c0_12 = arith.constant 0 : index
    %c0_13 = arith.constant 0 : index
    %5 = vector.load %arg11[%c0_11, %c1, %c0_12, %c0_13] : memref<2x18x18x3xf32, #tpu.memory_space<vmem>>, vector<2x16x1x3xf32>
    tpu.vector_store %arg11[%c0_11, %c1, %c0_12, %c0_13], %2 {strides = array<i32>} : memref<2x18x18x3xf32, #tpu.memory_space<vmem>>, vector<2x16x1x3xf32>,
    %c0_14 = arith.constant 0 : index
    %c1_15 = arith.constant 1 : index
    %c17_16 = arith.constant 17 : index
    %c0_17 = arith.constant 0 : index
    %6 = vector.load %arg11[%c0_14, %c1_15, %c17_16, %c0_17] : memref<2x18x18x3xf32, #tpu.memory_space<vmem>>, vector<2x16x1x3xf32>
    tpu.vector_store %arg11[%c0_14, %c1_15, %c17_16, %c0_17], %2 {strides = array<i32>} : memref<2x18x18x3xf32, #tpu.memory_space<vmem>>, vector<2x16x1x3xf32>,
    %c0_18 = arith.constant 0 : index
    %c1_19 = arith.constant 1 : index
    %c1_20 = arith.constant 1 : index
    %c0_21 = arith.constant 0 : index
    %7 = vector.load %arg11[%c0_18, %c1_19, %c1_20, %c0_21] : memref<2x18x18x3xf32, #tpu.memory_space<vmem>>, vector<2x16x16x3xf32>
    tpu.vector_store %arg11[%c0_18, %c1_19, %c1_20, %c0_21], %0 {strides = array<i32>} : memref<2x18x18x3xf32, #tpu.memory_space<vmem>>, vector<2x16x16x3xf32>,
    %c0_22 = arith.constant 0 : index
    %c0_23 = arith.constant 0 : index
    %c0_24 = arith.constant 0 : index
    %c0_25 = arith.constant 0 : index
    %8 = vector.load %arg11[%c0_22, %c0_23, %c0_24, %c0_25] : memref<2x18x18x3xf32, #tpu.memory_space<vmem>>, vector<2x18x18x3xf32>
    %9 = vector.extract_strided_slice %8 {offsets = [0, 0, 0, 0], sizes = [2, 16, 16, 3], strides = [1, 1, 1, 1]} : vector<2x18x18x3xf32> to vector<2x16x16x3xf32>
    %10 = vector.extract_strided_slice %8 {offsets = [0, 0, 1, 0], sizes = [2, 16, 16, 3], strides = [1, 1, 1, 1]} : vector<2x18x18x3xf32> to vector<2x16x16x3xf32>
    %11 = vector.extract_strided_slice %8 {offsets = [0, 0, 2, 0], sizes = [2, 16, 16, 3], strides = [1, 1, 1, 1]} : vector<2x18x18x3xf32> to vector<2x16x16x3xf32>
    %12 = vector.extract_strided_slice %8 {offsets = [0, 1, 0, 0], sizes = [2, 16, 16, 3], strides = [1, 1, 1, 1]} : vector<2x18x18x3xf32> to vector<2x16x16x3xf32>
    %13 = vector.extract_strided_slice %8 {offsets = [0, 1, 1, 0], sizes = [2, 16, 16, 3], strides = [1, 1, 1, 1]} : vector<2x18x18x3xf32> to vector<2x16x16x3xf32>
    %14 = vector.extract_strided_slice %8 {offsets = [0, 1, 2, 0], sizes = [2, 16, 16, 3], strides = [1, 1, 1, 1]} : vector<2x18x18x3xf32> to vector<2x16x16x3xf32>
    %15 = vector.extract_strided_slice %8 {offsets = [0, 2, 0, 0], sizes = [2, 16, 16, 3], strides = [1, 1, 1, 1]} : vector<2x18x18x3xf32> to vector<2x16x16x3xf32>
    %16 = vector.extract_strided_slice %8 {offsets = [0, 2, 1, 0], sizes = [2, 16, 16, 3], strides = [1, 1, 1, 1]} : vector<2x18x18x3xf32> to vector<2x16x16x3xf32>
    %17 = vector.extract_strided_slice %8 {offsets = [0, 2, 2, 0], sizes = [2, 16, 16, 3], strides = [1, 1, 1, 1]} : vector<2x18x18x3xf32> to vector<2x16x16x3xf32>
    %18 = tpu.concatenate %9, %10, %11, %12, %13, %14, %15, %16, %17 in 3 : vector<2x16x16x3xf32>, vector<2x16x16x3xf32>, vector<2x16x16x3xf32>, vector<2x16x16x3xf32>, vector<2x16x16x3xf32>, vector<2x16x16x3xf32>, vector<2x16x16x3xf32>, vector<2x16x16x3xf32>, vector<2x16x16x3xf32> -> vector<2x16x16x27xf32>
    %19 = vector.shape_cast %18 : vector<2x16x16x27xf32> to vector<512x27xf32>
    %c0_26 = arith.constant 0 : index
    %c0_27 = arith.constant 0 : index
    %20 = vector.load %arg2[%c0_26, %c0_27] : memref<27x16xf32, #tpu.memory_space<vmem>>, vector<27x16xf32>
    %cst_28 = arith.constant dense<0.000000e+00> : vector<512x16xf32>
    %21 = tpu.matmul %19, %20, %cst_28 {dimension_numbers = #tpu.dot_dimension_numbers<[1], [0], [0], [1], [0, 0, 1, 1], [], []>} : vector<512x27xf32>, vector<27x16xf32>, vector<512x16xf32> -> vector<512x16xf32>
    %c0_29 = arith.constant 0 : index
    %c0_30 = arith.constant 0 : index
    %22 = vector.load %arg3[%c0_29, %c0_30] : memref<1x16xf32, #tpu.memory_space<vmem>>, vector<1x16xf32>
    %23 = vector.broadcast %22 : vector<1x16xf32> to vector<512x16xf32>
    %24 = arith.addf %21, %23 : vector<512x16xf32>
    %cst_31 = arith.constant 0.000000e+00 : f32
    %25 = vector.broadcast %cst_31 : f32 to vector<512x16xf32>
    %26 = arith.maximumf %24, %25 : vector<512x16xf32>
    %27 = vector.shape_cast %26 : vector<512x16xf32> to vector<2x8x2x16x16xf32>
    %28 = vector.extract_strided_slice %27 {offsets = [0, 0, 0, 0, 0], sizes = [2, 8, 1, 16, 16], strides = [1, 1, 1, 1, 1]} : vector<2x8x2x16x16xf32> to vector<2x8x1x16x16xf32>
    %29 = vector.shape_cast %28 : vector<2x8x1x16x16xf32> to vector<2x8x16x16xf32>
    %30 = vector.extract_strided_slice %27 {offsets = [0, 0, 1, 0, 0], sizes = [2, 8, 1, 16, 16], strides = [1, 1, 1, 1, 1]} : vector<2x8x2x16x16xf32> to vector<2x8x1x16x16xf32>
    %31 = vector.shape_cast %30 : vector<2x8x1x16x16xf32> to vector<2x8x16x16xf32>
    %32 = arith.maximumf %29, %31 : vector<2x8x16x16xf32>
    %33 = vector.shape_cast %32 : vector<2x8x16x16xf32> to vector<256x16xf32>
    %34 = tpu.iota {dimensions = array<i32: 0>} : vector<128x256xi32>
    %35 = tpu.iota {dimensions = array<i32: 1>} : vector<128x256xi32>
    %c2_i32 = arith.constant 2 : i32
    %36 = vector.broadcast %c2_i32 : i32 to vector<128x256xi32>
    %37 = arith.muli %36, %34 : vector<128x256xi32>
    %38 = arith.cmpi eq, %35, %37 : vector<128x256xi32>
    %cst_32 = arith.constant 1.000000e+00 : f32
    %cst_33 = arith.constant 0.000000e+00 : f32
    %39 = vector.broadcast %cst_32 : f32 to vector<128x256xf32>
    %40 = vector.broadcast %cst_33 : f32 to vector<128x256xf32>
    %41 = arith.select %38, %39, %40 : vector<128x256xi1>, vector<128x256xf32>
    %c2_i32_34 = arith.constant 2 : i32
    %42 = vector.broadcast %c2_i32_34 : i32 to vector<128x256xi32>
    %43 = arith.muli %42, %34 : vector<128x256xi32>
    %c1_i32 = arith.constant 1 : i32
    %44 = vector.broadcast %c1_i32 : i32 to vector<128x256xi32>
    %45 = arith.addi %43, %44 : vector<128x256xi32>
    %46 = arith.cmpi eq, %35, %45 : vector<128x256xi32>
    %cst_35 = arith.constant 1.000000e+00 : f32
    %cst_36 = arith.constant 0.000000e+00 : f32
    %47 = vector.broadcast %cst_35 : f32 to vector<128x256xf32>
    %48 = vector.broadcast %cst_36 : f32 to vector<128x256xf32>
    %49 = arith.select %46, %47, %48 : vector<128x256xi1>, vector<128x256xf32>
    %cst_37 = arith.constant dense<0.000000e+00> : vector<128x16xf32>
    %50 = tpu.matmul %41, %33, %cst_37 {dimension_numbers = #tpu.dot_dimension_numbers<[1], [0], [0], [1], [0, 0, 1, 1], [], []>} : vector<128x256xf32>, vector<256x16xf32>, vector<128x16xf32> -> vector<128x16xf32>
    %cst_38 = arith.constant dense<0.000000e+00> : vector<128x16xf32>
    %51 = tpu.matmul %49, %33, %cst_38 {dimension_numbers = #tpu.dot_dimension_numbers<[1], [0], [0], [1], [0, 0, 1, 1], [], []>} : vector<128x256xf32>, vector<256x16xf32>, vector<128x16xf32> -> vector<128x16xf32>
    %52 = arith.maximumf %50, %51 : vector<128x16xf32>
    %53 = vector.shape_cast %52 : vector<128x16xf32> to vector<2x8x8x16xf32>
    %cst_39 = arith.constant 0.000000e+00 : f32
    %54 = vector.broadcast %cst_39 : f32 to vector<2x1x10x16xf32>
    %cst_40 = arith.constant 0.000000e+00 : f32
    %55 = vector.broadcast %cst_40 : f32 to vector<2x8x1x16xf32>
    %c0_41 = arith.constant 0 : index
    %c0_42 = arith.constant 0 : index
    %c0_43 = arith.constant 0 : index
    %c0_44 = arith.constant 0 : index
    %56 = vector.load %arg12[%c0_41, %c0_42, %c0_43, %c0_44] : memref<2x10x10x16xf32, #tpu.memory_space<vmem>>, vector<2x1x10x16xf32>
    tpu.vector_store %arg12[%c0_41, %c0_42, %c0_43, %c0_44], %54 {strides = array<i32>} : memref<2x10x10x16xf32, #tpu.memory_space<vmem>>, vector<2x1x10x16xf32>,
    %c0_45 = arith.constant 0 : index
    %c9 = arith.constant 9 : index
    %c0_46 = arith.constant 0 : index
    %c0_47 = arith.constant 0 : index
    %57 = vector.load %arg12[%c0_45, %c9, %c0_46, %c0_47] : memref<2x10x10x16xf32, #tpu.memory_space<vmem>>, vector<2x1x10x16xf32>
    tpu.vector_store %arg12[%c0_45, %c9, %c0_46, %c0_47], %54 {strides = array<i32>} : memref<2x10x10x16xf32, #tpu.memory_space<vmem>>, vector<2x1x10x16xf32>,
    %c0_48 = arith.constant 0 : index
    %c1_49 = arith.constant 1 : index
    %c0_50 = arith.constant 0 : index
    %c0_51 = arith.constant 0 : index
    %58 = vector.load %arg12[%c0_48, %c1_49, %c0_50, %c0_51] : memref<2x10x10x16xf32, #tpu.memory_space<vmem>>, vector<2x8x1x16xf32>
    tpu.vector_store %arg12[%c0_48, %c1_49, %c0_50, %c0_51], %55 {strides = array<i32>} : memref<2x10x10x16xf32, #tpu.memory_space<vmem>>, vector<2x8x1x16xf32>,
    %c0_52 = arith.constant 0 : index
    %c1_53 = arith.constant 1 : index
    %c9_54 = arith.constant 9 : index
    %c0_55 = arith.constant 0 : index
    %59 = vector.load %arg12[%c0_52, %c1_53, %c9_54, %c0_55] : memref<2x10x10x16xf32, #tpu.memory_space<vmem>>, vector<2x8x1x16xf32>
    tpu.vector_store %arg12[%c0_52, %c1_53, %c9_54, %c0_55], %55 {strides = array<i32>} : memref<2x10x10x16xf32, #tpu.memory_space<vmem>>, vector<2x8x1x16xf32>,
    %c0_56 = arith.constant 0 : index
    %c1_57 = arith.constant 1 : index
    %c1_58 = arith.constant 1 : index
    %c0_59 = arith.constant 0 : index
    %60 = vector.load %arg12[%c0_56, %c1_57, %c1_58, %c0_59] : memref<2x10x10x16xf32, #tpu.memory_space<vmem>>, vector<2x8x8x16xf32>
    tpu.vector_store %arg12[%c0_56, %c1_57, %c1_58, %c0_59], %53 {strides = array<i32>} : memref<2x10x10x16xf32, #tpu.memory_space<vmem>>, vector<2x8x8x16xf32>,
    %c0_60 = arith.constant 0 : index
    %c0_61 = arith.constant 0 : index
    %c0_62 = arith.constant 0 : index
    %c0_63 = arith.constant 0 : index
    %61 = vector.load %arg12[%c0_60, %c0_61, %c0_62, %c0_63] : memref<2x10x10x16xf32, #tpu.memory_space<vmem>>, vector<2x10x10x16xf32>
    %62 = vector.extract_strided_slice %61 {offsets = [0, 0, 0, 0], sizes = [2, 8, 8, 16], strides = [1, 1, 1, 1]} : vector<2x10x10x16xf32> to vector<2x8x8x16xf32>
    %63 = vector.extract_strided_slice %61 {offsets = [0, 0, 1, 0], sizes = [2, 8, 8, 16], strides = [1, 1, 1, 1]} : vector<2x10x10x16xf32> to vector<2x8x8x16xf32>
    %64 = vector.extract_strided_slice %61 {offsets = [0, 0, 2, 0], sizes = [2, 8, 8, 16], strides = [1, 1, 1, 1]} : vector<2x10x10x16xf32> to vector<2x8x8x16xf32>
    %65 = vector.extract_strided_slice %61 {offsets = [0, 1, 0, 0], sizes = [2, 8, 8, 16], strides = [1, 1, 1, 1]} : vector<2x10x10x16xf32> to vector<2x8x8x16xf32>
    %66 = vector.extract_strided_slice %61 {offsets = [0, 1, 1, 0], sizes = [2, 8, 8, 16], strides = [1, 1, 1, 1]} : vector<2x10x10x16xf32> to vector<2x8x8x16xf32>
    %67 = vector.extract_strided_slice %61 {offsets = [0, 1, 2, 0], sizes = [2, 8, 8, 16], strides = [1, 1, 1, 1]} : vector<2x10x10x16xf32> to vector<2x8x8x16xf32>
    %68 = vector.extract_strided_slice %61 {offsets = [0, 2, 0, 0], sizes = [2, 8, 8, 16], strides = [1, 1, 1, 1]} : vector<2x10x10x16xf32> to vector<2x8x8x16xf32>
    %69 = vector.extract_strided_slice %61 {offsets = [0, 2, 1, 0], sizes = [2, 8, 8, 16], strides = [1, 1, 1, 1]} : vector<2x10x10x16xf32> to vector<2x8x8x16xf32>
    %70 = vector.extract_strided_slice %61 {offsets = [0, 2, 2, 0], sizes = [2, 8, 8, 16], strides = [1, 1, 1, 1]} : vector<2x10x10x16xf32> to vector<2x8x8x16xf32>
    %71 = tpu.concatenate %62, %63, %64, %65, %66, %67, %68, %69, %70 in 3 : vector<2x8x8x16xf32>, vector<2x8x8x16xf32>, vector<2x8x8x16xf32>, vector<2x8x8x16xf32>, vector<2x8x8x16xf32>, vector<2x8x8x16xf32>, vector<2x8x8x16xf32>, vector<2x8x8x16xf32>, vector<2x8x8x16xf32> -> vector<2x8x8x144xf32>
    %72 = vector.shape_cast %71 : vector<2x8x8x144xf32> to vector<128x144xf32>
    %c0_64 = arith.constant 0 : index
    %c0_65 = arith.constant 0 : index
    %73 = vector.load %arg4[%c0_64, %c0_65] : memref<144x4xf32, #tpu.memory_space<vmem>>, vector<144x4xf32>
    %cst_66 = arith.constant dense<0.000000e+00> : vector<128x4xf32>
    %74 = tpu.matmul %72, %73, %cst_66 {dimension_numbers = #tpu.dot_dimension_numbers<[1], [0], [0], [1], [0, 0, 1, 1], [], []>} : vector<128x144xf32>, vector<144x4xf32>, vector<128x4xf32> -> vector<128x4xf32>
    %c0_67 = arith.constant 0 : index
    %c0_68 = arith.constant 0 : index
    %75 = vector.load %arg5[%c0_67, %c0_68] : memref<1x4xf32, #tpu.memory_space<vmem>>, vector<1x4xf32>
    %76 = vector.broadcast %75 : vector<1x4xf32> to vector<128x4xf32>
    %77 = arith.addf %74, %76 : vector<128x4xf32>
    %cst_69 = arith.constant 0.000000e+00 : f32
    %78 = vector.broadcast %cst_69 : f32 to vector<128x4xf32>
    %79 = arith.maximumf %77, %78 : vector<128x4xf32>
    %80 = vector.shape_cast %79 : vector<128x4xf32> to vector<2x4x2x8x4xf32>
    %81 = vector.extract_strided_slice %80 {offsets = [0, 0, 0, 0, 0], sizes = [2, 4, 1, 8, 4], strides = [1, 1, 1, 1, 1]} : vector<2x4x2x8x4xf32> to vector<2x4x1x8x4xf32>
    %82 = vector.shape_cast %81 : vector<2x4x1x8x4xf32> to vector<2x4x8x4xf32>
    %83 = vector.extract_strided_slice %80 {offsets = [0, 0, 1, 0, 0], sizes = [2, 4, 1, 8, 4], strides = [1, 1, 1, 1, 1]} : vector<2x4x2x8x4xf32> to vector<2x4x1x8x4xf32>
    %84 = vector.shape_cast %83 : vector<2x4x1x8x4xf32> to vector<2x4x8x4xf32>
    %85 = arith.maximumf %82, %84 : vector<2x4x8x4xf32>
    %86 = vector.shape_cast %85 : vector<2x4x8x4xf32> to vector<64x4xf32>
    %87 = tpu.iota {dimensions = array<i32: 0>} : vector<32x64xi32>
    %88 = tpu.iota {dimensions = array<i32: 1>} : vector<32x64xi32>
    %c2_i32_70 = arith.constant 2 : i32
    %89 = vector.broadcast %c2_i32_70 : i32 to vector<32x64xi32>
    %90 = arith.muli %89, %87 : vector<32x64xi32>
    %91 = arith.cmpi eq, %88, %90 : vector<32x64xi32>
    %cst_71 = arith.constant 1.000000e+00 : f32
    %cst_72 = arith.constant 0.000000e+00 : f32
    %92 = vector.broadcast %cst_71 : f32 to vector<32x64xf32>
    %93 = vector.broadcast %cst_72 : f32 to vector<32x64xf32>
    %94 = arith.select %91, %92, %93 : vector<32x64xi1>, vector<32x64xf32>
    %c2_i32_73 = arith.constant 2 : i32
    %95 = vector.broadcast %c2_i32_73 : i32 to vector<32x64xi32>
    %96 = arith.muli %95, %87 : vector<32x64xi32>
    %c1_i32_74 = arith.constant 1 : i32
    %97 = vector.broadcast %c1_i32_74 : i32 to vector<32x64xi32>
    %98 = arith.addi %96, %97 : vector<32x64xi32>
    %99 = arith.cmpi eq, %88, %98 : vector<32x64xi32>
    %cst_75 = arith.constant 1.000000e+00 : f32
    %cst_76 = arith.constant 0.000000e+00 : f32
    %100 = vector.broadcast %cst_75 : f32 to vector<32x64xf32>
    %101 = vector.broadcast %cst_76 : f32 to vector<32x64xf32>
    %102 = arith.select %99, %100, %101 : vector<32x64xi1>, vector<32x64xf32>
    %cst_77 = arith.constant dense<0.000000e+00> : vector<32x4xf32>
    %103 = tpu.matmul %94, %86, %cst_77 {dimension_numbers = #tpu.dot_dimension_numbers<[1], [0], [0], [1], [0, 0, 1, 1], [], []>} : vector<32x64xf32>, vector<64x4xf32>, vector<32x4xf32> -> vector<32x4xf32>
    %cst_78 = arith.constant dense<0.000000e+00> : vector<32x4xf32>
    %104 = tpu.matmul %102, %86, %cst_78 {dimension_numbers = #tpu.dot_dimension_numbers<[1], [0], [0], [1], [0, 0, 1, 1], [], []>} : vector<32x64xf32>, vector<64x4xf32>, vector<32x4xf32> -> vector<32x4xf32>
    %105 = arith.maximumf %103, %104 : vector<32x4xf32>
    %c0_79 = arith.constant 0 : index
    %c0_80 = arith.constant 0 : index
    %106 = vector.load %arg6[%c0_79, %c0_80] : memref<4x64xf32, #tpu.memory_space<vmem>>, vector<4x64xf32>
    %cst_81 = arith.constant dense<0.000000e+00> : vector<32x64xf32>
    %107 = tpu.matmul %105, %106, %cst_81 {dimension_numbers = #tpu.dot_dimension_numbers<[1], [0], [0], [1], [0, 0, 1, 1], [], []>} : vector<32x4xf32>, vector<4x64xf32>, vector<32x64xf32> -> vector<32x64xf32>
    %c0_82 = arith.constant 0 : index
    %c0_83 = arith.constant 0 : index
    %108 = vector.load %arg7[%c0_82, %c0_83] : memref<1x64xf32, #tpu.memory_space<vmem>>, vector<1x64xf32>
    %109 = vector.broadcast %108 : vector<1x64xf32> to vector<32x64xf32>
    %110 = arith.addf %107, %109 : vector<32x64xf32>
    %cst_84 = arith.constant 0.000000e+00 : f32
    %111 = vector.broadcast %cst_84 : f32 to vector<32x64xf32>
    %112 = arith.maximumf %110, %111 : vector<32x64xf32>
    %c0_85 = arith.constant 0 : index
    %c0_86 = arith.constant 0 : index
    %113 = vector.load %arg8[%c0_85, %c0_86] : memref<64x128xf32, #tpu.memory_space<vmem>>, vector<64x128xf32>
    %cst_87 = arith.constant dense<0.000000e+00> : vector<32x128xf32>
    %114 = tpu.matmul %112, %113, %cst_87 {dimension_numbers = #tpu.dot_dimension_numbers<[1], [0], [0], [1], [0, 0, 1, 1], [], []>} : vector<32x64xf32>, vector<64x128xf32>, vector<32x128xf32> -> vector<32x128xf32>
    %c0_88 = arith.constant 0 : index
    %c0_89 = arith.constant 0 : index
    %115 = vector.load %arg9[%c0_88, %c0_89] : memref<1x128xf32, #tpu.memory_space<vmem>>, vector<1x128xf32>
    %116 = vector.broadcast %115 : vector<1x128xf32> to vector<32x128xf32>
    %117 = arith.addf %114, %116 : vector<32x128xf32>
    %cst_90 = arith.constant 0.000000e+00 : f32
    %118 = vector.broadcast %cst_90 : f32 to vector<32x128xf32>
    %119 = arith.subf %118, %117 : vector<32x128xf32>
    %120 = math.exp %119 : vector<32x128xf32>
    %cst_91 = arith.constant 1.000000e+00 : f32
    %121 = vector.broadcast %cst_91 : f32 to vector<32x128xf32>
    %122 = arith.addf %121, %120 : vector<32x128xf32>
    %cst_92 = arith.constant 1.000000e+00 : f32
    %123 = vector.broadcast %cst_92 : f32 to vector<32x128xf32>
    %124 = arith.divf %123, %122 : vector<32x128xf32>
    %c0_93 = arith.constant 0 : index
    %c0_94 = arith.constant 0 : index
    %125 = vector.load %arg10[%c0_93, %c0_94] : memref<32x128xf32, #tpu.memory_space<vmem>>, vector<32x128xf32>
    tpu.vector_store %arg10[%c0_93, %c0_94], %124 {strides = array<i32>} : memref<32x128xf32, #tpu.memory_space<vmem>>, vector<32x128xf32>,
    return
  }
  func.func @transform_0(%arg0: i32) -> (i32, i32, i32, i32) {
    %c0_i32 = arith.constant 0 : i32
    %c0_i32_0 = arith.constant 0 : i32
    %c0_i32_1 = arith.constant 0 : i32
    %c0_i32_2 = arith.constant 0 : i32
    return %arg0, %c0_i32, %c0_i32_0, %c0_i32_1 : i32, i32, i32, i32
  }
  func.func @transform_1(%arg0: i32) -> (i32, i32) {
    %c0_i32 = arith.constant 0 : i32
    %c0_i32_0 = arith.constant 0 : i32
    %c0_i32_1 = arith.constant 0 : i32
    return %c0_i32, %c0_i32_0 : i32, i32
  }
  func.func @transform_2(%arg0: i32) -> (i32, i32) {
    %c0_i32 = arith.constant 0 : i32
    %c0_i32_0 = arith.constant 0 : i32
    %c0_i32_1 = arith.constant 0 : i32
    return %c0_i32, %c0_i32_0 : i32, i32
  }
  func.func @transform_3(%arg0: i32) -> (i32, i32) {
    %c0_i32 = arith.constant 0 : i32
    %c0_i32_0 = arith.constant 0 : i32
    %c0_i32_1 = arith.constant 0 : i32
    return %c0_i32, %c0_i32_0 : i32, i32
  }
  func.func @transform_4(%arg0: i32) -> (i32, i32) {
    %c0_i32 = arith.constant 0 : i32
    %c0_i32_0 = arith.constant 0 : i32
    %c0_i32_1 = arith.constant 0 : i32
    return %c0_i32, %c0_i32_0 : i32, i32
  }
  func.func @transform_5(%arg0: i32) -> (i32, i32) {
    %c0_i32 = arith.constant 0 : i32
    %c0_i32_0 = arith.constant 0 : i32
    %c0_i32_1 = arith.constant 0 : i32
    return %c0_i32, %c0_i32_0 : i32, i32
  }
  func.func @transform_6(%arg0: i32) -> (i32, i32) {
    %c0_i32 = arith.constant 0 : i32
    %c0_i32_0 = arith.constant 0 : i32
    %c0_i32_1 = arith.constant 0 : i32
    return %c0_i32, %c0_i32_0 : i32, i32
  }
  func.func @transform_7(%arg0: i32) -> (i32, i32) {
    %c0_i32 = arith.constant 0 : i32
    %c0_i32_0 = arith.constant 0 : i32
    %c0_i32_1 = arith.constant 0 : i32
    return %c0_i32, %c0_i32_0 : i32, i32
  }
  func.func @transform_8(%arg0: i32) -> (i32, i32) {
    %c0_i32 = arith.constant 0 : i32
    %c0_i32_0 = arith.constant 0 : i32
    %c0_i32_1 = arith.constant 0 : i32
    return %c0_i32, %c0_i32_0 : i32, i32
  }
  func.func @transform_9(%arg0: i32) -> (i32, i32) {
    %c0_i32 = arith.constant 0 : i32
    %c0_i32_0 = arith.constant 0 : i32
    return %arg0, %c0_i32 : i32, i32
  }
}

</mosaic_0001>

<bundles_post_ra>
// kernel: conv_autoencoder_forward.1
= control target key start
LH: loop header
LB: loop body
LE: loop exit
PB: predicated region body
PF: predicated region fallthrough
CT: control target
= control target key end

     0   :  { %vm96_vm0 = vcmask 23552   ;;  %vm112_vm1 = vcmask 16384   ;;  %v6518_v2 = vmov 0.0   ;;  %vm99_vm2 = vcmask 17408   ;;  %s6519_s29 = smov 9   ;;  %s6520_s30 = smov 6   ;;  %s10584_s0 = inlined_call_operand.vmem [shape: f32[2,16,16,3], index: 0, kind: input, shape index: {}]   ;;  %s10585_s1 = inlined_call_operand.vmem [shape: f32[27,16], index: 1, kind: input, shape index: {}]   ;;  %s10586_s2 = inlined_call_operand.vmem [shape: f32[1,16], index: 2, kind: input, shape index: {}]   ;;  %s10587_s3 = inlined_call_operand.vmem [shape: f32[144,4], index: 3, kind: input, shape index: {}]   ;;  %s10588_s4 = inlined_call_operand.vmem [shape: f32[1,4], index: 4, kind: input, shape index: {}]   ;;  %s10589_s5 = inlined_call_operand.vmem [shape: f32[4,64], index: 5, kind: input, shape index: {}]   ;;  %s10590_s7 = inlined_call_operand.vmem [shape: f32[64,128], index: 7, kind: input, shape index: {}]   ;;  %s10591_s6 = inlined_call_operand.vmem [shape: f32[1,64], index: 6, kind: input, shape index: {}]   ;;  %s10592_s8 = inlined_call_operand.vmem [shape: f32[1,128], index: 8, kind: input, shape index: {}]   ;;  %s10593_s9 = inlined_call_operand.vmem [shape: f32[32,128], index: 9, kind: output, shape index: {}]  }
   0x1   :  { %v6590_v0 = vld [vmem:[%s10584_s0] sm:$0xff]  ;;  %v6595_v1 = vld [vmem:[%s10584_s0 + $0x8] sm:$0xff]  ;;  %113 = vst.msk [vmem:[#allocation2 + $0x18] sm:$0x1] %vm112_vm1, %v6518_v2  ;;  %114 = vst.msk [vmem:[#allocation2 + $0x30] sm:$0x1] %vm112_vm1, %v6518_v2 }
   0x2   :  { %97 = vst.msk [vmem:[#allocation2] sm:$0xff] %vm96_vm0, %v6518_v2  ;;  %98 = vst.msk [vmem:[#allocation2 + $0x8] sm:$0xff] %vm96_vm0, %v6518_v2  ;;  %v34_v3 = vld [vmem:[%s10584_s0 + $0x10] sm:$0xff]  ;;  %v35_v4 = vld [vmem:[%s10584_s0 + $0x18] sm:$0xff]  ;;  %vm798_vm3 = vcmask 1045504   ;;  %vm445_vm4 = vcmask 1046528  }
   0x3   :  { %101 = vst.msk [vmem:[#allocation2 + $0x1b0] sm:$0xff] %vm96_vm0, %v6518_v2  ;;  %102 = vst.msk [vmem:[#allocation2 + $0x1b8] sm:$0xff] %vm96_vm0, %v6518_v2  ;;  %v36_v5 = vld [vmem:[%s10584_s0 + $0x20] sm:$0xff]  ;;  %v37_v6 = vld [vmem:[%s10584_s0 + $0x28] sm:$0xff]  ;;  %s6521_s10 = smov 3   ;;  %s6522_s11 = smov 12  }
   0x4   :  { %105 = vst.msk [vmem:[#allocation2 + $0x198] sm:$0xff] %vm96_vm0, %v6518_v2  ;;  %106 = vst.msk [vmem:[#allocation2 + $0x1a0] sm:$0xff] %vm96_vm0, %v6518_v2  ;;  %v38_v7 = vld [vmem:[%s10584_s0 + $0x30] sm:$0xff]  ;;  %v39_v8 = vld [vmem:[%s10584_s0 + $0x38] sm:$0xff]  ;;  %s6523_s14 = smov 15   ;;  %s6524_s17 = smov 18  }
   0x5   :  { %108 = vst.msk [vmem:[#allocation2 + $0x348] sm:$0xff] %vm96_vm0, %v6518_v2  ;;  %109 = vst.msk [vmem:[#allocation2 + $0x350] sm:$0xff] %vm96_vm0, %v6518_v2  ;;  %v40_v9 = vld [vmem:[%s10584_s0 + $0x40] sm:$0xff]  ;;  %v41_v10 = vld [vmem:[%s10584_s0 + $0x48] sm:$0xff]  ;;  %vm3078_vm5 = vcmask 1042432   ;;  %s6525_s26 = smov 21  }
   0x6   :  { %115 = vst.msk [vmem:[#allocation2 + $0x48] sm:$0x1] %vm112_vm1, %v6518_v2  ;;  %116 = vst.msk [vmem:[#allocation2 + $0x60] sm:$0x1] %vm112_vm1, %v6518_v2  ;;  %v42_v35 = vld [vmem:[%s10584_s0 + $0x50] sm:$0xff]  ;;  %v43_v39 = vld [vmem:[%s10584_s0 + $0x58] sm:$0xff] }
   0x7   :  { %117 = vst.msk [vmem:[#allocation2 + $0x78] sm:$0x1] %vm112_vm1, %v6518_v2  ;;  %118 = vst.msk [vmem:[#allocation2 + $0x90] sm:$0x1] %vm112_vm1, %v6518_v2  ;;  %v2874_v43 = vld [vmem:[%s10585_s1] sm:$0xff]  ;;  %v2875_v44 = vld [vmem:[%s10585_s1 + $0x8] sm:$0xff] }
   0x8   :  { %119 = vst.msk [vmem:[#allocation2 + $0xa8] sm:$0x1] %vm112_vm1, %v6518_v2  ;;  %120 = vst.msk [vmem:[#allocation2 + $0xc0] sm:$0x1] %vm112_vm1, %v6518_v2  ;;  %v6059_v45 = vpack.c.bf16 %v2875_v44, %v2874_v43  ;;  %v2876_v48 = vld [vmem:[%s10585_s1 + $0x10] sm:$0xff]  ;;  %vm6526_vm6 = vmmov 1  }
   0x9   :  { %121 = vst.msk [vmem:[#allocation2 + $0xd8] sm:$0x1] %vm112_vm1, %v6518_v2  ;;  %122 = vst.msk [vmem:[#allocation2 + $0xf0] sm:$0x1] %vm112_vm1, %v6518_v2  ;;  %v6781_v11 = vld [vmem:[#allocation2] sm:$0xff]  ;;  %v6783_v12 = vld [vmem:[#allocation2 + $0x8] sm:$0xff] }
   0xa   :  { %123 = vst.msk [vmem:[#allocation2 + $0x108] sm:$0x1] %vm112_vm1, %v6518_v2  ;;  %124 = vst.msk [vmem:[#allocation2 + $0x120] sm:$0x1] %vm112_vm1, %v6518_v2  ;;  %v799_v15 = vrot.slane %v6781_v11, 2  ;;  %v800_v16 = vrot.slane %v6783_v12, 2  ;;  %6060 = vmatprep.subr.bf16.mxu0 %v6059_v45 }
   0xb   :  { %125 = vst.msk [vmem:[#allocation2 + $0x138] sm:$0x1] %vm112_vm1, %v6518_v2  ;;  %126 = vst.msk [vmem:[#allocation2 + $0x150] sm:$0x1] %vm112_vm1, %v6518_v2  ;;  %v446_v17 = vrot.slane %v6781_v11, 1  ;;  %v447_v18 = vrot.slane %v6783_v12, 1  ;;  %6062 = vmatpush3.bf16.msra.mxu0 %v6059_v45 }
   0xc   :  { %127 = vst.msk [vmem:[#allocation2 + $0x168] sm:$0x1] %vm112_vm1, %v6518_v2  ;;  %128 = vst.msk [vmem:[#allocation2 + $0x180] sm:$0x1] %vm112_vm1, %v6518_v2  ;;  %v801_v20 = vsel %vm798_vm3, %v799_v15, %v800_v16  ;;  %v2877_v49 = vld [vmem:[%s10585_s1 + $0x18] sm:$0x7] }
   0xd   :  { %129 = vst.msk [vmem:[#allocation2 + $0x1c8] sm:$0x1] %vm112_vm1, %v6518_v2  ;;  %130 = vst.msk [vmem:[#allocation2 + $0x1e0] sm:$0x1] %vm112_vm1, %v6518_v2  ;;  %v448_v21 = vsel %vm445_vm4, %v446_v17, %v447_v18  ;;  %v6063_v50 = vpack.c.bf16 %v2877_v49, %v2876_v48  ;;  %s6527_s1 = smov 24   ;;  %v44_v58 = vld [vmem:[%s10584_s0 + $0x60] sm:$0xff] }
   0xe   :  { %131 = vst.msk [vmem:[#allocation2 + $0x1f8] sm:$0x1] %vm112_vm1, %v6518_v2  ;;  %132 = vst.msk [vmem:[#allocation2 + $0x210] sm:$0x1] %vm112_vm1, %v6518_v2  ;;  %v45_v60 = vld [vmem:[%s10584_s0 + $0x68] sm:$0xff]  ;;  %vm2419_vm8 = vcmask 48128  }
   0xf   :  { %133 = vst.msk [vmem:[#allocation2 + $0x228] sm:$0x1] %vm112_vm1, %v6518_v2  ;;  %134 = vst.msk [vmem:[#allocation2 + $0x240] sm:$0x1] %vm112_vm1, %v6518_v2  ;;  %vm2484_vm9 = vcmask 72704   ;;  %vm2549_vm10 = vcmask 97280  }
  0x10   :  { %135 = vst.msk [vmem:[#allocation2 + $0x258] sm:$0x1] %vm112_vm1, %v6518_v2  ;;  %136 = vst.msk [vmem:[#allocation2 + $0x270] sm:$0x1] %vm112_vm1, %v6518_v2  ;;  %vm2614_vm11 = vcmask 121856   ;;  %vm2679_vm12 = vcmask 146432  }
  0x11   :  { %137 = vst.msk [vmem:[#allocation2 + $0x288] sm:$0x1] %vm112_vm1, %v6518_v2  ;;  %138 = vst.msk [vmem:[#allocation2 + $0x2a0] sm:$0x1] %vm112_vm1, %v6518_v2  ;;  %vm2744_vm13 = vcmask 171008   ;;  %vm2809_vm14 = vcmask 195584  }
  0x12   :  { %139 = vst.msk [vmem:[#allocation2 + $0x2b8] sm:$0x1] %vm112_vm1, %v6518_v2  ;;  %140 = vst.msk [vmem:[#allocation2 + $0x2d0] sm:$0x1] %vm112_vm1, %v6518_v2  ;;  %vm2885_vm15 = vcmask 220160   ;;  %s6530_s27 = smov 32  }
  0x13   :  { %141 = vst.msk [vmem:[#allocation2 + $0x2e8] sm:$0x1] %vm112_vm1, %v6518_v2  ;;  %142 = vst.msk [vmem:[#allocation2 + $0x300] sm:$0x1] %vm112_vm1, %v6518_v2  ;;  %s6531_s28 = smov 16   ;;  %s6533_s12 = smov 64  }
  0x14   :  { %143 = vst.msk [vmem:[#allocation2 + $0x318] sm:$0x1] %vm112_vm1, %v6518_v2  ;;  %144 = vst.msk [vmem:[#allocation2 + $0x330] sm:$0x1] %vm112_vm1, %v6518_v2  ;;  %s6534_s13 = smov 80   ;;  %s6535_s15 = smov 96  }
  0x15   :  { %145 = vst.msk [vmem:[#allocation2 + $0x29] sm:$0x1] %vm112_vm1, %v6518_v2  ;;  %146 = vst.msk [vmem:[#allocation2 + $0x41] sm:$0x1] %vm112_vm1, %v6518_v2  ;;  %s6536_s16 = smov 112  }
  0x16   :  { %147 = vst.msk [vmem:[#allocation2 + $0x59] sm:$0x1] %vm112_vm1, %v6518_v2  ;;  %148 = vst.msk [vmem:[#allocation2 + $0x71] sm:$0x1] %vm112_vm1, %v6518_v2 }
  0x17   :  { %149 = vst.msk [vmem:[#allocation2 + $0x89] sm:$0x1] %vm112_vm1, %v6518_v2  ;;  %150 = vst.msk [vmem:[#allocation2 + $0xa1] sm:$0x1] %vm112_vm1, %v6518_v2 }
  0x18   :  { %151 = vst.msk [vmem:[#allocation2 + $0xb9] sm:$0x1] %vm112_vm1, %v6518_v2  ;;  %152 = vst.msk [vmem:[#allocation2 + $0xd1] sm:$0x1] %vm112_vm1, %v6518_v2 }
  0x19   :  { %153 = vst.msk [vmem:[#allocation2 + $0xe9] sm:$0x1] %vm112_vm1, %v6518_v2  ;;  %154 = vst.msk [vmem:[#allocation2 + $0x101] sm:$0x1] %vm112_vm1, %v6518_v2 }
  0x1a   :  { %155 = vst.msk [vmem:[#allocation2 + $0x119] sm:$0x1] %vm112_vm1, %v6518_v2  ;;  %156 = vst.msk [vmem:[#allocation2 + $0x131] sm:$0x1] %vm112_vm1, %v6518_v2 }
  0x1b   :  { %157 = vst.msk [vmem:[#allocation2 + $0x149] sm:$0x1] %vm112_vm1, %v6518_v2  ;;  %158 = vst.msk [vmem:[#allocation2 + $0x161] sm:$0x1] %vm112_vm1, %v6518_v2 }
  0x1c   :  { %159 = vst.msk [vmem:[#allocation2 + $0x179] sm:$0x1] %vm112_vm1, %v6518_v2  ;;  %160 = vst.msk [vmem:[#allocation2 + $0x191] sm:$0x1] %vm112_vm1, %v6518_v2 }
  0x1d   :  { %161 = vst.msk [vmem:[#allocation2 + $0x1d9] sm:$0x1] %vm112_vm1, %v6518_v2  ;;  %162 = vst.msk [vmem:[#allocation2 + $0x1f1] sm:$0x1] %vm112_vm1, %v6518_v2 }
  0x1e   :  { %163 = vst.msk [vmem:[#allocation2 + $0x209] sm:$0x1] %vm112_vm1, %v6518_v2  ;;  %164 = vst.msk [vmem:[#allocation2 + $0x221] sm:$0x1] %vm112_vm1, %v6518_v2 }
  0x1f   :  { %165 = vst.msk [vmem:[#allocation2 + $0x239] sm:$0x1] %vm112_vm1, %v6518_v2  ;;  %166 = vst.msk [vmem:[#allocation2 + $0x251] sm:$0x1] %vm112_vm1, %v6518_v2 }
  0x20   :  { %167 = vst.msk [vmem:[#allocation2 + $0x269] sm:$0x1] %vm112_vm1, %v6518_v2  ;;  %168 = vst.msk [vmem:[#allocation2 + $0x281] sm:$0x1] %vm112_vm1, %v6518_v2 }
  0x21   :  { %169 = vst.msk [vmem:[#allocation2 + $0x299] sm:$0x1] %vm112_vm1, %v6518_v2  ;;  %170 = vst.msk [vmem:[#allocation2 + $0x2b1] sm:$0x1] %vm112_vm1, %v6518_v2 }
  0x22   :  { %171 = vst.msk [vmem:[#allocation2 + $0x2c9] sm:$0x1] %vm112_vm1, %v6518_v2  ;;  %172 = vst.msk [vmem:[#allocation2 + $0x2e1] sm:$0x1] %vm112_vm1, %v6518_v2 }
  0x23   :  { %173 = vst.msk [vmem:[#allocation2 + $0x2f9] sm:$0x1] %vm112_vm1, %v6518_v2  ;;  %174 = vst.msk [vmem:[#allocation2 + $0x311] sm:$0x1] %vm112_vm1, %v6518_v2 }
  0x24   :  { %175 = vst.msk [vmem:[#allocation2 + $0x329] sm:$0x1] %vm112_vm1, %v6518_v2  ;;  %176 = vst.msk [vmem:[#allocation2 + $0x341] sm:$0x1] %vm112_vm1, %v6518_v2 }
  0x25   :  { %177 = vst.msk [vmem:[#allocation2 + $0x19] sm:$0xff] %vm96_vm0, %v6590_v0  ;;  %178 = vst.msk [vmem:[#allocation2 + $0x21] sm:$0xff] %vm96_vm0, %v6595_v1 }
  0x26   :  { %100 = vst.msk [vmem:[#allocation2 + $0x10] sm:$0x3] %vm99_vm2, %v6518_v2  ;;  %103 = vst.msk [vmem:[#allocation2 + $0x1c0] sm:$0x3] %vm99_vm2, %v6518_v2 }
  0x27   :  { %107 = vst.msk [vmem:[#allocation2 + $0x1a8] sm:$0x3] %vm99_vm2, %v6518_v2  ;;  %110 = vst.msk [vmem:[#allocation2 + $0x358] sm:$0x3] %vm99_vm2, %v6518_v2 }
  0x28   :  { %179 = vst.msk [vmem:[#allocation2 + $0x31] sm:$0xff] %vm96_vm0, %v34_v3  ;;  %180 = vst.msk [vmem:[#allocation2 + $0x39] sm:$0xff] %vm96_vm0, %v35_v4 }
  0x29   :  { %181 = vst.msk [vmem:[#allocation2 + $0x49] sm:$0xff] %vm96_vm0, %v36_v5  ;;  %182 = vst.msk [vmem:[#allocation2 + $0x51] sm:$0xff] %vm96_vm0, %v37_v6 }
  0x2a   :  { %183 = vst.msk [vmem:[#allocation2 + $0x61] sm:$0xff] %vm96_vm0, %v38_v7  ;;  %184 = vst.msk [vmem:[#allocation2 + $0x69] sm:$0xff] %vm96_vm0, %v39_v8 }
  0x2b   :  { %185 = vst.msk [vmem:[#allocation2 + $0x79] sm:$0xff] %vm96_vm0, %v40_v9  ;;  %186 = vst.msk [vmem:[#allocation2 + $0x81] sm:$0xff] %vm96_vm0, %v41_v10  ;;  %v46_v10 = vld [vmem:[%s10584_s0 + $0x70] sm:$0xff] }
  0x2c   :  { %v6785_v13 = vld [vmem:[#allocation2 + $0x20] sm:$0xff]  ;;  %v6787_v14 = vld [vmem:[#allocation2 + $0x18] sm:$0xff]  ;;  %v246_v28 = vld [vmem:[#allocation2 + $0x28] sm:$0x3]  ;;  %187 = vst.msk [vmem:[#allocation2 + $0x91] sm:$0xff] %vm96_vm0, %v42_v35 }
  0x2d   :  { %1157 = vrot.lane.b32.xlu1 %v6785_v13, %s6519_s29  ;;  %1155 = vrot.lane.b32.xlu0 %v6787_v14, %s6519_s29  ;;  %v243_v19 = vld [vmem:[#allocation2 + $0x10] sm:$0x3]  ;;  %v451_v26 = vrot.slane %v6787_v14, 1  ;;  %v452_v27 = vrot.slane %v6785_v13, 1  ;;  %v804_v30 = vrot.slane %v6787_v14, 2  ;;  %v805_v31 = vrot.slane %v6785_v13, 2  ;;  %vm6064_vm7 = vmpackc.low %vm3078_vm5, %vm6526_vm6 }
  0x2e   :  { %v802_v22 = vrot.slane %v243_v19, 2  ;;  %v449_v23 = vrot.slane %v243_v19, 1  ;;  %v454_v32 = vrot.slane %v246_v28, 1  ;;  %v807_v36 = vrot.slane %v246_v28, 2  ;;  %188 = vst.msk [vmem:[#allocation2 + $0x99] sm:$0xff] %vm96_vm0, %v43_v39  ;;  %6065 = vmatprep.subr.msk.bf16.mxu0 %vm6064_vm7, %v6063_v50  ;;  %189 = vst.msk [vmem:[#allocation2 + $0xa9] sm:$0xff] %vm96_vm0, %v44_v58 }
  0x2f   :  { %v453_v29 = vsel %vm445_vm4, %v451_v26, %v452_v27  ;;  %v806_v33 = vsel %vm798_vm3, %v804_v30, %v805_v31  ;;  %v6822_v37 = vld [vmem:[#allocation2 + $0x30] sm:$0xff]  ;;  %v6828_v40 = vld [vmem:[#allocation2 + $0x38] sm:$0xff]  ;;  %v249_v47 = vld [vmem:[#allocation2 + $0x40] sm:$0x3]  ;;  %6068 = vmatpush3.bf16.msk.msra.mxu0 %vm6064_vm7, %v6063_v50  ;;  %190 = vst.msk [vmem:[#allocation2 + $0xb1] sm:$0xff] %vm96_vm0, %v45_v60 }
  0x30   :  { %v803_v24 = vsel %vm798_vm3, %v800_v16, %v802_v22  ;;  %v450_v25 = vsel %vm445_vm4, %v447_v18, %v449_v23  ;;  %v455_v34 = vsel %vm445_vm4, %v452_v27, %v454_v32  ;;  %v808_v38 = vsel %vm798_vm3, %v805_v31, %v807_v36  ;;  %v6875_v59 = vld [vmem:[#allocation2 + $0x48] sm:$0xff]  ;;  %v6880_v61 = vld [vmem:[#allocation2 + $0x50] sm:$0xff]  ;;  %v252_v1 = vld [vmem:[#allocation2 + $0x58] sm:$0x3]  ;;  %191 = vst.msk [vmem:[#allocation2 + $0xc1] sm:$0xff] %vm96_vm0, %v46_v10 }
  0x31   :  { %959 = vrot.lane.b32.xlu1 %v801_v20, %s6520_s30  ;;  %606 = vrot.lane.b32.xlu0 %v448_v21, %s6521_s10  ;;  %v456_v41 = vrot.slane %v6822_v37, 1  ;;  %v457_v42 = vrot.slane %v6828_v40, 1  ;;  %v809_v51 = vrot.slane %v6822_v37, 2  ;;  %v810_v52 = vrot.slane %v6828_v40, 2  ;;  %v6915_v15 = vld [vmem:[#allocation2 + $0x60] sm:$0xff]  ;;  %v47_v16 = vld [vmem:[%s10584_s0 + $0x78] sm:$0xff] }
  0x32   :  { %v459_v53 = vrot.slane %v249_v47, 1  ;;  %v812_v56 = vrot.slane %v249_v47, 2  ;;  %v461_v62 = vrot.slane %v6875_v59, 1  ;;  %v462_v63 = vrot.slane %v6880_v61, 1  ;;  %v6920_v17 = vld [vmem:[#allocation2 + $0x68] sm:$0xff]  ;;  %192 = vst.msk [vmem:[#allocation2 + $0xc9] sm:$0xff] %vm96_vm0, %v47_v16 }
  0x33   :  { %v458_v46 = vsel %vm445_vm4, %v456_v41, %v457_v42  ;;  %v811_v54 = vsel %vm798_vm3, %v809_v51, %v810_v52  ;;  %v814_v3 = vrot.slane %v6875_v59, 2  ;;  %v815_v4 = vrot.slane %v6880_v61, 2  ;;  %v255_v21 = vld [vmem:[#allocation2 + $0x70] sm:$0x3]  ;;  %v6957_v32 = vld [vmem:[#allocation2 + $0x78] sm:$0xff]  ;;  %v6962_v36 = vld [vmem:[#allocation2 + $0x80] sm:$0xff] }
  0x34   :  { %v460_v55 = vsel %vm445_vm4, %v457_v42, %v459_v53  ;;  %v813_v57 = vsel %vm798_vm3, %v810_v52, %v812_v56  ;;  %v463_v0 = vsel %vm445_vm4, %v461_v62, %v462_v63  ;;  %v464_v5 = vrot.slane %v252_v1, 1 }
  0x35   :  { %961 = vrot.lane.b32.xlu1 %v803_v24, %s6520_s30  ;;  %608 = vrot.lane.b32.xlu0 %v450_v25, %s6521_s10  ;;  %v816_v6 = vsel %vm798_vm3, %v814_v3, %v815_v4  ;;  %v817_v8 = vrot.slane %v252_v1, 2  ;;  %v466_v18 = vrot.slane %v6915_v15, 1  ;;  %v467_v19 = vrot.slane %v6920_v17, 1  ;;  %v50_v1 = vld [vmem:[%s10584_s0 + $0x90] sm:$0xff]  ;;  %v7024_v10 = vld [vmem:[#allocation2 + $0x98] sm:$0xff] }
  0x36   :  { %v465_v7 = vsel %vm445_vm4, %v462_v63, %v464_v5  ;;  %v819_v22 = vrot.slane %v6915_v15, 2  ;;  %v820_v23 = vrot.slane %v6920_v17, 2  ;;  %v469_v24 = vrot.slane %v255_v21, 1  ;;  %195 = vst.msk [vmem:[#allocation2 + $0xf1] sm:$0xff] %vm96_vm0, %v50_v1 }
  0x37   :  { %v818_v9 = vsel %vm798_vm3, %v815_v4, %v817_v8  ;;  %v468_v20 = vsel %vm445_vm4, %v466_v18, %v467_v19  ;;  %v822_v27 = vrot.slane %v255_v21, 2  ;;  %v472_v39 = vrot.slane %v6962_v36, 1 }
  0x38   :  { %v821_v25 = vsel %vm798_vm3, %v819_v22, %v820_v23  ;;  %v470_v26 = vsel %vm445_vm4, %v467_v19, %v469_v24  ;;  %v824_v47 = vrot.slane %v6957_v32, 2  ;;  %v825_v48 = vrot.slane %v6962_v36, 2 }
  0x39   :  { %610 = vrot.lane.b32.xlu1 %v453_v29, %s6521_s10  ;;  %1359 = vrot.lane.b32.xlu0 %v453_v29, %s6522_s11  ;;  %v823_v28 = vsel %vm798_vm3, %v820_v23, %v822_v27  ;;  %v48_v29 = vld [vmem:[%s10584_s0 + $0x80] sm:$0xff]  ;;  %v477_v22 = vrot.slane %v7024_v10, 1 }
  0x3a   :  { %193 = vst.msk [vmem:[#allocation2 + $0xd9] sm:$0xff] %vm96_vm0, %v48_v29  ;;  %v826_v52 = vsel %vm798_vm3, %v824_v47, %v825_v48 }
  0x3d   :  { %1561 = vrot.lane.b32.xlu1 %v806_v33, %s6523_s14  ;;  %1361 = vrot.lane.b32.xlu0 %v455_v34, %s6522_s11 }
  0x41   :  { %963 = vrot.lane.b32.xlu1 %v806_v33, %s6520_s30  ;;  %612 = vrot.lane.b32.xlu0 %v455_v34, %s6521_s10  ;;  %v49_v33 = vld [vmem:[%s10584_s0 + $0x88] sm:$0xff] }
  0x42   :  { %194 = vst.msk [vmem:[#allocation2 + $0xe1] sm:$0xff] %vm96_vm0, %v49_v33  ;;  %v261_v33 = vld [vmem:[#allocation2 + $0xa0] sm:$0x3] }
  0x45   :  { %1757 = vrot.lane.b32.xlu1 %v6822_v37, %s6524_s17  ;;  %1563 = vrot.lane.b32.xlu0 %v808_v38, %s6523_s14 }
  0x49   :  { %1159 = vrot.lane.b32.xlu1 %v6822_v37, %s6519_s29  ;;  %965 = vrot.lane.b32.xlu0 %v808_v38, %s6520_s30  ;;  %v471_v38 = vrot.slane %v6957_v32, 1 }
  0x4b   :  { %v473_v43 = vsel %vm445_vm4, %v471_v38, %v472_v39 }
  0x4d   :  { %1961 = vrot.lane.b32.xlu1 %v458_v46, %s6525_s26  ;;  %1759 = vrot.lane.b32.xlu0 %v6828_v40, %s6524_s17 }
  0x51   :  { %1363 = vrot.lane.b32.xlu1 %v458_v46, %s6522_s11  ;;  %1161 = vrot.lane.b32.xlu0 %v6828_v40, %s6519_s29 }
  0x55   :  { %2163 = vrot.lane.b32.xlu1 %v811_v54, %s6527_s1  ;;  %1963 = vrot.lane.b32.xlu0 %v460_v55, %s6525_s26 }
  0x59   :  { %1365 = vrot.lane.b32.xlu1 %v460_v55, %s6522_s11  ;;  %614 = vrot.lane.b32.xlu0 %v458_v46, %s6521_s10  ;;  %v258_v46 = vld [vmem:[#allocation2 + $0x88] sm:$0x3] }
  0x5a   :  { %v474_v49 = vrot.slane %v258_v46, 1  ;;  %v827_v56 = vrot.slane %v258_v46, 2 }
  0x5c   :  { %v475_v53 = vsel %vm445_vm4, %v472_v39, %v474_v49  ;;  %v828_v60 = vsel %vm798_vm3, %v825_v48, %v827_v56 }
  0x5d   :  { %2165 = vrot.lane.b32.xlu1 %v813_v57, %s6527_s1  ;;  %1565 = vrot.lane.b32.xlu0 %v811_v54, %s6523_s14 }
  0x61   :  { %967 = vrot.lane.b32.xlu1 %v811_v54, %s6520_s30  ;;  %616 = vrot.lane.b32.xlu0 %v460_v55, %s6521_s10 }
  0x65   :  { %1761 = vrot.lane.b32.xlu1 %v6875_v59, %s6524_s17  ;;  %1567 = vrot.lane.b32.xlu0 %v813_v57, %s6523_s14 }
  0x69   :  { %1163 = vrot.lane.b32.xlu1 %v6875_v59, %s6519_s29  ;;  %969 = vrot.lane.b32.xlu0 %v813_v57, %s6520_s30 }
  0x6d   :  { %1965 = vrot.lane.b32.xlu1 %v463_v0, %s6525_s26  ;;  %1763 = vrot.lane.b32.xlu0 %v6880_v61, %s6524_s17 }
  0x71   :  { %1367 = vrot.lane.b32.xlu1 %v463_v0, %s6522_s11  ;;  %1165 = vrot.lane.b32.xlu0 %v6880_v61, %s6519_s29 }
  0x75   :  { %2167 = vrot.lane.b32.xlu1 %v816_v6, %s6527_s1  ;;  %1967 = vrot.lane.b32.xlu0 %v465_v7, %s6525_s26 }
  0x79   :  { %1369 = vrot.lane.b32.xlu1 %v465_v7, %s6522_s11  ;;  %618 = vrot.lane.b32.xlu0 %v463_v0, %s6521_s10 }
  0x7d   :  { %2169 = vrot.lane.b32.xlu1 %v818_v9, %s6527_s1  ;;  %1569 = vrot.lane.b32.xlu0 %v816_v6, %s6523_s14 }
  0x81   :  { %971 = vrot.lane.b32.xlu1 %v816_v6, %s6520_s30  ;;  %620 = vrot.lane.b32.xlu0 %v465_v7, %s6521_s10  ;;  %v51_v6 = vld [vmem:[%s10584_s0 + $0x98] sm:$0xff] }
  0x82   :  { %196 = vst.msk [vmem:[#allocation2 + $0xf9] sm:$0xff] %vm96_vm0, %v51_v6  ;;  %v53_v6 = vld [vmem:[%s10584_s0 + $0xa8] sm:$0xff] }
  0x83   :  { %198 = vst.msk [vmem:[#allocation2 + $0x111] sm:$0xff] %vm96_vm0, %v53_v6  ;;  %v55_v6 = vld [vmem:[%s10584_s0 + $0xb8] sm:$0xff] }
  0x84   :  { %200 = vst.msk [vmem:[#allocation2 + $0x129] sm:$0xff] %vm96_vm0, %v55_v6  ;;  %v57_v6 = vld [vmem:[%s10584_s0 + $0xc8] sm:$0xff] }
  0x85   :  { %1765 = vrot.lane.b32.xlu1 %v6915_v15, %s6524_s17  ;;  %1571 = vrot.lane.b32.xlu0 %v818_v9, %s6523_s14  ;;  %202 = vst.msk [vmem:[#allocation2 + $0x141] sm:$0xff] %vm96_vm0, %v57_v6  ;;  %v59_v6 = vld [vmem:[%s10584_s0 + $0xd8] sm:$0xff] }
  0x86   :  { %204 = vst.msk [vmem:[#allocation2 + $0x159] sm:$0xff] %vm96_vm0, %v59_v6  ;;  %v61_v6 = vld [vmem:[%s10584_s0 + $0xe8] sm:$0xff] }
  0x87   :  { %206 = vst.msk [vmem:[#allocation2 + $0x171] sm:$0xff] %vm96_vm0, %v61_v6  ;;  %v63_v6 = vld [vmem:[%s10584_s0 + $0xf8] sm:$0xff] }
  0x88   :  { %208 = vst.msk [vmem:[#allocation2 + $0x189] sm:$0xff] %vm96_vm0, %v63_v6 }
  0x89   :  { %1167 = vrot.lane.b32.xlu1 %v6915_v15, %s6519_s29  ;;  %973 = vrot.lane.b32.xlu0 %v818_v9, %s6520_s30 }
  0x8d   :  { %1969 = vrot.lane.b32.xlu1 %v468_v20, %s6525_s26  ;;  %1767 = vrot.lane.b32.xlu0 %v6920_v17, %s6524_s17 }
  0x91   :  { %1371 = vrot.lane.b32.xlu1 %v468_v20, %s6522_s11  ;;  %1169 = vrot.lane.b32.xlu0 %v6920_v17, %s6519_s29 }
  0x95   :  { %2171 = vrot.lane.b32.xlu1 %v821_v25, %s6527_s1  ;;  %1971 = vrot.lane.b32.xlu0 %v470_v26, %s6525_s26 }
  0x99   :  { %1373 = vrot.lane.b32.xlu1 %v470_v26, %s6522_s11  ;;  %622 = vrot.lane.b32.xlu0 %v468_v20, %s6521_s10 }
  0x9d   :  { %2173 = vrot.lane.b32.xlu1 %v823_v28, %s6527_s1  ;;  %1573 = vrot.lane.b32.xlu0 %v821_v25, %s6523_s14 }
  0x9f   :  { %v6953_v30 = vpop.permute.xlu1 %1157  ;;  %v1156_v31 = vpop.permute.xlu0 %1155 }
  0xa1   :  { %975 = vrot.lane.b32.xlu1 %v821_v25, %s6520_s30  ;;  %624 = vrot.lane.b32.xlu0 %v470_v26, %s6521_s10 }
  0xa3   :  { %v960_v34 = vpop.permute.xlu1 %959  ;;  %v607_v35 = vpop.permute.xlu0 %606 }
  0xa4   :  { %v2355_v0 = vsel %vm96_vm0, %v6781_v11, %v607_v35  ;;  %v7014_v11 = vld [vmem:[#allocation2 + $0x90] sm:$0xff] }
  0xa5   :  { %1769 = vrot.lane.b32.xlu1 %v6957_v32, %s6524_s17  ;;  %1575 = vrot.lane.b32.xlu0 %v823_v28, %s6523_s14  ;;  %v2420_v5 = vsel %vm2419_vm8, %v2355_v0, %v960_v34  ;;  %v476_v21 = vrot.slane %v7014_v11, 1  ;;  %v829_v39 = vrot.slane %v7014_v11, 2 }
  0xa6   :  { %v2485_v7 = vsel %vm2484_vm9, %v2420_v5, %v1156_v31  ;;  %v7095_v5 = vld [vmem:[#allocation2 + $0xa8] sm:$0xff] }
  0xa7   :  { %v6970_v41 = vpop.permute.xlu1 %961  ;;  %v609_v42 = vpop.permute.xlu0 %608  ;;  %v478_v27 = vsel %vm445_vm4, %v476_v21, %v477_v22 }
  0xa8   :  { %v2356_v18 = vsel %vm96_vm0, %v6783_v12, %v609_v42 }
  0xa9   :  { %1171 = vrot.lane.b32.xlu1 %v6957_v32, %s6519_s29  ;;  %977 = vrot.lane.b32.xlu0 %v823_v28, %s6520_s30  ;;  %v2421_v12 = vsel %vm2419_vm8, %v2356_v18, %v6970_v41  ;;  %v479_v41 = vrot.slane %v261_v33, 1 }
  0xaa   :  { %v2486_v28 = vsel %vm2484_vm9, %v2421_v12, %v6953_v30  ;;  %v830_v30 = vrot.slane %v7024_v10, 2 }
  0xab   :  { %v6976_v44 = vpop.permute.xlu1 %610  ;;  %v1360_v45 = vpop.permute.xlu0 %1359  ;;  %v480_v48 = vsel %vm445_vm4, %v477_v22, %v479_v41 }
  0xac   :  { %v2550_v16 = vsel %vm2549_vm10, %v2485_v7, %v1360_v45  ;;  %v831_v47 = vsel %vm798_vm3, %v829_v39, %v830_v30 }
  0xad   :  { %1973 = vrot.lane.b32.xlu1 %v473_v43, %s6525_s26  ;;  %1771 = vrot.lane.b32.xlu0 %v6962_v36, %s6524_s17 }
  0xaf   :  { %v1562_v50 = vpop.permute.xlu1 %1561  ;;  %v6983_v51 = vpop.permute.xlu0 %1361 }
  0xb0   :  { %v2615_v19 = vsel %vm2614_vm11, %v2550_v16, %v1562_v50  ;;  %v2551_v34 = vsel %vm2549_vm10, %v2486_v28, %v6983_v51  ;;  %v832_v51 = vrot.slane %v261_v33, 2 }
  0xb1   :  { %1375 = vrot.lane.b32.xlu1 %v473_v43, %s6522_s11  ;;  %1173 = vrot.lane.b32.xlu0 %v6962_v36, %s6519_s29 }
  0xb2   :  { %v833_v56 = vsel %vm798_vm3, %v830_v30, %v832_v51 }
  0xb3   :  { %v6990_v54 = vpop.permute.xlu1 %963  ;;  %v6992_v55 = vpop.permute.xlu0 %612 }
  0xb5   :  { %2175 = vrot.lane.b32.xlu1 %v826_v52, %s6527_s1  ;;  %1975 = vrot.lane.b32.xlu0 %v475_v53, %s6525_s26 }
  0xb7   :  { %v1758_v57 = vpop.permute.xlu1 %1757  ;;  %v1564_v58 = vpop.permute.xlu0 %1563 }
  0xb8   :  { %v2680_v20 = vsel %vm2679_vm12, %v2615_v19, %v1758_v57  ;;  %v2616_v35 = vsel %vm2614_vm11, %v2551_v34, %v1564_v58  ;;  %v481_v19 = vrot.slane %v7095_v5, 1  ;;  %v834_v34 = vrot.slane %v7095_v5, 2 }
  0xb9   :  { %1377 = vrot.lane.b32.xlu1 %v475_v53, %s6522_s11  ;;  %626 = vrot.lane.b32.xlu0 %v473_v43, %s6521_s10 }
  0xbb   :  { %v6999_v62 = vpop.permute.xlu1 %1159  ;;  %v7001_v63 = vpop.permute.xlu0 %965 }
  0xbd   :  { %2177 = vrot.lane.b32.xlu1 %v828_v60, %s6527_s1  ;;  %1577 = vrot.lane.b32.xlu0 %v826_v52, %s6523_s14 }
  0xbf   :  { %v1962_v3 = vpop.permute.xlu1 %1961  ;;  %v1760_v4 = vpop.permute.xlu0 %1759 }
  0xc0   :  { %v2745_v23 = vsel %vm2744_vm13, %v2680_v20, %v1962_v3  ;;  %v2681_v38 = vsel %vm2679_vm12, %v2616_v35, %v1760_v4  ;;  %v2357_v3 = vsel %vm96_vm0, %v6787_v14, %v6976_v44  ;;  %v7106_v14 = vld [vmem:[#allocation2 + $0xb0] sm:$0xff] }
  0xc1   :  { %979 = vrot.lane.b32.xlu1 %v826_v52, %s6520_s30  ;;  %628 = vrot.lane.b32.xlu0 %v475_v53, %s6521_s10  ;;  %v2422_v4 = vsel %vm2419_vm8, %v2357_v3, %v6990_v54  ;;  %v482_v20 = vrot.slane %v7106_v14, 1 }
  0xc2   :  { %v2487_v7 = vsel %vm2484_vm9, %v2422_v4, %v6999_v62  ;;  %v7179_v4 = vld [vmem:[#allocation2 + $0xc0] sm:$0xff] }
  0xc3   :  { %v7020_v8 = vpop.permute.xlu1 %1363  ;;  %v7022_v9 = vpop.permute.xlu0 %1161  ;;  %v483_v12 = vsel %vm445_vm4, %v481_v19, %v482_v20 }
  0xc4   :  { %v2552_v44 = vsel %vm2549_vm10, %v2487_v7, %v7020_v8  ;;  %v2358_v8 = vsel %vm96_vm0, %v6785_v13, %v6992_v55  ;;  %v264_v13 = vld [vmem:[#allocation2 + $0xb8] sm:$0x3] }
  0xc5   :  { %1773 = vrot.lane.b32.xlu1 %v7014_v11, %s6524_s17  ;;  %1579 = vrot.lane.b32.xlu0 %v828_v60, %s6523_s14  ;;  %v484_v35 = vrot.slane %v264_v13, 1 }
  0xc7   :  { %v2164_v24 = vpop.permute.xlu1 %2163  ;;  %v1964_v25 = vpop.permute.xlu0 %1963 }
  0xc8   :  { %v2810_v26 = vsel %vm2809_vm14, %v2745_v23, %v2164_v24  ;;  %v2746_v42 = vsel %vm2744_vm13, %v2681_v38, %v1964_v25  ;;  %v2423_v25 = vsel %vm2419_vm8, %v2358_v8, %v7001_v63 }
  0xc9   :  { %1175 = vrot.lane.b32.xlu1 %v7014_v11, %s6519_s29  ;;  %981 = vrot.lane.b32.xlu0 %v828_v60, %s6520_s30  ;;  %v52_v60 = vld [vmem:[%s10584_s0 + $0xa0] sm:$0xff] }
  0xca   :  { %5889 = vmatprep.mubr.msk.f32.mxu0 %vm2885_vm15, %v2810_v26  ;;  %197 = vst.msk [vmem:[#allocation2 + $0x109] sm:$0xff] %vm96_vm0, %v52_v60  ;;  %v2488_v26 = vsel %vm2484_vm9, %v2423_v25, %v7022_v9  ;;  %v835_v9 = vrot.slane %v7106_v14, 2 }
  0xcb   :  { %v7048_v29 = vpop.permute.xlu1 %1365  ;;  %v7050_v31 = vpop.permute.xlu0 %614 }
  0xcc   :  { %v2553_v55 = vsel %vm2549_vm10, %v2488_v26, %v7048_v29  ;;  %v836_v41 = vsel %vm798_vm3, %v834_v34, %v835_v9 }
  0xcd   :  { %1977 = vrot.lane.b32.xlu1 %v478_v27, %s6525_s26  ;;  %1775 = vrot.lane.b32.xlu0 %v7024_v10, %s6524_s17 }
  0xcf   :  { %v2166_v43 = vpop.permute.xlu1 %2165  ;;  %v1566_v45 = vpop.permute.xlu0 %1565 }
  0xd0   :  { %v2811_v46 = vsel %vm2809_vm14, %v2746_v42, %v2166_v43  ;;  %v2617_v54 = vsel %vm2614_vm11, %v2552_v44, %v1566_v45  ;;  %v485_v42 = vsel %vm445_vm4, %v482_v20, %v484_v35 }
  0xd1   :  { %1379 = vrot.lane.b32.xlu1 %v478_v27, %s6522_s11  ;;  %1177 = vrot.lane.b32.xlu0 %v7024_v10, %s6519_s29 }
  0xd2   :  { %5890 = vmatmul.mubr.msk.f32.vlgmr.msra.gmra.mrb[0].mxu0 %vm2885_vm15, %v2811_v46  ;;  %v837_v46 = vrot.slane %v264_v13, 2 }
  0xd3   :  { %v7069_v49 = vpop.permute.xlu1 %967  ;;  %v7071_v50 = vpop.permute.xlu0 %616 }
  0xd4   :  { %v838_v51 = vsel %vm798_vm3, %v835_v9, %v837_v46 }
  0xd5   :  { %2179 = vrot.lane.b32.xlu1 %v831_v47, %s6527_s1  ;;  %1979 = vrot.lane.b32.xlu0 %v480_v48, %s6525_s26 }
  0xd7   :  { %v1762_v52 = vpop.permute.xlu1 %1761  ;;  %v1568_v53 = vpop.permute.xlu0 %1567 }
  0xd8   :  { %v2682_v62 = vsel %vm2679_vm12, %v2617_v54, %v1762_v52  ;;  %v2618_v33 = vsel %vm2614_vm11, %v2553_v55, %v1568_v53  ;;  %v839_v55 = vrot.slane %v7179_v4, 2 }
  0xd9   :  { %1381 = vrot.lane.b32.xlu1 %v480_v48, %s6522_s11  ;;  %630 = vrot.lane.b32.xlu0 %v478_v27, %s6521_s10 }
  0xdb   :  { %v7078_v57 = vpop.permute.xlu1 %1163  ;;  %v7080_v58 = vpop.permute.xlu0 %969 }
  0xdd   :  { %2181 = vrot.lane.b32.xlu1 %v833_v56, %s6527_s1  ;;  %1581 = vrot.lane.b32.xlu0 %v831_v47, %s6523_s14 }
  0xdf   :  { %v1966_v0 = vpop.permute.xlu1 %1965  ;;  %v1764_v1 = vpop.permute.xlu0 %1763 }
  0xe0   :  { %v2747_v21 = vsel %vm2744_vm13, %v2682_v62, %v1966_v0  ;;  %v2683_v63 = vsel %vm2679_vm12, %v2618_v33, %v1764_v1  ;;  %v2359_v1 = vsel %vm96_vm0, %v6822_v37, %v7050_v31  ;;  %v7190_v37 = vld [vmem:[#allocation2 + $0xc8] sm:$0xff]  ;;  %v486_v62 = vrot.slane %v7179_v4, 1 }
  0xe1   :  { %983 = vrot.lane.b32.xlu1 %v831_v47, %s6520_s30  ;;  %632 = vrot.lane.b32.xlu0 %v480_v48, %s6521_s10  ;;  %v2424_v3 = vsel %vm2419_vm8, %v2359_v1, %v7069_v49  ;;  %v487_v19 = vrot.slane %v7190_v37, 1 }
  0xe2   :  { %v2489_v7 = vsel %vm2484_vm9, %v2424_v3, %v7078_v57  ;;  %v7263_v3 = vld [vmem:[#allocation2 + $0xd8] sm:$0xff] }
  0xe3   :  { %v7102_v16 = vpop.permute.xlu1 %1367  ;;  %v7104_v18 = vpop.permute.xlu0 %1165  ;;  %v488_v8 = vsel %vm445_vm4, %v486_v62, %v487_v19 }
  0xe4   :  { %v2554_v31 = vsel %vm2549_vm10, %v2489_v7, %v7102_v16  ;;  %v2360_v16 = vsel %vm96_vm0, %v6828_v40, %v7071_v50  ;;  %v267_v40 = vld [vmem:[#allocation2 + $0xd0] sm:$0x3] }
  0xe5   :  { %1777 = vrot.lane.b32.xlu1 %v7095_v5, %s6524_s17  ;;  %1583 = vrot.lane.b32.xlu0 %v833_v56, %s6523_s14  ;;  %v489_v33 = vrot.slane %v267_v40, 1 }
  0xe7   :  { %v2168_v22 = vpop.permute.xlu1 %2167  ;;  %v1968_v23 = vpop.permute.xlu0 %1967 }
  0xe8   :  { %v2812_v24 = vsel %vm2809_vm14, %v2747_v21, %v2168_v22  ;;  %v2748_v38 = vsel %vm2744_vm13, %v2683_v63, %v1968_v23 }
  0xe9   :  { %1179 = vrot.lane.b32.xlu1 %v7095_v5, %s6519_s29  ;;  %985 = vrot.lane.b32.xlu0 %v833_v56, %s6520_s30  ;;  %v54_v56 = vld [vmem:[%s10584_s0 + $0xb0] sm:$0xff] }
  0xea   :  { %5892 = vmatprep.mubr.msk.f32.mxu0 %vm2885_vm15, %v2812_v24  ;;  %199 = vst.msk [vmem:[#allocation2 + $0x121] sm:$0xff] %vm96_vm0, %v54_v56  ;;  %v2425_v24 = vsel %vm2419_vm8, %v2360_v16, %v7080_v58 }
  0xeb   :  { %v7132_v27 = vpop.permute.xlu1 %1369  ;;  %v7134_v28 = vpop.permute.xlu0 %618  ;;  %v2490_v25 = vsel %vm2484_vm9, %v2425_v24, %v7104_v18  ;;  %v840_v18 = vrot.slane %v7190_v37, 2 }
  0xec   :  { %v2555_v50 = vsel %vm2549_vm10, %v2490_v25, %v7132_v27 }
  0xed   :  { %1981 = vrot.lane.b32.xlu1 %v483_v12, %s6525_s26  ;;  %1779 = vrot.lane.b32.xlu0 %v7106_v14, %s6524_s17  ;;  %v841_v35 = vsel %vm798_vm3, %v839_v55, %v840_v18 }
  0xef   :  { %v2170_v39 = vpop.permute.xlu1 %2169  ;;  %v1570_v30 = vpop.permute.xlu0 %1569 }
  0xf0   :  { %v2813_v29 = vsel %vm2809_vm14, %v2748_v38, %v2170_v39  ;;  %v2619_v49 = vsel %vm2614_vm11, %v2554_v31, %v1570_v30  ;;  %v490_v38 = vsel %vm445_vm4, %v487_v19, %v489_v33 }
  0xf1   :  { %1383 = vrot.lane.b32.xlu1 %v483_v12, %s6522_s11  ;;  %1181 = vrot.lane.b32.xlu0 %v7106_v14, %s6519_s29 }
  0xf2   :  { %5893 = vmatmul.mubr.msk.f32.gmra.mrb[2].mxu0 %vm2885_vm15, %v2813_v29  ;;  %v842_v29 = vrot.slane %v267_v40, 2 }
  0xf3   :  { %v7153_v43 = vpop.permute.xlu1 %971  ;;  %v7155_v45 = vpop.permute.xlu0 %620 }
  0xf4   :  { %v843_v46 = vsel %vm798_vm3, %v840_v18, %v842_v29 }
  0xf5   :  { %2183 = vrot.lane.b32.xlu1 %v836_v41, %s6527_s1  ;;  %1983 = vrot.lane.b32.xlu0 %v485_v42, %s6525_s26 }
  0xf7   :  { %v1766_v47 = vpop.permute.xlu1 %1765  ;;  %v1572_v48 = vpop.permute.xlu0 %1571 }
  0xf8   :  { %v2684_v57 = vsel %vm2679_vm12, %v2619_v49, %v1766_v47  ;;  %v2620_v13 = vsel %vm2614_vm11, %v2555_v50, %v1572_v48  ;;  %v844_v50 = vrot.slane %v7263_v3, 2 }
  0xf9   :  { %1385 = vrot.lane.b32.xlu1 %v485_v42, %s6522_s11  ;;  %634 = vrot.lane.b32.xlu0 %v483_v12, %s6521_s10 }
  0xfb   :  { %v7162_v52 = vpop.permute.xlu1 %1167  ;;  %v7164_v53 = vpop.permute.xlu0 %973 }
  0xfd   :  { %2185 = vrot.lane.b32.xlu1 %v838_v51, %s6527_s1  ;;  %1585 = vrot.lane.b32.xlu0 %v836_v41, %s6523_s14 }
  0xff   :  { %v1970_v60 = vpop.permute.xlu1 %1969  ;;  %v1768_v0 = vpop.permute.xlu0 %1767 }
 0x100   :  { %v2749_v20 = vsel %vm2744_vm13, %v2684_v57, %v1970_v60  ;;  %v2685_v58 = vsel %vm2679_vm12, %v2620_v13, %v1768_v0  ;;  %v2361_v0 = vsel %vm96_vm0, %v6875_v59, %v7134_v28  ;;  %v7274_v59 = vld [vmem:[#allocation2 + $0xe0] sm:$0xff]  ;;  %v491_v57 = vrot.slane %v7263_v3, 1 }
 0x101   :  { %987 = vrot.lane.b32.xlu1 %v836_v41, %s6520_s30  ;;  %636 = vrot.lane.b32.xlu0 %v485_v42, %s6521_s10  ;;  %v2426_v1 = vsel %vm2419_vm8, %v2361_v0, %v7153_v43  ;;  %v492_v62 = vrot.slane %v7274_v59, 1 }
 0x102   :  { %v2491_v7 = vsel %vm2484_vm9, %v2426_v1, %v7162_v52  ;;  %v7347_v1 = vld [vmem:[#allocation2 + $0xf0] sm:$0xff] }
 0x103   :  { %v7186_v44 = vpop.permute.xlu1 %1371  ;;  %v7188_v54 = vpop.permute.xlu0 %1169  ;;  %v493_v16 = vsel %vm445_vm4, %v491_v57, %v492_v62 }
 0x104   :  { %v2556_v28 = vsel %vm2549_vm10, %v2491_v7, %v7186_v44  ;;  %v2362_v44 = vsel %vm96_vm0, %v6880_v61, %v7155_v45  ;;  %v270_v61 = vld [vmem:[#allocation2 + $0xe8] sm:$0x3] }
 0x105   :  { %1781 = vrot.lane.b32.xlu1 %v7179_v4, %s6524_s17  ;;  %1587 = vrot.lane.b32.xlu0 %v838_v51, %s6523_s14  ;;  %v494_v13 = vrot.slane %v270_v61, 1 }
 0x107   :  { %v2172_v21 = vpop.permute.xlu1 %2171  ;;  %v1972_v22 = vpop.permute.xlu0 %1971 }
 0x108   :  { %v2814_v23 = vsel %vm2809_vm14, %v2749_v20, %v2172_v21  ;;  %v2750_v63 = vsel %vm2744_vm13, %v2685_v58, %v1972_v22 }
 0x109   :  { %1183 = vrot.lane.b32.xlu1 %v7179_v4, %s6519_s29  ;;  %989 = vrot.lane.b32.xlu0 %v838_v51, %s6520_s30  ;;  %v56_v51 = vld [vmem:[%s10584_s0 + $0xc0] sm:$0xff] }
 0x10a   :  { %5895 = vmatprep.mubr.msk.f32.mxu0 %vm2885_vm15, %v2814_v23  ;;  %201 = vst.msk [vmem:[#allocation2 + $0x139] sm:$0xff] %vm96_vm0, %v56_v51  ;;  %v2427_v23 = vsel %vm2419_vm8, %v2362_v44, %v7164_v53 }
 0x10b   :  { %v7216_v12 = vpop.permute.xlu1 %1373  ;;  %v7218_v26 = vpop.permute.xlu0 %622  ;;  %v2492_v24 = vsel %vm2484_vm9, %v2427_v23, %v7188_v54  ;;  %v845_v54 = vrot.slane %v7274_v59, 2 }
 0x10c   :  { %v2557_v45 = vsel %vm2549_vm10, %v2492_v24, %v7216_v12 }
 0x10d   :  { %1985 = vrot.lane.b32.xlu1 %v488_v8, %s6525_s26  ;;  %1783 = vrot.lane.b32.xlu0 %v7190_v37, %s6524_s17  ;;  %v846_v33 = vsel %vm798_vm3, %v844_v50, %v845_v54 }
 0x10f   :  { %v2174_v34 = vpop.permute.xlu1 %2173  ;;  %v1574_v9 = vpop.permute.xlu0 %1573 }
 0x110   :  { %v2815_v27 = vsel %vm2809_vm14, %v2750_v63, %v2174_v34  ;;  %v2621_v43 = vsel %vm2614_vm11, %v2556_v28, %v1574_v9  ;;  %v495_v63 = vsel %vm445_vm4, %v492_v62, %v494_v13 }
 0x111   :  { %1387 = vrot.lane.b32.xlu1 %v488_v8, %s6522_s11  ;;  %1185 = vrot.lane.b32.xlu0 %v7190_v37, %s6519_s29 }
 0x112   :  { %5896 = vmatmul.mubr.msk.f32.gmra.mrb[4].mxu0 %vm2885_vm15, %v2815_v27  ;;  %v847_v27 = vrot.slane %v270_v61, 2 }
 0x113   :  { %v7237_v39 = vpop.permute.xlu1 %975  ;;  %v7239_v30 = vpop.permute.xlu0 %624 }
 0x114   :  { %v848_v29 = vsel %vm798_vm3, %v845_v54, %v847_v27 }
 0x115   :  { %2187 = vrot.lane.b32.xlu1 %v841_v35, %s6527_s1  ;;  %1987 = vrot.lane.b32.xlu0 %v490_v38, %s6525_s26 }
 0x117   :  { %v1770_v41 = vpop.permute.xlu1 %1769  ;;  %v1576_v42 = vpop.permute.xlu0 %1575 }
 0x118   :  { %v2686_v52 = vsel %vm2679_vm12, %v2621_v43, %v1770_v41  ;;  %v2622_v40 = vsel %vm2614_vm11, %v2557_v45, %v1576_v42  ;;  %v849_v45 = vrot.slane %v7347_v1, 2 }
 0x119   :  { %1389 = vrot.lane.b32.xlu1 %v490_v38, %s6522_s11  ;;  %638 = vrot.lane.b32.xlu0 %v488_v8, %s6521_s10 }
 0x11b   :  { %v7246_v47 = vpop.permute.xlu1 %1171  ;;  %v7248_v48 = vpop.permute.xlu0 %977 }
 0x11d   :  { %2189 = vrot.lane.b32.xlu1 %v843_v46, %s6527_s1  ;;  %1589 = vrot.lane.b32.xlu0 %v841_v35, %s6523_s14 }
 0x11f   :  { %v1974_v56 = vpop.permute.xlu1 %1973  ;;  %v1772_v60 = vpop.permute.xlu0 %1771 }
 0x120   :  { %v2751_v19 = vsel %vm2744_vm13, %v2686_v52, %v1974_v56  ;;  %v2687_v53 = vsel %vm2679_vm12, %v2622_v40, %v1772_v60  ;;  %v2363_v60 = vsel %vm96_vm0, %v6915_v15, %v7218_v26  ;;  %v7358_v15 = vld [vmem:[#allocation2 + $0xf8] sm:$0xff]  ;;  %v496_v52 = vrot.slane %v7347_v1, 1 }
 0x121   :  { %991 = vrot.lane.b32.xlu1 %v841_v35, %s6520_s30  ;;  %640 = vrot.lane.b32.xlu0 %v490_v38, %s6521_s10  ;;  %v2428_v0 = vsel %vm2419_vm8, %v2363_v60, %v7237_v39  ;;  %v497_v57 = vrot.slane %v7358_v15, 1 }
 0x122   :  { %v2493_v7 = vsel %vm2484_vm9, %v2428_v0, %v7246_v47  ;;  %v7431_v0 = vld [vmem:[#allocation2 + $0x108] sm:$0xff] }
 0x123   :  { %v7270_v31 = vpop.permute.xlu1 %1375  ;;  %v7272_v49 = vpop.permute.xlu0 %1173  ;;  %v498_v44 = vsel %vm445_vm4, %v496_v52, %v497_v57 }
 0x124   :  { %v2558_v26 = vsel %vm2549_vm10, %v2493_v7, %v7270_v31  ;;  %v2364_v31 = vsel %vm96_vm0, %v6920_v17, %v7239_v30  ;;  %v273_v17 = vld [vmem:[#allocation2 + $0x100] sm:$0x3] }
 0x125   :  { %1785 = vrot.lane.b32.xlu1 %v7263_v3, %s6524_s17  ;;  %1591 = vrot.lane.b32.xlu0 %v843_v46, %s6523_s14  ;;  %v499_v40 = vrot.slane %v273_v17, 1 }
 0x127   :  { %v2176_v20 = vpop.permute.xlu1 %2175  ;;  %v1976_v21 = vpop.permute.xlu0 %1975 }
 0x128   :  { %v2816_v22 = vsel %vm2809_vm14, %v2751_v19, %v2176_v20  ;;  %v2752_v58 = vsel %vm2744_vm13, %v2687_v53, %v1976_v21 }
 0x129   :  { %1187 = vrot.lane.b32.xlu1 %v7263_v3, %s6519_s29  ;;  %993 = vrot.lane.b32.xlu0 %v843_v46, %s6520_s30  ;;  %v58_v46 = vld [vmem:[%s10584_s0 + $0xd0] sm:$0xff] }
 0x12a   :  { %5898 = vmatprep.mubr.msk.f32.mxu0 %vm2885_vm15, %v2816_v22  ;;  %203 = vst.msk [vmem:[#allocation2 + $0x151] sm:$0xff] %vm96_vm0, %v58_v46  ;;  %v2429_v22 = vsel %vm2419_vm8, %v2364_v31, %v7248_v48 }
 0x12b   :  { %v7300_v8 = vpop.permute.xlu1 %1377  ;;  %v7302_v25 = vpop.permute.xlu0 %626  ;;  %v2494_v23 = vsel %vm2484_vm9, %v2429_v22, %v7272_v49  ;;  %v850_v49 = vrot.slane %v7358_v15, 2 }
 0x12c   :  { %v2559_v30 = vsel %vm2549_vm10, %v2494_v23, %v7300_v8 }
 0x12d   :  { %1989 = vrot.lane.b32.xlu1 %v493_v16, %s6525_s26  ;;  %1787 = vrot.lane.b32.xlu0 %v7274_v59, %s6524_s17  ;;  %v851_v13 = vsel %vm798_vm3, %v849_v45, %v850_v49 }
 0x12f   :  { %v2178_v55 = vpop.permute.xlu1 %2177  ;;  %v1578_v18 = vpop.permute.xlu0 %1577 }
 0x130   :  { %v2817_v12 = vsel %vm2809_vm14, %v2752_v58, %v2178_v55  ;;  %v2623_v39 = vsel %vm2614_vm11, %v2558_v26, %v1578_v18  ;;  %v500_v58 = vsel %vm445_vm4, %v497_v57, %v499_v40 }
 0x131   :  { %1391 = vrot.lane.b32.xlu1 %v493_v16, %s6522_s11  ;;  %1189 = vrot.lane.b32.xlu0 %v7274_v59, %s6519_s29 }
 0x132   :  { %5899 = vmatmul.mubr.msk.f32.gmra.mrb[6].mxu0 %vm2885_vm15, %v2817_v12  ;;  %v852_v12 = vrot.slane %v273_v17, 2 }
 0x133   :  { %v7321_v34 = vpop.permute.xlu1 %979  ;;  %v7323_v9 = vpop.permute.xlu0 %628 }
 0x134   :  { %v853_v27 = vsel %vm798_vm3, %v850_v49, %v852_v12 }
 0x135   :  { %2191 = vrot.lane.b32.xlu1 %v846_v33, %s6527_s1  ;;  %1991 = vrot.lane.b32.xlu0 %v495_v63, %s6525_s26 }
 0x137   :  { %v1774_v35 = vpop.permute.xlu1 %1773  ;;  %v1580_v38 = vpop.permute.xlu0 %1579 }
 0x138   :  { %v2688_v47 = vsel %vm2679_vm12, %v2623_v39, %v1774_v35  ;;  %v2624_v61 = vsel %vm2614_vm11, %v2559_v30, %v1580_v38  ;;  %v854_v30 = vrot.slane %v7431_v0, 2 }
 0x139   :  { %1393 = vrot.lane.b32.xlu1 %v495_v63, %s6522_s11  ;;  %642 = vrot.lane.b32.xlu0 %v493_v16, %s6521_s10 }
 0x13b   :  { %v7330_v41 = vpop.permute.xlu1 %1175  ;;  %v7332_v42 = vpop.permute.xlu0 %981 }
 0x13d   :  { %2193 = vrot.lane.b32.xlu1 %v848_v29, %s6527_s1  ;;  %1593 = vrot.lane.b32.xlu0 %v846_v33, %s6523_s14 }
 0x13f   :  { %v1978_v51 = vpop.permute.xlu1 %1977  ;;  %v1776_v56 = vpop.permute.xlu0 %1775 }
 0x140   :  { %v2753_v62 = vsel %vm2744_vm13, %v2688_v47, %v1978_v51  ;;  %v2689_v48 = vsel %vm2679_vm12, %v2624_v61, %v1776_v56  ;;  %v2365_v56 = vsel %vm96_vm0, %v6957_v32, %v7302_v25  ;;  %v7442_v32 = vld [vmem:[#allocation2 + $0x110] sm:$0xff]  ;;  %v501_v47 = vrot.slane %v7431_v0, 1 }
 0x141   :  { %995 = vrot.lane.b32.xlu1 %v846_v33, %s6520_s30  ;;  %644 = vrot.lane.b32.xlu0 %v495_v63, %s6521_s10  ;;  %v2430_v60 = vsel %vm2419_vm8, %v2365_v56, %v7321_v34  ;;  %v502_v52 = vrot.slane %v7442_v32, 1 }
 0x142   :  { %v2495_v7 = vsel %vm2484_vm9, %v2430_v60, %v7330_v41  ;;  %v7515_v60 = vld [vmem:[#allocation2 + $0x120] sm:$0xff] }
 0x143   :  { %v7354_v28 = vpop.permute.xlu1 %1379  ;;  %v7356_v43 = vpop.permute.xlu0 %1177  ;;  %v503_v31 = vsel %vm445_vm4, %v501_v47, %v502_v52 }
 0x144   :  { %v2560_v25 = vsel %vm2549_vm10, %v2495_v7, %v7354_v28  ;;  %v2366_v28 = vsel %vm96_vm0, %v6962_v36, %v7323_v9  ;;  %v276_v36 = vld [vmem:[#allocation2 + $0x118] sm:$0x3] }
 0x145   :  { %1789 = vrot.lane.b32.xlu1 %v7347_v1, %s6524_s17  ;;  %1595 = vrot.lane.b32.xlu0 %v848_v29, %s6523_s14  ;;  %v504_v61 = vrot.slane %v276_v36, 1 }
 0x147   :  { %v2180_v19 = vpop.permute.xlu1 %2179  ;;  %v1980_v20 = vpop.permute.xlu0 %1979 }
 0x148   :  { %v2818_v21 = vsel %vm2809_vm14, %v2753_v62, %v2180_v19  ;;  %v2754_v53 = vsel %vm2744_vm13, %v2689_v48, %v1980_v20 }
 0x149   :  { %1191 = vrot.lane.b32.xlu1 %v7347_v1, %s6519_s29  ;;  %997 = vrot.lane.b32.xlu0 %v848_v29, %s6520_s30  ;;  %v60_v29 = vld [vmem:[%s10584_s0 + $0xe0] sm:$0xff] }
 0x14a   :  { %5901 = vmatprep.mubr.msk.f32.mxu0 %vm2885_vm15, %v2818_v21  ;;  %205 = vst.msk [vmem:[#allocation2 + $0x169] sm:$0xff] %vm96_vm0, %v60_v29  ;;  %v2431_v21 = vsel %vm2419_vm8, %v2366_v28, %v7332_v42 }
 0x14b   :  { %v7384_v16 = vpop.permute.xlu1 %1381  ;;  %v7386_v24 = vpop.permute.xlu0 %630  ;;  %v2496_v22 = vsel %vm2484_vm9, %v2431_v21, %v7356_v43  ;;  %v855_v43 = vrot.slane %v7442_v32, 2 }
 0x14c   :  { %v2561_v9 = vsel %vm2549_vm10, %v2496_v22, %v7384_v16 }
 0x14d   :  { %1993 = vrot.lane.b32.xlu1 %v498_v44, %s6525_s26  ;;  %1791 = vrot.lane.b32.xlu0 %v7358_v15, %s6524_s17  ;;  %v856_v40 = vsel %vm798_vm3, %v854_v30, %v855_v43 }
 0x14f   :  { %v2182_v50 = vpop.permute.xlu1 %2181  ;;  %v1582_v54 = vpop.permute.xlu0 %1581 }
 0x150   :  { %v2819_v8 = vsel %vm2809_vm14, %v2754_v53, %v2182_v50  ;;  %v2625_v34 = vsel %vm2614_vm11, %v2560_v25, %v1582_v54  ;;  %v505_v53 = vsel %vm445_vm4, %v502_v52, %v504_v61 }
 0x151   :  { %1395 = vrot.lane.b32.xlu1 %v498_v44, %s6522_s11  ;;  %1193 = vrot.lane.b32.xlu0 %v7358_v15, %s6519_s29 }
 0x152   :  { %5902 = vmatmul.mubr.msk.f32.gmra.mrb[8].mxu0 %vm2885_vm15, %v2819_v8  ;;  %v857_v8 = vrot.slane %v276_v36, 2 }
 0x153   :  { %v7405_v55 = vpop.permute.xlu1 %983  ;;  %v7407_v18 = vpop.permute.xlu0 %632 }
 0x154   :  { %v858_v12 = vsel %vm798_vm3, %v855_v43, %v857_v8 }
 0x155   :  { %2195 = vrot.lane.b32.xlu1 %v851_v13, %s6527_s1  ;;  %1995 = vrot.lane.b32.xlu0 %v500_v58, %s6525_s26 }
 0x157   :  { %v1778_v33 = vpop.permute.xlu1 %1777  ;;  %v1584_v63 = vpop.permute.xlu0 %1583 }
 0x158   :  { %v2690_v41 = vsel %vm2679_vm12, %v2625_v34, %v1778_v33  ;;  %v2626_v17 = vsel %vm2614_vm11, %v2561_v9, %v1584_v63  ;;  %v859_v9 = vrot.slane %v7515_v60, 2 }
 0x159   :  { %1397 = vrot.lane.b32.xlu1 %v500_v58, %s6522_s11  ;;  %646 = vrot.lane.b32.xlu0 %v498_v44, %s6521_s10 }
 0x15b   :  { %v7414_v35 = vpop.permute.xlu1 %1179  ;;  %v7416_v38 = vpop.permute.xlu0 %985 }
 0x15d   :  { %2197 = vrot.lane.b32.xlu1 %v853_v27, %s6527_s1  ;;  %1597 = vrot.lane.b32.xlu0 %v851_v13, %s6523_s14 }
 0x15f   :  { %v1982_v46 = vpop.permute.xlu1 %1981  ;;  %v1780_v51 = vpop.permute.xlu0 %1779 }
 0x160   :  { %v2755_v57 = vsel %vm2744_vm13, %v2690_v41, %v1982_v46  ;;  %v2691_v42 = vsel %vm2679_vm12, %v2626_v17, %v1780_v51  ;;  %v2367_v51 = vsel %vm96_vm0, %v7014_v11, %v7386_v24  ;;  %v7526_v11 = vld [vmem:[#allocation2 + $0x128] sm:$0xff]  ;;  %v506_v41 = vrot.slane %v7515_v60, 1 }
 0x161   :  { %999 = vrot.lane.b32.xlu1 %v851_v13, %s6520_s30  ;;  %648 = vrot.lane.b32.xlu0 %v500_v58, %s6521_s10  ;;  %v2432_v56 = vsel %vm2419_vm8, %v2367_v51, %v7405_v55  ;;  %v507_v47 = vrot.slane %v7526_v11, 1 }
 0x162   :  { %v2497_v7 = vsel %vm2484_vm9, %v2432_v56, %v7414_v35  ;;  %v7598_v56 = vld [vmem:[#allocation2 + $0x138] sm:$0xff] }
 0x163   :  { %v7438_v26 = vpop.permute.xlu1 %1383  ;;  %v7440_v39 = vpop.permute.xlu0 %1181  ;;  %v508_v28 = vsel %vm445_vm4, %v506_v41, %v507_v47  ;;  %v511_v41 = vrot.slane %v7598_v56, 1 }
 0x164   :  { %v2562_v24 = vsel %vm2549_vm10, %v2497_v7, %v7438_v26  ;;  %v2368_v26 = vsel %vm96_vm0, %v7024_v10, %v7407_v18  ;;  %v279_v10 = vld [vmem:[#allocation2 + $0x130] sm:$0x3] }
 0x165   :  { %1793 = vrot.lane.b32.xlu1 %v7431_v0, %s6524_s17  ;;  %1599 = vrot.lane.b32.xlu0 %v853_v27, %s6523_s14  ;;  %v509_v17 = vrot.slane %v279_v10, 1 }
 0x167   :  { %v2184_v62 = vpop.permute.xlu1 %2183  ;;  %v1984_v19 = vpop.permute.xlu0 %1983 }
 0x168   :  { %v2820_v20 = vsel %vm2809_vm14, %v2755_v57, %v2184_v62  ;;  %v2756_v48 = vsel %vm2744_vm13, %v2691_v42, %v1984_v19 }
 0x169   :  { %1195 = vrot.lane.b32.xlu1 %v7431_v0, %s6519_s29  ;;  %1001 = vrot.lane.b32.xlu0 %v853_v27, %s6520_s30  ;;  %v62_v27 = vld [vmem:[%s10584_s0 + $0xf0] sm:$0xff] }
 0x16a   :  { %5904 = vmatprep.mubr.msk.f32.mxu0 %vm2885_vm15, %v2820_v20  ;;  %207 = vst.msk [vmem:[#allocation2 + $0x181] sm:$0xff] %vm96_vm0, %v62_v27  ;;  %v2433_v20 = vsel %vm2419_vm8, %v2368_v26, %v7416_v38 }
 0x16b   :  { %v7468_v44 = vpop.permute.xlu1 %1385  ;;  %v7470_v23 = vpop.permute.xlu0 %634  ;;  %v2498_v21 = vsel %vm2484_vm9, %v2433_v20, %v7440_v39  ;;  %v860_v39 = vrot.slane %v7526_v11, 2 }
 0x16c   :  { %v2563_v18 = vsel %vm2549_vm10, %v2498_v21, %v7468_v44 }
 0x16d   :  { %1997 = vrot.lane.b32.xlu1 %v503_v31, %s6525_s26  ;;  %1795 = vrot.lane.b32.xlu0 %v7442_v32, %s6524_s17  ;;  %v861_v61 = vsel %vm798_vm3, %v859_v9, %v860_v39 }
 0x16f   :  { %v2186_v45 = vpop.permute.xlu1 %2185  ;;  %v1586_v49 = vpop.permute.xlu0 %1585 }
 0x170   :  { %v2821_v16 = vsel %vm2809_vm14, %v2756_v48, %v2186_v45  ;;  %v2627_v55 = vsel %vm2614_vm11, %v2562_v24, %v1586_v49  ;;  %v510_v48 = vsel %vm445_vm4, %v507_v47, %v509_v17 }
 0x171   :  { %1399 = vrot.lane.b32.xlu1 %v503_v31, %s6522_s11  ;;  %1197 = vrot.lane.b32.xlu0 %v7442_v32, %s6519_s29 }
 0x172   :  { %5905 = vmatmul.mubr.msk.f32.gmra.mrb[10].mxu0 %vm2885_vm15, %v2821_v16  ;;  %v862_v16 = vrot.slane %v279_v10, 2 }
 0x173   :  { %v7489_v50 = vpop.permute.xlu1 %987  ;;  %v7491_v54 = vpop.permute.xlu0 %636 }
 0x174   :  { %v863_v8 = vsel %vm798_vm3, %v860_v39, %v862_v16  ;;  %v2370_v26 = vsel %vm96_vm0, %v7106_v14, %v7491_v54  ;;  %v282_v14 = vld [vmem:[#allocation2 + $0x148] sm:$0x3] }
 0x175   :  { %2199 = vrot.lane.b32.xlu1 %v856_v40, %s6527_s1  ;;  %1999 = vrot.lane.b32.xlu0 %v505_v53, %s6525_s26  ;;  %v514_v9 = vrot.slane %v282_v14, 1 }
 0x177   :  { %v1782_v13 = vpop.permute.xlu1 %1781  ;;  %v1588_v58 = vpop.permute.xlu0 %1587 }
 0x178   :  { %v2692_v35 = vsel %vm2679_vm12, %v2627_v55, %v1782_v13  ;;  %v2628_v36 = vsel %vm2614_vm11, %v2563_v18, %v1588_v58 }
 0x179   :  { %1401 = vrot.lane.b32.xlu1 %v505_v53, %s6522_s11  ;;  %650 = vrot.lane.b32.xlu0 %v503_v31, %s6521_s10 }
 0x17b   :  { %v7498_v33 = vpop.permute.xlu1 %1183  ;;  %v7500_v63 = vpop.permute.xlu0 %989 }
 0x17c   :  { %v2435_v20 = vsel %vm2419_vm8, %v2370_v26, %v7500_v63 }
 0x17d   :  { %2201 = vrot.lane.b32.xlu1 %v858_v12, %s6527_s1  ;;  %1601 = vrot.lane.b32.xlu0 %v856_v40, %s6523_s14 }
 0x17f   :  { %v1986_v29 = vpop.permute.xlu1 %1985  ;;  %v1784_v46 = vpop.permute.xlu0 %1783 }
 0x180   :  { %v2757_v52 = vsel %vm2744_vm13, %v2692_v35, %v1986_v29  ;;  %v2693_v38 = vsel %vm2679_vm12, %v2628_v36, %v1784_v46  ;;  %v2369_v29 = vsel %vm96_vm0, %v7095_v5, %v7470_v23  ;;  %v64_v46 = vld [vmem:[%s10584_s0 + $0x100] sm:$0xff] }
 0x181   :  { %1003 = vrot.lane.b32.xlu1 %v856_v40, %s6520_s30  ;;  %652 = vrot.lane.b32.xlu0 %v505_v53, %s6521_s10  ;;  %v2434_v51 = vsel %vm2419_vm8, %v2369_v29, %v7489_v50  ;;  %209 = vst.msk [vmem:[#allocation2 + $0x1c9] sm:$0xff] %vm96_vm0, %v64_v46  ;;  %v7607_v23 = vld [vmem:[#allocation2 + $0x140] sm:$0xff] }
 0x182   :  { %v2499_v6 = vsel %vm2484_vm9, %v2434_v51, %v7498_v33  ;;  %v512_v47 = vrot.slane %v7607_v23, 1 }
 0x183   :  { %v7522_v25 = vpop.permute.xlu1 %1387  ;;  %v7524_v34 = vpop.permute.xlu0 %1185 }
 0x184   :  { %v2564_v24 = vsel %vm2549_vm10, %v2499_v6, %v7522_v25  ;;  %v65_v25 = vld [vmem:[%s10584_s0 + $0x108] sm:$0xff]  ;;  %v2500_v21 = vsel %vm2484_vm9, %v2435_v20, %v7524_v34  ;;  %v865_v34 = vrot.slane %v7607_v23, 2  ;;  %v7686_v6 = vld [vmem:[%s10586_s2] ss:$0 sm:$0xff] }
 0x185   :  { %1797 = vrot.lane.b32.xlu1 %v7515_v60, %s6524_s17  ;;  %1603 = vrot.lane.b32.xlu0 %v858_v12, %s6523_s14  ;;  %210 = vst.msk [vmem:[#allocation2 + $0x1d1] sm:$0xff] %vm96_vm0, %v65_v25 }
 0x187   :  { %v2188_v57 = vpop.permute.xlu1 %2187  ;;  %v1988_v62 = vpop.permute.xlu0 %1987 }
 0x188   :  { %v2822_v19 = vsel %vm2809_vm14, %v2757_v52, %v2188_v57  ;;  %v2758_v42 = vsel %vm2744_vm13, %v2693_v38, %v1988_v62  ;;  %v864_v38 = vrot.slane %v7598_v56, 2 }
 0x189   :  { %1199 = vrot.lane.b32.xlu1 %v7515_v60, %s6519_s29  ;;  %1005 = vrot.lane.b32.xlu0 %v858_v12, %s6520_s30 }
 0x18a   :  { %5907 = vmatprep.mubr.msk.f32.mxu0 %vm2885_vm15, %v2822_v19 }
 0x18b   :  { %v7552_v31 = vpop.permute.xlu1 %1389  ;;  %v7554_v22 = vpop.permute.xlu0 %638 }
 0x18c   :  { %v2565_v54 = vsel %vm2549_vm10, %v2500_v21, %v7552_v31  ;;  %v2371_v51 = vsel %vm96_vm0, %v7179_v4, %v7554_v22 }
 0x18d   :  { %2001 = vrot.lane.b32.xlu1 %v508_v28, %s6525_s26  ;;  %1799 = vrot.lane.b32.xlu0 %v7526_v11, %s6524_s17 }
 0x18f   :  { %v2190_v30 = vpop.permute.xlu1 %2189  ;;  %v1590_v43 = vpop.permute.xlu0 %1589 }
 0x190   :  { %v2823_v44 = vsel %vm2809_vm14, %v2758_v42, %v2190_v30  ;;  %v2629_v55 = vsel %vm2614_vm11, %v2564_v24, %v1590_v43  ;;  %v866_v30 = vsel %vm798_vm3, %v864_v38, %v865_v34  ;;  %v515_v43 = vsel %vm445_vm4, %v512_v47, %v514_v9 }
 0x191   :  { %1403 = vrot.lane.b32.xlu1 %v508_v28, %s6522_s11  ;;  %1201 = vrot.lane.b32.xlu0 %v7526_v11, %s6519_s29 }
 0x192   :  { %5908 = vmatmul.mubr.msk.f32.gmra.mrb[12].mxu0 %vm2885_vm15, %v2823_v44 }
 0x193   :  { %v7573_v45 = vpop.permute.xlu1 %991  ;;  %v7575_v49 = vpop.permute.xlu0 %640 }
 0x194   :  { %v2436_v24 = vsel %vm2419_vm8, %v2371_v51, %v7573_v45 }
 0x195   :  { %2203 = vrot.lane.b32.xlu1 %v861_v61, %s6527_s1  ;;  %2003 = vrot.lane.b32.xlu0 %v510_v48, %s6525_s26 }
 0x197   :  { %v1786_v40 = vpop.permute.xlu1 %1785  ;;  %v1592_v53 = vpop.permute.xlu0 %1591 }
 0x198   :  { %v2694_v50 = vsel %vm2679_vm12, %v2629_v55, %v1786_v40  ;;  %v2630_v36 = vsel %vm2614_vm11, %v2565_v54, %v1592_v53  ;;  %v7692_v55 = vld [vmem:[#allocation2 + $0x150] sm:$0xff] }
 0x199   :  { %1405 = vrot.lane.b32.xlu1 %v510_v48, %s6522_s11  ;;  %654 = vrot.lane.b32.xlu0 %v508_v28, %s6521_s10  ;;  %v513_v28 = vsel %vm445_vm4, %v511_v41, %v512_v47  ;;  %v7703_v47 = vld [vmem:[#allocation2 + $0x158] sm:$0xff] }
 0x19b   :  { %v7582_v13 = vpop.permute.xlu1 %1187  ;;  %v7584_v58 = vpop.permute.xlu0 %993 }
 0x19c   :  { %v2501_v4 = vsel %vm2484_vm9, %v2436_v24, %v7582_v13 }
 0x19d   :  { %2205 = vrot.lane.b32.xlu1 %v863_v8, %s6527_s1  ;;  %1605 = vrot.lane.b32.xlu0 %v861_v61, %s6523_s14 }
 0x19f   :  { %v1990_v12 = vpop.permute.xlu1 %1989  ;;  %v1788_v27 = vpop.permute.xlu0 %1787 }
 0x1a0   :  { %v2759_v52 = vsel %vm2744_vm13, %v2694_v50, %v1990_v12  ;;  %v2695_v63 = vsel %vm2679_vm12, %v2630_v36, %v1788_v27  ;;  %v66_v27 = vld [vmem:[%s10584_s0 + $0x110] sm:$0xff]  ;;  %v67_v50 = vld [vmem:[%s10584_s0 + $0x118] sm:$0xff] }
 0x1a1   :  { %1007 = vrot.lane.b32.xlu1 %v861_v61, %s6520_s30  ;;  %656 = vrot.lane.b32.xlu0 %v510_v48, %s6521_s10  ;;  %v867_v48 = vrot.slane %v282_v14, 2  ;;  %211 = vst.msk [vmem:[#allocation2 + $0x1e1] sm:$0xff] %vm96_vm0, %v66_v27  ;;  %212 = vst.msk [vmem:[#allocation2 + $0x1e9] sm:$0xff] %vm96_vm0, %v67_v50 }
 0x1a3   :  { %v7603_v7 = vpop.permute.xlu1 %1391  ;;  %v7605_v5 = vpop.permute.xlu0 %1189  ;;  %v868_v53 = vsel %vm798_vm3, %v865_v34, %v867_v48 }
 0x1a4   :  { %v2566_v45 = vsel %vm2549_vm10, %v2501_v4, %v7603_v7  ;;  %v516_v7 = vrot.slane %v7692_v55, 1 }
 0x1a5   :  { %v7612_v35 = vpop.f32.mrb[0].mxu0  ;;  %1801 = vrot.lane.b32.xlu1 %v7598_v56, %s6524_s17  ;;  %1607 = vrot.lane.b32.xlu0 %v863_v8, %s6523_s14 }
 0x1a6   :  { %v7618_v33 = vpop.f32.mrb[1].mxu0  ;;  %v3154_v25 = vadd.f32 %v7612_v35, %v7686_v6  ;;  %v517_v35 = vrot.slane %v7703_v47, 1 }
 0x1a7   :  { %v2192_v57 = vpop.permute.xlu1 %2191  ;;  %v1992_v62 = vpop.permute.xlu0 %1991 }
 0x1a8   :  { %v2824_v19 = vsel %vm2809_vm14, %v2759_v52, %v2192_v57  ;;  %v2760_v39 = vsel %vm2744_vm13, %v2695_v63, %v1992_v62  ;;  %v3149_v52 = vadd.f32 %v7686_v6, %v7618_v33  ;;  %v3468_v14 = vmax.f32 %v3154_v25, 0.0 }
 0x1a9   :  { %1203 = vrot.lane.b32.xlu1 %v7598_v56, %s6519_s29  ;;  %1009 = vrot.lane.b32.xlu0 %v863_v8, %s6520_s30  ;;  %v2372_v63 = vsel %vm96_vm0, %v7190_v37, %v7575_v49 }
 0x1aa   :  { %5910 = vmatprep.mubr.msk.f32.mxu0 %vm2885_vm15, %v2824_v19  ;;  %v3467_v38 = vmax.f32 %v3149_v52, 0.0  ;;  %v2437_v9 = vsel %vm2419_vm8, %v2372_v63, %v7584_v58 }
 0x1ab   :  { %v7640_v10 = vpop.permute.xlu1 %1393  ;;  %v7642_v18 = vpop.permute.xlu0 %642 }
 0x1ad   :  { %2005 = vrot.lane.b32.xlu1 %v513_v28, %s6525_s26  ;;  %1803 = vrot.lane.b32.xlu0 %v7607_v23, %s6524_s17 }
 0x1af   :  { %v2194_v17 = vpop.permute.xlu1 %2193  ;;  %v1594_v42 = vpop.permute.xlu0 %1593 }
 0x1b0   :  { %v2825_v31 = vsel %vm2809_vm14, %v2760_v39, %v2194_v17  ;;  %v2631_v57 = vsel %vm2614_vm11, %v2566_v45, %v1594_v42  ;;  %v518_v17 = vsel %vm445_vm4, %v516_v7, %v517_v35  ;;  %v2502_v42 = vsel %vm2484_vm9, %v2437_v9, %v7605_v5 }
 0x1b1   :  { %1407 = vrot.lane.b32.xlu1 %v513_v28, %s6522_s11  ;;  %1205 = vrot.lane.b32.xlu0 %v7607_v23, %s6519_s29 }
 0x1b2   :  { %5911 = vmatmul.mubr.msk.f32.gmra.mrb[14].mxu0 %vm2885_vm15, %v2825_v31 }
 0x1b3   :  { %v7661_v44 = vpop.permute.xlu1 %995  ;;  %v7663_v61 = vpop.permute.xlu0 %644 }
 0x1b5   :  { %2207 = vrot.lane.b32.xlu1 %v866_v30, %s6527_s1  ;;  %2007 = vrot.lane.b32.xlu0 %v515_v43, %s6525_s26 }
 0x1b7   :  { %v1790_v16 = vpop.permute.xlu1 %1789  ;;  %v1596_v40 = vpop.permute.xlu0 %1595 }
 0x1b8   :  { %v2696_v62 = vsel %vm2679_vm12, %v2631_v57, %v1790_v16  ;;  %v869_v16 = vrot.slane %v7692_v55, 2 }
 0x1b9   :  { %1409 = vrot.lane.b32.xlu1 %v515_v43, %s6522_s11  ;;  %658 = vrot.lane.b32.xlu0 %v513_v28, %s6521_s10 }
 0x1bb   :  { %v7670_v8 = vpop.permute.xlu1 %1191  ;;  %v7672_v12 = vpop.permute.xlu0 %997 }
 0x1bd   :  { %2209 = vrot.lane.b32.xlu1 %v868_v53, %s6527_s1  ;;  %1609 = vrot.lane.b32.xlu0 %v866_v30, %s6523_s14 }
 0x1bf   :  { %v1994_v29 = vpop.permute.xlu1 %1993  ;;  %v1792_v46 = vpop.permute.xlu0 %1791 }
 0x1c0   :  { %v2761_v20 = vsel %vm2744_vm13, %v2696_v62, %v1994_v29 }
 0x1c1   :  { %1011 = vrot.lane.b32.xlu1 %v866_v30, %s6520_s30  ;;  %660 = vrot.lane.b32.xlu0 %v515_v43, %s6521_s10  ;;  %v285_v30 = vld [vmem:[#allocation2 + $0x160] sm:$0x3]  ;;  %v2567_v43 = vsel %vm2549_vm10, %v2502_v42, %v7640_v10  ;;  %v2374_v42 = vsel %vm96_vm0, %v7274_v59, %v7663_v61  ;;  %v288_v59 = vld [vmem:[#allocation2 + $0x178] sm:$0x3] }
 0x1c2   :  { %v2632_v48 = vsel %vm2614_vm11, %v2567_v43, %v1596_v40  ;;  %v519_v27 = vrot.slane %v285_v30, 1  ;;  %v872_v45 = vrot.slane %v285_v30, 2 }
 0x1c3   :  { %v7699_v22 = vpop.permute.xlu1 %1395  ;;  %v7701_v41 = vpop.permute.xlu0 %1193  ;;  %v2697_v5 = vsel %vm2679_vm12, %v2632_v48, %v1792_v46 }
 0x1c4   :  { %v520_v24 = vsel %vm445_vm4, %v517_v35, %v519_v27  ;;  %v2373_v35 = vsel %vm96_vm0, %v7263_v3, %v7642_v18  ;;  %v7795_v3 = vld [vmem:[#allocation2 + $0x170] sm:$0xff]  ;;  %v524_v27 = vrot.slane %v288_v59, 1 }
 0x1c5   :  { %v5894_v13 = vpop.f32.mrb[2].mxu0  ;;  %1805 = vrot.lane.b32.xlu1 %v7692_v55, %s6524_s17  ;;  %1611 = vrot.lane.b32.xlu0 %v868_v53, %s6523_s14 }
 0x1c6   :  { %v3164_v19 = vadd.f32 %v5894_v13, %v7686_v6  ;;  %v3158_v26 = vpop.f32.mrb[3].mxu0 }
 0x1c7   :  { %v3159_v33 = vadd.f32 %v7686_v6, %v3158_v26  ;;  %v2196_v28 = vpop.permute.xlu1 %2195  ;;  %v1996_v21 = vpop.permute.xlu0 %1995 }
 0x1c8   :  { %v3470_v54 = vmax.f32 %v3164_v19, 0.0  ;;  %v2826_v36 = vsel %vm2809_vm14, %v2761_v20, %v2196_v28  ;;  %v2762_v29 = vsel %vm2744_vm13, %v2697_v5, %v1996_v21  ;;  %v68_v19 = vld [vmem:[%s10584_s0 + $0x120] sm:$0xff]  ;;  %v2438_v20 = vsel %vm2419_vm8, %v2373_v35, %v7661_v44  ;;  %v69_v28 = vld [vmem:[%s10584_s0 + $0x128] sm:$0xff]  ;;  %v70_v35 = vld [vmem:[%s10584_s0 + $0x130] sm:$0xff] }
 0x1c9   :  { %v3469_v34 = vmax.f32 %v3159_v33, 0.0  ;;  %1207 = vrot.lane.b32.xlu1 %v7692_v55, %s6519_s29  ;;  %1013 = vrot.lane.b32.xlu0 %v868_v53, %s6520_s30  ;;  %v870_v53 = vrot.slane %v7703_v47, 2  ;;  %213 = vst.msk [vmem:[#allocation2 + $0x1f9] sm:$0xff] %vm96_vm0, %v68_v19  ;;  %v7784_v33 = vld [vmem:[#allocation2 + $0x168] sm:$0xff]  ;;  %v2503_v21 = vsel %vm2484_vm9, %v2438_v20, %v7670_v8  ;;  %214 = vst.msk [vmem:[#allocation2 + $0x201] sm:$0xff] %vm96_vm0, %v69_v28 }
 0x1ca   :  { %v3532_v39 = vmax.f32 %v3468_v14, %v3470_v54  ;;  %5913 = vmatprep.mubr.msk.f32.mxu0 %vm2885_vm15, %v2826_v36  ;;  %v2568_v18 = vsel %vm2549_vm10, %v2503_v21, %v7699_v22  ;;  %215 = vst.msk [vmem:[#allocation2 + $0x211] sm:$0xff] %vm96_vm0, %v70_v35 }
 0x1cb   :  { %v3531_v31 = vmax.f32 %v3467_v38, %v3469_v34  ;;  %v7735_v37 = vpop.permute.xlu1 %1397  ;;  %v7737_v49 = vpop.permute.xlu0 %646  ;;  %v871_v46 = vsel %vm798_vm3, %v869_v16, %v870_v53  ;;  %v873_v57 = vsel %vm798_vm3, %v870_v53, %v872_v45  ;;  %v521_v38 = vrot.slane %v7784_v33, 1 }
 0x1cc   :  { %v522_v34 = vrot.slane %v7795_v3, 1  ;;  %v874_v53 = vrot.slane %v7784_v33, 2  ;;  %v2375_v21 = vsel %vm96_vm0, %v7347_v1, %v7737_v49  ;;  %v7881_v1 = vld [vmem:[#allocation2 + $0x188] sm:$0xff] }
 0x1cd   :  { %2009 = vrot.lane.b32.xlu1 %v518_v17, %s6525_s26  ;;  %1807 = vrot.lane.b32.xlu0 %v7703_v47, %s6524_s17  ;;  %v7745_v58 = vpack.c.bf16 %v3532_v39, %v3531_v31  ;;  %v2439_v31 = vsel %vm2419_vm8, %v2374_v42, %v7672_v12  ;;  %v1552_v35 = vrot.slane %v7881_v1, 2 }
 0x1ce   :  { %v523_v30 = vsel %vm445_vm4, %v521_v38, %v522_v34  ;;  %v2504_v43 = vsel %vm2484_vm9, %v2439_v31, %v7701_v41  ;;  %v875_v41 = vrot.slane %v7795_v3, 2 }
 0x1cf   :  { %v2198_v51 = vpop.permute.xlu1 %2197  ;;  %v1598_v10 = vpop.permute.xlu0 %1597  ;;  %v2569_v61 = vsel %vm2549_vm10, %v2504_v43, %v7735_v37 }
 0x1d0   :  { %v2827_v40 = vsel %vm2809_vm14, %v2762_v29, %v2198_v51  ;;  %v2633_v44 = vsel %vm2614_vm11, %v2568_v18, %v1598_v10 }
 0x1d1   :  { %1411 = vrot.lane.b32.xlu1 %v518_v17, %s6522_s11  ;;  %1209 = vrot.lane.b32.xlu0 %v7703_v47, %s6519_s29 }
 0x1d2   :  { %5914 = vmatmul.mubr.msk.f32.gmra.mrb[16].mxu0 %vm2885_vm15, %v2827_v40  ;;  %v876_v40 = vsel %vm798_vm3, %v874_v53, %v875_v41 }
 0x1d3   :  { %v7758_v50 = vpop.permute.xlu1 %999  ;;  %v7760_v4 = vpop.permute.xlu0 %648 }
 0x1d4   :  { %v2440_v18 = vsel %vm2419_vm8, %v2375_v21, %v7758_v50  ;;  %v2376_v53 = vsel %vm96_vm0, %v7358_v15, %v7760_v4  ;;  %v291_v4 = vld [vmem:[#allocation2 + $0x190] sm:$0x3] }
 0x1d5   :  { %2211 = vrot.lane.b32.xlu1 %v871_v46, %s6527_s1  ;;  %2011 = vrot.lane.b32.xlu0 %v520_v24, %s6525_s26 }
 0x1d7   :  { %v1794_v25 = vpop.permute.xlu1 %1793  ;;  %v1600_v52 = vpop.permute.xlu0 %1599 }
 0x1d8   :  { %v2698_v8 = vsel %vm2679_vm12, %v2633_v44, %v1794_v25  ;;  %v2634_v16 = vsel %vm2614_vm11, %v2569_v61, %v1600_v52  ;;  %v877_v25 = vrot.slane %v288_v59, 2  ;;  %v289_v44 = vld [vmem:[#allocation2 + $0x180] sm:$0xff] }
 0x1d9   :  { %1413 = vrot.lane.b32.xlu1 %v520_v24, %s6522_s11  ;;  %662 = vrot.lane.b32.xlu0 %v518_v17, %s6521_s10  ;;  %v1349_v31 = vrot.slane %v289_v44, 1 }
 0x1da   :  { %v878_v19 = vsel %vm798_vm3, %v875_v41, %v877_v25 }
 0x1db   :  { %v7767_v13 = vpop.permute.xlu1 %1195  ;;  %v7769_v62 = vpop.permute.xlu0 %1001 }
 0x1dc   :  { %v2505_v38 = vsel %vm2484_vm9, %v2440_v18, %v7767_v13 }
 0x1dd   :  { %2213 = vrot.lane.b32.xlu1 %v873_v57, %s6527_s1  ;;  %1613 = vrot.lane.b32.xlu0 %v871_v46, %s6523_s14 }
 0x1df   :  { %v1998_v26 = vpop.permute.xlu1 %1997  ;;  %v1796_v7 = vpop.permute.xlu0 %1795 }
 0x1e0   :  { %v2763_v9 = vsel %vm2744_vm13, %v2698_v8, %v1998_v26  ;;  %v2699_v12 = vsel %vm2679_vm12, %v2634_v16, %v1796_v7  ;;  %v71_v8 = vld [vmem:[%s10584_s0 + $0x138] sm:$0xff] }
 0x1e1   :  { %1015 = vrot.lane.b32.xlu1 %v871_v46, %s6520_s30  ;;  %664 = vrot.lane.b32.xlu0 %v520_v24, %s6521_s10  ;;  %v525_v46 = vsel %vm445_vm4, %v522_v34, %v524_v27  ;;  %216 = vst.msk [vmem:[#allocation2 + $0x219] sm:$0xff] %vm96_vm0, %v71_v8 }
 0x1e3   :  { %v7791_v14 = vpop.permute.xlu1 %1399  ;;  %v7793_v54 = vpop.permute.xlu0 %1197 }
 0x1e4   :  { %v2570_v49 = vsel %vm2549_vm10, %v2505_v38, %v7791_v14  ;;  %v1350_v14 = vrot.slane %v7881_v1, 1 }
 0x1e5   :  { %v7801_v36 = vpop.f32.mrb[4].mxu0  ;;  %1809 = vrot.lane.b32.xlu1 %v7784_v33, %s6524_s17  ;;  %1615 = vrot.lane.b32.xlu0 %v873_v57, %s6523_s14 }
 0x1e6   :  { %v7807_v63 = vpop.f32.mrb[5].mxu0  ;;  %v3174_v50 = vadd.f32 %v7801_v36, %v7686_v6 }
 0x1e7   :  { %v2200_v22 = vpop.permute.xlu1 %2199  ;;  %v2000_v39 = vpop.permute.xlu0 %1999 }
 0x1e8   :  { %v2828_v17 = vsel %vm2809_vm14, %v2763_v9, %v2200_v22  ;;  %v2764_v29 = vsel %vm2744_vm13, %v2699_v12, %v2000_v39  ;;  %v3169_v22 = vadd.f32 %v7686_v6, %v7807_v63  ;;  %v3472_v61 = vmax.f32 %v3174_v50, 0.0 }
 0x1e9   :  { %1211 = vrot.lane.b32.xlu1 %v7784_v33, %s6519_s29  ;;  %1017 = vrot.lane.b32.xlu0 %v873_v57, %s6520_s30 }
 0x1ea   :  { %5916 = vmatprep.mubr.msk.f32.mxu0 %vm2885_vm15, %v2828_v17  ;;  %v3471_v41 = vmax.f32 %v3169_v22, 0.0 }
 0x1eb   :  { %v7825_v48 = vpop.permute.xlu1 %1401  ;;  %v7827_v5 = vpop.permute.xlu0 %650 }
 0x1ed   :  { %2013 = vrot.lane.b32.xlu1 %v523_v30, %s6525_s26  ;;  %1811 = vrot.lane.b32.xlu0 %v7795_v3, %s6524_s17 }
 0x1ef   :  { %v2202_v51 = vpop.permute.xlu1 %2201  ;;  %v1602_v10 = vpop.permute.xlu0 %1601 }
 0x1f0   :  { %v2829_v37 = vsel %vm2809_vm14, %v2764_v29, %v2202_v51  ;;  %v2635_v39 = vsel %vm2614_vm11, %v2570_v49, %v1602_v10  ;;  %v2441_v29 = vsel %vm2419_vm8, %v2376_v53, %v7769_v62  ;;  %v1351_v10 = vsel %vm445_vm4, %v1349_v31, %v1350_v14  ;;  %v297_v31 = vld [vmem:[#allocation2 + $0x1c0] sm:$0x3] }
 0x1f1   :  { %1415 = vrot.lane.b32.xlu1 %v523_v30, %s6522_s11  ;;  %1213 = vrot.lane.b32.xlu0 %v7795_v3, %s6519_s29 }
 0x1f2   :  { %5917 = vmatmul.mubr.msk.f32.gmra.mrb[18].mxu0 %vm2885_vm15, %v2829_v37  ;;  %v2506_v37 = vsel %vm2484_vm9, %v2441_v29, %v7793_v54 }
 0x1f3   :  { %v7846_v24 = vpop.permute.xlu1 %1003  ;;  %v7848_v45 = vpop.permute.xlu0 %652  ;;  %v2571_v25 = vsel %vm2549_vm10, %v2506_v37, %v7825_v48  ;;  %v7925_v48 = vld [vmem:[#allocation2 + $0x1b0] sm:$0xff]  ;;  %v73_v37 = vld [vmem:[%s10584_s0 + $0x148] sm:$0xff] }
 0x1f4   :  { %v526_v49 = vrot.slane %v7925_v48, 1  ;;  %218 = vst.msk [vmem:[#allocation2 + $0x231] sm:$0xff] %vm96_vm0, %v73_v37 }
 0x1f5   :  { %2215 = vrot.lane.b32.xlu1 %v876_v40, %s6527_s1  ;;  %2015 = vrot.lane.b32.xlu0 %v525_v46, %s6525_s26 }
 0x1f7   :  { %v1798_v52 = vpop.permute.xlu1 %1797  ;;  %v1604_v57 = vpop.permute.xlu0 %1603 }
 0x1f8   :  { %v2700_v17 = vsel %vm2679_vm12, %v2635_v39, %v1798_v52  ;;  %v2636_v52 = vsel %vm2614_vm11, %v2571_v25, %v1604_v57  ;;  %v7927_v57 = vld [vmem:[#allocation2 + $0x1b8] sm:$0xff] }
 0x1f9   :  { %1417 = vrot.lane.b32.xlu1 %v525_v46, %s6522_s11  ;;  %666 = vrot.lane.b32.xlu0 %v523_v30, %s6521_s10  ;;  %v527_v50 = vrot.slane %v7927_v57, 1 }
 0x1fb   :  { %v7855_v26 = vpop.permute.xlu1 %1199  ;;  %v7857_v7 = vpop.permute.xlu0 %1005 }
 0x1fd   :  { %2217 = vrot.lane.b32.xlu1 %v878_v19, %s6527_s1  ;;  %1617 = vrot.lane.b32.xlu0 %v876_v40, %s6523_s14 }
 0x1ff   :  { %v2002_v20 = vpop.permute.xlu1 %2001  ;;  %v1800_v28 = vpop.permute.xlu0 %1799 }
 0x200   :  { %v2765_v36 = vsel %vm2744_vm13, %v2700_v17, %v2002_v20  ;;  %v2701_v54 = vsel %vm2679_vm12, %v2636_v52, %v1800_v28  ;;  %v1352_v20 = vrot.slane %v291_v4, 1 }
 0x201   :  { %1019 = vrot.lane.b32.xlu1 %v876_v40, %s6520_s30  ;;  %668 = vrot.lane.b32.xlu0 %v525_v46, %s6521_s10 }
 0x203   :  { %v7877_v34 = vpop.permute.xlu1 %1403  ;;  %v7879_v9 = vpop.permute.xlu0 %1201 }
 0x205   :  { %v5900_v13 = vpop.f32.mrb[6].mxu0  ;;  %1813 = vrot.lane.b32.xlu1 %v289_v44, %s6524_s17  ;;  %1619 = vrot.lane.b32.xlu0 %v878_v19, %s6523_s14 }
 0x206   :  { %v3184_v42 = vadd.f32 %v5900_v13, %v7686_v6  ;;  %v3178_v30 = vpop.f32.mrb[7].mxu0  ;;  %v1554_v13 = vrot.slane %v291_v4, 2 }
 0x207   :  { %v3179_v43 = vadd.f32 %v7686_v6, %v3178_v30  ;;  %v2204_v63 = vpop.permute.xlu1 %2203  ;;  %v2004_v59 = vpop.permute.xlu0 %2003 }
 0x208   :  { %v3474_v16 = vmax.f32 %v3184_v42, 0.0  ;;  %v2830_v12 = vsel %vm2809_vm14, %v2765_v36, %v2204_v63  ;;  %v2766_v21 = vsel %vm2744_vm13, %v2701_v54, %v2004_v59  ;;  %v1555_v30 = vsel %vm798_vm3, %v1552_v35, %v1554_v13 }
 0x209   :  { %v3473_v27 = vmax.f32 %v3179_v43, 0.0  ;;  %1215 = vrot.lane.b32.xlu1 %v289_v44, %s6519_s29  ;;  %1021 = vrot.lane.b32.xlu0 %v878_v19, %s6520_s30  ;;  %v1551_v19 = vrot.slane %v289_v44, 2  ;;  %v1353_v44 = vsel %vm445_vm4, %v1350_v14, %v1352_v20  ;;  %v879_v14 = vrot.slane %v7925_v48, 2 }
 0x20a   :  { %v3534_v51 = vmax.f32 %v3472_v61, %v3474_v16  ;;  %5919 = vmatprep.mubr.msk.f32.mxu0 %vm2885_vm15, %v2830_v12  ;;  %v880_v36 = vrot.slane %v7927_v57, 2  ;;  %v529_v43 = vrot.slane %v297_v31, 1  ;;  %v72_v61 = vld [vmem:[%s10584_s0 + $0x140] sm:$0xff] }
 0x20b   :  { %v3533_v40 = vmax.f32 %v3471_v41, %v3473_v27  ;;  %v7910_v46 = vpop.permute.xlu1 %1405  ;;  %v7912_v15 = vpop.permute.xlu0 %654  ;;  %v1553_v28 = vsel %vm798_vm3, %v1551_v19, %v1552_v35  ;;  %217 = vst.msk [vmem:[#allocation2 + $0x229] sm:$0xff] %vm96_vm0, %v72_v61  ;;  %v2377_v27 = vsel %vm96_vm0, %v7431_v0, %v7827_v5  ;;  %v7978_v0 = vld [vmem:[#allocation2 + $0x1a0] sm:$0xff]  ;;  %v7991_v35 = vld [vmem:[#allocation2 + $0x1c8] sm:$0xff] }
 0x20c   :  { %v881_v16 = vsel %vm798_vm3, %v879_v14, %v880_v36  ;;  %v530_v12 = vsel %vm445_vm4, %v527_v50, %v529_v43  ;;  %v2442_v29 = vsel %vm2419_vm8, %v2377_v27, %v7846_v24  ;;  %v2154_v43 = vrot.slane %v7978_v0, 2 }
 0x20d   :  { %2017 = vrot.lane.b32.xlu1 %v1351_v10, %s6525_s26  ;;  %1815 = vrot.lane.b32.xlu0 %v7881_v1, %s6524_s17  ;;  %v7920_v62 = vpack.c.bf16 %v3534_v51, %v3533_v40  ;;  %v292_v51 = vld [vmem:[#allocation2 + $0x198] sm:$0xff]  ;;  %v2507_v40 = vsel %vm2484_vm9, %v2442_v29, %v7855_v26  ;;  %v884_v37 = vrot.slane %v7991_v35, 2 }
 0x20e   :  { %v2572_v5 = vsel %vm2549_vm10, %v2507_v40, %v7877_v34  ;;  %v1951_v54 = vrot.slane %v292_v51, 1  ;;  %v2153_v14 = vrot.slane %v292_v51, 2 }
 0x20f   :  { %v2206_v18 = vpop.permute.xlu1 %2205  ;;  %v1606_v8 = vpop.permute.xlu0 %1605 }
 0x210   :  { %v2831_v38 = vsel %vm2809_vm14, %v2766_v21, %v2206_v18  ;;  %v2637_v24 = vsel %vm2614_vm11, %v2572_v5, %v1606_v8  ;;  %v1952_v21 = vrot.slane %v7978_v0, 1 }
 0x211   :  { %1419 = vrot.lane.b32.xlu1 %v1351_v10, %s6522_s11  ;;  %1217 = vrot.lane.b32.xlu0 %v7881_v1, %s6519_s29  ;;  %v528_v1 = vsel %vm445_vm4, %v526_v49, %v527_v50  ;;  %v882_v10 = vrot.slane %v297_v31, 2  ;;  %v531_v50 = vrot.slane %v7991_v35, 1  ;;  %v294_v31 = vld [vmem:[#allocation2 + $0x1a8] sm:$0x3] }
 0x212   :  { %5920 = vmatmul.mubr.msk.f32.gmra.mrb[20].mxu0 %vm2885_vm15, %v2831_v38  ;;  %v7996_v38 = vld [vmem:[#allocation2 + $0x1d0] sm:$0xff]  ;;  %v1954_v61 = vrot.slane %v294_v31, 1 }
 0x213   :  { %v7938_v22 = vpop.permute.xlu1 %1007  ;;  %v7940_v39 = vpop.permute.xlu0 %656  ;;  %v883_v20 = vsel %vm798_vm3, %v880_v36, %v882_v10  ;;  %v532_v13 = vrot.slane %v7996_v38, 1  ;;  %v885_v5 = vrot.slane %v7996_v38, 2 }
 0x214   :  { %v1955_v27 = vsel %vm445_vm4, %v1952_v21, %v1954_v61 }
 0x215   :  { %2219 = vrot.lane.b32.xlu1 %v1553_v28, %s6527_s1  ;;  %2019 = vrot.lane.b32.xlu0 %v1353_v44, %s6525_s26 }
 0x217   :  { %v1802_v17 = vpop.permute.xlu1 %1801  ;;  %v1608_v42 = vpop.permute.xlu0 %1607 }
 0x218   :  { %v2702_v26 = vsel %vm2679_vm12, %v2637_v24, %v1802_v17 }
 0x219   :  { %1421 = vrot.lane.b32.xlu1 %v1353_v44, %s6522_s11  ;;  %670 = vrot.lane.b32.xlu0 %v528_v1, %s6521_s10  ;;  %v2378_v44 = vsel %vm96_vm0, %v7442_v32, %v7848_v45  ;;  %v1953_v1 = vsel %vm445_vm4, %v1951_v54, %v1952_v21 }
 0x21a   :  { %v2443_v49 = vsel %vm2419_vm8, %v2378_v44, %v7857_v7 }
 0x21b   :  { %v7950_v63 = vpop.permute.xlu1 %1203  ;;  %v7952_v59 = vpop.permute.xlu0 %1009  ;;  %v2508_v17 = vsel %vm2484_vm9, %v2443_v49, %v7879_v9  ;;  %v533_v9 = vsel %vm445_vm4, %v531_v50, %v532_v13  ;;  %v2379_v49 = vsel %vm96_vm0, %v7515_v60, %v7912_v15  ;;  %v8076_v15 = vld [vmem:[#allocation2 + $0x1e8] sm:$0xff] }
 0x21c   :  { %v2444_v50 = vsel %vm2419_vm8, %v2379_v49, %v7938_v22  ;;  %v890_v49 = vrot.slane %v8076_v15, 2 }
 0x21d   :  { %2221 = vrot.lane.b32.xlu1 %v1555_v30, %s6527_s1  ;;  %1621 = vrot.lane.b32.xlu0 %v1553_v28, %s6523_s14 }
 0x21f   :  { %v2006_v53 = vpop.permute.xlu1 %2005  ;;  %v1804_v41 = vpop.permute.xlu0 %1803 }
 0x220   :  { %v2767_v34 = vsel %vm2744_vm13, %v2702_v26, %v2006_v53 }
 0x221   :  { %1023 = vrot.lane.b32.xlu1 %v881_v16, %s6520_s30  ;;  %672 = vrot.lane.b32.xlu0 %v530_v12, %s6521_s10 }
 0x223   :  { %v7974_v4 = vpop.permute.xlu1 %1407  ;;  %v7976_v25 = vpop.permute.xlu0 %1205 }
 0x225   :  { %v7984_v52 = vpop.f32.mrb[8].mxu0  ;;  %1817 = vrot.lane.b32.xlu1 %v292_v51, %s6524_s17  ;;  %1623 = vrot.lane.b32.xlu0 %v1555_v30, %s6523_s14  ;;  %v2573_v30 = vsel %vm2549_vm10, %v2508_v17, %v7910_v46  ;;  %v300_v46 = vld [vmem:[#allocation2 + $0x1d8] sm:$0x3] }
 0x226   :  { %v7989_v19 = vpop.f32.mrb[9].mxu0  ;;  %v2638_v7 = vsel %vm2614_vm11, %v2573_v30, %v1608_v42  ;;  %v534_v29 = vrot.slane %v300_v46, 1  ;;  %v75_v17 = vld [vmem:[%s10584_s0 + $0x158] sm:$0xff] }
 0x227   :  { %v2208_v18 = vpop.permute.xlu1 %2207  ;;  %v2008_v8 = vpop.permute.xlu0 %2007  ;;  %v2703_v36 = vsel %vm2679_vm12, %v2638_v7, %v1804_v41  ;;  %v2155_v41 = vsel %vm798_vm3, %v2153_v14, %v2154_v43  ;;  %220 = vst.msk [vmem:[#allocation2 + $0x249] sm:$0xff] %vm96_vm0, %v75_v17  ;;  %v3194_v7 = vadd.f32 %v7984_v52, %v7686_v6  ;;  %v3189_v14 = vadd.f32 %v7686_v6, %v7989_v19 }
 0x228   :  { %v2832_v28 = vsel %vm2809_vm14, %v2767_v34, %v2208_v18  ;;  %v2768_v16 = vsel %vm2744_vm13, %v2703_v36, %v2008_v8  ;;  %v535_v40 = vsel %vm445_vm4, %v532_v13, %v534_v29  ;;  %v74_v18 = vld [vmem:[%s10584_s0 + $0x150] sm:$0xff]  ;;  %v887_v8 = vrot.slane %v300_v46, 2 }
 0x229   :  { %1219 = vrot.lane.b32.xlu1 %v7991_v35, %s6519_s29  ;;  %1025 = vrot.lane.b32.xlu0 %v883_v20, %s6520_s30  ;;  %v886_v20 = vsel %vm798_vm3, %v884_v37, %v885_v5  ;;  %219 = vst.msk [vmem:[#allocation2 + $0x241] sm:$0xff] %vm96_vm0, %v74_v18  ;;  %v537_v52 = vrot.slane %v8076_v15, 1  ;;  %v3476_v46 = vmax.f32 %v3194_v7, 0.0  ;;  %v3475_v29 = vmax.f32 %v3189_v14, 0.0 }
 0x22a   :  { %5922 = vmatprep.mubr.msk.f32.mxu0 %vm2885_vm15, %v2832_v28  ;;  %v888_v13 = vsel %vm798_vm3, %v885_v5, %v887_v8 }
 0x22b   :  { %v8013_v32 = vpop.permute.xlu1 %1409  ;;  %v8015_v45 = vpop.permute.xlu0 %658 }
 0x22d   :  { %2021 = vrot.lane.b32.xlu1 %v1953_v1, %s6525_s26  ;;  %1819 = vrot.lane.b32.xlu0 %v7978_v0, %s6524_s17  ;;  %v2156_v0 = vrot.slane %v294_v31, 2  ;;  %v8064_v1 = vld [vmem:[#allocation2 + $0x1e0] sm:$0xff]  ;;  %v2509_v31 = vsel %vm2484_vm9, %v2444_v50, %v7950_v63 }
 0x22e   :  { %v2574_v22 = vsel %vm2549_vm10, %v2509_v31, %v7974_v4  ;;  %v536_v4 = vrot.slane %v8064_v1, 1 }
 0x22f   :  { %v2210_v12 = vpop.permute.xlu1 %2209  ;;  %v1610_v53 = vpop.permute.xlu0 %1609  ;;  %v2157_v54 = vsel %vm798_vm3, %v2154_v43, %v2156_v0 }
 0x230   :  { %v2833_v42 = vsel %vm2809_vm14, %v2768_v16, %v2210_v12  ;;  %v2639_v36 = vsel %vm2614_vm11, %v2574_v22, %v1610_v53  ;;  %v538_v5 = vsel %vm445_vm4, %v536_v4, %v537_v52  ;;  %v76_v4 = vld [vmem:[%s10584_s0 + $0x160] sm:$0xff] }
 0x231   :  { %1423 = vrot.lane.b32.xlu1 %v533_v9, %s6522_s11  ;;  %1221 = vrot.lane.b32.xlu0 %v7996_v38, %s6519_s29  ;;  %221 = vst.msk [vmem:[#allocation2 + $0x259] sm:$0xff] %vm96_vm0, %v76_v4 }
 0x232   :  { %5923 = vmatmul.mubr.msk.f32.gmra.mrb[22].mxu0 %vm2885_vm15, %v2833_v42 }
 0x233   :  { %v8034_v51 = vpop.permute.xlu1 %1011  ;;  %v8036_v10 = vpop.permute.xlu0 %660 }
 0x235   :  { %2223 = vrot.lane.b32.xlu1 %v2155_v41, %s6527_s1  ;;  %2023 = vrot.lane.b32.xlu0 %v1955_v27, %s6525_s26  ;;  %v2380_v27 = vsel %vm96_vm0, %v7526_v11, %v7940_v39 }
 0x237   :  { %v1806_v24 = vpop.permute.xlu1 %1805  ;;  %v1612_v26 = vpop.permute.xlu0 %1611 }
 0x239   :  { %1425 = vrot.lane.b32.xlu1 %v535_v40, %s6522_s11  ;;  %674 = vrot.lane.b32.xlu0 %v533_v9, %s6521_s10  ;;  %v2704_v9 = vsel %vm2679_vm12, %v2639_v36, %v1806_v24 }
 0x23b   :  { %v8047_v21 = vpop.permute.xlu1 %1207  ;;  %v8049_v34 = vpop.permute.xlu0 %1013 }
 0x23d   :  { %2225 = vrot.lane.b32.xlu1 %v2157_v54, %s6527_s1  ;;  %1625 = vrot.lane.b32.xlu0 %v886_v20, %s6523_s14 }
 0x23f   :  { %v2010_v28 = vpop.permute.xlu1 %2009  ;;  %v1808_v44 = vpop.permute.xlu0 %1807 }
 0x240   :  { %v2769_v16 = vsel %vm2744_vm13, %v2704_v9, %v2010_v28  ;;  %v889_v28 = vrot.slane %v8064_v1, 2 }
 0x241   :  { %1027 = vrot.lane.b32.xlu1 %v886_v20, %s6520_s30  ;;  %676 = vrot.lane.b32.xlu0 %v535_v40, %s6521_s10  ;;  %v2445_v40 = vsel %vm2419_vm8, %v2380_v27, %v7952_v59  ;;  %v303_v20 = vld [vmem:[#allocation2 + $0x1f0] sm:$0x3] }
 0x242   :  { %v2510_v24 = vsel %vm2484_vm9, %v2445_v40, %v7976_v25  ;;  %v539_v50 = vrot.slane %v303_v20, 1  ;;  %v892_v14 = vrot.slane %v303_v20, 2  ;;  %v2382_v20 = vsel %vm96_vm0, %v7607_v23, %v8036_v10  ;;  %v306_v23 = vld [vmem:[#allocation2 + $0x208] sm:$0x3] }
 0x243   :  { %v8072_v30 = vpop.permute.xlu1 %1411  ;;  %v8074_v60 = vpop.permute.xlu0 %1209  ;;  %v2575_v18 = vsel %vm2549_vm10, %v2510_v24, %v8013_v32 }
 0x244   :  { %v2640_v8 = vsel %vm2614_vm11, %v2575_v18, %v1612_v26  ;;  %v540_v31 = vsel %vm445_vm4, %v537_v52, %v539_v50  ;;  %v893_v9 = vsel %vm798_vm3, %v890_v49, %v892_v14  ;;  %v2447_v18 = vsel %vm2419_vm8, %v2382_v20, %v8049_v34 }
 0x245   :  { %v5906_v63 = vpop.f32.mrb[10].mxu0  ;;  %1821 = vrot.lane.b32.xlu1 %v8064_v1, %s6524_s17  ;;  %1627 = vrot.lane.b32.xlu0 %v888_v13, %s6523_s14  ;;  %v2705_v25 = vsel %vm2679_vm12, %v2640_v8, %v1808_v44  ;;  %v891_v44 = vsel %vm798_vm3, %v889_v28, %v890_v49 }
 0x246   :  { %v3204_v43 = vadd.f32 %v5906_v63, %v7686_v6  ;;  %v3198_v61 = vpop.f32.mrb[11].mxu0 }
 0x247   :  { %v3199_v19 = vadd.f32 %v7686_v6, %v3198_v61  ;;  %v2212_v12 = vpop.permute.xlu1 %2211  ;;  %v2012_v53 = vpop.permute.xlu0 %2011 }
 0x248   :  { %v3478_v42 = vmax.f32 %v3204_v43, 0.0  ;;  %v2834_v41 = vsel %vm2809_vm14, %v2769_v16, %v2212_v12 }
 0x249   :  { %v3477_v37 = vmax.f32 %v3199_v19, 0.0  ;;  %1223 = vrot.lane.b32.xlu1 %v8064_v1, %s6519_s29  ;;  %1029 = vrot.lane.b32.xlu0 %v888_v13, %s6520_s30  ;;  %v2770_v13 = vsel %vm2744_vm13, %v2705_v25, %v2012_v53  ;;  %v2381_v19 = vsel %vm96_vm0, %v7598_v56, %v8015_v45  ;;  %v8157_v53 = vld [vmem:[#allocation2 + $0x1f8] sm:$0xff]  ;;  %v8168_v56 = vld [vmem:[#allocation2 + $0x200] sm:$0xff]  ;;  %v2512_v25 = vsel %vm2484_vm9, %v2447_v18, %v8074_v60 }
 0x24a   :  { %v3536_v0 = vmax.f32 %v3476_v46, %v3478_v42  ;;  %5925 = vmatprep.mubr.msk.f32.mxu0 %vm2885_vm15, %v2834_v41  ;;  %v2446_v12 = vsel %vm2419_vm8, %v2381_v19, %v8034_v51  ;;  %v77_v46 = vld [vmem:[%s10584_s0 + $0x168] sm:$0xff]  ;;  %v541_v40 = vrot.slane %v8157_v53, 1  ;;  %v895_v60 = vrot.slane %v8168_v56, 2 }
 0x24b   :  { %v3535_v54 = vmax.f32 %v3475_v29, %v3477_v37  ;;  %v8108_v11 = vpop.permute.xlu1 %1413  ;;  %v8110_v39 = vpop.permute.xlu0 %662  ;;  %v2511_v42 = vsel %vm2484_vm9, %v2446_v12, %v8047_v21  ;;  %222 = vst.msk [vmem:[#allocation2 + $0x261] sm:$0xff] %vm96_vm0, %v77_v46  ;;  %v78_v46 = vld [vmem:[%s10584_s0 + $0x170] sm:$0xff] }
 0x24c   :  { %v2576_v45 = vsel %vm2549_vm10, %v2511_v42, %v8072_v30  ;;  %v2577_v10 = vsel %vm2549_vm10, %v2512_v25, %v8108_v11  ;;  %223 = vst.msk [vmem:[#allocation2 + $0x271] sm:$0xff] %vm96_vm0, %v78_v46 }
 0x24d   :  { %2025 = vrot.lane.b32.xlu1 %v538_v5, %s6525_s26  ;;  %1823 = vrot.lane.b32.xlu0 %v8076_v15, %s6524_s17  ;;  %v8118_v59 = vpack.c.bf16 %v3536_v0, %v3535_v54  ;;  %v542_v0 = vrot.slane %v8168_v56, 1 }
 0x24f   :  { %v2214_v17 = vpop.permute.xlu1 %2213  ;;  %v1614_v32 = vpop.permute.xlu0 %1613  ;;  %v543_v8 = vsel %vm445_vm4, %v541_v40, %v542_v0  ;;  %v8245_v40 = vld [vmem:[#allocation2 + $0x210] sm:$0xff] }
 0x250   :  { %v2835_v26 = vsel %vm2809_vm14, %v2770_v13, %v2214_v17  ;;  %v2641_v51 = vsel %vm2614_vm11, %v2576_v45, %v1614_v32  ;;  %v894_v13 = vrot.slane %v8157_v53, 2  ;;  %v544_v17 = vrot.slane %v306_v23, 1 }
 0x251   :  { %1427 = vrot.lane.b32.xlu1 %v538_v5, %s6522_s11  ;;  %1225 = vrot.lane.b32.xlu0 %v8076_v15, %s6519_s29  ;;  %v899_v46 = vrot.slane %v8245_v40, 2 }
 0x252   :  { %5926 = vmatmul.mubr.msk.f32.gmra.mrb[24].mxu0 %vm2885_vm15, %v2835_v26  ;;  %v545_v14 = vsel %vm445_vm4, %v542_v0, %v544_v17  ;;  %v79_v0 = vld [vmem:[%s10584_s0 + $0x178] sm:$0xff] }
 0x253   :  { %v8131_v22 = vpop.permute.xlu1 %1015  ;;  %v8133_v7 = vpop.permute.xlu0 %664  ;;  %224 = vst.msk [vmem:[#allocation2 + $0x279] sm:$0xff] %vm96_vm0, %v79_v0 }
 0x254   :  { %v2384_v17 = vsel %vm96_vm0, %v7703_v47, %v8133_v7 }
 0x255   :  { %2227 = vrot.lane.b32.xlu1 %v891_v44, %s6527_s1  ;;  %2027 = vrot.lane.b32.xlu0 %v540_v31, %s6525_s26 }
 0x257   :  { %v1810_v36 = vpop.permute.xlu1 %1809  ;;  %v1616_v63 = vpop.permute.xlu0 %1615 }
 0x258   :  { %v2706_v21 = vsel %vm2679_vm12, %v2641_v51, %v1810_v36  ;;  %v2642_v50 = vsel %vm2614_vm11, %v2577_v10, %v1616_v63  ;;  %v2383_v51 = vsel %vm96_vm0, %v7692_v55, %v8110_v39  ;;  %v8256_v55 = vld [vmem:[#allocation2 + $0x218] sm:$0xff] }
 0x259   :  { %1429 = vrot.lane.b32.xlu1 %v540_v31, %s6522_s11  ;;  %678 = vrot.lane.b32.xlu0 %v538_v5, %s6521_s10 }
 0x25b   :  { %v8140_v43 = vpop.permute.xlu1 %1211  ;;  %v8142_v61 = vpop.permute.xlu0 %1017 }
 0x25d   :  { %2229 = vrot.lane.b32.xlu1 %v893_v9, %s6527_s1  ;;  %1629 = vrot.lane.b32.xlu0 %v891_v44, %s6523_s14 }
 0x25f   :  { %v2014_v52 = vpop.permute.xlu1 %2013  ;;  %v1812_v16 = vpop.permute.xlu0 %1811 }
 0x260   :  { %v2771_v5 = vsel %vm2744_vm13, %v2706_v21, %v2014_v52  ;;  %v2707_v34 = vsel %vm2679_vm12, %v2642_v50, %v1812_v16  ;;  %v2448_v21 = vsel %vm2419_vm8, %v2383_v51, %v8131_v22 }
 0x261   :  { %1031 = vrot.lane.b32.xlu1 %v891_v44, %s6520_s30  ;;  %680 = vrot.lane.b32.xlu0 %v540_v31, %s6521_s10  ;;  %v896_v31 = vsel %vm798_vm3, %v894_v13, %v895_v60 }
 0x263   :  { %v8164_v41 = vpop.permute.xlu1 %1415  ;;  %v8166_v27 = vpop.permute.xlu0 %1213 }
 0x265   :  { %v8174_v29 = vpop.f32.mrb[12].mxu0  ;;  %1825 = vrot.lane.b32.xlu1 %v8157_v53, %s6524_s17  ;;  %1631 = vrot.lane.b32.xlu0 %v893_v9, %s6523_s14 }
 0x266   :  { %v8180_v37 = vpop.f32.mrb[13].mxu0  ;;  %v3214_v22 = vadd.f32 %v8174_v29, %v7686_v6  ;;  %v547_v29 = vrot.slane %v8256_v55, 1 }
 0x267   :  { %v2216_v30 = vpop.permute.xlu1 %2215  ;;  %v2016_v24 = vpop.permute.xlu0 %2015 }
 0x268   :  { %v2836_v54 = vsel %vm2809_vm14, %v2771_v5, %v2216_v30  ;;  %v2772_v32 = vsel %vm2744_vm13, %v2707_v34, %v2016_v24  ;;  %v2513_v5 = vsel %vm2484_vm9, %v2448_v21, %v8140_v43  ;;  %v3480_v34 = vmax.f32 %v3214_v22, 0.0 }
 0x269   :  { %1227 = vrot.lane.b32.xlu1 %v8157_v53, %s6519_s29  ;;  %1033 = vrot.lane.b32.xlu0 %v893_v9, %s6520_s30  ;;  %v897_v9 = vrot.slane %v306_v23, 2  ;;  %v2578_v39 = vsel %vm2549_vm10, %v2513_v5, %v8164_v41  ;;  %v546_v41 = vrot.slane %v8245_v40, 1 }
 0x26a   :  { %5928 = vmatprep.mubr.msk.f32.mxu0 %vm2885_vm15, %v2836_v54  ;;  %v3209_v54 = vadd.f32 %v7686_v6, %v8180_v37 }
 0x26b   :  { %v8198_v28 = vpop.permute.xlu1 %1417  ;;  %v8200_v49 = vpop.permute.xlu0 %666  ;;  %v898_v16 = vsel %vm798_vm3, %v895_v60, %v897_v9  ;;  %v309_v9 = vld [vmem:[#allocation2 + $0x220] sm:$0x3] }
 0x26c   :  { %v549_v51 = vrot.slane %v309_v9, 1 }
 0x26d   :  { %2029 = vrot.lane.b32.xlu1 %v543_v8, %s6525_s26  ;;  %1827 = vrot.lane.b32.xlu0 %v8168_v56, %s6524_s17 }
 0x26e   :  { %v550_v5 = vsel %vm445_vm4, %v547_v29, %v549_v51 }
 0x26f   :  { %v2218_v26 = vpop.permute.xlu1 %2217  ;;  %v1618_v44 = vpop.permute.xlu0 %1617 }
 0x270   :  { %v2837_v11 = vsel %vm2809_vm14, %v2772_v32, %v2218_v26  ;;  %v2643_v20 = vsel %vm2614_vm11, %v2578_v39, %v1618_v44  ;;  %v3479_v32 = vmax.f32 %v3209_v54, 0.0  ;;  %v902_v54 = vrot.slane %v309_v9, 2 }
 0x271   :  { %1431 = vrot.lane.b32.xlu1 %v543_v8, %s6522_s11  ;;  %1229 = vrot.lane.b32.xlu0 %v8168_v56, %s6519_s29 }
 0x272   :  { %5929 = vmatmul.mubr.msk.f32.gmra.mrb[26].mxu0 %vm2885_vm15, %v2837_v11  ;;  %v548_v11 = vsel %vm445_vm4, %v546_v41, %v547_v29  ;;  %v80_v41 = vld [vmem:[%s10584_s0 + $0x180] sm:$0xff] }
 0x273   :  { %v8219_v36 = vpop.permute.xlu1 %1019  ;;  %v8221_v63 = vpop.permute.xlu0 %668  ;;  %225 = vst.msk [vmem:[#allocation2 + $0x289] sm:$0xff] %vm96_vm0, %v80_v41 }
 0x274   :  { %v2386_v9 = vsel %vm96_vm0, %v7795_v3, %v8221_v63  ;;  %v312_v3 = vld [vmem:[#allocation2 + $0x238] sm:$0x3] }
 0x275   :  { %2231 = vrot.lane.b32.xlu1 %v896_v31, %s6527_s1  ;;  %2031 = vrot.lane.b32.xlu0 %v545_v14, %s6525_s26 }
 0x277   :  { %v1814_v4 = vpop.permute.xlu1 %1813  ;;  %v1620_v52 = vpop.permute.xlu0 %1619 }
 0x278   :  { %v2708_v18 = vsel %vm2679_vm12, %v2643_v20, %v1814_v4 }
 0x279   :  { %1433 = vrot.lane.b32.xlu1 %v545_v14, %s6522_s11  ;;  %682 = vrot.lane.b32.xlu0 %v543_v8, %s6521_s10 }
 0x27b   :  { %v8228_v19 = vpop.permute.xlu1 %1215  ;;  %v8230_v12 = vpop.permute.xlu0 %1021 }
 0x27d   :  { %2233 = vrot.lane.b32.xlu1 %v898_v16, %s6527_s1  ;;  %1633 = vrot.lane.b32.xlu0 %v896_v31, %s6523_s14 }
 0x27f   :  { %v2018_v42 = vpop.permute.xlu1 %2017  ;;  %v1816_v45 = vpop.permute.xlu0 %1815 }
 0x280   :  { %v2773_v23 = vsel %vm2744_vm13, %v2708_v18, %v2018_v42  ;;  %v900_v42 = vrot.slane %v8256_v55, 2 }
 0x281   :  { %1035 = vrot.lane.b32.xlu1 %v896_v31, %s6520_s30  ;;  %684 = vrot.lane.b32.xlu0 %v545_v14, %s6521_s10 }
 0x282   :  { %v903_v18 = vsel %vm798_vm3, %v900_v42, %v902_v54 }
 0x283   :  { %v8252_v30 = vpop.permute.xlu1 %1419  ;;  %v8254_v24 = vpop.permute.xlu0 %1217 }
 0x285   :  { %v5912_v43 = vpop.f32.mrb[14].mxu0  ;;  %1829 = vrot.lane.b32.xlu1 %v8245_v40, %s6524_s17  ;;  %1635 = vrot.lane.b32.xlu0 %v898_v16, %s6523_s14 }
 0x286   :  { %v3224_v8 = vadd.f32 %v5912_v43, %v7686_v6  ;;  %v3218_v25 = vpop.f32.mrb[15].mxu0 }
 0x287   :  { %v3219_v37 = vadd.f32 %v7686_v6, %v3218_v25  ;;  %v2220_v10 = vpop.permute.xlu1 %2219  ;;  %v2020_v50 = vpop.permute.xlu0 %2019  ;;  %v2449_v6 = vsel %vm2419_vm8, %v2384_v17, %v8142_v61 }
 0x288   :  { %v3482_v13 = vmax.f32 %v3224_v8, 0.0  ;;  %v2838_v60 = vsel %vm2809_vm14, %v2773_v23, %v2220_v10  ;;  %v2514_v31 = vsel %vm2484_vm9, %v2449_v6, %v8166_v27 }
 0x289   :  { %v3481_v26 = vmax.f32 %v3219_v37, 0.0  ;;  %1231 = vrot.lane.b32.xlu1 %v8245_v40, %s6519_s29  ;;  %1037 = vrot.lane.b32.xlu0 %v898_v16, %s6520_s30  ;;  %v2579_v4 = vsel %vm2549_vm10, %v2514_v31, %v8198_v28  ;;  %v2385_v37 = vsel %vm96_vm0, %v7784_v33, %v8200_v49  ;;  %v8348_v33 = vld [vmem:[#allocation2 + $0x230] sm:$0xff] }
 0x28a   :  { %v3538_v44 = vmax.f32 %v3480_v34, %v3482_v13  ;;  %5931 = vmatprep.mubr.msk.f32.mxu0 %vm2885_vm15, %v2838_v60  ;;  %v2644_v16 = vsel %vm2614_vm11, %v2579_v4, %v1620_v52  ;;  %v2450_v10 = vsel %vm2419_vm8, %v2385_v37, %v8219_v36  ;;  %v81_v34 = vld [vmem:[%s10584_s0 + $0x188] sm:$0xff]  ;;  %v2451_v4 = vsel %vm2419_vm8, %v2386_v9, %v8230_v12 }
 0x28b   :  { %v3537_v14 = vmax.f32 %v3479_v32, %v3481_v26  ;;  %v8288_v47 = vpop.permute.xlu1 %1421  ;;  %v8290_v7 = vpop.permute.xlu0 %670  ;;  %v2709_v27 = vsel %vm2679_vm12, %v2644_v16, %v1816_v45  ;;  %v901_v45 = vsel %vm798_vm3, %v899_v46, %v900_v42  ;;  %v2515_v13 = vsel %vm2484_vm9, %v2450_v10, %v8228_v19  ;;  %226 = vst.msk [vmem:[#allocation2 + $0x291] sm:$0xff] %vm96_vm0, %v81_v34  ;;  %v82_v34 = vld [vmem:[%s10584_s0 + $0x190] sm:$0xff] }
 0x28c   :  { %v2774_v21 = vsel %vm2744_vm13, %v2709_v27, %v2020_v50  ;;  %v8337_v50 = vld [vmem:[#allocation2 + $0x228] sm:$0xff]  ;;  %v2580_v49 = vsel %vm2549_vm10, %v2515_v13, %v8252_v30  ;;  %v2516_v27 = vsel %vm2484_vm9, %v2451_v4, %v8254_v24  ;;  %v905_v24 = vrot.slane %v8348_v33, 2  ;;  %227 = vst.msk [vmem:[#allocation2 + $0x2a1] sm:$0xff] %vm96_vm0, %v82_v34  ;;  %v315_v34 = vld [vmem:[#allocation2 + $0x250] sm:$0x3] }
 0x28d   :  { %2033 = vrot.lane.b32.xlu1 %v548_v11, %s6525_s26  ;;  %1831 = vrot.lane.b32.xlu0 %v8256_v55, %s6524_s17  ;;  %v8298_v61 = vpack.c.bf16 %v3538_v44, %v3537_v14  ;;  %v551_v6 = vrot.slane %v8337_v50, 1  ;;  %v552_v44 = vrot.slane %v8348_v33, 1  ;;  %v2581_v63 = vsel %vm2549_vm10, %v2516_v27, %v8288_v47 }
 0x28f   :  { %v2222_v0 = vpop.permute.xlu1 %2221  ;;  %v1622_v28 = vpop.permute.xlu0 %1621  ;;  %v553_v16 = vsel %vm445_vm4, %v551_v6, %v552_v44  ;;  %v8425_v6 = vld [vmem:[#allocation2 + $0x240] sm:$0xff] }
 0x290   :  { %v2839_v52 = vsel %vm2809_vm14, %v2774_v21, %v2222_v0  ;;  %v2645_v36 = vsel %vm2614_vm11, %v2580_v49, %v1622_v28  ;;  %v904_v21 = vrot.slane %v8337_v50, 2  ;;  %v554_v0 = vrot.slane %v312_v3, 1 }
 0x291   :  { %1435 = vrot.lane.b32.xlu1 %v548_v11, %s6522_s11  ;;  %1233 = vrot.lane.b32.xlu0 %v8256_v55, %s6519_s29 }
 0x292   :  { %5932 = vmatmul.mubr.msk.f32.gmra.mrb[28].mxu0 %vm2885_vm15, %v2839_v52  ;;  %v555_v54 = vsel %vm445_vm4, %v552_v44, %v554_v0  ;;  %v83_v44 = vld [vmem:[%s10584_s0 + $0x198] sm:$0xff] }
 0x293   :  { %v8311_v39 = vpop.permute.xlu1 %1023  ;;  %v8313_v22 = vpop.permute.xlu0 %672  ;;  %228 = vst.msk [vmem:[#allocation2 + $0x2a9] sm:$0xff] %vm96_vm0, %v83_v44  ;;  %v559_v44 = vrot.slane %v315_v34, 1 }
 0x295   :  { %2235 = vrot.lane.b32.xlu1 %v901_v45, %s6527_s1  ;;  %2035 = vrot.lane.b32.xlu0 %v550_v5, %s6525_s26 }
 0x297   :  { %v1818_v20 = vpop.permute.xlu1 %1817  ;;  %v1624_v43 = vpop.permute.xlu0 %1623 }
 0x298   :  { %v2710_v19 = vsel %vm2679_vm12, %v2645_v36, %v1818_v20  ;;  %v2646_v51 = vsel %vm2614_vm11, %v2581_v63, %v1624_v43  ;;  %v2387_v36 = vsel %vm96_vm0, %v7925_v48, %v8290_v7  ;;  %v8436_v48 = vld [vmem:[#allocation2 + $0x248] sm:$0xff] }
 0x299   :  { %1437 = vrot.lane.b32.xlu1 %v550_v5, %s6522_s11  ;;  %686 = vrot.lane.b32.xlu0 %v548_v11, %s6521_s10 }
 0x29b   :  { %v8320_v8 = vpop.permute.xlu1 %1219  ;;  %v8322_v25 = vpop.permute.xlu0 %1025 }
 0x29d   :  { %2237 = vrot.lane.b32.xlu1 %v903_v18, %s6527_s1  ;;  %1637 = vrot.lane.b32.xlu0 %v901_v45, %s6523_s14 }
 0x29f   :  { %v2022_v29 = vpop.permute.xlu1 %2021  ;;  %v1820_v23 = vpop.permute.xlu0 %1819 }
 0x2a0   :  { %v2775_v11 = vsel %vm2744_vm13, %v2710_v19, %v2022_v29  ;;  %v2711_v12 = vsel %vm2679_vm12, %v2646_v51, %v1820_v23  ;;  %v2452_v19 = vsel %vm2419_vm8, %v2387_v36, %v8311_v39  ;;  %v8444_v39 = vld [vmem:[%s10586_s2] ss:$0 sm:$0xff]  ;;  %v909_v36 = vrot.slane %v8425_v6, 2 }
 0x2a1   :  { %1039 = vrot.lane.b32.xlu1 %v901_v45, %s6520_s30  ;;  %688 = vrot.lane.b32.xlu0 %v550_v5, %s6521_s10  ;;  %v906_v5 = vsel %vm798_vm3, %v904_v21, %v905_v24 }
 0x2a3   :  { %v8344_v60 = vpop.permute.xlu1 %1423  ;;  %v8346_v17 = vpop.permute.xlu0 %1221 }
 0x2a5   :  { %v8354_v32 = vpop.f32.mrb[16].mxu0  ;;  %1833 = vrot.lane.b32.xlu1 %v8337_v50, %s6524_s17  ;;  %1639 = vrot.lane.b32.xlu0 %v903_v18, %s6523_s14 }
 0x2a6   :  { %v8360_v26 = vpop.f32.mrb[17].mxu0 }
 0x2a7   :  { %v2224_v30 = vpop.permute.xlu1 %2223  ;;  %v2024_v31 = vpop.permute.xlu0 %2023 }
 0x2a8   :  { %v2840_v14 = vsel %vm2809_vm14, %v2775_v11, %v2224_v30  ;;  %v2776_v28 = vsel %vm2744_vm13, %v2711_v12, %v2024_v31  ;;  %v2517_v11 = vsel %vm2484_vm9, %v2452_v19, %v8320_v8  ;;  %v3229_v8 = vadd.f32 %v8444_v39, %v8360_v26 }
 0x2a9   :  { %1235 = vrot.lane.b32.xlu1 %v8337_v50, %s6519_s29  ;;  %1041 = vrot.lane.b32.xlu0 %v903_v18, %s6520_s30  ;;  %v907_v18 = vrot.slane %v312_v3, 2  ;;  %v2582_v7 = vsel %vm2549_vm10, %v2517_v11, %v8344_v60  ;;  %v556_v3 = vrot.slane %v8425_v6, 1  ;;  %v910_v19 = vrot.slane %v8436_v48, 2 }
 0x2aa   :  { %5934 = vmatprep.mubr.msk.f32.mxu0 %vm2885_vm15, %v2840_v14  ;;  %v3234_v14 = vadd.f32 %v8444_v39, %v8354_v32  ;;  %v557_v32 = vrot.slane %v8436_v48, 1 }
 0x2ab   :  { %v8378_v46 = vpop.permute.xlu1 %1425  ;;  %v8380_v42 = vpop.permute.xlu0 %674  ;;  %v908_v23 = vsel %vm798_vm3, %v905_v24, %v907_v18 }
 0x2ac   :  { %v3484_v21 = vmax.f32 %v3234_v14, 0.0  ;;  %v560_v14 = vsel %vm445_vm4, %v557_v32, %v559_v44 }
 0x2ad   :  { %2037 = vrot.lane.b32.xlu1 %v553_v16, %s6525_s26  ;;  %1835 = vrot.lane.b32.xlu0 %v8348_v33, %s6524_s17 }
 0x2af   :  { %v2226_v52 = vpop.permute.xlu1 %2225  ;;  %v1626_v45 = vpop.permute.xlu0 %1625 }
 0x2b0   :  { %v2841_v47 = vsel %vm2809_vm14, %v2776_v28, %v2226_v52  ;;  %v2647_v9 = vsel %vm2614_vm11, %v2582_v7, %v1626_v45  ;;  %v2388_v28 = vsel %vm96_vm0, %v7927_v57, %v8313_v22  ;;  %v3483_v52 = vmax.f32 %v3229_v8, 0.0 }
 0x2b1   :  { %1439 = vrot.lane.b32.xlu1 %v553_v16, %s6522_s11  ;;  %1237 = vrot.lane.b32.xlu0 %v8348_v33, %s6519_s29 }
 0x2b2   :  { %5935 = vmatmul.mubr.msk.f32.gmra.mrb[30].mxu0 %vm2885_vm15, %v2841_v47  ;;  %v2453_v47 = vsel %vm2419_vm8, %v2388_v28, %v8322_v25 }
 0x2b3   :  { %v8399_v20 = vpop.permute.xlu1 %1027  ;;  %v8401_v43 = vpop.permute.xlu0 %676  ;;  %v2518_v18 = vsel %vm2484_vm9, %v2453_v47, %v8346_v17 }
 0x2b5   :  { %2239 = vrot.lane.b32.xlu1 %v906_v5, %s6527_s1  ;;  %2039 = vrot.lane.b32.xlu0 %v555_v54, %s6525_s26 }
 0x2b7   :  { %v1822_v41 = vpop.permute.xlu1 %1821  ;;  %v1628_v29 = vpop.permute.xlu0 %1627 }
 0x2b8   :  { %v2712_v60 = vsel %vm2679_vm12, %v2647_v9, %v1822_v41 }
 0x2b9   :  { %1441 = vrot.lane.b32.xlu1 %v555_v54, %s6522_s11  ;;  %690 = vrot.lane.b32.xlu0 %v553_v16, %s6521_s10 }
 0x2bb   :  { %v8408_v37 = vpop.permute.xlu1 %1223  ;;  %v8410_v10 = vpop.permute.xlu0 %1029 }
 0x2bd   :  { %2241 = vrot.lane.b32.xlu1 %v908_v23, %s6527_s1  ;;  %1641 = vrot.lane.b32.xlu0 %v906_v5, %s6523_s14 }
 0x2bf   :  { %v2026_v13 = vpop.permute.xlu1 %2025  ;;  %v1824_v49 = vpop.permute.xlu0 %1823 }
 0x2c0   :  { %v2777_v63 = vsel %vm2744_vm13, %v2712_v60, %v2026_v13 }
 0x2c1   :  { %1043 = vrot.lane.b32.xlu1 %v906_v5, %s6520_s30  ;;  %692 = vrot.lane.b32.xlu0 %v555_v54, %s6521_s10  ;;  %v558_v54 = vsel %vm445_vm4, %v556_v3, %v557_v32 }
 0x2c3   :  { %v8432_v30 = vpop.permute.xlu1 %1427  ;;  %v8434_v31 = vpop.permute.xlu0 %1225 }
 0x2c5   :  { %v5918_v4 = vpop.f32.mrb[18].mxu0  ;;  %1837 = vrot.lane.b32.xlu1 %v8425_v6, %s6524_s17  ;;  %1643 = vrot.lane.b32.xlu0 %v908_v23, %s6523_s14 }
 0x2c6   :  { %v3244_v16 = vadd.f32 %v8444_v39, %v5918_v4  ;;  %v3238_v27 = vpop.f32.mrb[19].mxu0  ;;  %v912_v4 = vrot.slane %v315_v34, 2 }
 0x2c7   :  { %v3239_v26 = vadd.f32 %v8444_v39, %v3238_v27  ;;  %v2228_v51 = vpop.permute.xlu1 %2227  ;;  %v2028_v12 = vpop.permute.xlu0 %2027 }
 0x2c8   :  { %v3486_v24 = vmax.f32 %v3244_v16, 0.0  ;;  %v2842_v0 = vsel %vm2809_vm14, %v2777_v63, %v2228_v51  ;;  %v913_v27 = vsel %vm798_vm3, %v910_v19, %v912_v4  ;;  %v84_v63 = vld [vmem:[%s10584_s0 + $0x1a0] sm:$0xff] }
 0x2c9   :  { %v3485_v45 = vmax.f32 %v3239_v26, 0.0  ;;  %1239 = vrot.lane.b32.xlu1 %v8425_v6, %s6519_s29  ;;  %1045 = vrot.lane.b32.xlu0 %v908_v23, %s6520_s30  ;;  %v2583_v23 = vsel %vm2549_vm10, %v2518_v18, %v8378_v46  ;;  %229 = vst.msk [vmem:[#allocation2 + $0x2b9] sm:$0xff] %vm96_vm0, %v84_v63 }
 0x2ca   :  { %v3540_v5 = vmax.f32 %v3484_v21, %v3486_v24  ;;  %5937 = vmatprep.mubr.msk.f32.mxu0 %vm2885_vm15, %v2842_v0  ;;  %v2648_v13 = vsel %vm2614_vm11, %v2583_v23, %v1628_v29  ;;  %v8522_v24 = vld [vmem:[#allocation2 + $0x258] sm:$0xff]  ;;  %v85_v0 = vld [vmem:[%s10584_s0 + $0x1a8] sm:$0xff] }
 0x2cb   :  { %v3539_v41 = vmax.f32 %v3483_v52, %v3485_v45  ;;  %v8473_v57 = vpop.permute.xlu1 %1429  ;;  %v8475_v22 = vpop.permute.xlu0 %678  ;;  %v2713_v17 = vsel %vm2679_vm12, %v2648_v13, %v1824_v49  ;;  %v911_v49 = vsel %vm798_vm3, %v909_v36, %v910_v19  ;;  %230 = vst.msk [vmem:[#allocation2 + $0x2c1] sm:$0xff] %vm96_vm0, %v85_v0  ;;  %v2390_v13 = vsel %vm96_vm0, %v7996_v38, %v8401_v43  ;;  %v318_v38 = vld [vmem:[#allocation2 + $0x268] sm:$0x3] }
 0x2cc   :  { %v2778_v11 = vsel %vm2744_vm13, %v2713_v17, %v2028_v12  ;;  %v2389_v12 = vsel %vm96_vm0, %v7991_v35, %v8380_v42  ;;  %v8533_v35 = vld [vmem:[#allocation2 + $0x260] sm:$0xff]  ;;  %v2455_v17 = vsel %vm2419_vm8, %v2390_v13, %v8410_v10 }
 0x2cd   :  { %2041 = vrot.lane.b32.xlu1 %v558_v54, %s6525_s26  ;;  %1839 = vrot.lane.b32.xlu0 %v8436_v48, %s6524_s17  ;;  %v8483_v25 = vpack.c.bf16 %v3540_v5, %v3539_v41  ;;  %v2454_v21 = vsel %vm2419_vm8, %v2389_v12, %v8399_v20  ;;  %v562_v18 = vrot.slane %v8533_v35, 1  ;;  %v2520_v19 = vsel %vm2484_vm9, %v2455_v17, %v8434_v31 }
 0x2ce   :  { %v2519_v28 = vsel %vm2484_vm9, %v2454_v21, %v8408_v37  ;;  %v2585_v43 = vsel %vm2549_vm10, %v2520_v19, %v8473_v57  ;;  %v915_v31 = vrot.slane %v8533_v35, 2 }
 0x2cf   :  { %v2230_v7 = vpop.permute.xlu1 %2229  ;;  %v1630_v46 = vpop.permute.xlu0 %1629  ;;  %v2584_v42 = vsel %vm2549_vm10, %v2519_v28, %v8432_v30 }
 0x2d0   :  { %v2843_v29 = vsel %vm2809_vm14, %v2778_v11, %v2230_v7  ;;  %v2649_v20 = vsel %vm2614_vm11, %v2584_v42, %v1630_v46  ;;  %v914_v46 = vrot.slane %v8522_v24, 2  ;;  %v86_v42 = vld [vmem:[%s10584_s0 + $0x1b0] sm:$0xff] }
 0x2d1   :  { %1443 = vrot.lane.b32.xlu1 %v558_v54, %s6522_s11  ;;  %1241 = vrot.lane.b32.xlu0 %v8436_v48, %s6519_s29  ;;  %231 = vst.msk [vmem:[#allocation2 + $0x2d1] sm:$0xff] %vm96_vm0, %v86_v42 }
 0x2d2   :  { %5938 = vmatmul.mubr.msk.f32.gmra.mrb[32].mxu0 %vm2885_vm15, %v2843_v29  ;;  %v564_v29 = vrot.slane %v318_v38, 1 }
 0x2d3   :  { %v8496_v8 = vpop.permute.xlu1 %1031  ;;  %v8498_v9 = vpop.permute.xlu0 %680 }
 0x2d5   :  { %2243 = vrot.lane.b32.xlu1 %v911_v49, %s6527_s1  ;;  %2043 = vrot.lane.b32.xlu0 %v560_v14, %s6525_s26 }
 0x2d7   :  { %v1826_v60 = vpop.permute.xlu1 %1825  ;;  %v1632_v16 = vpop.permute.xlu0 %1631 }
 0x2d8   :  { %v2714_v37 = vsel %vm2679_vm12, %v2649_v20, %v1826_v60  ;;  %v2650_v7 = vsel %vm2614_vm11, %v2585_v43, %v1632_v16  ;;  %v916_v60 = vsel %vm798_vm3, %v914_v46, %v915_v31  ;;  %v565_v16 = vsel %vm445_vm4, %v562_v18, %v564_v29 }
 0x2d9   :  { %1445 = vrot.lane.b32.xlu1 %v560_v14, %s6522_s11  ;;  %694 = vrot.lane.b32.xlu0 %v558_v54, %s6521_s10  ;;  %v561_v54 = vrot.slane %v8522_v24, 1 }
 0x2db   :  { %v8505_v3 = vpop.permute.xlu1 %1227  ;;  %v8507_v32 = vpop.permute.xlu0 %1033  ;;  %v563_v36 = vsel %vm445_vm4, %v561_v54, %v562_v18  ;;  %v2391_v54 = vsel %vm96_vm0, %v8064_v1, %v8475_v22  ;;  %v8621_v1 = vld [vmem:[#allocation2 + $0x278] sm:$0xff] }
 0x2dc   :  { %v2456_v18 = vsel %vm2419_vm8, %v2391_v54, %v8496_v8 }
 0x2dd   :  { %2245 = vrot.lane.b32.xlu1 %v913_v27, %s6527_s1  ;;  %1645 = vrot.lane.b32.xlu0 %v911_v49, %s6523_s14 }
 0x2df   :  { %v2030_v26 = vpop.permute.xlu1 %2029  ;;  %v1828_v51 = vpop.permute.xlu0 %1827 }
 0x2e0   :  { %v2779_v41 = vsel %vm2744_vm13, %v2714_v37, %v2030_v26  ;;  %v2715_v10 = vsel %vm2679_vm12, %v2650_v7, %v1828_v51  ;;  %v917_v26 = vrot.slane %v318_v38, 2 }
 0x2e1   :  { %1047 = vrot.lane.b32.xlu1 %v911_v49, %s6520_s30  ;;  %696 = vrot.lane.b32.xlu0 %v560_v14, %s6521_s10 }
 0x2e2   :  { %v918_v21 = vsel %vm798_vm3, %v915_v31, %v917_v26 }
 0x2e3   :  { %v8529_v52 = vpop.permute.xlu1 %1431  ;;  %v8531_v45 = vpop.permute.xlu0 %1229 }
 0x2e5   :  { %v8539_v47 = vpop.f32.mrb[20].mxu0  ;;  %1841 = vrot.lane.b32.xlu1 %v8522_v24, %s6524_s17  ;;  %1647 = vrot.lane.b32.xlu0 %v913_v27, %s6523_s14 }
 0x2e6   :  { %v8545_v5 = vpop.f32.mrb[21].mxu0  ;;  %v3254_v8 = vadd.f32 %v8444_v39, %v8539_v47  ;;  %v567_v47 = vrot.slane %v8621_v1, 1 }
 0x2e7   :  { %v2232_v30 = vpop.permute.xlu1 %2231  ;;  %v2032_v34 = vpop.permute.xlu0 %2031  ;;  %v3249_v17 = vadd.f32 %v8444_v39, %v8545_v5 }
 0x2e8   :  { %v2844_v23 = vsel %vm2809_vm14, %v2779_v41, %v2232_v30  ;;  %v2780_v49 = vsel %vm2744_vm13, %v2715_v10, %v2032_v34  ;;  %v8610_v41 = vld [vmem:[#allocation2 + $0x270] sm:$0xff]  ;;  %v87_v30 = vld [vmem:[%s10584_s0 + $0x1b8] sm:$0xff]  ;;  %v2521_v34 = vsel %vm2484_vm9, %v2456_v18, %v8505_v3  ;;  %v3488_v31 = vmax.f32 %v3254_v8, 0.0 }
 0x2e9   :  { %1243 = vrot.lane.b32.xlu1 %v8522_v24, %s6519_s29  ;;  %1049 = vrot.lane.b32.xlu0 %v913_v27, %s6520_s30  ;;  %232 = vst.msk [vmem:[#allocation2 + $0x2d9] sm:$0xff] %vm96_vm0, %v87_v30  ;;  %v2586_v22 = vsel %vm2549_vm10, %v2521_v34, %v8529_v52  ;;  %v566_v52 = vrot.slane %v8610_v41, 1  ;;  %v919_v18 = vrot.slane %v8610_v41, 2  ;;  %v920_v30 = vrot.slane %v8621_v1, 2 }
 0x2ea   :  { %5940 = vmatprep.mubr.msk.f32.mxu0 %vm2885_vm15, %v2844_v23 }
 0x2eb   :  { %v8563_v44 = vpop.permute.xlu1 %1433  ;;  %v8565_v11 = vpop.permute.xlu0 %682  ;;  %v568_v26 = vsel %vm445_vm4, %v566_v52, %v567_v47 }
 0x2ed   :  { %2045 = vrot.lane.b32.xlu1 %v563_v36, %s6525_s26  ;;  %1843 = vrot.lane.b32.xlu0 %v8533_v35, %s6524_s17 }
 0x2ef   :  { %v2234_v14 = vpop.permute.xlu1 %2233  ;;  %v1634_v4 = vpop.permute.xlu0 %1633 }
 0x2f0   :  { %v2845_v57 = vsel %vm2809_vm14, %v2780_v49, %v2234_v14  ;;  %v2392_v14 = vsel %vm96_vm0, %v8076_v15, %v8498_v9 }
 0x2f1   :  { %1447 = vrot.lane.b32.xlu1 %v563_v36, %s6522_s11  ;;  %1245 = vrot.lane.b32.xlu0 %v8533_v35, %s6519_s29 }
 0x2f2   :  { %5941 = vmatmul.mubr.msk.f32.gmra.mrb[34].mxu0 %vm2885_vm15, %v2845_v57 }
 0x2f3   :  { %v8584_v27 = vpop.permute.xlu1 %1035  ;;  %v8586_v63 = vpop.permute.xlu0 %684 }
 0x2f5   :  { %2247 = vrot.lane.b32.xlu1 %v916_v60, %s6527_s1  ;;  %2047 = vrot.lane.b32.xlu0 %v565_v16, %s6525_s26 }
 0x2f7   :  { %v1830_v51 = vpop.permute.xlu1 %1829  ;;  %v1636_v12 = vpop.permute.xlu0 %1635 }
 0x2f9   :  { %1449 = vrot.lane.b32.xlu1 %v565_v16, %s6522_s11  ;;  %698 = vrot.lane.b32.xlu0 %v563_v36, %s6521_s10  ;;  %v2651_v36 = vsel %vm2614_vm11, %v2586_v22, %v1634_v4  ;;  %v3487_v4 = vmax.f32 %v3249_v17, 0.0 }
 0x2fa   :  { %v2716_v19 = vsel %vm2679_vm12, %v2651_v36, %v1830_v51 }
 0x2fb   :  { %v8593_v0 = vpop.permute.xlu1 %1231  ;;  %v8595_v28 = vpop.permute.xlu0 %1037 }
 0x2fd   :  { %2249 = vrot.lane.b32.xlu1 %v918_v21, %s6527_s1  ;;  %1649 = vrot.lane.b32.xlu0 %v916_v60, %s6523_s14 }
 0x2ff   :  { %v2034_v20 = vpop.permute.xlu1 %2033  ;;  %v1832_v37 = vpop.permute.xlu0 %1831 }
 0x300   :  { %v2781_v7 = vsel %vm2744_vm13, %v2716_v19, %v2034_v20  ;;  %v321_v20 = vld [vmem:[#allocation2 + $0x280] sm:$0x3] }
 0x301   :  { %1051 = vrot.lane.b32.xlu1 %v916_v60, %s6520_s30  ;;  %700 = vrot.lane.b32.xlu0 %v565_v16, %s6521_s10  ;;  %v2457_v60 = vsel %vm2419_vm8, %v2392_v14, %v8507_v32  ;;  %v569_v34 = vrot.slane %v321_v20, 1  ;;  %v922_v19 = vrot.slane %v321_v20, 2  ;;  %v89_v14 = vld [vmem:[%s10584_s0 + $0x1c8] sm:$0xff] }
 0x302   :  { %v2522_v51 = vsel %vm2484_vm9, %v2457_v60, %v8531_v45  ;;  %234 = vst.msk [vmem:[#allocation2 + $0x2f1] sm:$0xff] %vm96_vm0, %v89_v14 }
 0x303   :  { %v8617_v23 = vpop.permute.xlu1 %1435  ;;  %v8619_v13 = vpop.permute.xlu0 %1233  ;;  %v570_v17 = vsel %vm445_vm4, %v567_v47, %v569_v34  ;;  %v923_v52 = vsel %vm798_vm3, %v920_v30, %v922_v19 }
 0x305   :  { %v5924_v3 = vpop.f32.mrb[22].mxu0  ;;  %1845 = vrot.lane.b32.xlu1 %v8610_v41, %s6524_s17  ;;  %1651 = vrot.lane.b32.xlu0 %v918_v21, %s6523_s14 }
 0x306   :  { %v3264_v38 = vadd.f32 %v8444_v39, %v5924_v3  ;;  %v3258_v43 = vpop.f32.mrb[23].mxu0 }
 0x307   :  { %v3259_v5 = vadd.f32 %v8444_v39, %v3258_v43  ;;  %v2236_v10 = vpop.permute.xlu1 %2235  ;;  %v2036_v46 = vpop.permute.xlu0 %2035 }
 0x308   :  { %v3490_v29 = vmax.f32 %v3264_v38, 0.0  ;;  %v2846_v49 = vsel %vm2809_vm14, %v2781_v7, %v2236_v10 }
 0x309   :  { %v3489_v57 = vmax.f32 %v3259_v5, 0.0  ;;  %1247 = vrot.lane.b32.xlu1 %v8610_v41, %s6519_s29  ;;  %1053 = vrot.lane.b32.xlu0 %v918_v21, %s6520_s30  ;;  %v2587_v21 = vsel %vm2549_vm10, %v2522_v51, %v8563_v44  ;;  %v88_v5 = vld [vmem:[%s10584_s0 + $0x1c0] sm:$0xff] }
 0x30a   :  { %v3542_v16 = vmax.f32 %v3488_v31, %v3490_v29  ;;  %5943 = vmatprep.mubr.msk.f32.mxu0 %vm2885_vm15, %v2846_v49  ;;  %v2652_v54 = vsel %vm2614_vm11, %v2587_v21, %v1636_v12  ;;  %233 = vst.msk [vmem:[#allocation2 + $0x2e9] sm:$0xff] %vm96_vm0, %v88_v5  ;;  %v2393_v31 = vsel %vm96_vm0, %v8157_v53, %v8565_v11  ;;  %v8702_v49 = vld [vmem:[#allocation2 + $0x288] sm:$0xff]  ;;  %v8713_v53 = vld [vmem:[#allocation2 + $0x290] sm:$0xff] }
 0x30b   :  { %v3541_v42 = vmax.f32 %v3487_v4, %v3489_v57  ;;  %v8653_v15 = vpop.permute.xlu1 %1437  ;;  %v8655_v9 = vpop.permute.xlu0 %686  ;;  %v2717_v45 = vsel %vm2679_vm12, %v2652_v54, %v1832_v37  ;;  %v921_v37 = vsel %vm798_vm3, %v919_v18, %v920_v30  ;;  %v2458_v29 = vsel %vm2419_vm8, %v2393_v31, %v8584_v27 }
 0x30c   :  { %v2782_v22 = vsel %vm2744_vm13, %v2717_v45, %v2036_v46  ;;  %v2523_v4 = vsel %vm2484_vm9, %v2458_v29, %v8593_v0  ;;  %v571_v51 = vrot.slane %v8702_v49, 1  ;;  %v2394_v45 = vsel %vm96_vm0, %v8168_v56, %v8586_v63  ;;  %v324_v56 = vld [vmem:[#allocation2 + $0x298] sm:$0x3] }
 0x30d   :  { %2049 = vrot.lane.b32.xlu1 %v568_v26, %s6525_s26  ;;  %1847 = vrot.lane.b32.xlu0 %v8621_v1, %s6524_s17  ;;  %v8663_v32 = vpack.c.bf16 %v3542_v16, %v3541_v42  ;;  %v2588_v11 = vsel %vm2549_vm10, %v2523_v4, %v8617_v23  ;;  %v572_v42 = vrot.slane %v8713_v53, 1  ;;  %v2459_v18 = vsel %vm2419_vm8, %v2394_v45, %v8595_v28 }
 0x30e   :  { %v2524_v34 = vsel %vm2484_vm9, %v2459_v18, %v8619_v13  ;;  %v925_v13 = vrot.slane %v8713_v53, 2 }
 0x30f   :  { %v2238_v8 = vpop.permute.xlu1 %2237  ;;  %v1638_v44 = vpop.permute.xlu0 %1637  ;;  %v573_v30 = vsel %vm445_vm4, %v571_v51, %v572_v42  ;;  %v2589_v63 = vsel %vm2549_vm10, %v2524_v34, %v8653_v15 }
 0x310   :  { %v2847_v12 = vsel %vm2809_vm14, %v2782_v22, %v2238_v8  ;;  %v2653_v27 = vsel %vm2614_vm11, %v2588_v11, %v1638_v44 }
 0x311   :  { %1451 = vrot.lane.b32.xlu1 %v568_v26, %s6522_s11  ;;  %1249 = vrot.lane.b32.xlu0 %v8621_v1, %s6519_s29 }
 0x312   :  { %5944 = vmatmul.mubr.msk.f32.gmra.mrb[36].mxu0 %vm2885_vm15, %v2847_v12  ;;  %v924_v12 = vrot.slane %v8702_v49, 2 }
 0x313   :  { %v8676_v36 = vpop.permute.xlu1 %1039  ;;  %v8678_v3 = vpop.permute.xlu0 %688 }
 0x315   :  { %2251 = vrot.lane.b32.xlu1 %v921_v37, %s6527_s1  ;;  %2051 = vrot.lane.b32.xlu0 %v570_v17, %s6525_s26 }
 0x317   :  { %v1834_v38 = vpop.permute.xlu1 %1833  ;;  %v1640_v43 = vpop.permute.xlu0 %1639 }
 0x318   :  { %v2718_v0 = vsel %vm2679_vm12, %v2653_v27, %v1834_v38  ;;  %v2654_v44 = vsel %vm2614_vm11, %v2589_v63, %v1640_v43  ;;  %v926_v43 = vsel %vm798_vm3, %v924_v12, %v925_v13  ;;  %v90_v27 = vld [vmem:[%s10584_s0 + $0x1d0] sm:$0xff] }
 0x319   :  { %1453 = vrot.lane.b32.xlu1 %v570_v17, %s6522_s11  ;;  %702 = vrot.lane.b32.xlu0 %v568_v26, %s6521_s10  ;;  %235 = vst.msk [vmem:[#allocation2 + $0x301] sm:$0xff] %vm96_vm0, %v90_v27 }
 0x31b   :  { %v8685_v7 = vpop.permute.xlu1 %1235  ;;  %v8687_v47 = vpop.permute.xlu0 %1041 }
 0x31d   :  { %2253 = vrot.lane.b32.xlu1 %v923_v52, %s6527_s1  ;;  %1653 = vrot.lane.b32.xlu0 %v921_v37, %s6523_s14 }
 0x31f   :  { %v2038_v10 = vpop.permute.xlu1 %2037  ;;  %v1836_v46 = vpop.permute.xlu0 %1835 }
 0x320   :  { %v2783_v20 = vsel %vm2744_vm13, %v2718_v0, %v2038_v10  ;;  %v2719_v28 = vsel %vm2679_vm12, %v2654_v44, %v1836_v46  ;;  %v927_v46 = vrot.slane %v324_v56, 2 }
 0x321   :  { %1055 = vrot.lane.b32.xlu1 %v921_v37, %s6520_s30  ;;  %704 = vrot.lane.b32.xlu0 %v570_v17, %s6521_s10  ;;  %v574_v37 = vrot.slane %v324_v56, 1 }
 0x322   :  { %v928_v14 = vsel %vm798_vm3, %v925_v13, %v927_v46 }
 0x323   :  { %v8709_v57 = vpop.permute.xlu1 %1439  ;;  %v8711_v60 = vpop.permute.xlu0 %1237 }
 0x325   :  { %v8719_v16 = vpop.f32.mrb[24].mxu0  ;;  %1849 = vrot.lane.b32.xlu1 %v8702_v49, %s6524_s17  ;;  %1655 = vrot.lane.b32.xlu0 %v923_v52, %s6523_s14 }
 0x326   :  { %v8725_v26 = vpop.f32.mrb[25].mxu0 }
 0x327   :  { %v2240_v23 = vpop.permute.xlu1 %2239  ;;  %v2040_v21 = vpop.permute.xlu0 %2039 }
 0x328   :  { %v2848_v54 = vsel %vm2809_vm14, %v2783_v20, %v2240_v23  ;;  %v2784_v17 = vsel %vm2744_vm13, %v2719_v28, %v2040_v21  ;;  %v8790_v23 = vld [vmem:[#allocation2 + $0x2a0] sm:$0xff]  ;;  %v91_v21 = vld [vmem:[%s10584_s0 + $0x1d8] sm:$0xff] }
 0x329   :  { %1251 = vrot.lane.b32.xlu1 %v8702_v49, %s6519_s29  ;;  %1057 = vrot.lane.b32.xlu0 %v923_v52, %s6520_s30  ;;  %v575_v52 = vsel %vm445_vm4, %v572_v42, %v574_v37  ;;  %v2395_v42 = vsel %vm96_vm0, %v8245_v40, %v8655_v9  ;;  %v8801_v40 = vld [vmem:[#allocation2 + $0x2a8] sm:$0xff]  ;;  %236 = vst.msk [vmem:[#allocation2 + $0x309] sm:$0xff] %vm96_vm0, %v91_v21  ;;  %v929_v21 = vrot.slane %v8790_v23, 2 }
 0x32a   :  { %5946 = vmatprep.mubr.msk.f32.mxu0 %vm2885_vm15, %v2848_v54  ;;  %v2460_v20 = vsel %vm2419_vm8, %v2395_v42, %v8676_v36  ;;  %v3274_v36 = vadd.f32 %v8444_v39, %v8719_v16  ;;  %v577_v16 = vrot.slane %v8801_v40, 1  ;;  %v327_v42 = vld [vmem:[#allocation2 + $0x2b0] sm:$0x3] }
 0x32b   :  { %v8743_v22 = vpop.permute.xlu1 %1441  ;;  %v8745_v8 = vpop.permute.xlu0 %690  ;;  %v2525_v54 = vsel %vm2484_vm9, %v2460_v20, %v8685_v7 }
 0x32c   :  { %v2590_v9 = vsel %vm2549_vm10, %v2525_v54, %v8709_v57  ;;  %v576_v57 = vrot.slane %v8790_v23, 1  ;;  %v3492_v37 = vmax.f32 %v3274_v36, 0.0  ;;  %v930_v54 = vrot.slane %v8801_v40, 2 }
 0x32d   :  { %2053 = vrot.lane.b32.xlu1 %v573_v30, %s6525_s26  ;;  %1851 = vrot.lane.b32.xlu0 %v8713_v53, %s6524_s17 }
 0x32f   :  { %v2242_v19 = vpop.permute.xlu1 %2241  ;;  %v1642_v38 = vpop.permute.xlu0 %1641 }
 0x330   :  { %v2849_v15 = vsel %vm2809_vm14, %v2784_v17, %v2242_v19  ;;  %v2655_v34 = vsel %vm2614_vm11, %v2590_v9, %v1642_v38  ;;  %v2396_v38 = vsel %vm96_vm0, %v8256_v55, %v8678_v3  ;;  %v579_v9 = vrot.slane %v327_v42, 1 }
 0x331   :  { %1455 = vrot.lane.b32.xlu1 %v573_v30, %s6522_s11  ;;  %1253 = vrot.lane.b32.xlu0 %v8713_v53, %s6519_s29 }
 0x332   :  { %5947 = vmatmul.mubr.msk.f32.gmra.mrb[38].mxu0 %vm2885_vm15, %v2849_v15 }
 0x333   :  { %v8764_v5 = vpop.permute.xlu1 %1043  ;;  %v8766_v10 = vpop.permute.xlu0 %692 }
 0x335   :  { %2255 = vrot.lane.b32.xlu1 %v926_v43, %s6527_s1  ;;  %2055 = vrot.lane.b32.xlu0 %v575_v52, %s6525_s26 }
 0x337   :  { %v1838_v31 = vpop.permute.xlu1 %1837  ;;  %v1644_v29 = vpop.permute.xlu0 %1643 }
 0x338   :  { %v2720_v56 = vsel %vm2679_vm12, %v2655_v34, %v1838_v31  ;;  %v578_v31 = vsel %vm445_vm4, %v576_v57, %v577_v16  ;;  %v580_v34 = vsel %vm445_vm4, %v577_v16, %v579_v9 }
 0x339   :  { %1457 = vrot.lane.b32.xlu1 %v575_v52, %s6522_s11  ;;  %706 = vrot.lane.b32.xlu0 %v573_v30, %s6521_s10  ;;  %v3269_v30 = vadd.f32 %v8444_v39, %v8725_v26 }
 0x33b   :  { %v8773_v4 = vpop.permute.xlu1 %1239  ;;  %v8775_v11 = vpop.permute.xlu0 %1045  ;;  %v3491_v15 = vmax.f32 %v3269_v30, 0.0 }
 0x33d   :  { %2257 = vrot.lane.b32.xlu1 %v928_v14, %s6527_s1  ;;  %1657 = vrot.lane.b32.xlu0 %v926_v43, %s6523_s14 }
 0x33f   :  { %v2042_v0 = vpop.permute.xlu1 %2041  ;;  %v1840_v51 = vpop.permute.xlu0 %1839 }
 0x340   :  { %v2785_v28 = vsel %vm2744_vm13, %v2720_v56, %v2042_v0 }
 0x341   :  { %1059 = vrot.lane.b32.xlu1 %v926_v43, %s6520_s30  ;;  %708 = vrot.lane.b32.xlu0 %v575_v52, %s6521_s10  ;;  %v2461_v52 = vsel %vm2419_vm8, %v2396_v38, %v8687_v47  ;;  %v8882_v38 = vld [vmem:[#allocation2 + $0x2b8] sm:$0xff] }
 0x342   :  { %v2526_v27 = vsel %vm2484_vm9, %v2461_v52, %v8711_v60 }
 0x343   :  { %v8797_v45 = vpop.permute.xlu1 %1443  ;;  %v8799_v18 = vpop.permute.xlu0 %1241 }
 0x345   :  { %v5930_v7 = vpop.f32.mrb[26].mxu0  ;;  %1853 = vrot.lane.b32.xlu1 %v8790_v23, %s6524_s17  ;;  %1659 = vrot.lane.b32.xlu0 %v928_v14, %s6523_s14 }
 0x346   :  { %v3284_v63 = vadd.f32 %v8444_v39, %v5930_v7  ;;  %v3278_v44 = vpop.f32.mrb[27].mxu0 }
 0x347   :  { %v3279_v26 = vadd.f32 %v8444_v39, %v3278_v44  ;;  %v2244_v12 = vpop.permute.xlu1 %2243  ;;  %v2044_v13 = vpop.permute.xlu0 %2043 }
 0x348   :  { %v3494_v17 = vmax.f32 %v3284_v63, 0.0  ;;  %v2850_v19 = vsel %vm2809_vm14, %v2785_v28, %v2244_v12  ;;  %v932_v63 = vrot.slane %v327_v42, 2  ;;  %v92_v12 = vld [vmem:[%s10584_s0 + $0x1e0] sm:$0xff] }
 0x349   :  { %v3493_v43 = vmax.f32 %v3279_v26, 0.0  ;;  %1255 = vrot.lane.b32.xlu1 %v8790_v23, %s6519_s29  ;;  %1061 = vrot.lane.b32.xlu0 %v928_v14, %s6520_s30  ;;  %v2591_v14 = vsel %vm2549_vm10, %v2526_v27, %v8743_v22  ;;  %237 = vst.msk [vmem:[#allocation2 + $0x319] sm:$0xff] %vm96_vm0, %v92_v12 }
 0x34a   :  { %v3544_v46 = vmax.f32 %v3492_v37, %v3494_v17  ;;  %5949 = vmatprep.mubr.msk.f32.mxu0 %vm2885_vm15, %v2850_v19  ;;  %v2656_v20 = vsel %vm2614_vm11, %v2591_v14, %v1644_v29  ;;  %v933_v28 = vsel %vm798_vm3, %v930_v54, %v932_v63  ;;  %v2397_v17 = vsel %vm96_vm0, %v8337_v50, %v8745_v8  ;;  %v8893_v50 = vld [vmem:[#allocation2 + $0x2c0] sm:$0xff] }
 0x34b   :  { %v3543_v0 = vmax.f32 %v3491_v15, %v3493_v43  ;;  %v8833_v55 = vpop.permute.xlu1 %1445  ;;  %v8835_v3 = vpop.permute.xlu0 %694  ;;  %v2721_v60 = vsel %vm2679_vm12, %v2656_v20, %v1840_v51  ;;  %v931_v51 = vsel %vm798_vm3, %v929_v21, %v930_v54  ;;  %v2462_v19 = vsel %vm2419_vm8, %v2397_v17, %v8764_v5  ;;  %v93_v15 = vld [vmem:[%s10584_s0 + $0x1e8] sm:$0xff] }
 0x34c   :  { %v2786_v36 = vsel %vm2744_vm13, %v2721_v60, %v2044_v13  ;;  %v2527_v43 = vsel %vm2484_vm9, %v2462_v19, %v8773_v4  ;;  %238 = vst.msk [vmem:[#allocation2 + $0x321] sm:$0xff] %vm96_vm0, %v93_v15  ;;  %v582_v42 = vrot.slane %v8893_v50, 1  ;;  %v2398_v21 = vsel %vm96_vm0, %v8348_v33, %v8766_v10  ;;  %v330_v33 = vld [vmem:[#allocation2 + $0x2c8] sm:$0x3] }
 0x34d   :  { %2057 = vrot.lane.b32.xlu1 %v578_v31, %s6525_s26  ;;  %1855 = vrot.lane.b32.xlu0 %v8801_v40, %s6524_s17  ;;  %v8843_v47 = vpack.c.bf16 %v3544_v46, %v3543_v0  ;;  %v2592_v8 = vsel %vm2549_vm10, %v2527_v43, %v8797_v45  ;;  %v581_v0 = vrot.slane %v8882_v38, 1  ;;  %v2463_v54 = vsel %vm2419_vm8, %v2398_v21, %v8775_v11 }
 0x34e   :  { %v937_v17 = vrot.slane %v330_v33, 2 }
 0x34f   :  { %v2246_v30 = vpop.permute.xlu1 %2245  ;;  %v1646_v22 = vpop.permute.xlu0 %1645  ;;  %v583_v9 = vsel %vm445_vm4, %v581_v0, %v582_v42 }
 0x350   :  { %v2851_v29 = vsel %vm2809_vm14, %v2786_v36, %v2246_v30  ;;  %v2657_v5 = vsel %vm2614_vm11, %v2592_v8, %v1646_v22  ;;  %v2528_v36 = vsel %vm2484_vm9, %v2463_v54, %v8799_v18  ;;  %v935_v18 = vrot.slane %v8893_v50, 2 }
 0x351   :  { %1459 = vrot.lane.b32.xlu1 %v578_v31, %s6522_s11  ;;  %1257 = vrot.lane.b32.xlu0 %v8801_v40, %s6519_s29  ;;  %v2593_v10 = vsel %vm2549_vm10, %v2528_v36, %v8833_v55 }
 0x352   :  { %5950 = vmatmul.mubr.msk.f32.gmra.mrb[40].mxu0 %vm2885_vm15, %v2851_v29  ;;  %v938_v43 = vsel %vm798_vm3, %v935_v18, %v937_v17 }
 0x353   :  { %v8856_v7 = vpop.permute.xlu1 %1047  ;;  %v8858_v56 = vpop.permute.xlu0 %696 }
 0x355   :  { %2259 = vrot.lane.b32.xlu1 %v931_v51, %s6527_s1  ;;  %2059 = vrot.lane.b32.xlu0 %v580_v34, %s6525_s26 }
 0x357   :  { %v1842_v44 = vpop.permute.xlu1 %1841  ;;  %v1648_v57 = vpop.permute.xlu0 %1647 }
 0x358   :  { %v2722_v4 = vsel %vm2679_vm12, %v2657_v5, %v1842_v44  ;;  %v2658_v29 = vsel %vm2614_vm11, %v2593_v10, %v1648_v57 }
 0x359   :  { %1461 = vrot.lane.b32.xlu1 %v580_v34, %s6522_s11  ;;  %710 = vrot.lane.b32.xlu0 %v578_v31, %s6521_s10 }
 0x35b   :  { %v8865_v26 = vpop.permute.xlu1 %1243  ;;  %v8867_v16 = vpop.permute.xlu0 %1049 }
 0x35d   :  { %2261 = vrot.lane.b32.xlu1 %v933_v28, %s6527_s1  ;;  %1661 = vrot.lane.b32.xlu0 %v931_v51, %s6523_s14 }
 0x35f   :  { %v2046_v13 = vpop.permute.xlu1 %2045  ;;  %v1844_v37 = vpop.permute.xlu0 %1843 }
 0x360   :  { %v2787_v14 = vsel %vm2744_vm13, %v2722_v4, %v2046_v13  ;;  %v2723_v11 = vsel %vm2679_vm12, %v2658_v29, %v1844_v37  ;;  %v94_v4 = vld [vmem:[%s10584_s0 + $0x1f0] sm:$0xff] }
 0x361   :  { %1063 = vrot.lane.b32.xlu1 %v931_v51, %s6520_s30  ;;  %712 = vrot.lane.b32.xlu0 %v580_v34, %s6521_s10  ;;  %v934_v51 = vrot.slane %v8882_v38, 2  ;;  %v584_v34 = vrot.slane %v330_v33, 1  ;;  %239 = vst.msk [vmem:[#allocation2 + $0x331] sm:$0xff] %vm96_vm0, %v94_v4 }
 0x363   :  { %v8889_v52 = vpop.permute.xlu1 %1447  ;;  %v8891_v46 = vpop.permute.xlu0 %1245  ;;  %v936_v57 = vsel %vm798_vm3, %v934_v51, %v935_v18  ;;  %v585_v12 = vsel %vm445_vm4, %v582_v42, %v584_v34 }
 0x365   :  { %v8899_v31 = vpop.f32.mrb[28].mxu0  ;;  %1857 = vrot.lane.b32.xlu1 %v8882_v38, %s6524_s17  ;;  %1663 = vrot.lane.b32.xlu0 %v933_v28, %s6523_s14 }
 0x366   :  { %v8905_v27 = vpop.f32.mrb[29].mxu0 }
 0x367   :  { %v2248_v45 = vpop.permute.xlu1 %2247  ;;  %v2048_v20 = vpop.permute.xlu0 %2047  ;;  %v3289_v36 = vadd.f32 %v8444_v39, %v8905_v27 }
 0x368   :  { %v2852_v60 = vsel %vm2809_vm14, %v2787_v14, %v2248_v45  ;;  %v2788_v63 = vsel %vm2744_vm13, %v2723_v11, %v2048_v20  ;;  %v2399_v14 = vsel %vm96_vm0, %v8425_v6, %v8835_v3  ;;  %v8970_v20 = vld [vmem:[#allocation2 + $0x2d0] sm:$0xff]  ;;  %v8981_v6 = vld [vmem:[#allocation2 + $0x2d8] sm:$0xff] }
 0x369   :  { %1259 = vrot.lane.b32.xlu1 %v8882_v38, %s6519_s29  ;;  %1065 = vrot.lane.b32.xlu0 %v933_v28, %s6520_s30  ;;  %v2464_v45 = vsel %vm2419_vm8, %v2399_v14, %v8856_v7  ;;  %v3294_v7 = vadd.f32 %v8444_v39, %v8899_v31  ;;  %v587_v31 = vrot.slane %v8981_v6, 1  ;;  %v333_v14 = vld [vmem:[#allocation2 + $0x2e0] sm:$0x3] }
 0x36a   :  { %5952 = vmatprep.mubr.msk.f32.mxu0 %vm2885_vm15, %v2852_v60  ;;  %v95_v60 = vld [vmem:[%s10584_s0 + $0x1f8] sm:$0xff]  ;;  %v2529_v21 = vsel %vm2484_vm9, %v2464_v45, %v8865_v26 }
 0x36b   :  { %v8923_v30 = vpop.permute.xlu1 %1449  ;;  %v8925_v22 = vpop.permute.xlu0 %698  ;;  %240 = vst.msk [vmem:[#allocation2 + $0x339] sm:$0xff] %vm96_vm0, %v95_v60  ;;  %v2594_v3 = vsel %vm2549_vm10, %v2529_v21, %v8889_v52  ;;  %v586_v52 = vrot.slane %v8970_v20, 1  ;;  %v939_v60 = vrot.slane %v8970_v20, 2  ;;  %v940_v21 = vrot.slane %v8981_v6, 2 }
 0x36d   :  { %2061 = vrot.lane.b32.xlu1 %v583_v9, %s6525_s26  ;;  %1859 = vrot.lane.b32.xlu0 %v8893_v50, %s6524_s17 }
 0x36f   :  { %v2250_v44 = vpop.permute.xlu1 %2249  ;;  %v1650_v28 = vpop.permute.xlu0 %1649 }
 0x370   :  { %v2853_v55 = vsel %vm2809_vm14, %v2788_v63, %v2250_v44  ;;  %v2659_v33 = vsel %vm2614_vm11, %v2594_v3, %v1650_v28  ;;  %v3496_v63 = vmax.f32 %v3294_v7, 0.0  ;;  %v589_v3 = vrot.slane %v333_v14, 1 }
 0x371   :  { %1463 = vrot.lane.b32.xlu1 %v583_v9, %s6522_s11  ;;  %1261 = vrot.lane.b32.xlu0 %v8893_v50, %s6519_s29 }
 0x372   :  { %5953 = vmatmul.mubr.msk.f32.gmra.mrb[42].mxu0 %vm2885_vm15, %v2853_v55  ;;  %v2400_v55 = vsel %vm96_vm0, %v8436_v48, %v8858_v56 }
 0x373   :  { %v8944_v13 = vpop.permute.xlu1 %1051  ;;  %v8946_v37 = vpop.permute.xlu0 %700 }
 0x375   :  { %2263 = vrot.lane.b32.xlu1 %v936_v57, %s6527_s1  ;;  %2063 = vrot.lane.b32.xlu0 %v585_v12, %s6525_s26 }
 0x377   :  { %v1846_v19 = vpop.permute.xlu1 %1845  ;;  %v1652_v15 = vpop.permute.xlu0 %1651 }
 0x378   :  { %v2724_v10 = vsel %vm2679_vm12, %v2659_v33, %v1846_v19  ;;  %v588_v19 = vsel %vm445_vm4, %v586_v52, %v587_v31  ;;  %v590_v33 = vsel %vm445_vm4, %v587_v31, %v589_v3 }
 0x379   :  { %1465 = vrot.lane.b32.xlu1 %v585_v12, %s6522_s11  ;;  %714 = vrot.lane.b32.xlu0 %v583_v9, %s6521_s10 }
 0x37b   :  { %v8953_v8 = vpop.permute.xlu1 %1247  ;;  %v8955_v5 = vpop.permute.xlu0 %1053 }
 0x37d   :  { %2265 = vrot.lane.b32.xlu1 %v938_v43, %s6527_s1  ;;  %1665 = vrot.lane.b32.xlu0 %v936_v57, %s6523_s14 }
 0x37f   :  { %v2050_v0 = vpop.permute.xlu1 %2049  ;;  %v1848_v42 = vpop.permute.xlu0 %1847 }
 0x380   :  { %v2789_v51 = vsel %vm2744_vm13, %v2724_v10, %v2050_v0 }
 0x381   :  { %1067 = vrot.lane.b32.xlu1 %v936_v57, %s6520_s30  ;;  %716 = vrot.lane.b32.xlu0 %v585_v12, %s6521_s10  ;;  %v3495_v57 = vmax.f32 %v3289_v36, 0.0 }
 0x383   :  { %v8977_v54 = vpop.permute.xlu1 %1451  ;;  %v8979_v9 = vpop.permute.xlu0 %1249 }
 0x385   :  { %v5936_v26 = vpop.f32.mrb[30].mxu0  ;;  %1861 = vrot.lane.b32.xlu1 %v8970_v20, %s6524_s17  ;;  %1667 = vrot.lane.b32.xlu0 %v938_v43, %s6523_s14 }
 0x386   :  { %v3304_v29 = vadd.f32 %v8444_v39, %v5936_v26  ;;  %v3298_v11 = vpop.f32.mrb[31].mxu0 }
 0x387   :  { %v3299_v27 = vadd.f32 %v8444_v39, %v3298_v11  ;;  %v2252_v18 = vpop.permute.xlu1 %2251  ;;  %v2052_v34 = vpop.permute.xlu0 %2051  ;;  %v2465_v39 = vsel %vm2419_vm8, %v2400_v55, %v8867_v16 }
 0x388   :  { %v3498_v44 = vmax.f32 %v3304_v29, 0.0  ;;  %v2854_v28 = vsel %vm2809_vm14, %v2789_v51, %v2252_v18  ;;  %v2530_v4 = vsel %vm2484_vm9, %v2465_v39, %v8891_v46  ;;  %v942_v29 = vrot.slane %v333_v14, 2  ;;  %v9066_v39 = vld [vmem:[#allocation2 + $0x2f0] sm:$0xff] }
 0x389   :  { %v3497_v12 = vmax.f32 %v3299_v27, 0.0  ;;  %1263 = vrot.lane.b32.xlu1 %v8970_v20, %s6519_s29  ;;  %1069 = vrot.lane.b32.xlu0 %v938_v43, %s6520_s30  ;;  %v2595_v43 = vsel %vm2549_vm10, %v2530_v4, %v8923_v30  ;;  %v592_v4 = vrot.slane %v9066_v39, 1 }
 0x38a   :  { %v3546_v17 = vmax.f32 %v3496_v63, %v3498_v44  ;;  %5955 = vmatprep.mubr.msk.f32.mxu0 %vm2885_vm15, %v2854_v28  ;;  %v2660_v45 = vsel %vm2614_vm11, %v2595_v43, %v1652_v15  ;;  %v943_v51 = vsel %vm798_vm3, %v940_v21, %v942_v29  ;;  %v2401_v63 = vsel %vm96_vm0, %v8522_v24, %v8925_v22  ;;  %v9058_v28 = vld [vmem:[#allocation2 + $0x2e8] sm:$0xff] }
 0x38b   :  { %v3545_v0 = vmax.f32 %v3495_v57, %v3497_v12  ;;  %v9013_v48 = vpop.permute.xlu1 %1453  ;;  %v9015_v56 = vpop.permute.xlu0 %702  ;;  %v2725_v46 = vsel %vm2679_vm12, %v2660_v45, %v1848_v42  ;;  %v941_v42 = vsel %vm798_vm3, %v939_v60, %v940_v21  ;;  %v2466_v44 = vsel %vm2419_vm8, %v2401_v63, %v8944_v13 }
 0x38c   :  { %v2790_v7 = vsel %vm2744_vm13, %v2725_v46, %v2052_v34  ;;  %v2531_v55 = vsel %vm2484_vm9, %v2466_v44, %v8953_v8  ;;  %v2402_v45 = vsel %vm96_vm0, %v8533_v35, %v8946_v37  ;;  %v336_v35 = vld [vmem:[#allocation2 + $0x2f8] sm:$0x3] }
 0x38d   :  { %2065 = vrot.lane.b32.xlu1 %v588_v19, %s6525_s26  ;;  %1863 = vrot.lane.b32.xlu0 %v8981_v6, %s6524_s17  ;;  %v9023_v16 = vpack.c.bf16 %v3546_v17, %v3545_v0  ;;  %v2596_v24 = vsel %vm2549_vm10, %v2531_v55, %v8977_v54  ;;  %v2467_v46 = vsel %vm2419_vm8, %v2402_v45, %v8955_v5 }
 0x38e   :  { %v2532_v21 = vsel %vm2484_vm9, %v2467_v46, %v8979_v9  ;;  %v945_v9 = vrot.slane %v9066_v39, 2  ;;  %v9144_v46 = vld [vmem:[#allocation2 + $0x308] sm:$0xff] }
 0x38f   :  { %v2254_v36 = vpop.permute.xlu1 %2253  ;;  %v1654_v30 = vpop.permute.xlu0 %1653  ;;  %v2597_v37 = vsel %vm2549_vm10, %v2532_v21, %v9013_v48 }
 0x390   :  { %v2855_v15 = vsel %vm2809_vm14, %v2790_v7, %v2254_v36  ;;  %v2661_v22 = vsel %vm2614_vm11, %v2596_v24, %v1654_v30  ;;  %v944_v30 = vrot.slane %v9058_v28, 2 }
 0x391   :  { %1467 = vrot.lane.b32.xlu1 %v588_v19, %s6522_s11  ;;  %1265 = vrot.lane.b32.xlu0 %v8981_v6, %s6519_s29 }
 0x392   :  { %5956 = vmatmul.mubr.msk.f32.gmra.mrb[44].mxu0 %vm2885_vm15, %v2855_v15  ;;  %v594_v15 = vrot.slane %v336_v35, 1 }
 0x393   :  { %v9036_v26 = vpop.permute.xlu1 %1055  ;;  %v9038_v10 = vpop.permute.xlu0 %704 }
 0x395   :  { %2267 = vrot.lane.b32.xlu1 %v941_v42, %s6527_s1  ;;  %2067 = vrot.lane.b32.xlu0 %v590_v33, %s6525_s26 }
 0x397   :  { %v1850_v11 = vpop.permute.xlu1 %1849  ;;  %v1656_v52 = vpop.permute.xlu0 %1655 }
 0x398   :  { %v2726_v13 = vsel %vm2679_vm12, %v2661_v22, %v1850_v11  ;;  %v2662_v36 = vsel %vm2614_vm11, %v2597_v37, %v1656_v52  ;;  %v946_v11 = vsel %vm798_vm3, %v944_v30, %v945_v9  ;;  %v595_v52 = vsel %vm445_vm4, %v592_v4, %v594_v15 }
 0x399   :  { %1469 = vrot.lane.b32.xlu1 %v590_v33, %s6522_s11  ;;  %718 = vrot.lane.b32.xlu0 %v588_v19, %s6521_s10  ;;  %v591_v19 = vrot.slane %v9058_v28, 1 }
 0x39b   :  { %v9045_v27 = vpop.permute.xlu1 %1251  ;;  %v9047_v31 = vpop.permute.xlu0 %1057  ;;  %v593_v60 = vsel %vm445_vm4, %v591_v19, %v592_v4  ;;  %v2403_v4 = vsel %vm96_vm0, %v8610_v41, %v9015_v56  ;;  %v9151_v56 = vld [vmem:[%s10586_s2] ss:$0 sm:$0xff] }
 0x39d   :  { %2269 = vrot.lane.b32.xlu1 %v943_v51, %s6527_s1  ;;  %1669 = vrot.lane.b32.xlu0 %v941_v42, %s6523_s14 }
 0x39f   :  { %v2054_v18 = vpop.permute.xlu1 %2053  ;;  %v1852_v34 = vpop.permute.xlu0 %1851 }
 0x3a0   :  { %v2791_v0 = vsel %vm2744_vm13, %v2726_v13, %v2054_v18  ;;  %v2727_v5 = vsel %vm2679_vm12, %v2662_v36, %v1852_v34  ;;  %v947_v34 = vrot.slane %v336_v35, 2 }
 0x3a1   :  { %1071 = vrot.lane.b32.xlu1 %v941_v42, %s6520_s30  ;;  %720 = vrot.lane.b32.xlu0 %v590_v33, %s6521_s10 }
 0x3a2   :  { %v948_v55 = vsel %vm798_vm3, %v945_v9, %v947_v34 }
 0x3a3   :  { %v9062_v57 = vpop.permute.xlu1 %1455  ;;  %v9064_v12 = vpop.permute.xlu0 %1253 }
 0x3a5   :  { %v9071_v17 = vpop.f32.mrb[32].mxu0  ;;  %1865 = vrot.lane.b32.xlu1 %v9058_v28, %s6524_s17  ;;  %1671 = vrot.lane.b32.xlu0 %v943_v51, %s6523_s14 }
 0x3a6   :  { %v3308_v8 = vpop.f32.mrb[33].mxu0 }
 0x3a7   :  { %v2256_v14 = vpop.permute.xlu1 %2255  ;;  %v2056_v54 = vpop.permute.xlu0 %2055 }
 0x3a8   :  { %v2856_v43 = vsel %vm2809_vm14, %v2791_v0, %v2256_v14  ;;  %v2792_v42 = vsel %vm2744_vm13, %v2727_v5, %v2056_v54  ;;  %v2468_v0 = vsel %vm2419_vm8, %v2403_v4, %v9036_v26  ;;  %v9136_v14 = vld [vmem:[#allocation2 + $0x300] sm:$0xff]  ;;  %v3314_v26 = vadd.f32 %v9151_v56, %v9071_v17 }
 0x3a9   :  { %1267 = vrot.lane.b32.xlu1 %v9058_v28, %s6519_s29  ;;  %1073 = vrot.lane.b32.xlu0 %v943_v51, %s6520_s30  ;;  %v2533_v54 = vsel %vm2484_vm9, %v2468_v0, %v9045_v27  ;;  %v596_v36 = vrot.slane %v9136_v14, 1  ;;  %v597_v5 = vrot.slane %v9144_v46, 1  ;;  %v339_v0 = vld [vmem:[#allocation2 + $0x310] sm:$0x3] }
 0x3aa   :  { %5958 = vmatprep.mubr.msk.f32.mxu0 %vm2885_vm15, %v2856_v43  ;;  %v2598_v41 = vsel %vm2549_vm10, %v2533_v54, %v9062_v57  ;;  %v3500_v15 = vmax.f32 %v3314_v26, 0.0  ;;  %v950_v26 = vrot.slane %v9144_v46, 2 }
 0x3ab   :  { %v9093_v3 = vpop.permute.xlu1 %1457  ;;  %v9095_v7 = vpop.permute.xlu0 %706 }
 0x3ad   :  { %2069 = vrot.lane.b32.xlu1 %v593_v60, %s6525_s26  ;;  %1867 = vrot.lane.b32.xlu0 %v9066_v39, %s6524_s17 }
 0x3af   :  { %v2258_v33 = vpop.permute.xlu1 %2257  ;;  %v1658_v29 = vpop.permute.xlu0 %1657 }
 0x3b0   :  { %v2857_v48 = vsel %vm2809_vm14, %v2792_v42, %v2258_v33  ;;  %v2663_v27 = vsel %vm2614_vm11, %v2598_v41, %v1658_v29  ;;  %v2404_v29 = vsel %vm96_vm0, %v8621_v1, %v9038_v10  ;;  %v949_v41 = vrot.slane %v9136_v14, 2 }
 0x3b1   :  { %1471 = vrot.lane.b32.xlu1 %v593_v60, %s6522_s11  ;;  %1269 = vrot.lane.b32.xlu0 %v9066_v39, %s6519_s29 }
 0x3b2   :  { %5959 = vmatmul.mubr.msk.f32.gmra.mrb[46].mxu0 %vm2885_vm15, %v2857_v48 }
 0x3b3   :  { %v9114_v51 = vpop.permute.xlu1 %1059  ;;  %v9116_v18 = vpop.permute.xlu0 %708 }
 0x3b5   :  { %2271 = vrot.lane.b32.xlu1 %v946_v11, %s6527_s1  ;;  %2071 = vrot.lane.b32.xlu0 %v595_v52, %s6525_s26 }
 0x3b7   :  { %v1854_v63 = vpop.permute.xlu1 %1853  ;;  %v1660_v44 = vpop.permute.xlu0 %1659 }
 0x3b8   :  { %v2728_v57 = vsel %vm2679_vm12, %v2663_v27, %v1854_v63  ;;  %v598_v63 = vsel %vm445_vm4, %v596_v36, %v597_v5  ;;  %v952_v36 = vrot.slane %v339_v0, 2 }
 0x3b9   :  { %1473 = vrot.lane.b32.xlu1 %v595_v52, %s6522_s11  ;;  %722 = vrot.lane.b32.xlu0 %v593_v60, %s6521_s10  ;;  %v3309_v60 = vadd.f32 %v9151_v56, %v3308_v8 }
 0x3bb   :  { %v9123_v24 = vpop.permute.xlu1 %1255  ;;  %v9125_v22 = vpop.permute.xlu0 %1061  ;;  %v3499_v48 = vmax.f32 %v3309_v60, 0.0  ;;  %v599_v60 = vrot.slane %v339_v0, 1 }
 0x3bd   :  { %2273 = vrot.lane.b32.xlu1 %v948_v55, %s6527_s1  ;;  %1673 = vrot.lane.b32.xlu0 %v946_v11, %s6523_s14 }
 0x3bf   :  { %v2058_v13 = vpop.permute.xlu1 %2057  ;;  %v1856_v19 = vpop.permute.xlu0 %1855 }
 0x3c0   :  { %v2793_v17 = vsel %vm2744_vm13, %v2728_v57, %v2058_v13  ;;  %v600_v57 = vsel %vm445_vm4, %v597_v5, %v599_v60 }
 0x3c1   :  { %1075 = vrot.lane.b32.xlu1 %v946_v11, %s6520_s30  ;;  %724 = vrot.lane.b32.xlu0 %v595_v52, %s6521_s10  ;;  %v2469_v52 = vsel %vm2419_vm8, %v2404_v29, %v9047_v31 }
 0x3c2   :  { %v2534_v13 = vsel %vm2484_vm9, %v2469_v52, %v9064_v12 }
 0x3c3   :  { %v9140_v43 = vpop.permute.xlu1 %1459  ;;  %v9142_v45 = vpop.permute.xlu0 %1257 }
 0x3c5   :  { %v5942_v21 = vpop.f32.mrb[34].mxu0  ;;  %1869 = vrot.lane.b32.xlu1 %v9136_v14, %s6524_s17  ;;  %1675 = vrot.lane.b32.xlu0 %v948_v55, %s6523_s14 }
 0x3c6   :  { %v3324_v35 = vadd.f32 %v9151_v56, %v5942_v21  ;;  %v3318_v37 = vpop.f32.mrb[35].mxu0 }
 0x3c7   :  { %v3319_v8 = vadd.f32 %v9151_v56, %v3318_v37  ;;  %v2260_v30 = vpop.permute.xlu1 %2259  ;;  %v2060_v9 = vpop.permute.xlu0 %2059 }
 0x3c8   :  { %v3502_v42 = vmax.f32 %v3324_v35, 0.0  ;;  %v2858_v33 = vsel %vm2809_vm14, %v2793_v17, %v2260_v30  ;;  %v953_v30 = vsel %vm798_vm3, %v950_v26, %v952_v36 }
 0x3c9   :  { %v3501_v11 = vmax.f32 %v3319_v8, 0.0  ;;  %1271 = vrot.lane.b32.xlu1 %v9136_v14, %s6519_s29  ;;  %1077 = vrot.lane.b32.xlu0 %v948_v55, %s6520_s30  ;;  %v2599_v55 = vsel %vm2549_vm10, %v2534_v13, %v9093_v3 }
 0x3ca   :  { %v3548_v34 = vmax.f32 %v3500_v15, %v3502_v42  ;;  %5961 = vmatprep.mubr.msk.f32.mxu0 %vm2885_vm15, %v2858_v33  ;;  %v2664_v54 = vsel %vm2614_vm11, %v2599_v55, %v1660_v44  ;;  %v2405_v33 = vsel %vm96_vm0, %v8702_v49, %v9095_v7 }
 0x3cb   :  { %v3547_v4 = vmax.f32 %v3499_v48, %v3501_v11  ;;  %v9179_v1 = vpop.permute.xlu1 %1461  ;;  %v9181_v10 = vpop.permute.xlu0 %710  ;;  %v2729_v12 = vsel %vm2679_vm12, %v2664_v54, %v1856_v19  ;;  %v951_v19 = vsel %vm798_vm3, %v949_v41, %v950_v26  ;;  %v2470_v29 = vsel %vm2419_vm8, %v2405_v33, %v9114_v51  ;;  %v9226_v48 = vld [vmem:[#allocation2 + $0x318] sm:$0xff] }
 0x3cc   :  { %v2794_v27 = vsel %vm2744_vm13, %v2729_v12, %v2060_v9  ;;  %v2535_v11 = vsel %vm2484_vm9, %v2470_v29, %v9123_v24  ;;  %v2406_v41 = vsel %vm96_vm0, %v8713_v53, %v9116_v18  ;;  %v342_v53 = vld [vmem:[#allocation2 + $0x328] sm:$0x3] }
 0x3cd   :  { %2073 = vrot.lane.b32.xlu1 %v598_v63, %s6525_s26  ;;  %1871 = vrot.lane.b32.xlu0 %v9144_v46, %s6524_s17  ;;  %v9189_v31 = vpack.c.bf16 %v3548_v34, %v3547_v4  ;;  %v2600_v49 = vsel %vm2549_vm10, %v2535_v11, %v9140_v43  ;;  %v601_v4 = vrot.slane %v9226_v48, 1  ;;  %v2471_v26 = vsel %vm2419_vm8, %v2406_v41, %v9125_v22 }
 0x3ce   :  { %v957_v29 = vrot.slane %v342_v53, 2 }
 0x3cf   :  { %6070 = vmatprep.subr.bf16.mxu1 %v9189_v31  ;;  %v2262_v3 = vpop.permute.xlu1 %2261  ;;  %v1662_v44 = vpop.permute.xlu0 %1661 }
 0x3d0   :  { %v2859_v21 = vsel %vm2809_vm14, %v2794_v27, %v2262_v3  ;;  %6072 = vmatpush3.bf16.msra.mxu1 %v7745_v58  ;;  %v2665_v7 = vsel %vm2614_vm11, %v2600_v49, %v1662_v44  ;;  %v2536_v27 = vsel %vm2484_vm9, %v2471_v26, %v9142_v45 }
 0x3d1   :  { %1475 = vrot.lane.b32.xlu1 %v598_v63, %s6522_s11  ;;  %1273 = vrot.lane.b32.xlu0 %v9144_v46, %s6519_s29  ;;  %v2601_v18 = vsel %vm2549_vm10, %v2536_v27, %v9179_v1  ;;  %v9310_v27 = vld [vmem:[#allocation2 + $0x338] sm:$0xff] }
 0x3d2   :  { %5962 = vmatmul.mubr.msk.f32.gmra.mrb[48].mxu0 %vm2885_vm15, %v2859_v21 }
 0x3d3   :  { %v9204_v35 = vpop.permute.xlu1 %1063  ;;  %v9206_v37 = vpop.permute.xlu0 %712 }
 0x3d5   :  { %2275 = vrot.lane.b32.xlu1 %v951_v19, %s6527_s1  ;;  %2075 = vrot.lane.b32.xlu0 %v600_v57, %s6525_s26 }
 0x3d7   :  { %v1858_v17 = vpop.permute.xlu1 %1857  ;;  %v1664_v8 = vpop.permute.xlu0 %1663 }
 0x3d8   :  { %v2730_v51 = vsel %vm2679_vm12, %v2665_v7, %v1858_v17  ;;  %v2666_v21 = vsel %vm2614_vm11, %v2601_v18, %v1664_v8 }
 0x3d9   :  { %1477 = vrot.lane.b32.xlu1 %v600_v57, %s6522_s11  ;;  %726 = vrot.lane.b32.xlu0 %v598_v63, %s6521_s10  ;;  %v9234_v63 = vld [vmem:[#allocation2 + $0x320] sm:$0xff] }
 0x3da   :  { %v602_v0 = vrot.slane %v9234_v63, 1  ;;  %v955_v45 = vrot.slane %v9234_v63, 2 }
 0x3db   :  { %v9213_v9 = vpop.permute.xlu1 %1259  ;;  %v9215_v5 = vpop.permute.xlu0 %1065 }
 0x3dc   :  { %v603_v60 = vsel %vm445_vm4, %v601_v4, %v602_v0  ;;  %v958_v7 = vsel %vm798_vm3, %v955_v45, %v957_v29 }
 0x3dd   :  { %2277 = vrot.lane.b32.xlu1 %v953_v30, %s6527_s1  ;;  %1677 = vrot.lane.b32.xlu0 %v951_v19, %s6523_s14 }
 0x3df   :  { %v2062_v15 = vpop.permute.xlu1 %2061  ;;  %v1860_v42 = vpop.permute.xlu0 %1859 }
 0x3e0   :  { %v2795_v55 = vsel %vm2744_vm13, %v2730_v51, %v2062_v15  ;;  %v2731_v22 = vsel %vm2679_vm12, %v2666_v21, %v1860_v42 }
 0x3e1   :  { %1079 = vrot.lane.b32.xlu1 %v951_v19, %s6520_s30  ;;  %728 = vrot.lane.b32.xlu0 %v600_v57, %s6521_s10  ;;  %v954_v19 = vrot.slane %v9226_v48, 2  ;;  %v604_v57 = vrot.slane %v342_v53, 1 }
 0x3e3   :  { %v9230_v52 = vpop.permute.xlu1 %1463  ;;  %v9232_v34 = vpop.permute.xlu0 %1261  ;;  %v956_v8 = vsel %vm798_vm3, %v954_v19, %v955_v45  ;;  %v605_v15 = vsel %vm445_vm4, %v602_v0, %v604_v57 }
 0x3e5   :  { %v9239_v13 = vpop.f32.mrb[36].mxu0  ;;  %1873 = vrot.lane.b32.xlu1 %v9226_v48, %s6524_s17  ;;  %1679 = vrot.lane.b32.xlu0 %v953_v30, %s6523_s14 }
 0x3e6   :  { %v3328_v24 = vpop.f32.mrb[37].mxu0 }
 0x3e7   :  { %v2264_v54 = vpop.permute.xlu1 %2263  ;;  %v2064_v43 = vpop.permute.xlu0 %2063  ;;  %v3329_v53 = vadd.f32 %v9151_v56, %v3328_v24 }
 0x3e8   :  { %v2860_v12 = vsel %vm2809_vm14, %v2795_v55, %v2264_v54  ;;  %v2796_v36 = vsel %vm2744_vm13, %v2731_v22, %v2064_v43  ;;  %v2407_v54 = vsel %vm96_vm0, %v8790_v23, %v9181_v10  ;;  %v3334_v10 = vadd.f32 %v9151_v56, %v9239_v13 }
 0x3e9   :  { %1275 = vrot.lane.b32.xlu1 %v9226_v48, %s6519_s29  ;;  %1081 = vrot.lane.b32.xlu0 %v953_v30, %s6520_s30  ;;  %v2472_v43 = vsel %vm2419_vm8, %v2407_v54, %v9204_v35 }
 0x3ea   :  { %5964 = vmatprep.mubr.msk.f32.mxu0 %vm2885_vm15, %v2860_v12  ;;  %v343_v12 = vld [vmem:[#allocation2 + $0x330] sm:$0xff]  ;;  %v2537_v41 = vsel %vm2484_vm9, %v2472_v43, %v9213_v9 }
 0x3eb   :  { %v9261_v3 = vpop.permute.xlu1 %1465  ;;  %v9263_v44 = vpop.permute.xlu0 %714  ;;  %v2602_v23 = vsel %vm2549_vm10, %v2537_v41, %v9230_v52  ;;  %v1354_v22 = vrot.slane %v343_v12, 1  ;;  %v1355_v52 = vrot.slane %v9310_v27, 1 }
 0x3ed   :  { %2077 = vrot.lane.b32.xlu1 %v603_v60, %s6525_s26  ;;  %1875 = vrot.lane.b32.xlu0 %v9234_v63, %s6524_s17 }
 0x3ef   :  { %v2266_v17 = vpop.permute.xlu1 %2265  ;;  %v1666_v30 = vpop.permute.xlu0 %1665 }
 0x3f0   :  { %v2861_v1 = vsel %vm2809_vm14, %v2796_v36, %v2266_v17  ;;  %v2667_v35 = vsel %vm2614_vm11, %v2602_v23, %v1666_v30  ;;  %v3504_v36 = vmax.f32 %v3334_v10, 0.0  ;;  %v1556_v10 = vrot.slane %v343_v12, 2 }
 0x3f1   :  { %1479 = vrot.lane.b32.xlu1 %v603_v60, %s6522_s11  ;;  %1277 = vrot.lane.b32.xlu0 %v9234_v63, %s6519_s29 }
 0x3f2   :  { %5965 = vmatmul.mubr.msk.f32.gmra.mrb[50].mxu0 %vm2885_vm15, %v2861_v1  ;;  %v2408_v1 = vsel %vm96_vm0, %v8801_v40, %v9206_v37  ;;  %v345_v37 = vld [vmem:[#allocation2 + $0x340] sm:$0x3] }
 0x3f3   :  { %v9282_v42 = vpop.permute.xlu1 %1067  ;;  %v9284_v33 = vpop.permute.xlu0 %716  ;;  %v2473_v29 = vsel %vm2419_vm8, %v2408_v1, %v9215_v5 }
 0x3f4   :  { %v2538_v54 = vsel %vm2484_vm9, %v2473_v29, %v9232_v34 }
 0x3f5   :  { %2279 = vrot.lane.b32.xlu1 %v956_v8, %s6527_s1  ;;  %2079 = vrot.lane.b32.xlu0 %v605_v15, %s6525_s26 }
 0x3f7   :  { %v1862_v11 = vpop.permute.xlu1 %1861  ;;  %v1668_v49 = vpop.permute.xlu0 %1667 }
 0x3f8   :  { %v2732_v9 = vsel %vm2679_vm12, %v2667_v35, %v1862_v11  ;;  %v1357_v35 = vrot.slane %v345_v37, 1 }
 0x3f9   :  { %1481 = vrot.lane.b32.xlu1 %v605_v15, %s6522_s11  ;;  %730 = vrot.lane.b32.xlu0 %v603_v60, %s6521_s10 }
 0x3fb   :  { %v9291_v51 = vpop.permute.xlu1 %1263  ;;  %v9293_v4 = vpop.permute.xlu0 %1069 }
 0x3fd   :  { %2281 = vrot.lane.b32.xlu1 %v958_v7, %s6527_s1  ;;  %1681 = vrot.lane.b32.xlu0 %v956_v8, %s6523_s14 }
 0x3ff   :  { %v2066_v0 = vpop.permute.xlu1 %2065  ;;  %v1864_v55 = vpop.permute.xlu0 %1863 }
 0x400   :  { %v2797_v45 = vsel %vm2744_vm13, %v2732_v9, %v2066_v0  ;;  %v1356_v0 = vsel %vm445_vm4, %v1354_v22, %v1355_v52 }
 0x401   :  { %1083 = vrot.lane.b32.xlu1 %v956_v8, %s6520_s30  ;;  %732 = vrot.lane.b32.xlu0 %v605_v15, %s6521_s10  ;;  %v3503_v8 = vmax.f32 %v3329_v53, 0.0  ;;  %v1557_v53 = vrot.slane %v9310_v27, 2 }
 0x403   :  { %v9306_v26 = vpop.permute.xlu1 %1467  ;;  %v9308_v60 = vpop.permute.xlu0 %1265 }
 0x405   :  { %v5948_v18 = vpop.f32.mrb[38].mxu0  ;;  %1877 = vrot.lane.b32.xlu1 %v343_v12, %s6524_s17  ;;  %1683 = vrot.lane.b32.xlu0 %v958_v7, %s6523_s14 }
 0x406   :  { %v3344_v21 = vadd.f32 %v9151_v56, %v5948_v18  ;;  %v3338_v19 = vpop.f32.mrb[39].mxu0 }
 0x407   :  { %v3339_v13 = vadd.f32 %v9151_v56, %v3338_v19  ;;  %v2268_v24 = vpop.permute.xlu1 %2267  ;;  %v2068_v57 = vpop.permute.xlu0 %2067  ;;  %v1559_v19 = vrot.slane %v345_v37, 2 }
 0x408   :  { %v3506_v17 = vmax.f32 %v3344_v21, 0.0  ;;  %v2862_v30 = vsel %vm2809_vm14, %v2797_v45, %v2268_v24 }
 0x409   :  { %v3505_v15 = vmax.f32 %v3339_v13, 0.0  ;;  %1279 = vrot.lane.b32.xlu1 %v343_v12, %s6519_s29  ;;  %1085 = vrot.lane.b32.xlu0 %v958_v7, %s6520_s30  ;;  %v2603_v7 = vsel %vm2549_vm10, %v2538_v54, %v9261_v3  ;;  %v1358_v12 = vsel %vm445_vm4, %v1355_v52, %v1357_v35 }
 0x40a   :  { %v3550_v11 = vmax.f32 %v3504_v36, %v3506_v17  ;;  %5967 = vmatprep.mubr.msk.f32.mxu0 %vm2885_vm15, %v2862_v30  ;;  %v2668_v23 = vsel %vm2614_vm11, %v2603_v7, %v1668_v49  ;;  %v346_v36 = vld [vmem:[#allocation2 + $0x348] sm:$0xff]  ;;  %v348_v17 = vld [vmem:[#allocation2 + $0x358] sm:$0x3] }
 0x40b   :  { %v3549_v43 = vmax.f32 %v3503_v8, %v3505_v15  ;;  %v9337_v41 = vpop.permute.xlu1 %1469  ;;  %v9339_v40 = vpop.permute.xlu0 %718  ;;  %v2733_v34 = vsel %vm2679_vm12, %v2668_v23, %v1864_v55  ;;  %v1558_v55 = vsel %vm798_vm3, %v1556_v10, %v1557_v53  ;;  %v1956_v1 = vrot.slane %v346_v36, 1 }
 0x40c   :  { %v2798_v18 = vsel %vm2744_vm13, %v2733_v34, %v2068_v57  ;;  %v347_v57 = vld [vmem:[#allocation2 + $0x350] sm:$0xff]  ;;  %v1959_v8 = vrot.slane %v348_v17, 1  ;;  %v2158_v54 = vrot.slane %v346_v36, 2  ;;  %v2161_v23 = vrot.slane %v348_v17, 2 }
 0x40d   :  { %2081 = vrot.lane.b32.xlu1 %v1356_v0, %s6525_s26  ;;  %1879 = vrot.lane.b32.xlu0 %v9310_v27, %s6524_s17  ;;  %v9347_v5 = vpack.c.bf16 %v3550_v11, %v3549_v43  ;;  %v1957_v30 = vrot.slane %v347_v57, 1  ;;  %v2409_v11 = vsel %vm96_vm0, %v8882_v38, %v9263_v44 }
 0x40e   :  { %v2474_v43 = vsel %vm2419_vm8, %v2409_v11, %v9282_v42 }
 0x40f   :  { %6074 = vmatprep.subr.bf16.mxu1 %v9347_v5  ;;  %v2270_v3 = vpop.permute.xlu1 %2269  ;;  %v1670_v9 = vpop.permute.xlu0 %1669  ;;  %v1960_v37 = vsel %vm445_vm4, %v1957_v30, %v1959_v8  ;;  %v1958_v7 = vsel %vm445_vm4, %v1956_v1, %v1957_v30  ;;  %v2539_v34 = vsel %vm2484_vm9, %v2474_v43, %v9291_v51 }
 0x410   :  { %v2863_v49 = vsel %vm2809_vm14, %v2798_v18, %v2270_v3  ;;  %6076 = vmatpush3.bf16.msra.mxu1 %v7920_v62  ;;  %v2604_v38 = vsel %vm2549_vm10, %v2539_v34, %v9306_v26 }
 0x411   :  { %1483 = vrot.lane.b32.xlu1 %v1356_v0, %s6522_s11  ;;  %1281 = vrot.lane.b32.xlu0 %v9310_v27, %s6519_s29  ;;  %v1560_v27 = vsel %vm798_vm3, %v1557_v53, %v1559_v19  ;;  %v2159_v0 = vrot.slane %v347_v57, 2  ;;  %v2669_v44 = vsel %vm2614_vm11, %v2604_v38, %v1670_v9  ;;  %v2410_v9 = vsel %vm96_vm0, %v8893_v50, %v9284_v33 }
 0x412   :  { %5968 = vmatmul.mubr.msk.f32.gmra.mrb[52].mxu0 %vm2885_vm15, %v2863_v49  ;;  %v2475_v19 = vsel %vm2419_vm8, %v2410_v9, %v9293_v4 }
 0x413   :  { %v9361_v21 = vpop.permute.xlu1 %1071  ;;  %v9363_v22 = vpop.permute.xlu0 %720  ;;  %v2162_v3 = vsel %vm798_vm3, %v2159_v0, %v2161_v23  ;;  %v2160_v51 = vsel %vm798_vm3, %v2158_v54, %v2159_v0 }
 0x415   :  { %2283 = vrot.lane.b32.xlu1 %v1558_v55, %s6527_s1  ;;  %2083 = vrot.lane.b32.xlu0 %v1358_v12, %s6525_s26 }
 0x417   :  { %v1866_v45 = vpop.permute.xlu1 %1865  ;;  %v1672_v13 = vpop.permute.xlu0 %1671 }
 0x418   :  { %v2734_v42 = vsel %vm2679_vm12, %v2669_v44, %v1866_v45  ;;  %v2540_v45 = vsel %vm2484_vm9, %v2475_v19, %v9308_v60 }
 0x419   :  { %1685 = vrot.lane.b32.xlu1 %v1558_v55, %s6523_s14  ;;  %1485 = vrot.lane.b32.xlu0 %v1358_v12, %s6522_s11 }
 0x41b   :  { %v9370_v24 = vpop.permute.xlu1 %1267  ;;  %v9372_v52 = vpop.permute.xlu0 %1073 }
 0x41d   :  { %1687 = vrot.lane.b32.xlu1 %v1560_v27, %s6523_s14  ;;  %2285 = vrot.lane.b32.xlu0 %v1560_v27, %s6527_s1 }
 0x41f   :  { %v2070_v15 = vpop.permute.xlu1 %2069  ;;  %v1868_v29 = vpop.permute.xlu0 %1867 }
 0x420   :  { %v2799_v49 = vsel %vm2744_vm13, %v2734_v42, %v2070_v15 }
 0x421   :  { %1883 = vrot.lane.b32.xlu1 %v347_v57, %s6524_s17  ;;  %1881 = vrot.lane.b32.xlu0 %v346_v36, %s6524_s17  ;;  %v2605_v36 = vsel %vm2549_vm10, %v2540_v45, %v9337_v41 }
 0x422   :  { %v2670_v50 = vsel %vm2614_vm11, %v2605_v36, %v1672_v13 }
 0x423   :  { %v1472_v10 = vpop.permute.xlu1 %1471  ;;  %v9387_v53 = vpop.permute.xlu0 %1269  ;;  %v2735_v33 = vsel %vm2679_vm12, %v2670_v50, %v1868_v29  ;;  %v2411_v29 = vsel %vm96_vm0, %v8970_v20, %v9339_v40 }
 0x424   :  { %v2476_v43 = vsel %vm2419_vm8, %v2411_v29, %v9361_v21 }
 0x425   :  { %v5951_v35 = vpop.f32.mrb[40].mxu0  ;;  %2087 = vrot.lane.b32.xlu1 %v1960_v37, %s6525_s26  ;;  %2085 = vrot.lane.b32.xlu0 %v1958_v7, %s6525_s26  ;;  %v2541_v37 = vsel %vm2484_vm9, %v2476_v43, %v9370_v24 }
 0x426   :  { %v3348_v18 = vpop.f32.mrb[41].mxu0  ;;  %v2606_v34 = vsel %vm2549_vm10, %v2541_v37, %v1472_v10  ;;  %v3354_v38 = vadd.f32 %v9151_v56, %v5951_v35 }
 0x427   :  { %v2272_v55 = vpop.permute.xlu1 %2271  ;;  %v2072_v12 = vpop.permute.xlu0 %2071  ;;  %v3349_v44 = vadd.f32 %v9151_v56, %v3348_v18  ;;  %v2412_v18 = vsel %vm96_vm0, %v8981_v6, %v9363_v22 }
 0x428   :  { %v2864_v26 = vsel %vm2809_vm14, %v2799_v49, %v2272_v55  ;;  %v2800_v17 = vsel %vm2744_vm13, %v2735_v33, %v2072_v12  ;;  %v3508_v12 = vmax.f32 %v3354_v38, 0.0  ;;  %v2477_v19 = vsel %vm2419_vm8, %v2412_v18, %v9372_v52 }
 0x429   :  { %2289 = vrot.lane.b32.xlu1 %v2162_v3, %s6527_s1  ;;  %2287 = vrot.lane.b32.xlu0 %v2160_v51, %s6527_s1  ;;  %v2542_v36 = vsel %vm2484_vm9, %v2477_v19, %v9387_v53 }
 0x42a   :  { %5970 = vmatprep.mubr.msk.f32.mxu0 %vm2885_vm15, %v2864_v26  ;;  %v3507_v26 = vmax.f32 %v3349_v44, 0.0 }
 0x42b   :  { %v1474_v27 = vpop.permute.xlu1 %1473  ;;  %v9409_v57 = vpop.permute.xlu0 %722 }
 0x42c   :  { %v2413_v38 = vsel %vm96_vm0, %v9058_v28, %v9409_v57 }
 0x42f   :  { %v2274_v30 = vpop.permute.xlu1 %2273  ;;  %v1674_v1 = vpop.permute.xlu0 %1673 }
 0x430   :  { %v2865_v4 = vsel %vm2809_vm14, %v2800_v17, %v2274_v30  ;;  %v2671_v42 = vsel %vm2614_vm11, %v2606_v34, %v1674_v1  ;;  %v2607_v30 = vsel %vm2549_vm10, %v2542_v36, %v1474_v27 }
 0x431   :  { %5971 = vmatmul.mubr.msk.f32.gmra.mrb[54].mxu0 %vm2885_vm15, %v2865_v4 }
 0x433   :  { %v1076_v8 = vpop.permute.xlu1 %1075  ;;  %v9418_v60 = vpop.permute.xlu0 %724 }
 0x434   :  { %v2478_v44 = vsel %vm2419_vm8, %v2413_v38, %v1076_v8  ;;  %v2414_v57 = vsel %vm96_vm0, %v9066_v39, %v9418_v60 }
 0x437   :  { %v1870_v15 = vpop.permute.xlu1 %1869  ;;  %v1676_v11 = vpop.permute.xlu0 %1675 }
 0x438   :  { %v2736_v20 = vsel %vm2679_vm12, %v2671_v42, %v1870_v15  ;;  %v2672_v1 = vsel %vm2614_vm11, %v2607_v30, %v1676_v11 }
 0x43b   :  { %v1272_v0 = vpop.permute.xlu1 %1271  ;;  %v9420_v54 = vpop.permute.xlu0 %1077 }
 0x43c   :  { %v2543_v42 = vsel %vm2484_vm9, %v2478_v44, %v1272_v0  ;;  %v2479_v8 = vsel %vm2419_vm8, %v2414_v57, %v9420_v54 }
 0x43f   :  { %v2074_v41 = vpop.permute.xlu1 %2073  ;;  %v1872_v13 = vpop.permute.xlu0 %1871 }
 0x440   :  { %v2801_v51 = vsel %vm2744_vm13, %v2736_v20, %v2074_v41  ;;  %v2737_v6 = vsel %vm2679_vm12, %v2672_v1, %v1872_v13 }
 0x443   :  { %v1476_v7 = vpop.permute.xlu1 %1475  ;;  %v9429_v23 = vpop.permute.xlu0 %1273 }
 0x444   :  { %v2544_v0 = vsel %vm2484_vm9, %v2479_v8, %v9429_v23 }
 0x445   :  { %v5954_v3 = vpop.f32.mrb[42].mxu0 }
 0x446   :  { %v3364_v40 = vadd.f32 %v9151_v56, %v5954_v3  ;;  %v3358_v21 = vpop.f32.mrb[43].mxu0 }
 0x447   :  { %v3359_v24 = vadd.f32 %v9151_v56, %v3358_v21  ;;  %v2276_v49 = vpop.permute.xlu1 %2275  ;;  %v2076_v55 = vpop.permute.xlu0 %2075 }
 0x448   :  { %v3510_v10 = vmax.f32 %v3364_v40, 0.0  ;;  %v2866_v35 = vsel %vm2809_vm14, %v2801_v51, %v2276_v49  ;;  %v2802_v22 = vsel %vm2744_vm13, %v2737_v6, %v2076_v55  ;;  %v2608_v40 = vsel %vm2549_vm10, %v2543_v42, %v1476_v7 }
 0x449   :  { %v3509_v9 = vmax.f32 %v3359_v24, 0.0  ;;  %5973 = vmatprep.mubr.msk.f32.mxu0 %vm2885_vm15, %v2866_v35 }
 0x44a   :  { %v3552_v45 = vmax.f32 %v3508_v12, %v3510_v10 }
 0x44b   :  { %v3551_v50 = vmax.f32 %v3507_v26, %v3509_v9  ;;  %v1478_v33 = vpop.permute.xlu1 %1477  ;;  %v727_v17 = vpop.permute.xlu0 %726 }
 0x44c   :  { %v2609_v18 = vsel %vm2549_vm10, %v2544_v0, %v1478_v33 }
 0x44d   :  { %v9450_v4 = vpack.c.bf16 %v3552_v45, %v3551_v50 }
 0x44f   :  { %6078 = vmatprep.subr.bf16.mxu1 %v9450_v4  ;;  %v2278_v52 = vpop.permute.xlu1 %2277  ;;  %v1678_v15 = vpop.permute.xlu0 %1677 }
 0x450   :  { %v2867_v41 = vsel %vm2809_vm14, %v2802_v22, %v2278_v52  ;;  %6080 = vmatpush3.bf16.msra.mxu1 %v8118_v59  ;;  %v2673_v21 = vsel %vm2614_vm11, %v2608_v40, %v1678_v15  ;;  %v2415_v22 = vsel %vm96_vm0, %v9136_v14, %v727_v17 }
 0x451   :  { %5974 = vmatmul.mubr.msk.f32.gmra.mrb[56].mxu0 %vm2885_vm15, %v2867_v41 }
 0x453   :  { %v1080_v53 = vpop.permute.xlu1 %1079  ;;  %v9458_v27 = vpop.permute.xlu0 %728 }
 0x454   :  { %v2480_v52 = vsel %vm2419_vm8, %v2415_v22, %v1080_v53 }
 0x457   :  { %v1874_v11 = vpop.permute.xlu1 %1873  ;;  %v1680_v29 = vpop.permute.xlu0 %1679 }
 0x458   :  { %v2738_v24 = vsel %vm2679_vm12, %v2673_v21, %v1874_v11  ;;  %v2674_v26 = vsel %vm2614_vm11, %v2609_v18, %v1680_v29 }
 0x45b   :  { %v1276_v43 = vpop.permute.xlu1 %1275  ;;  %v9460_v37 = vpop.permute.xlu0 %1081 }
 0x45c   :  { %v2545_v15 = vsel %vm2484_vm9, %v2480_v52, %v1276_v43 }
 0x45f   :  { %v2078_v13 = vpop.permute.xlu1 %2077  ;;  %v1876_v34 = vpop.permute.xlu0 %1875 }
 0x460   :  { %v2803_v55 = vsel %vm2744_vm13, %v2738_v24, %v2078_v13  ;;  %v2739_v9 = vsel %vm2679_vm12, %v2674_v26, %v1876_v34 }
 0x463   :  { %v1480_v3 = vpop.permute.xlu1 %1479  ;;  %v1278_v20 = vpop.permute.xlu0 %1277 }
 0x464   :  { %v2610_v29 = vsel %vm2549_vm10, %v2545_v15, %v1480_v3 }
 0x465   :  { %v5957_v51 = vpop.f32.mrb[44].mxu0 }
 0x466   :  { %v3368_v49 = vpop.f32.mrb[45].mxu0  ;;  %v3374_v13 = vadd.f32 %v9151_v56, %v5957_v51 }
 0x467   :  { %v2280_v12 = vpop.permute.xlu1 %2279  ;;  %v2080_v10 = vpop.permute.xlu0 %2079  ;;  %v3369_v34 = vadd.f32 %v9151_v56, %v3368_v49  ;;  %v2416_v49 = vsel %vm96_vm0, %v9144_v46, %v9458_v27 }
 0x468   :  { %v2868_v28 = vsel %vm2809_vm14, %v2803_v55, %v2280_v12  ;;  %v2804_v19 = vsel %vm2744_vm13, %v2739_v9, %v2080_v10  ;;  %v3512_v24 = vmax.f32 %v3374_v13, 0.0  ;;  %v2481_v10 = vsel %vm2419_vm8, %v2416_v49, %v9460_v37 }
 0x469   :  { %5976 = vmatprep.mubr.msk.f32.mxu0 %vm2885_vm15, %v2868_v28  ;;  %v3511_v55 = vmax.f32 %v3369_v34, 0.0  ;;  %v2546_v57 = vsel %vm2484_vm9, %v2481_v10, %v1278_v20 }
 0x46b   :  { %v1482_v7 = vpop.permute.xlu1 %1481  ;;  %v731_v35 = vpop.permute.xlu0 %730 }
 0x46c   :  { %v2611_v26 = vsel %vm2549_vm10, %v2546_v57, %v1482_v7  ;;  %v3563_v57 = vlaneseq }
 0x46f   :  { %v2282_v45 = vpop.permute.xlu1 %2281  ;;  %v1682_v39 = vpop.permute.xlu0 %1681 }
 0x470   :  { %v2869_v60 = vsel %vm2809_vm14, %v2804_v19, %v2282_v45  ;;  %v2675_v38 = vsel %vm2614_vm11, %v2610_v29, %v1682_v39 }
 0x471   :  { %5977 = vmatmul.mubr.msk.f32.gmra.mrb[58].mxu0 %vm2885_vm15, %v2869_v60  ;;  %v2417_v60 = vsel %vm96_vm0, %v9226_v48, %v731_v35 }
 0x473   :  { %v1084_v54 = vpop.permute.xlu1 %1083  ;;  %v733_v36 = vpop.permute.xlu0 %732 }
 0x477   :  { %v1878_v50 = vpop.permute.xlu1 %1877  ;;  %v1684_v23 = vpop.permute.xlu0 %1683 }
 0x478   :  { %v2740_v42 = vsel %vm2679_vm12, %v2675_v38, %v1878_v50  ;;  %v2676_v9 = vsel %vm2614_vm11, %v2611_v26, %v1684_v23  ;;  %v2418_v50 = vsel %vm96_vm0, %v9234_v63, %v733_v36  ;;  %v2482_v23 = vsel %vm2419_vm8, %v2417_v60, %v1084_v54 }
 0x47b   :  { %v1280_v30 = vpop.permute.xlu1 %1279  ;;  %v1086_v1 = vpop.permute.xlu0 %1085 }
 0x47f   :  { %v2082_v6 = vpop.permute.xlu1 %2081  ;;  %v1880_v33 = vpop.permute.xlu0 %1879 }
 0x480   :  { %v2805_v17 = vsel %vm2744_vm13, %v2740_v42, %v2082_v6  ;;  %v2741_v46 = vsel %vm2679_vm12, %v2676_v9, %v1880_v33  ;;  %v2483_v6 = vsel %vm2419_vm8, %v2418_v50, %v1086_v1  ;;  %v2547_v33 = vsel %vm2484_vm9, %v2482_v23, %v1280_v30 }
 0x481   :  { %v6528_v9 = vmov 1.0  }
 0x483   :  { %v1484_v41 = vpop.permute.xlu1 %1483  ;;  %v1282_v11 = vpop.permute.xlu0 %1281 }
 0x484   :  { %v2548_v22 = vsel %vm2484_vm9, %v2483_v6, %v1282_v11  ;;  %v2612_v29 = vsel %vm2549_vm10, %v2547_v33, %v1484_v41 }
 0x485   :  { %v5960_v44 = vpop.f32.mrb[46].mxu0 }
 0x486   :  { %v3384_v40 = vadd.f32 %v9151_v56, %v5960_v44  ;;  %v3378_v14 = vpop.f32.mrb[47].mxu0 }
 0x487   :  { %v3379_v53 = vadd.f32 %v9151_v56, %v3378_v14  ;;  %v2284_v43 = vpop.permute.xlu1 %2283  ;;  %v2084_v21 = vpop.permute.xlu0 %2083 }
 0x488   :  { %v3514_v3 = vmax.f32 %v3384_v40, 0.0  ;;  %v2870_v51 = vsel %vm2809_vm14, %v2805_v17, %v2284_v43  ;;  %v2806_v27 = vsel %vm2744_vm13, %v2741_v46, %v2084_v21 }
 0x489   :  { %v3513_v12 = vmax.f32 %v3379_v53, 0.0  ;;  %5979 = vmatprep.mubr.msk.f32.mxu0 %vm2885_vm15, %v2870_v51 }
 0x48a   :  { %v3554_v28 = vmax.f32 %v3512_v24, %v3514_v3 }
 0x48b   :  { %v3553_v8 = vmax.f32 %v3511_v55, %v3513_v12  ;;  %v1686_v0 = vpop.permute.xlu1 %1685  ;;  %v1486_v18 = vpop.permute.xlu0 %1485 }
 0x48c   :  { %v2613_v13 = vsel %vm2549_vm10, %v2548_v22, %v1486_v18  ;;  %v2677_v34 = vsel %vm2614_vm11, %v2612_v29, %v1686_v0  ;;  %v9546_v0 = vand.u32 127, %v3563_v57 }
 0x48d   :  { %v9508_v19 = vpack.c.bf16 %v3554_v28, %v3553_v8  ;;  %v9544_v8 = vshrl.u32 %v3563_v57, 7 }
 0x48e   :  { %v9549_v18 = vadd.s32 128, %v9546_v0 }
 0x48f   :  { %6082 = vmatprep.subr.bf16.mxu1 %v9508_v19  ;;  %v1688_v45 = vpop.permute.xlu1 %1687  ;;  %v2286_v37 = vpop.permute.xlu0 %2285  ;;  %v9552_v26 = vmul.u32 2, %v9544_v8 }
 0x490   :  { %6084 = vmatpush3.bf16.msra.mxu1 %v8298_v61  ;;  %v2871_v20 = vsel %vm2809_vm14, %v2806_v27, %v2286_v37  ;;  %v2678_v48 = vsel %vm2614_vm11, %v2613_v13, %v1688_v45 }
 0x491   :  { %5980 = vmatmul.mubr.msk.f32.gmra.mrb[60].mxu0 %vm2885_vm15, %v2871_v20  ;;  %vm3600_vm0 = vcmp.eq.s32.totalorder %v9549_v18, %v9552_v26  ;;  %vm3599_vm1 = vcmp.eq.s32.totalorder %v9546_v0, %v9552_v26 }
 0x492   :  { %5512 = vmatprep.mubr.msk.f32.mxu1 %vm3600_vm0, %v6528_v9 }
 0x493   :  { %v1884_v39 = vpop.permute.xlu1 %1883  ;;  %v1882_v7 = vpop.permute.xlu0 %1881 }
 0x494   :  { %v2743_v63 = vsel %vm2679_vm12, %v2678_v48, %v1884_v39  ;;  %v2742_v35 = vsel %vm2679_vm12, %v2677_v34, %v1882_v7 }
 0x497   :  { %v2088_v52 = vpop.permute.xlu1 %2087  ;;  %v2086_v15 = vpop.permute.xlu0 %2085 }
 0x498   :  { %v2808_v54 = vsel %vm2744_vm13, %v2743_v63, %v2088_v52  ;;  %v2807_v36 = vsel %vm2744_vm13, %v2742_v35, %v2086_v15 }
 0x49b   :  { %v2290_v30 = vpop.permute.xlu1 %2289  ;;  %v2288_v1 = vpop.permute.xlu0 %2287 }
 0x49c   :  { %v2873_v11 = vsel %vm2809_vm14, %v2808_v54, %v2290_v30  ;;  %v2872_v41 = vsel %vm2809_vm14, %v2807_v36, %v2288_v1 }
 0x49d   :  { %5982 = vmatprep.mubr.msk.f32.mxu0 %vm2885_vm15, %v2872_v41 }
 0x49e   :  { %5983 = vmatmul.mubr.msk.f32.gmra.mrb[62].mxu0 %vm2885_vm15, %v2873_v11 }
 0x4a5   :  { %v5963_v38 = vpop.f32.mrb[48].mxu0 }
 0x4a6   :  { %v3388_v44 = vpop.f32.mrb[49].mxu0  ;;  %v3394_v42 = vadd.f32 %v9151_v56, %v5963_v38 }
 0x4a7   :  { %v3389_v40 = vadd.f32 %v9151_v56, %v3388_v44 }
 0x4a8   :  { %v3516_v21 = vmax.f32 %v3394_v42, 0.0 }
 0x4a9   :  { %v3515_v3 = vmax.f32 %v3389_v40, 0.0 }
 0x4c5   :  { %v5966_v14 = vpop.f32.mrb[50].mxu0 }
 0x4c6   :  { %v3404_v17 = vadd.f32 %v9151_v56, %v5966_v14  ;;  %v3398_v53 = vpop.f32.mrb[51].mxu0 }
 0x4c7   :  { %v3399_v43 = vadd.f32 %v9151_v56, %v3398_v53 }
 0x4c8   :  { %v3518_v24 = vmax.f32 %v3404_v17, 0.0 }
 0x4c9   :  { %v3517_v51 = vmax.f32 %v3399_v43, 0.0 }
 0x4ca   :  { %v3556_v49 = vmax.f32 %v3516_v21, %v3518_v24 }
 0x4cb   :  { %v3555_v55 = vmax.f32 %v3515_v3, %v3517_v51 }
 0x4cd   :  { %v9540_v12 = vpack.c.bf16 %v3556_v49, %v3555_v55  ;;  %v3565_v55 = vadd.s32 8, %v9544_v8 }
 0x4cf   :  { %6086 = vmatprep.subr.bf16.mxu1 %v9540_v12 }
 0x4d0   :  { %6088 = vmatpush3.bf16.msra.mxu1 %v8483_v25 }
 0x4e5   :  { %v5969_v10 = vpop.f32.mrb[52].mxu0 }
 0x4e6   :  { %v3408_v28 = vpop.f32.mrb[53].mxu0  ;;  %v3414_v46 = vadd.f32 %v9151_v56, %v5969_v10 }
 0x4e7   :  { %v3409_v27 = vadd.f32 %v9151_v56, %v3408_v28 }
 0x4e8   :  { %v3520_v7 = vmax.f32 %v3414_v46, 0.0  ;;  %v9578_v46 = vmul.u32 2, %v3565_v55 }
 0x4e9   :  { %v3519_v50 = vmax.f32 %v3409_v27, 0.0  ;;  %v3566_v27 = vadd.s32 16, %v9544_v8 }
 0x4ea   :  { %vm3602_vm2 = vcmp.eq.s32.totalorder %v9549_v18, %v9578_v46  ;;  %vm3601_vm5 = vcmp.eq.s32.totalorder %v9546_v0, %v9578_v46 }
 0x504   :  { %v5972_v45 = vpop.f32.mrb[54].mxu0 }
 0x505   :  { %v3424_v37 = vadd.f32 %v9151_v56, %v5972_v45  ;;  %v3418_v20 = vpop.f32.mrb[55].mxu0  ;;  %v3567_v45 = vadd.s32 24, %v9544_v8 }
 0x506   :  { %v3419_v39 = vadd.f32 %v9151_v56, %v3418_v20  ;;  %v3573_v20 = vadd.s32 72, %v9544_v8 }
 0x507   :  { %v3522_v60 = vmax.f32 %v3424_v37, 0.0  ;;  %v3568_v37 = vadd.s32 32, %v9544_v8 }
 0x508   :  { %v3521_v23 = vmax.f32 %v3419_v39, 0.0  ;;  %v3574_v39 = vadd.s32 80, %v9544_v8 }
 0x509   :  { %v3558_v6 = vmax.f32 %v3520_v7, %v3522_v60  ;;  %v3575_v7 = vadd.s32 88, %v9544_v8  ;;  %v3576_v60 = vadd.s32 96, %v9544_v8 }
 0x50a   :  { %v3557_v33 = vmax.f32 %v3519_v50, %v3521_v23  ;;  %v3577_v23 = vadd.s32 104, %v9544_v8 }
 0x50b   :  { %v9703_v50 = vmul.u32 2, %v3576_v60 }
 0x50c   :  { %v9561_v22 = vpack.c.bf16 %v3558_v6, %v3557_v33  ;;  %v9712_v6 = vmul.u32 2, %v3577_v23  ;;  %v3578_v33 = vadd.s32 112, %v9544_v8 }
 0x50e   :  { %6090 = vmatprep.subr.bf16.mxu1 %v9561_v22 }
 0x50f   :  { %6092 = vmatpush3.bf16.msra.mxu1 %v8663_v32 }
 0x524   :  { %v5975_v52 = vpop.f32.mrb[56].mxu0 }
 0x525   :  { %v3428_v15 = vpop.f32.mrb[57].mxu0  ;;  %v3434_v29 = vadd.f32 %v9151_v56, %v5975_v52  ;;  %v3579_v52 = vadd.s32 120, %v9544_v8 }
 0x526   :  { %v3429_v13 = vadd.f32 %v9151_v56, %v3428_v15 }
 0x527   :  { %v3524_v54 = vmax.f32 %v3434_v29, 0.0  ;;  %v9730_v15 = vmul.u32 2, %v3579_v52  ;;  %v9748_v29 = vadd.s32 1, %v9578_v46  ;;  %v4769_v52 = vld [vmem:[%s10587_s3 + $0x28] sm:$0xff] }
 0x528   :  { %v3523_v30 = vmax.f32 %v3429_v13, 0.0 }
 0x544   :  { %v5978_v34 = vpop.f32.mrb[58].mxu0 }
 0x545   :  { %v3444_v48 = vadd.f32 %v9151_v56, %v5978_v34  ;;  %v3438_v63 = vpop.f32.mrb[59].mxu0 }
 0x546   :  { %v3439_v35 = vadd.f32 %v9151_v56, %v3438_v63 }
 0x547   :  { %v3526_v36 = vmax.f32 %v3444_v48, 0.0 }
 0x548   :  { %v3525_v1 = vmax.f32 %v3439_v35, 0.0 }
 0x549   :  { %v3560_v11 = vmax.f32 %v3524_v54, %v3526_v36 }
 0x54a   :  { %v3559_v41 = vmax.f32 %v3523_v30, %v3525_v1 }
 0x54c   :  { %v9569_v38 = vpack.c.bf16 %v3560_v11, %v3559_v41  ;;  %v3675_v41 = vadd.s32 1, %v9703_v50 }
 0x54e   :  { %6094 = vmatprep.subr.bf16.mxu1 %v9569_v38 }
 0x54f   :  { %6096 = vmatpush3.bf16.msra.mxu1 %v8843_v47 }
 0x564   :  { %v5981_v44 = vpop.f32.mrb[60].mxu0 }
 0x565   :  { %v3448_v42 = vpop.f32.mrb[61].mxu0  ;;  %v3454_v40 = vadd.f32 %v9151_v56, %v5981_v44 }
 0x566   :  { %v3449_v14 = vadd.f32 %v9151_v56, %v3448_v42  ;;  %v3678_v42 = vadd.s32 1, %v9730_v15 }
 0x567   :  { %v3528_v24 = vmax.f32 %v3454_v40, 0.0 }
 0x568   :  { %v3527_v51 = vmax.f32 %v3449_v14, 0.0 }
 0x571   :  { %v5984_v17 = vpop.f32.mrb[62].mxu0 }
 0x572   :  { %v3464_v53 = vadd.f32 %v9151_v56, %v5984_v17  ;;  %v3458_v43 = vpop.f32.mrb[63].mxu0 }
 0x573   :  { %v3459_v21 = vadd.f32 %v9151_v56, %v3458_v43  ;;  %v9587_v56 = vmul.u32 2, %v3566_v27 }
 0x574   :  { %v3530_v3 = vmax.f32 %v3464_v53, 0.0 }
 0x575   :  { %v3529_v49 = vmax.f32 %v3459_v21, 0.0  ;;  %vm3604_vm6 = vcmp.eq.s32.totalorder %v9549_v18, %v9587_v56  ;;  %vm3603_vm7 = vcmp.eq.s32.totalorder %v9546_v0, %v9587_v56  ;;  %v9757_v13 = vadd.s32 1, %v9587_v56 }
 0x576   :  { %v3562_v10 = vmax.f32 %v3528_v24, %v3530_v3  ;;  %v6529_v3 = vmov 0.0|0.0  }
 0x577   :  { %v3561_v28 = vmax.f32 %v3527_v51, %v3529_v49  ;;  %6133 = vmatprep.subr.bf16.mxu0 %v6529_v3  ;;  %v4764_v51 = vld [vmem:[%s10587_s3] sm:$0xff]  ;;  %v4765_v49 = vld [vmem:[%s10587_s3 + $0x8] sm:$0xff] }
 0x578   :  { %v6134_v55 = vpack.c.bf16 %v4765_v49, %v4764_v51 }
 0x579   :  { %v6097_v57 = vpack.c.bf16 %v3562_v10, %v3561_v28 }
 0x57a   :  { %6135 = vmatpush1.bf16.msra.mxu0 %v6134_v55 }
 0x57b   :  { %6098 = vmatprep.subr.bf16.mxu1 %v6097_v57  ;;  %6136 = vmatprep.subr.bf16.mxu0 %v6529_v3 }
 0x57c   :  { %6100 = vmatpush3.bf16.msra.mxu1 %v9023_v16 }
 0x57d   :  { %6102 = vmatprep.subr.bf16.mxu1 %v9189_v31  ;;  %v9601_v31 = vmul.u32 2, %v3567_v45 }
 0x57f   :  { %5513 = vmatmul.mubr.msk.f32.vlgmr.msra.gmra.mrb[0].mxu1 %vm3599_vm1, %v6528_v9  ;;  %vm3606_vm8 = vcmp.eq.s32.totalorder %v9549_v18, %v9601_v31  ;;  %vm3605_vm9 = vcmp.eq.s32.totalorder %v9546_v0, %v9601_v31  ;;  %v9769_v34 = vadd.s32 1, %v9601_v31 }
 0x580   :  { %6104 = vmatpush3.bf16.msra.mxu1 %v7745_v58  ;;  %5514 = vmatprep.mubr.msk.f32.mxu1 %vm3602_vm2, %v6528_v9  ;;  %v9615_v58 = vmul.u32 2, %v3568_v37  ;;  %v3637_v46 = vsel %vm3605_vm9, 1.0, %v6518_v2 }
 0x581   :  { %6106 = vmatprep.subr.bf16.mxu1 %v9347_v5  ;;  %v3569_v5 = vadd.s32 40, %v9544_v8 }
 0x582   :  { %vm3608_vm10 = vcmp.eq.s32.totalorder %v9549_v18, %v9615_v58  ;;  %vm3607_vm11 = vcmp.eq.s32.totalorder %v9546_v0, %v9615_v58  ;;  %v3667_v48 = vadd.s32 1, %v9615_v58 }
 0x583   :  { %5515 = vmatmul.mubr.msk.f32.gmra.mrb[2].mxu1 %vm3601_vm5, %v6528_v9 }
 0x584   :  { %6108 = vmatpush3.bf16.msra.mxu1 %v7920_v62  ;;  %5516 = vmatprep.mubr.msk.f32.mxu1 %vm3604_vm6, %v6528_v9  ;;  %v9629_v62 = vmul.u32 2, %v3569_v5 }
 0x585   :  { %6110 = vmatprep.subr.bf16.mxu1 %v9450_v4  ;;  %v3570_v4 = vadd.s32 48, %v9544_v8 }
 0x586   :  { %vm3610_vm12 = vcmp.eq.s32.totalorder %v9549_v18, %v9629_v62  ;;  %vm3609_vm13 = vcmp.eq.s32.totalorder %v9546_v0, %v9629_v62  ;;  %v3668_v63 = vadd.s32 1, %v9629_v62 }
 0x587   :  { %5517 = vmatmul.mubr.msk.f32.gmra.mrb[4].mxu1 %vm3603_vm7, %v6528_v9 }
 0x588   :  { %6112 = vmatpush3.bf16.msra.mxu1 %v8118_v59  ;;  %5518 = vmatprep.mubr.msk.f32.mxu1 %vm3606_vm8, %v6528_v9  ;;  %v9643_v59 = vmul.u32 2, %v3570_v4 }
 0x589   :  { %6114 = vmatprep.subr.bf16.mxu1 %v9508_v19  ;;  %v3571_v19 = vadd.s32 56, %v9544_v8 }
 0x58a   :  { %vm3612_vm14 = vcmp.eq.s32.totalorder %v9549_v18, %v9643_v59  ;;  %vm3611_vm15 = vcmp.eq.s32.totalorder %v9546_v0, %v9643_v59  ;;  %v3669_v35 = vadd.s32 1, %v9643_v59 }
 0x58b   :  { %5519 = vmatmul.mubr.msk.f32.gmra.mrb[6].mxu1 %vm3605_vm9, %v6528_v9 }
 0x58c   :  { %6116 = vmatpush3.bf16.msra.mxu1 %v8298_v61  ;;  %5520 = vmatprep.mubr.msk.f32.mxu1 %vm3608_vm10, %v6528_v9  ;;  %v9654_v61 = vmul.u32 2, %v3571_v19  ;;  %v4766_v19 = vld [vmem:[%s10587_s3 + $0x10] sm:$0xff] }
 0x58d   :  { %6118 = vmatprep.subr.bf16.mxu1 %v9540_v12  ;;  %v3572_v12 = vadd.s32 64, %v9544_v8  ;;  %v9739_v8 = vadd.s32 1, %v9552_v26 }
 0x58e   :  { %vm3614_vm0 = vcmp.eq.s32.totalorder %v9549_v18, %v9654_v61  ;;  %vm3613_vm2 = vcmp.eq.s32.totalorder %v9546_v0, %v9654_v61  ;;  %v3670_v54 = vadd.s32 1, %v9654_v61  ;;  %v4767_v61 = vld [vmem:[%s10587_s3 + $0x18] sm:$0xff] }
 0x58f   :  { %5521 = vmatmul.mubr.msk.f32.gmra.mrb[8].mxu1 %vm3607_vm11, %v6528_v9 }
 0x590   :  { %6120 = vmatpush3.bf16.msra.mxu1 %v8483_v25  ;;  %5522 = vmatprep.mubr.msk.f32.mxu1 %vm3610_vm12, %v6528_v9  ;;  %v9665_v25 = vmul.u32 2, %v3572_v12 }
 0x591   :  { %6122 = vmatprep.subr.bf16.mxu1 %v9561_v22  ;;  %v9721_v22 = vmul.u32 2, %v3578_v33 }
 0x592   :  { %vm3616_vm6 = vcmp.eq.s32.totalorder %v9549_v18, %v9665_v25  ;;  %vm3615_vm8 = vcmp.eq.s32.totalorder %v9546_v0, %v9665_v25  ;;  %v3671_v36 = vadd.s32 1, %v9665_v25  ;;  %v6137_v25 = vpack.c.bf16 %v4767_v61, %v4766_v19 }
 0x593   :  { %5523 = vmatmul.mubr.msk.f32.gmra.mrb[10].mxu1 %vm3609_vm13, %v6528_v9  ;;  %v3677_v44 = vadd.s32 1, %v9721_v22 }
 0x594   :  { %6124 = vmatpush3.bf16.msra.mxu1 %v8663_v32  ;;  %5524 = vmatprep.mubr.msk.f32.mxu1 %vm3612_vm14, %v6528_v9  ;;  %v9675_v32 = vmul.u32 2, %v3573_v20 }
 0x595   :  { %6126 = vmatprep.subr.bf16.mxu1 %v9569_v38  ;;  %v3676_v38 = vadd.s32 1, %v9712_v6  ;;  %6138 = vmatpush1.bf16.msra.mxu0 %v6137_v25  ;;  %v4774_v25 = vld [vmem:[%s10587_s3 + $0x50] sm:$0xff] }
 0x596   :  { %vm3618_vm10 = vcmp.eq.s32.totalorder %v9549_v18, %v9675_v32  ;;  %vm3617_vm11 = vcmp.eq.s32.totalorder %v9546_v0, %v9675_v32  ;;  %v3672_v30 = vadd.s32 1, %v9675_v32  ;;  %6139 = vmatprep.subr.bf16.mxu0 %v6529_v3 }
 0x597   :  { %5525 = vmatmul.mubr.msk.f32.gmra.mrb[12].mxu1 %vm3611_vm15, %v6528_v9 }
 0x598   :  { %6128 = vmatpush3.bf16.msra.mxu1 %v8843_v47  ;;  %5526 = vmatprep.mubr.msk.f32.mxu1 %vm3614_vm0, %v6528_v9  ;;  %v9685_v47 = vmul.u32 2, %v3574_v39  ;;  %vm3624_vm0 = vcmp.eq.s32.totalorder %v9549_v18, %v9703_v50 }
 0x599   :  { %6130 = vmatprep.subr.bf16.mxu1 %v6097_v57 }
 0x59a   :  { %vm3620_vm12 = vcmp.eq.s32.totalorder %v9549_v18, %v9685_v47  ;;  %vm3619_vm13 = vcmp.eq.s32.totalorder %v9546_v0, %v9685_v47  ;;  %v3673_v1 = vadd.s32 1, %v9685_v47 }
 0x59b   :  { %5527 = vmatmul.mubr.msk.f32.gmra.mrb[14].mxu1 %vm3613_vm2, %v6528_v9  ;;  %vm3623_vm2 = vcmp.eq.s32.totalorder %v9546_v0, %v9703_v50 }
 0x59c   :  { %6132 = vmatpush3.bf16.msra.mxu1 %v9023_v16  ;;  %5528 = vmatprep.mubr.msk.f32.mxu1 %vm3616_vm6, %v6528_v9  ;;  %v9694_v16 = vmul.u32 2, %v3575_v7  ;;  %vm3626_vm6 = vcmp.eq.s32.totalorder %v9549_v18, %v9712_v6 }
 0x59e   :  { %vm3622_vm14 = vcmp.eq.s32.totalorder %v9549_v18, %v9694_v16  ;;  %vm3621_vm15 = vcmp.eq.s32.totalorder %v9546_v0, %v9694_v16  ;;  %v3674_v11 = vadd.s32 1, %v9694_v16 }
 0x59f   :  { %5529 = vmatmul.mubr.msk.f32.gmra.mrb[16].mxu1 %vm3615_vm8, %v6528_v9  ;;  %vm3625_vm8 = vcmp.eq.s32.totalorder %v9546_v0, %v9712_v6 }
 0x5a0   :  { %5530 = vmatprep.mubr.msk.f32.mxu1 %vm3618_vm10, %v6528_v9  ;;  %vm3628_vm10 = vcmp.eq.s32.totalorder %v9549_v18, %v9721_v22 }
 0x5a3   :  { %5531 = vmatmul.mubr.msk.f32.gmra.mrb[18].mxu1 %vm3617_vm11, %v6528_v9  ;;  %vm3627_vm11 = vcmp.eq.s32.totalorder %v9546_v0, %v9721_v22  ;;  %v4768_v22 = vld [vmem:[%s10587_s3 + $0x20] sm:$0xff] }
 0x5a4   :  { %5532 = vmatprep.mubr.msk.f32.mxu1 %vm3620_vm12, %v6528_v9  ;;  %vm3630_vm12 = vcmp.eq.s32.totalorder %v9549_v18, %v9730_v15 }
 0x5a7   :  { %5533 = vmatmul.mubr.msk.f32.gmra.mrb[20].mxu1 %vm3619_vm13, %v6528_v9  ;;  %vm3629_vm13 = vcmp.eq.s32.totalorder %v9546_v0, %v9730_v15 }
 0x5a8   :  { %5534 = vmatprep.mubr.msk.f32.mxu1 %vm3622_vm14, %v6528_v9  ;;  %vm3680_vm14 = vcmp.eq.s32.totalorder %v9549_v18, %v9739_v8 }
 0x5ab   :  { %5535 = vmatmul.mubr.msk.f32.gmra.mrb[22].mxu1 %vm3621_vm15, %v6528_v9  ;;  %vm3679_vm15 = vcmp.eq.s32.totalorder %v9546_v0, %v9739_v8 }
 0x5ac   :  { %5536 = vmatprep.mubr.msk.f32.mxu1 %vm3624_vm0, %v6528_v9  ;;  %vm3682_vm0 = vcmp.eq.s32.totalorder %v9549_v18, %v9748_v29 }
 0x5af   :  { %5537 = vmatmul.mubr.msk.f32.gmra.mrb[24].mxu1 %vm3623_vm2, %v6528_v9  ;;  %vm3681_vm2 = vcmp.eq.s32.totalorder %v9546_v0, %v9748_v29  ;;  %v5188_v29 = vld [vmem:[%s10589_s5] sm:$0xf] }
 0x5b0   :  { %5538 = vmatprep.mubr.msk.f32.mxu1 %vm3626_vm6, %v6528_v9  ;;  %vm3684_vm6 = vcmp.eq.s32.totalorder %v9549_v18, %v9757_v13  ;;  %v3713_v56 = vsel %vm3681_vm2, 1.0, %v6518_v2 }
 0x5b3   :  { %5539 = vmatmul.mubr.msk.f32.gmra.mrb[26].mxu1 %vm3625_vm8, %v6528_v9  ;;  %vm3683_vm8 = vcmp.eq.s32.totalorder %v9546_v0, %v9757_v13  ;;  %v5302_v13 = vld [vmem:[%s10590_s7] sm:$0xff] }
 0x5b4   :  { %5540 = vmatprep.mubr.msk.f32.mxu1 %vm3628_vm10, %v6528_v9  ;;  %vm3686_vm10 = vcmp.eq.s32.totalorder %v9549_v18, %v9769_v34  ;;  %v3715_v31 = vsel %vm3683_vm8, 1.0, %v6518_v2 }
 0x5b7   :  { %5541 = vmatmul.mubr.msk.f32.gmra.mrb[28].mxu1 %vm3627_vm11, %v6528_v9  ;;  %vm3685_vm11 = vcmp.eq.s32.totalorder %v9546_v0, %v9769_v34  ;;  %v5305_v34 = vld [vmem:[%s10590_s7 + $0x18] sm:$0xff] }
 0x5b8   :  { %5542 = vmatprep.mubr.msk.f32.mxu1 %vm3630_vm12, %v6528_v9  ;;  %vm3688_vm12 = vcmp.eq.s32.totalorder %v9549_v18, %v3667_v48  ;;  %v3717_v8 = vsel %vm3685_vm11, 1.0, %v6518_v2 }
 0x5bb   :  { %5543 = vmatmul.mubr.msk.f32.gmra.mrb[30].mxu1 %vm3629_vm13, %v6528_v9  ;;  %vm3687_vm13 = vcmp.eq.s32.totalorder %v9546_v0, %v3667_v48  ;;  %v6140_v48 = vpack.c.bf16 %v4769_v52, %v4768_v22  ;;  %v4777_v22 = vld [vmem:[%s10587_s3 + $0x68] sm:$0xff] }
 0x5bc   :  { %5544 = vmatprep.mubr.msk.f32.mxu1 %vm3680_vm14, %v6528_v9  ;;  %vm3690_vm14 = vcmp.eq.s32.totalorder %v9549_v18, %v3668_v63 }
 0x5bd   :  { %6141 = vmatpush1.bf16.msra.mxu0 %v6140_v48 }
 0x5be   :  { %6142 = vmatprep.subr.bf16.mxu0 %v6529_v3 }
 0x5bf   :  { %5545 = vmatmul.mubr.msk.f32.vlgmr.msra.gmra.mrb[32].mxu1 %vm3679_vm15, %v6528_v9 }
 0x5c0   :  { %5546 = vmatprep.mubr.msk.f32.mxu1 %vm3682_vm0, %v6528_v9  ;;  %vm3689_vm0 = vcmp.eq.s32.totalorder %v9546_v0, %v3668_v63 }
 0x5c3   :  { %5547 = vmatmul.mubr.msk.f32.gmra.mrb[34].mxu1 %vm3681_vm2, %v6528_v9 }
 0x5c4   :  { %5548 = vmatprep.mubr.msk.f32.mxu1 %vm3684_vm6, %v6528_v9  ;;  %vm3692_vm6 = vcmp.eq.s32.totalorder %v9549_v18, %v3669_v35 }
 0x5c7   :  { %5549 = vmatmul.mubr.msk.f32.gmra.mrb[36].mxu1 %vm3683_vm8, %v6528_v9 }
 0x5c8   :  { %5550 = vmatprep.mubr.msk.f32.mxu1 %vm3686_vm10, %v6528_v9  ;;  %vm3691_vm10 = vcmp.eq.s32.totalorder %v9546_v0, %v3669_v35 }
 0x5cb   :  { %5551 = vmatmul.mubr.msk.f32.gmra.mrb[38].mxu1 %vm3685_vm11, %v6528_v9 }
 0x5cc   :  { %5552 = vmatprep.mubr.msk.f32.mxu1 %vm3688_vm12, %v6528_v9  ;;  %vm3694_vm12 = vcmp.eq.s32.totalorder %v9549_v18, %v3670_v54 }
 0x5cf   :  { %5553 = vmatmul.mubr.msk.f32.gmra.mrb[40].mxu1 %vm3687_vm13, %v6528_v9  ;;  %vm3693_vm13 = vcmp.eq.s32.totalorder %v9546_v0, %v3670_v54 }
 0x5d0   :  { %5554 = vmatprep.mubr.msk.f32.mxu1 %vm3690_vm14, %v6528_v9  ;;  %vm3696_vm14 = vcmp.eq.s32.totalorder %v9549_v18, %v3671_v36 }
 0x5d3   :  { %5555 = vmatmul.mubr.msk.f32.gmra.mrb[42].mxu1 %vm3689_vm0, %v6528_v9  ;;  %vm3695_vm0 = vcmp.eq.s32.totalorder %v9546_v0, %v3671_v36 }
 0x5d4   :  { %5556 = vmatprep.mubr.msk.f32.mxu1 %vm3692_vm6, %v6528_v9  ;;  %vm3698_vm6 = vcmp.eq.s32.totalorder %v9549_v18, %v3672_v30 }
 0x5d7   :  { %5557 = vmatmul.mubr.msk.f32.gmra.mrb[44].mxu1 %vm3691_vm10, %v6528_v9  ;;  %vm3697_vm10 = vcmp.eq.s32.totalorder %v9546_v0, %v3672_v30 }
 0x5d8   :  { %5558 = vmatprep.mubr.msk.f32.mxu1 %vm3694_vm12, %v6528_v9  ;;  %vm3700_vm12 = vcmp.eq.s32.totalorder %v9549_v18, %v3673_v1 }
 0x5db   :  { %5559 = vmatmul.mubr.msk.f32.gmra.mrb[46].mxu1 %vm3693_vm13, %v6528_v9  ;;  %vm3699_vm13 = vcmp.eq.s32.totalorder %v9546_v0, %v3673_v1 }
 0x5dc   :  { %5560 = vmatprep.mubr.msk.f32.mxu1 %vm3696_vm14, %v6528_v9  ;;  %vm3702_vm14 = vcmp.eq.s32.totalorder %v9549_v18, %v3674_v11 }
 0x5df   :  { %5561 = vmatmul.mubr.msk.f32.gmra.mrb[48].mxu1 %vm3695_vm0, %v6528_v9  ;;  %vm3701_vm0 = vcmp.eq.s32.totalorder %v9546_v0, %v3674_v11 }
 0x5e0   :  { %5562 = vmatprep.mubr.msk.f32.mxu1 %vm3698_vm6, %v6528_v9  ;;  %vm3704_vm6 = vcmp.eq.s32.totalorder %v9549_v18, %v3675_v41 }
 0x5e3   :  { %5563 = vmatmul.mubr.msk.f32.gmra.mrb[50].mxu1 %vm3697_vm10, %v6528_v9  ;;  %vm3703_vm10 = vcmp.eq.s32.totalorder %v9546_v0, %v3675_v41 }
 0x5e4   :  { %5564 = vmatprep.mubr.msk.f32.mxu1 %vm3700_vm12, %v6528_v9  ;;  %vm3706_vm12 = vcmp.eq.s32.totalorder %v9549_v18, %v3676_v38 }
 0x5e7   :  { %5565 = vmatmul.mubr.msk.f32.gmra.mrb[52].mxu1 %vm3699_vm13, %v6528_v9  ;;  %vm3705_vm13 = vcmp.eq.s32.totalorder %v9546_v0, %v3676_v38  ;;  %v4770_v38 = vld [vmem:[%s10587_s3 + $0x30] sm:$0xff] }
 0x5e8   :  { %5566 = vmatprep.mubr.msk.f32.mxu1 %vm3702_vm14, %v6528_v9  ;;  %vm3708_vm14 = vcmp.eq.s32.totalorder %v9549_v18, %v3677_v44 }
 0x5eb   :  { %5567 = vmatmul.mubr.msk.f32.gmra.mrb[54].mxu1 %vm3701_vm0, %v6528_v9  ;;  %vm3707_vm0 = vcmp.eq.s32.totalorder %v9546_v0, %v3677_v44  ;;  %v4771_v44 = vld [vmem:[%s10587_s3 + $0x38] sm:$0xff] }
 0x5ec   :  { %5568 = vmatprep.mubr.msk.f32.mxu1 %vm3704_vm6, %v6528_v9  ;;  %vm3710_vm6 = vcmp.eq.s32.totalorder %v9549_v18, %v3678_v42 }
 0x5ef   :  { %5569 = vmatmul.mubr.msk.f32.gmra.mrb[56].mxu1 %vm3703_vm10, %v6528_v9  ;;  %vm3709_vm10 = vcmp.eq.s32.totalorder %v9546_v0, %v3678_v42 }
 0x5f0   :  { %5570 = vmatprep.mubr.msk.f32.mxu1 %vm3706_vm12, %v6528_v9  ;;  %vm4049_vm12 = vcmask 130048  }
 0x5f1   :  { %4050 = vst.msk [vmem:[#allocation3] sm:$0xff] %vm4049_vm12, %v6518_v2  ;;  %4053 = vst.msk [vmem:[#allocation3 + $0xa0] sm:$0xff] %vm4049_vm12, %v6518_v2 }
 0x5f2   :  { %4056 = vst.msk [vmem:[#allocation3 + $0x90] sm:$0xff] %vm4049_vm12, %v6518_v2  ;;  %4058 = vst.msk [vmem:[#allocation3 + $0x130] sm:$0xff] %vm4049_vm12, %v6518_v2 }
 0x5f3   :  { %5571 = vmatmul.mubr.msk.f32.gmra.mrb[58].mxu1 %vm3705_vm13, %v6528_v9  ;;  %vm4051_vm13 = vcmask 123904  }
 0x5f4   :  { %5572 = vmatprep.mubr.msk.f32.mxu1 %vm3708_vm14, %v6528_v9  ;;  %vm4061_vm14 = vcmask 122880   ;;  %4052 = vst.msk [vmem:[#allocation3 + $0x8] sm:$0x3] %vm4051_vm13, %v6518_v2  ;;  %4054 = vst.msk [vmem:[#allocation3 + $0xa8] sm:$0x3] %vm4051_vm13, %v6518_v2 }
 0x5f5   :  { %4062 = vst.msk [vmem:[#allocation3 + $0x10] sm:$0x1] %vm4061_vm14, %v6518_v2  ;;  %4078 = vst.msk [vmem:[#allocation3 + $0x19] sm:$0x1] %vm4061_vm14, %v6518_v2 }
 0x5f6   :  { %4057 = vst.msk [vmem:[#allocation3 + $0x98] sm:$0x3] %vm4051_vm13, %v6518_v2  ;;  %4059 = vst.msk [vmem:[#allocation3 + $0x138] sm:$0x3] %vm4051_vm13, %v6518_v2  ;;  %vm4730_vm13 = vcmask 785408  }
 0x5f7   :  { %5573 = vmatmul.mubr.msk.f32.gmra.mrb[60].mxu1 %vm3707_vm0, %v6528_v9  ;;  %4063 = vst.msk [vmem:[#allocation3 + $0x20] sm:$0x1] %vm4061_vm14, %v6518_v2  ;;  %4064 = vst.msk [vmem:[#allocation3 + $0x30] sm:$0x1] %vm4061_vm14, %v6518_v2  ;;  %vm4662_vm0 = vcmask 261120  }
 0x5f8   :  { %5574 = vmatprep.mubr.msk.f32.mxu1 %vm3710_vm6, %v6528_v9  ;;  %4065 = vst.msk [vmem:[#allocation3 + $0x40] sm:$0x1] %vm4061_vm14, %v6518_v2  ;;  %4066 = vst.msk [vmem:[#allocation3 + $0x50] sm:$0x1] %vm4061_vm14, %v6518_v2  ;;  %vm4679_vm6 = vcmask 392192  }
 0x5f9   :  { %4067 = vst.msk [vmem:[#allocation3 + $0x60] sm:$0x1] %vm4061_vm14, %v6518_v2  ;;  %4068 = vst.msk [vmem:[#allocation3 + $0x70] sm:$0x1] %vm4061_vm14, %v6518_v2 }
 0x5fa   :  { %4069 = vst.msk [vmem:[#allocation3 + $0x80] sm:$0x1] %vm4061_vm14, %v6518_v2  ;;  %4070 = vst.msk [vmem:[#allocation3 + $0xb0] sm:$0x1] %vm4061_vm14, %v6518_v2 }
 0x5fb   :  { %5575 = vmatmul.mubr.msk.f32.gmra.mrb[62].mxu1 %vm3709_vm10, %v6528_v9  ;;  %4071 = vst.msk [vmem:[#allocation3 + $0xc0] sm:$0x1] %vm4061_vm14, %v6518_v2  ;;  %4072 = vst.msk [vmem:[#allocation3 + $0xd0] sm:$0x1] %vm4061_vm14, %v6518_v2  ;;  %v4111_v61 = vld [vmem:[#allocation3 + $0x8] sm:$0x3] }
 0x5fc   :  { %4073 = vst.msk [vmem:[#allocation3 + $0xe0] sm:$0x1] %vm4061_vm14, %v6518_v2  ;;  %4074 = vst.msk [vmem:[#allocation3 + $0xf0] sm:$0x1] %vm4061_vm14, %v6518_v2  ;;  %v4183_v52 = vrot.slane %v4111_v61, 1  ;;  %vm4713_vm10 = vcmask 654336  }
 0x5fd   :  { %4075 = vst.msk [vmem:[#allocation3 + $0x100] sm:$0x1] %vm4061_vm14, %v6518_v2  ;;  %4076 = vst.msk [vmem:[#allocation3 + $0x110] sm:$0x1] %vm4061_vm14, %v6518_v2 }
 0x5fe   :  { %4077 = vst.msk [vmem:[#allocation3 + $0x120] sm:$0x1] %vm4061_vm14, %v6518_v2  ;;  %4079 = vst.msk [vmem:[#allocation3 + $0x29] sm:$0x1] %vm4061_vm14, %v6518_v2 }
 0x5ff   :  { %4080 = vst.msk [vmem:[#allocation3 + $0x39] sm:$0x1] %vm4061_vm14, %v6518_v2  ;;  %4081 = vst.msk [vmem:[#allocation3 + $0x49] sm:$0x1] %vm4061_vm14, %v6518_v2 }
 0x600   :  { %4082 = vst.msk [vmem:[#allocation3 + $0x59] sm:$0x1] %vm4061_vm14, %v6518_v2  ;;  %4083 = vst.msk [vmem:[#allocation3 + $0x69] sm:$0x1] %vm4061_vm14, %v6518_v2 }
 0x601   :  { %4084 = vst.msk [vmem:[#allocation3 + $0x79] sm:$0x1] %vm4061_vm14, %v6518_v2  ;;  %4085 = vst.msk [vmem:[#allocation3 + $0x89] sm:$0x1] %vm4061_vm14, %v6518_v2 }
 0x602   :  { %4086 = vst.msk [vmem:[#allocation3 + $0xb9] sm:$0x1] %vm4061_vm14, %v6518_v2  ;;  %4087 = vst.msk [vmem:[#allocation3 + $0xc9] sm:$0x1] %vm4061_vm14, %v6518_v2 }
 0x603   :  { %4088 = vst.msk [vmem:[#allocation3 + $0xd9] sm:$0x1] %vm4061_vm14, %v6518_v2  ;;  %4089 = vst.msk [vmem:[#allocation3 + $0xe9] sm:$0x1] %vm4061_vm14, %v6518_v2 }
 0x604   :  { %4090 = vst.msk [vmem:[#allocation3 + $0xf9] sm:$0x1] %vm4061_vm14, %v6518_v2  ;;  %4091 = vst.msk [vmem:[#allocation3 + $0x109] sm:$0x1] %vm4061_vm14, %v6518_v2 }
 0x605   :  { %4092 = vst.msk [vmem:[#allocation3 + $0x119] sm:$0x1] %vm4061_vm14, %v6518_v2  ;;  %4093 = vst.msk [vmem:[#allocation3 + $0x129] sm:$0x1] %vm4061_vm14, %v6518_v2  ;;  %vm4747_vm14 = vcmask 916480  }
 0x652   :  { %v5712_v18 = vpop.f32.mrb[0].mxu1 }
 0x653   :  { %v5713_v9 = vpop.f32.mrb[1].mxu1 }
 0x654   :  { %v9927_v40 = vadd.f32 %v5713_v9, %v5712_v18  ;;  %v6143_v18 = vpack.c.bf16 %v4771_v44, %v4770_v38 }
 0x656   :  { %v5715_v14 = vpop.f32.mrb[2].mxu1  ;;  %6144 = vmatpush1.bf16.msra.mxu0 %v6143_v18 }
 0x657   :  { %v5716_v17 = vpop.f32.mrb[3].mxu1  ;;  %6145 = vmatprep.subr.bf16.mxu0 %v6529_v3 }
 0x658   :  { %v9929_v53 = vadd.f32 %v5716_v17, %v5715_v14 }
 0x65a   :  { %v5718_v43 = vpop.f32.mrb[4].mxu1 }
 0x65b   :  { %v5719_v21 = vpop.f32.mrb[5].mxu1 }
 0x65c   :  { %v9931_v24 = vadd.f32 %v5719_v21, %v5718_v43 }
 0x65e   :  { %v5721_v10 = vpop.f32.mrb[6].mxu1 }
 0x65f   :  { %v5722_v28 = vpop.f32.mrb[7].mxu1 }
 0x660   :  { %v9940_v57 = vadd.f32 %v5722_v28, %v5721_v10  ;;  %v4772_v10 = vld [vmem:[%s10587_s3 + $0x40] sm:$0xff]  ;;  %v4773_v28 = vld [vmem:[%s10587_s3 + $0x48] sm:$0xff] }
 0x662   :  { %v5724_v27 = vpop.f32.mrb[8].mxu1 }
 0x663   :  { %v5725_v45 = vpop.f32.mrb[9].mxu1 }
 0x664   :  { %v9943_v37 = vadd.f32 %v5725_v45, %v5724_v27  ;;  %v6146_v45 = vpack.c.bf16 %v4773_v28, %v4772_v10 }
 0x666   :  { %v5727_v58 = vpop.f32.mrb[10].mxu1  ;;  %6147 = vmatpush1.bf16.msra.mxu0 %v6146_v45 }
 0x667   :  { %v5728_v5 = vpop.f32.mrb[11].mxu1  ;;  %6148 = vmatprep.subr.bf16.mxu0 %v6529_v3 }
 0x668   :  { %v9945_v62 = vadd.f32 %v5728_v5, %v5727_v58 }
 0x66a   :  { %v5730_v4 = vpop.f32.mrb[12].mxu1 }
 0x66b   :  { %v5731_v59 = vpop.f32.mrb[13].mxu1 }
 0x66c   :  { %v9953_v12 = vadd.f32 %v5731_v59, %v5730_v4  ;;  %v9995_v59 = vld [vmem:[#allocation3] sm:$0xff] }
 0x66e   :  { %v5733_v20 = vpop.f32.mrb[14].mxu1 }
 0x66f   :  { %v5734_v32 = vpop.f32.mrb[15].mxu1 }
 0x670   :  { %v9956_v39 = vadd.f32 %v5734_v32, %v5733_v20  ;;  %v4775_v20 = vld [vmem:[%s10587_s3 + $0x58] sm:$0xff] }
 0x672   :  { %v5736_v47 = vpop.f32.mrb[16].mxu1 }
 0x673   :  { %v5737_v7 = vpop.f32.mrb[17].mxu1 }
 0x674   :  { %v9958_v16 = vadd.f32 %v5737_v7, %v5736_v47 }
 0x676   :  { %v5739_v60 = vpop.f32.mrb[18].mxu1 }
 0x677   :  { %v5740_v50 = vpop.f32.mrb[19].mxu1 }
 0x678   :  { %v9960_v23 = vadd.f32 %v5740_v50, %v5739_v60  ;;  %v4278_v60 = vrot.slane %v9995_v59, 2  ;;  %v4279_v50 = vrot.slane %v4111_v61, 2 }
 0x67a   :  { %v5742_v6 = vpop.f32.mrb[20].mxu1 }
 0x67b   :  { %v5743_v33 = vpop.f32.mrb[21].mxu1 }
 0x67c   :  { %v9968_v15 = vadd.f32 %v5743_v33, %v5742_v6  ;;  %v4776_v33 = vld [vmem:[%s10587_s3 + $0x60] sm:$0xff] }
 0x67d   :  { %v6152_v48 = vpack.c.bf16 %v4777_v22, %v4776_v33 }
 0x67e   :  { %v5745_v63 = vpop.f32.mrb[22].mxu1 }
 0x67f   :  { %v5746_v35 = vpop.f32.mrb[23].mxu1 }
 0x680   :  { %v9971_v54 = vadd.f32 %v5746_v35, %v5745_v63 }
 0x682   :  { %v5748_v36 = vpop.f32.mrb[24].mxu1 }
 0x683   :  { %v5749_v30 = vpop.f32.mrb[25].mxu1 }
 0x684   :  { %v9973_v1 = vadd.f32 %v5749_v30, %v5748_v36 }
 0x686   :  { %v5751_v11 = vpop.f32.mrb[26].mxu1 }
 0x687   :  { %v5752_v41 = vpop.f32.mrb[27].mxu1 }
 0x688   :  { %v9981_v42 = vadd.f32 %v5752_v41, %v5751_v11  ;;  %v4280_v41 = vsel %vm798_vm3, %v4278_v60, %v4279_v50 }
 0x68a   :  { %v5754_v9 = vpop.f32.mrb[28].mxu1 }
 0x68b   :  { %v5755_v14 = vpop.f32.mrb[29].mxu1 }
 0x68c   :  { %v9984_v17 = vadd.f32 %v5755_v14, %v5754_v9  ;;  %v4779_v14 = vld [vmem:[%s10587_s3 + $0x78] sm:$0xff] }
 0x68e   :  { %v5757_v43 = vpop.f32.mrb[30].mxu1 }
 0x68f   :  { %v5758_v21 = vpop.f32.mrb[31].mxu1 }
 0x690   :  { %v9986_v51 = vadd.f32 %v5758_v21, %v5757_v43 }
 0x692   :  { %v5792_v49 = vpop.f32.mrb[32].mxu1 }
 0x693   :  { %v5793_v55 = vpop.f32.mrb[33].mxu1 }
 0x694   :  { %v5794_v27 = vadd.f32 %v5793_v55, %v5792_v49 }
 0x696   :  { %v4033_v58 = vmax.f32 %v9927_v40, %v5794_v27  ;;  %v5795_v5 = vpop.f32.mrb[34].mxu1  ;;  %v6149_v40 = vpack.c.bf16 %v4775_v20, %v4774_v25 }
 0x697   :  { %v5796_v4 = vpop.f32.mrb[35].mxu1 }
 0x698   :  { %4094 = vst.msk [vmem:[#allocation3 + $0x11] sm:$0xff] %vm4049_vm12, %v4033_v58  ;;  %v5797_v19 = vadd.f32 %v5796_v4, %v5795_v5  ;;  %6150 = vmatpush1.bf16.msra.mxu0 %v6149_v40  ;;  %v4781_v40 = vld [vmem:[%s10587_s3 + $0x88] sm:$0xff] }
 0x699   :  { %6151 = vmatprep.subr.bf16.mxu0 %v6529_v3 }
 0x69a   :  { %v4034_v32 = vmax.f32 %v9929_v53, %v5797_v19  ;;  %v5798_v47 = vpop.f32.mrb[36].mxu1  ;;  %v4182_v53 = vrot.slane %v9995_v59, 1 }
 0x69b   :  { %v5799_v7 = vpop.f32.mrb[37].mxu1 }
 0x69c   :  { %4095 = vst.msk [vmem:[#allocation3 + $0x21] sm:$0xff] %vm4049_vm12, %v4034_v32  ;;  %v5800_v6 = vadd.f32 %v5799_v7, %v5798_v47  ;;  %6153 = vmatpush1.bf16.msra.mxu0 %v6152_v48  ;;  %v4184_v43 = vsel %vm445_vm4, %v4182_v53, %v4183_v52 }
 0x69d   :  { %6154 = vmatprep.subr.bf16.mxu0 %v6529_v3 }
 0x69e   :  { %v4035_v63 = vmax.f32 %v9931_v24, %v5800_v6  ;;  %v5801_v35 = vpop.f32.mrb[38].mxu1  ;;  %v4778_v24 = vld [vmem:[%s10587_s3 + $0x70] sm:$0xff] }
 0x69f   :  { %v5802_v36 = vpop.f32.mrb[39].mxu1  ;;  %v10017_v30 = vld [vmem:[#allocation3 + $0x10] sm:$0xff]  ;;  %v4113_v11 = vld [vmem:[#allocation3 + $0x18] sm:$0x3]  ;;  %v6155_v49 = vpack.c.bf16 %v4779_v14, %v4778_v24 }
 0x6a0   :  { %4096 = vst.msk [vmem:[#allocation3 + $0x31] sm:$0xff] %vm4049_vm12, %v4035_v63  ;;  %v5803_v38 = vadd.f32 %v5802_v36, %v5801_v35  ;;  %v4281_v44 = vrot.slane %v10017_v30, 2  ;;  %v4282_v18 = vrot.slane %v4113_v11, 2  ;;  %v4185_v9 = vrot.slane %v10017_v30, 1 }
 0x6a1   :  { %v4186_v21 = vrot.slane %v4113_v11, 1  ;;  %6156 = vmatpush1.bf16.msra.mxu0 %v6155_v49 }
 0x6a2   :  { %v4036_v55 = vmax.f32 %v9940_v57, %v5803_v38  ;;  %v5804_v10 = vpop.f32.mrb[40].mxu1  ;;  %v4283_v28 = vsel %vm798_vm3, %v4281_v44, %v4282_v18  ;;  %6157 = vmatprep.subr.bf16.mxu0 %v6529_v3  ;;  %v4780_v57 = vld [vmem:[%s10587_s3 + $0x80] sm:$0xff]  ;;  %s6532_s3 = smov 48  }
 0x6a3   :  { %v5805_v27 = vpop.f32.mrb[41].mxu1  ;;  %v6240_v45 = vpack.i.bf16 %v4283_v28, %v4280_v41  ;;  %v4187_v58 = vsel %vm445_vm4, %v4185_v9, %v4186_v21  ;;  %v10034_v5 = vld [vmem:[#allocation3 + $0x20] sm:$0xff]  ;;  %v4115_v4 = vld [vmem:[#allocation3 + $0x28] sm:$0x3]  ;;  %v6158_v7 = vpack.c.bf16 %v4781_v40, %v4780_v57 }
 0x6a4   :  { %4097 = vst.msk [vmem:[#allocation3 + $0x41] sm:$0xff] %vm4049_vm12, %v4036_v55  ;;  %v5806_v19 = vadd.f32 %v5805_v27, %v5804_v10  ;;  %v6235_v61 = vpack.i.bf16 %v4187_v58, %v4184_v43  ;;  %v4189_v25 = vrot.slane %v4115_v4, 1  ;;  %v4284_v20 = vrot.slane %v10034_v5, 2 }
 0x6a5   :  { %6241 = vrot.lane.b32.xlu1 %v6240_v45, %s6530_s27  ;;  %v4285_v32 = vrot.slane %v4115_v4, 2  ;;  %v4188_v47 = vrot.slane %v10034_v5, 1  ;;  %6159 = vmatpush1.bf16.msra.mxu0 %v6158_v7 }
 0x6a6   :  { %v4037_v60 = vmax.f32 %v9943_v37, %v5806_v19  ;;  %6236 = vrot.lane.b32.xlu0 %v6235_v61, %s6531_s28  ;;  %v5807_v3 = vpop.f32.mrb[42].mxu1  ;;  %v6245_v37 = vpack.i.bf16 %v10034_v5, %v10017_v30 }
 0x6a7   :  { %v5808_v50 = vpop.f32.mrb[43].mxu1  ;;  %v10049_v6 = vld [vmem:[#allocation3 + $0x30] sm:$0xff]  ;;  %v4117_v33 = vld [vmem:[#allocation3 + $0x38] sm:$0x3]  ;;  %v4286_v22 = vsel %vm798_vm3, %v4284_v20, %v4285_v32  ;;  %v4190_v53 = vsel %vm445_vm4, %v4188_v47, %v4189_v25 }
 0x6a8   :  { %4098 = vst.msk [vmem:[#allocation3 + $0x51] sm:$0xff] %vm4049_vm12, %v4037_v60  ;;  %v5809_v52 = vadd.f32 %v5808_v50, %v5807_v3  ;;  %5577 = vmatprep.mubr.msk.f32.mxu0 %vm4049_vm12, %v4286_v22  ;;  %v6250_v48 = vpack.i.bf16 %v4190_v53, %v4187_v58  ;;  %v4191_v63 = vrot.slane %v10049_v6, 1  ;;  %v4192_v35 = vrot.slane %v4117_v33, 1 }
 0x6a9   :  { %v6255_v38 = vpack.i.bf16 %v4286_v22, %v4283_v28  ;;  %v4287_v18 = vrot.slane %v10049_v6, 2  ;;  %v4288_v9 = vrot.slane %v4117_v33, 2  ;;  %v6260_v24 = vpack.i.bf16 %v10049_v6, %v10034_v5 }
 0x6aa   :  { %v4038_v36 = vmax.f32 %v9945_v62, %v5809_v52  ;;  %6246 = vrot.lane.b32.xlu0 %v6245_v37, %s6532_s3  ;;  %v5810_v11 = vpop.f32.mrb[44].mxu1  ;;  %6251 = vrot.lane.b32.xlu1 %v6250_v48, %s6533_s12  ;;  %v4193_v62 = vsel %vm445_vm4, %v4191_v63, %v4192_v35 }
 0x6ab   :  { %v5811_v41 = vpop.f32.mrb[45].mxu1  ;;  %v10068_v21 = vld [vmem:[#allocation3 + $0x40] sm:$0xff]  ;;  %v4119_v49 = vld [vmem:[#allocation3 + $0x48] sm:$0x3]  ;;  %v6265_v28 = vpack.i.bf16 %v4193_v62, %v4190_v53  ;;  %v10073_v27 = vsel %vm798_vm3, %v4287_v18, %v4288_v9 }
 0x6ac   :  { %4099 = vst.msk [vmem:[#allocation3 + $0x61] sm:$0xff] %vm4049_vm12, %v4038_v36  ;;  %v5812_v44 = vadd.f32 %v5811_v41, %v5810_v11  ;;  %v4195_v45 = vrot.slane %v4119_v49, 1  ;;  %v4290_v19 = vrot.slane %v10068_v21, 2  ;;  %v4291_v61 = vrot.slane %v4119_v49, 2 }
 0x6ad   :  { %v6275_v40 = vpack.i.bf16 %v10073_v27, %v4286_v22 }
 0x6ae   :  { %v4039_v14 = vmax.f32 %v9953_v12, %v5812_v44  ;;  %6256 = vrot.lane.b32.xlu0 %v6255_v38, %s6534_s13  ;;  %v5813_v43 = vpop.f32.mrb[46].mxu1  ;;  %6261 = vrot.lane.b32.xlu1 %v6260_v24, %s6535_s15  ;;  %v4194_v12 = vrot.slane %v10068_v21, 1  ;;  %v10090_v3 = vsel %vm798_vm3, %v4290_v19, %v4291_v61 }
 0x6af   :  { %v5814_v55 = vpop.f32.mrb[47].mxu1  ;;  %v10080_v20 = vld [vmem:[#allocation3 + $0x50] sm:$0xff]  ;;  %v4121_v57 = vld [vmem:[#allocation3 + $0x58] sm:$0x3]  ;;  %v6290_v37 = vpack.i.bf16 %v10090_v3, %v10073_v27 }
 0x6b0   :  { %4100 = vst.msk [vmem:[#allocation3 + $0x71] sm:$0xff] %vm4049_vm12, %v4039_v14  ;;  %v5815_v10 = vadd.f32 %v5814_v55, %v5813_v43  ;;  %v4196_v47 = vsel %vm445_vm4, %v4194_v12, %v4195_v45  ;;  %v4197_v50 = vrot.slane %v10080_v20, 1  ;;  %v4198_v33 = vrot.slane %v4121_v57, 1 }
 0x6b1   :  { %v6285_v52 = vpack.i.bf16 %v4196_v47, %v4193_v62  ;;  %v4293_v35 = vrot.slane %v10080_v20, 2  ;;  %v4294_v36 = vrot.slane %v4121_v57, 2 }
 0x6b2   :  { %v4040_v58 = vmax.f32 %v9956_v39, %v5815_v10  ;;  %6266 = vrot.lane.b32.xlu0 %v6265_v28, %s6536_s16  ;;  %v5816_v4 = vpop.f32.mrb[48].mxu1  ;;  %6271 = vrot.lane.b32.xlu1 %v6265_v28, %s6531_s28  ;;  %v6280_v39 = vpack.i.bf16 %v10068_v21, %v10049_v6  ;;  %v4199_v63 = vsel %vm445_vm4, %v4197_v50, %v4198_v33 }
 0x6b3   :  { %v5817_v25 = vpop.f32.mrb[49].mxu1  ;;  %v10102_v41 = vld [vmem:[#allocation3 + $0x60] sm:$0xff]  ;;  %v4123_v38 = vld [vmem:[#allocation3 + $0x68] sm:$0x3]  ;;  %v6300_v18 = vpack.i.bf16 %v4199_v63, %v4196_v47  ;;  %v10110_v62 = vsel %vm798_vm3, %v4293_v35, %v4294_v36 }
 0x6b4   :  { %4101 = vst.msk [vmem:[#allocation3 + $0x81] sm:$0xff] %vm4049_vm12, %v4040_v58  ;;  %v5818_v32 = vadd.f32 %v5817_v25, %v5816_v4  ;;  %v4200_v14 = vrot.slane %v10102_v41, 1  ;;  %v4201_v43 = vrot.slane %v4123_v38, 1  ;;  %v6310_v10 = vpack.i.bf16 %v10110_v62, %v10090_v3 }
 0x6b5   :  { %v4297_v28 = vrot.slane %v4123_v38, 2  ;;  %v6315_v57 = vpack.i.bf16 %v10102_v41, %v10080_v20 }
 0x6b6   :  { %v4041_v7 = vmax.f32 %v9958_v16, %v5818_v32  ;;  %6276 = vrot.lane.b32.xlu0 %v6275_v40, %s6530_s27  ;;  %v5819_v60 = vpop.f32.mrb[50].mxu1  ;;  %6281 = vrot.lane.b32.xlu1 %v6280_v39, %s6532_s3  ;;  %v4202_v58 = vsel %vm445_vm4, %v4200_v14, %v4201_v43 }
 0x6b7   :  { %v5820_v22 = vpop.f32.mrb[51].mxu1  ;;  %v10121_v4 = vld [vmem:[#allocation3 + $0x70] sm:$0xff]  ;;  %v4125_v19 = vld [vmem:[#allocation3 + $0x78] sm:$0x3]  ;;  %v6320_v40 = vpack.i.bf16 %v4202_v58, %v4199_v63 }
 0x6b8   :  { %4102 = vst.msk [vmem:[#allocation3 + $0xb1] sm:$0xff] %vm4049_vm12, %v4041_v7  ;;  %v5821_v53 = vadd.f32 %v5820_v22, %v5819_v60  ;;  %v4203_v32 = vrot.slane %v10121_v4, 1  ;;  %v4204_v39 = vrot.slane %v4125_v19, 1  ;;  %v6330_v22 = vpack.i.bf16 %v10121_v4, %v10102_v41 }
 0x6ba   :  { %v4042_v16 = vmax.f32 %v9960_v23, %v5821_v53  ;;  %6286 = vrot.lane.b32.xlu0 %v6285_v52, %s6533_s12  ;;  %v5822_v48 = vpop.f32.mrb[52].mxu1  ;;  %6291 = vrot.lane.b32.xlu1 %v6290_v37, %s6534_s13  ;;  %v6295_v23 = vpack.i.bf16 %v10080_v20, %v10068_v21  ;;  %v4205_v53 = vsel %vm445_vm4, %v4203_v32, %v4204_v39  ;;  %v4299_v52 = vrot.slane %v10121_v4, 2 }
 0x6bb   :  { %v5823_v11 = vpop.f32.mrb[53].mxu1  ;;  %v4127_v63 = vld [vmem:[#allocation3 + $0x88] sm:$0x3] }
 0x6bc   :  { %4103 = vst.msk [vmem:[#allocation3 + $0xc1] sm:$0xff] %vm4049_vm12, %v4042_v16  ;;  %v5824_v44 = vadd.f32 %v5823_v11, %v5822_v48  ;;  %v4126_v48 = vld [vmem:[#allocation3 + $0x80] sm:$0xff]  ;;  %v6335_v11 = vpack.i.bf16 %v4205_v53, %v4202_v58  ;;  %v4481_v43 = vrot.slane %v4127_v63, 2 }
 0x6bd   :  { %v4480_v14 = vrot.slane %v4126_v48, 2 }
 0x6be   :  { %v4043_v9 = vmax.f32 %v9968_v15, %v5824_v44  ;;  %6296 = vrot.lane.b32.xlu0 %v6295_v23, %s6535_s15  ;;  %v5825_v24 = vpop.f32.mrb[54].mxu1  ;;  %6301 = vrot.lane.b32.xlu1 %v6300_v18, %s6536_s16  ;;  %v4296_v15 = vrot.slane %v10102_v41, 2  ;;  %v4426_v44 = vrot.slane %v4126_v48, 1  ;;  %v4427_v23 = vrot.slane %v4127_v63, 1 }
 0x6bf   :  { %v5826_v49 = vpop.f32.mrb[55].mxu1 }
 0x6c0   :  { %4104 = vst.msk [vmem:[#allocation3 + $0xd1] sm:$0xff] %vm4049_vm12, %v4043_v9  ;;  %v5827_v55 = vadd.f32 %v5826_v49, %v5825_v24 }
 0x6c2   :  { %v4044_v12 = vmax.f32 %v9971_v54, %v5827_v55  ;;  %6306 = vrot.lane.b32.xlu0 %v6300_v18, %s6531_s28  ;;  %v5828_v45 = vpop.f32.mrb[56].mxu1  ;;  %6311 = vrot.lane.b32.xlu1 %v6310_v10, %s6530_s27  ;;  %v10128_v54 = vsel %vm798_vm3, %v4296_v15, %v4297_v28  ;;  %v10148_v18 = vld [vmem:[#allocation3 + $0x90] sm:$0xff] }
 0x6c3   :  { %v5829_v61 = vpop.f32.mrb[57].mxu1  ;;  %v6325_v33 = vpack.i.bf16 %v10128_v54, %v10110_v62  ;;  %v4586_v15 = vrot.slane %v10148_v18, 1 }
 0x6c4   :  { %4105 = vst.msk [vmem:[#allocation3 + $0xe1] sm:$0xff] %vm4049_vm12, %v4044_v12  ;;  %v5830_v25 = vadd.f32 %v5829_v61, %v5828_v45  ;;  %v4428_v12 = vsel %vm445_vm4, %v4426_v44, %v4427_v23  ;;  %v10162_v45 = vld [vmem:[#allocation3 + $0xa0] sm:$0xff]  ;;  %v4131_v61 = vld [vmem:[#allocation3 + $0xa8] sm:$0x3] }
 0x6c5   :  { %v4206_v39 = vrot.slane %v10162_v45, 1 }
 0x6c6   :  { %v4045_v47 = vmax.f32 %v9973_v1, %v5830_v25  ;;  %6316 = vrot.lane.b32.xlu0 %v6315_v57, %s6532_s3  ;;  %v5831_v7 = vpop.f32.mrb[58].mxu1  ;;  %6321 = vrot.lane.b32.xlu1 %v6320_v40, %s6533_s12  ;;  %v4300_v1 = vrot.slane %v4125_v19, 2  ;;  %v10167_v19 = vsel %vm798_vm3, %v4480_v14, %v4481_v43  ;;  %v10169_v25 = vld [vmem:[#allocation3 + $0xb0] sm:$0xff]  ;;  %v4133_v57 = vld [vmem:[#allocation3 + $0xb8] sm:$0x3]  ;;  %v6355_v40 = vpack.i.bf16 %v4428_v12, %v4205_v53  ;;  %v10182_v53 = vld [vmem:[#allocation3 + $0xc0] sm:$0xff] }
 0x6c7   :  { %v5832_v60 = vpop.f32.mrb[59].mxu1  ;;  %v4212_v44 = vrot.slane %v10182_v53, 1 }
 0x6c8   :  { %4106 = vst.msk [vmem:[#allocation3 + $0xf1] sm:$0xff] %vm4049_vm12, %v4045_v47  ;;  %v5833_v50 = vadd.f32 %v5832_v60, %v5831_v7  ;;  %v10146_v38 = vsel %vm798_vm3, %v4299_v52, %v4300_v1  ;;  %v4207_v47 = vrot.slane %v4131_v61, 1  ;;  %v4209_v7 = vrot.slane %v10169_v25, 1  ;;  %v4135_v1 = vld [vmem:[#allocation3 + $0xc8] sm:$0x3] }
 0x6c9   :  { %v6345_v10 = vpack.i.bf16 %v10146_v38, %v10128_v54  ;;  %v4210_v60 = vrot.slane %v4133_v57, 1  ;;  %v4306_v52 = vrot.slane %v4133_v57, 2  ;;  %v4213_v23 = vrot.slane %v4135_v1, 1 }
 0x6ca   :  { %v4046_v37 = vmax.f32 %v9981_v42, %v5833_v50  ;;  %6326 = vrot.lane.b32.xlu0 %v6325_v33, %s6534_s13  ;;  %v5834_v16 = vpop.f32.mrb[60].mxu1  ;;  %6331 = vrot.lane.b32.xlu1 %v6330_v22, %s6535_s15  ;;  %v10150_v42 = vld [vmem:[#allocation3 + $0x98] sm:$0x3]  ;;  %v4302_v50 = vrot.slane %v10162_v45, 2  ;;  %v4303_v33 = vrot.slane %v4131_v61, 2  ;;  %v4305_v22 = vrot.slane %v10169_v25, 2 }
 0x6cb   :  { %v5835_v35 = vpop.f32.mrb[61].mxu1  ;;  %v4587_v28 = vrot.slane %v10150_v42, 1  ;;  %v4208_v63 = vsel %vm445_vm4, %v4206_v39, %v4207_v47  ;;  %v4309_v14 = vrot.slane %v4135_v1, 2  ;;  %v4214_v43 = vsel %vm445_vm4, %v4212_v44, %v4213_v23  ;;  %v10212_v39 = vld [vmem:[#allocation3 + $0xe0] sm:$0xff] }
 0x6cc   :  { %4107 = vst.msk [vmem:[#allocation3 + $0x101] sm:$0xff] %vm4049_vm12, %v4046_v37  ;;  %v5836_v36 = vadd.f32 %v5835_v35, %v5834_v16  ;;  %v6365_v37 = vpack.i.bf16 %v10148_v18, %v4126_v48  ;;  %v4211_v35 = vsel %vm445_vm4, %v4209_v7, %v4210_v60  ;;  %v4218_v60 = vrot.slane %v10212_v39, 1 }
 0x6cd   :  { %v4588_v32 = vsel %vm445_vm4, %v4586_v15, %v4587_v28  ;;  %v6390_v15 = vpack.i.bf16 %v4214_v43, %v4211_v35 }
 0x6ce   :  { %v4047_v9 = vmax.f32 %v9984_v17, %v5836_v36  ;;  %6336 = vrot.lane.b32.xlu0 %v6335_v11, %s6536_s16  ;;  %v5837_v24 = vpop.f32.mrb[62].mxu1  ;;  %6341 = vrot.lane.b32.xlu1 %v6335_v11, %s6531_s28  ;;  %v6350_v17 = vpack.i.bf16 %v4126_v48, %v10121_v4  ;;  %v6370_v16 = vpack.i.bf16 %v4588_v32, %v4428_v12  ;;  %v4308_v48 = vrot.slane %v10182_v53, 2 }
 0x6cf   :  { %v5838_v49 = vpop.f32.mrb[63].mxu1  ;;  %v4304_v36 = vsel %vm798_vm3, %v4302_v50, %v4303_v33  ;;  %v4307_v11 = vsel %vm798_vm3, %v4305_v22, %v4306_v52  ;;  %v4314_v33 = vrot.slane %v10212_v39, 2  ;;  %v10222_v52 = vld [vmem:[#allocation3 + $0xf0] sm:$0xff]  ;;  %v4141_v1 = vld [vmem:[#allocation3 + $0xf8] sm:$0x3] }
 0x6d0   :  { %4108 = vst.msk [vmem:[#allocation3 + $0x111] sm:$0xff] %vm4049_vm12, %v4047_v9  ;;  %v5839_v55 = vadd.f32 %v5838_v49, %v5837_v24  ;;  %v6375_v9 = vpack.i.bf16 %v4211_v35, %v4208_v63  ;;  %v6380_v24 = vpack.i.bf16 %v4307_v11, %v4304_v36  ;;  %v10195_v49 = vld [vmem:[#allocation3 + $0xd0] sm:$0xff]  ;;  %v10201_v28 = vsel %vm798_vm3, %v4308_v48, %v4309_v14 }
 0x6d1   :  { %v6400_v61 = vpack.i.bf16 %v10195_v49, %v10182_v53  ;;  %v4221_v36 = vrot.slane %v10222_v52, 1  ;;  %v4318_v48 = vrot.slane %v4141_v1, 2 }
 0x6d2   :  { %v4048_v58 = vmax.f32 %v9986_v51, %v5839_v55  ;;  %6346 = vrot.lane.b32.xlu0 %v6345_v10, %s6530_s27  ;;  %6351 = vrot.lane.b32.xlu1 %v6350_v17, %s6532_s3  ;;  %v6360_v51 = vpack.i.bf16 %v10167_v19, %v10146_v38  ;;  %v4137_v55 = vld [vmem:[#allocation3 + $0xd8] sm:$0x3]  ;;  %v6385_v10 = vpack.i.bf16 %v10182_v53, %v10169_v25  ;;  %v4215_v17 = vrot.slane %v10195_v49, 1 }
 0x6d3   :  { %v4216_v12 = vrot.slane %v4137_v55, 1  ;;  %v4312_v32 = vrot.slane %v4137_v55, 2  ;;  %v10241_v14 = vld [vmem:[#allocation3 + $0x100] sm:$0xff]  ;;  %v6435_v55 = vpack.i.bf16 %v10222_v52, %v10212_v39 }
 0x6d4   :  { %4109 = vst.msk [vmem:[#allocation3 + $0x121] sm:$0xff] %vm4049_vm12, %v4048_v58  ;;  %v6395_v58 = vpack.i.bf16 %v10201_v28, %v4307_v11  ;;  %v4222_v11 = vrot.slane %v4141_v1, 1 }
 0x6d5   :  { %v4217_v57 = vsel %vm445_vm4, %v4215_v17, %v4216_v12  ;;  %v4224_v17 = vrot.slane %v10241_v14, 1 }
 0x6d6   :  { %6356 = vrot.lane.b32.xlu0 %v6355_v40, %s6533_s12  ;;  %6361 = vrot.lane.b32.xlu1 %v6360_v51, %s6534_s13  ;;  %v4311_v40 = vrot.slane %v10195_v49, 2  ;;  %v4139_v51 = vld [vmem:[#allocation3 + $0xe8] sm:$0x3]  ;;  %v6405_v47 = vpack.i.bf16 %v4217_v57, %v4214_v43 }
 0x6d7   :  { %v4219_v50 = vrot.slane %v4139_v51, 1  ;;  %v4315_v22 = vrot.slane %v4139_v51, 2  ;;  %v4143_v43 = vld [vmem:[#allocation3 + $0x108] sm:$0x3]  ;;  %v4145_v51 = vld [vmem:[#allocation3 + $0x118] sm:$0x3] }
 0x6d8   :  { %v10216_v7 = vsel %vm798_vm3, %v4311_v40, %v4312_v32  ;;  %v4225_v12 = vrot.slane %v4143_v43, 1  ;;  %v10256_v32 = vld [vmem:[#allocation3 + $0x110] sm:$0xff] }
 0x6d9   :  { %v4220_v63 = vsel %vm445_vm4, %v4218_v60, %v4219_v50  ;;  %v10231_v35 = vsel %vm798_vm3, %v4314_v33, %v4315_v22  ;;  %v4227_v33 = vrot.slane %v10256_v32, 1  ;;  %v4228_v22 = vrot.slane %v4145_v51, 1 }
 0x6da   :  { %6366 = vrot.lane.b32.xlu0 %v6365_v37, %s6535_s15  ;;  %6371 = vrot.lane.b32.xlu1 %v6370_v16, %s6536_s16  ;;  %v6415_v37 = vpack.i.bf16 %v10216_v7, %v10201_v28  ;;  %v6420_v16 = vpack.i.bf16 %v10212_v39, %v10195_v49  ;;  %v6425_v44 = vpack.i.bf16 %v4220_v63, %v4217_v57  ;;  %v4321_v57 = vrot.slane %v4143_v43, 2 }
 0x6db   :  { %v6430_v23 = vpack.i.bf16 %v10231_v35, %v10216_v7  ;;  %v4226_v40 = vsel %vm445_vm4, %v4224_v17, %v4225_v12  ;;  %v10289_v12 = vld [vmem:[#allocation3 + $0x130] sm:$0xff] }
 0x6de   :  { %6376 = vrot.lane.b32.xlu0 %v6375_v9, %s6531_s28  ;;  %6381 = vrot.lane.b32.xlu1 %v6380_v24, %s6530_s27  ;;  %v4223_v9 = vsel %vm445_vm4, %v4221_v36, %v4222_v11  ;;  %v4317_v24 = vrot.slane %v10222_v52, 2  ;;  %v4324_v36 = vrot.slane %v4145_v51, 2  ;;  %v4146_v11 = vld [vmem:[#allocation3 + $0x120] sm:$0xff] }
 0x6df   :  { %v6460_v60 = vpack.i.bf16 %v4226_v40, %v4223_v9 }
 0x6e2   :  { %6386 = vrot.lane.b32.xlu0 %v6385_v10, %s6532_s3  ;;  %6391 = vrot.lane.b32.xlu1 %v6390_v15, %s6533_s12  ;;  %v6440_v10 = vpack.i.bf16 %v4223_v9, %v4220_v63  ;;  %v10247_v15 = vsel %vm798_vm3, %v4317_v24, %v4318_v48  ;;  %v4323_v63 = vrot.slane %v10256_v32, 2  ;;  %v4429_v24 = vrot.slane %v4146_v11, 1 }
 0x6e4   :  { %v10276_v9 = vsel %vm798_vm3, %v4323_v63, %v4324_v36 }
 0x6e6   :  { %6396 = vrot.lane.b32.xlu0 %v6395_v58, %s6534_s13  ;;  %6401 = vrot.lane.b32.xlu1 %v6400_v61, %s6535_s15  ;;  %v6450_v58 = vpack.i.bf16 %v10247_v15, %v10231_v35  ;;  %v4320_v61 = vrot.slane %v10241_v14, 2 }
 0x6e8   :  { %v10262_v50 = vsel %vm798_vm3, %v4320_v61, %v4321_v57  ;;  %v4483_v61 = vrot.slane %v4146_v11, 2 }
 0x6e9   :  { %v6465_v1 = vpack.i.bf16 %v10262_v50, %v10247_v15  ;;  %v6485_v43 = vpack.i.bf16 %v10276_v9, %v10262_v50 }
 0x6ea   :  { %6406 = vrot.lane.b32.xlu0 %v6405_v47, %s6536_s16  ;;  %6411 = vrot.lane.b32.xlu1 %v6405_v47, %s6531_s28  ;;  %v6455_v47 = vpack.i.bf16 %v10241_v14, %v10222_v52 }
 0x6ee   :  { %6416 = vrot.lane.b32.xlu0 %v6415_v37, %s6530_s27  ;;  %6421 = vrot.lane.b32.xlu1 %v6420_v16, %s6532_s3  ;;  %v6470_v37 = vpack.i.bf16 %v10256_v32, %v10241_v14  ;;  %v4229_v16 = vsel %vm445_vm4, %v4227_v33, %v4228_v22 }
 0x6f2   :  { %6426 = vrot.lane.b32.xlu0 %v6425_v44, %s6533_s12  ;;  %6431 = vrot.lane.b32.xlu1 %v6430_v23, %s6534_s13  ;;  %v4147_v44 = vld [vmem:[#allocation3 + $0x128] sm:$0x3]  ;;  %v6475_v23 = vpack.i.bf16 %v4229_v16, %v4226_v40  ;;  %v4589_v40 = vrot.slane %v10289_v12, 1 }
 0x6f3   :  { %v4430_v48 = vrot.slane %v4147_v44, 1  ;;  %v4484_v57 = vrot.slane %v4147_v44, 2 }
 0x6f6   :  { %6436 = vrot.lane.b32.xlu0 %v6435_v55, %s6535_s15  ;;  %6441 = vrot.lane.b32.xlu1 %v6440_v10, %s6536_s16  ;;  %v6490_v55 = vpack.i.bf16 %v4146_v11, %v10256_v32 }
 0x6fa   :  { %6446 = vrot.lane.b32.xlu0 %v6440_v10, %s6531_s28  ;;  %6451 = vrot.lane.b32.xlu1 %v6450_v58, %s6530_s27  ;;  %v4431_v10 = vsel %vm445_vm4, %v4429_v24, %v4430_v48  ;;  %v10291_v58 = vld [vmem:[#allocation3 + $0x138] sm:$0x3] }
 0x6fb   :  { %v6495_v17 = vpack.i.bf16 %v4431_v10, %v4229_v16  ;;  %v4590_v51 = vrot.slane %v10291_v58, 1 }
 0x6fd   :  { %v4591_v33 = vsel %vm445_vm4, %v4589_v40, %v4590_v51  ;;  %vm4696_vm4 = vcmask 523264  }
 0x6fe   :  { %6456 = vrot.lane.b32.xlu0 %v6455_v47, %s6532_s3  ;;  %6461 = vrot.lane.b32.xlu1 %v6460_v60, %s6533_s12  ;;  %v10298_v47 = vsel %vm798_vm3, %v4483_v61, %v4484_v57 }
 0x702   :  { %6466 = vrot.lane.b32.xlu0 %v6465_v1, %s6534_s13  ;;  %6471 = vrot.lane.b32.xlu1 %v6470_v37, %s6535_s15 }
 0x706   :  { %6476 = vrot.lane.b32.xlu0 %v6475_v23, %s6536_s16  ;;  %6481 = vrot.lane.b32.xlu1 %v6475_v23, %s6531_s28 }
 0x70a   :  { %6486 = vrot.lane.b32.xlu0 %v6485_v43, %s6530_s27  ;;  %6491 = vrot.lane.b32.xlu1 %v6490_v55, %s6532_s3 }
 0x70e   :  { %6496 = vrot.lane.b32.xlu0 %v6495_v17, %s6533_s12  ;;  %4514 = vrot.lane.b32.xlu1 %v10276_v9, %s6534_s13 }
 0x712   :  { %4564 = vrot.lane.b32.xlu0 %v4146_v11, %s6535_s15  ;;  %4620 = vrot.lane.b32.xlu1 %v4431_v10, %s6536_s16 }
 0x716   :  { %4516 = vrot.lane.b32.xlu0 %v10298_v47, %s6534_s13  ;;  %4566 = vrot.lane.b32.xlu1 %v10289_v12, %s6535_s15 }
 0x717   :  { %v6242_v60 = vpop.permute.xlu1 %6241 }
 0x718   :  { %v6237_v22 = vpop.permute.xlu0 %6236  ;;  %v6243_v37 = vunpack.i.l.bf16 %v6242_v60  ;;  %v6244_v23 = vunpack.i.h.bf16 %v6242_v60 }
 0x719   :  { %v6238_v1 = vunpack.i.l.bf16 %v6237_v22  ;;  %v6239_v16 = vunpack.i.h.bf16 %v6237_v22 }
 0x71a   :  { %4622 = vrot.lane.b32.xlu0 %v4591_v33, %s6536_s16 }
 0x71b   :  { %v4646_v63 = vsel %vm4049_vm12, %v9995_v59, %v6238_v1  ;;  %v4647_v43 = vsel %vm4049_vm12, %v10017_v30, %v6239_v16 }
 0x71c   :  { %v6247_v36 = vpop.permute.xlu0 %6246  ;;  %v6252_v11 = vpop.permute.xlu1 %6251  ;;  %v4663_v48 = vsel %vm4662_vm0, %v4646_v63, %v6243_v37  ;;  %v4664_v40 = vsel %vm4662_vm0, %v4647_v43, %v6244_v23 }
 0x71d   :  { %v6248_v44 = vunpack.i.l.bf16 %v6247_v36  ;;  %v6253_v24 = vunpack.i.l.bf16 %v6252_v11  ;;  %v6249_v55 = vunpack.i.h.bf16 %v6247_v36  ;;  %v6254_v57 = vunpack.i.h.bf16 %v6252_v11 }
 0x71f   :  { %v4680_v10 = vsel %vm4679_vm6, %v4663_v48, %v6248_v44  ;;  %v4681_v33 = vsel %vm4679_vm6, %v4664_v40, %v6249_v55 }
 0x720   :  { %v6257_v17 = vpop.permute.xlu0 %6256  ;;  %v6262_v61 = vpop.permute.xlu1 %6261  ;;  %v4697_v60 = vsel %vm4696_vm4, %v4680_v10, %v6253_v24  ;;  %v4698_v11 = vsel %vm4696_vm4, %v4681_v33, %v6254_v57 }
 0x721   :  { %v6258_v59 = vunpack.i.l.bf16 %v6257_v17  ;;  %v6263_v51 = vunpack.i.l.bf16 %v6262_v61  ;;  %v6259_v22 = vunpack.i.h.bf16 %v6257_v17  ;;  %v6264_v63 = vunpack.i.h.bf16 %v6262_v61 }
 0x723   :  { %v4714_v1 = vsel %vm4713_vm10, %v4697_v60, %v6258_v59  ;;  %v4715_v24 = vsel %vm4713_vm10, %v4698_v11, %v6259_v22 }
 0x724   :  { %v6267_v30 = vpop.permute.xlu0 %6266  ;;  %v6272_v37 = vpop.permute.xlu1 %6271  ;;  %v4731_v44 = vsel %vm4730_vm13, %v4714_v1, %v6263_v51  ;;  %v4732_v57 = vsel %vm4730_vm13, %v4715_v24, %v6264_v63 }
 0x725   :  { %v6268_v16 = vunpack.i.l.bf16 %v6267_v30  ;;  %v6273_v36 = vunpack.i.l.bf16 %v6272_v37  ;;  %v6269_v23 = vunpack.i.h.bf16 %v6267_v30  ;;  %v6274_v43 = vunpack.i.h.bf16 %v6272_v37 }
 0x727   :  { %v4748_v48 = vsel %vm4747_vm14, %v4731_v44, %v6268_v16  ;;  %v4648_v61 = vsel %vm4049_vm12, %v10034_v5, %v6273_v36  ;;  %v4749_v60 = vsel %vm4747_vm14, %v4732_v57, %v6269_v23  ;;  %v4649_v33 = vsel %vm4049_vm12, %v10049_v6, %v6274_v43 }
 0x728   :  { %v6277_v55 = vpop.permute.xlu0 %6276  ;;  %4886 = vmatmul.mubr.f32.vlgmr.msra.gmra.mrb[64].mxu0 %v4748_v48  ;;  %v6282_v10 = vpop.permute.xlu1 %6281 }
 0x729   :  { %v6279_v17 = vunpack.i.h.bf16 %v6277_v55  ;;  %v6278_v59 = vunpack.i.l.bf16 %v6277_v55  ;;  %5578 = vmatprep.mubr.msk.f32.mxu0 %vm4049_vm12, %v10073_v27  ;;  %v6283_v40 = vunpack.i.l.bf16 %v6282_v10  ;;  %v6284_v22 = vunpack.i.h.bf16 %v6282_v10 }
 0x72b   :  { %v4665_v51 = vsel %vm4662_vm0, %v4648_v61, %v6278_v59  ;;  %v4666_v30 = vsel %vm4662_vm0, %v4649_v33, %v6279_v17 }
 0x72c   :  { %v6287_v1 = vpop.permute.xlu0 %6286  ;;  %4891 = vmatmul.mubr.f32.gmra.mrb[66].mxu0 %v4749_v60  ;;  %v6292_v37 = vpop.permute.xlu1 %6291  ;;  %v4682_v63 = vsel %vm4679_vm6, %v4665_v51, %v6283_v40  ;;  %v4683_v11 = vsel %vm4679_vm6, %v4666_v30, %v6284_v22 }
 0x72d   :  { %v6289_v27 = vunpack.i.h.bf16 %v6287_v1  ;;  %v6288_v16 = vunpack.i.l.bf16 %v6287_v1  ;;  %5579 = vmatprep.mubr.msk.f32.mxu0 %vm4049_vm12, %v10090_v3  ;;  %v6293_v5 = vunpack.i.l.bf16 %v6292_v37  ;;  %v6294_v44 = vunpack.i.h.bf16 %v6292_v37 }
 0x72f   :  { %v4699_v36 = vsel %vm4696_vm4, %v4682_v63, %v6288_v16  ;;  %v4700_v23 = vsel %vm4696_vm4, %v4683_v11, %v6289_v27 }
 0x730   :  { %v6297_v6 = vpop.permute.xlu0 %6296  ;;  %v6302_v48 = vpop.permute.xlu1 %6301  ;;  %v4716_v10 = vsel %vm4713_vm10, %v4699_v36, %v6293_v5  ;;  %v4717_v40 = vsel %vm4713_vm10, %v4700_v23, %v6294_v44 }
 0x731   :  { %v6299_v24 = vunpack.i.h.bf16 %v6297_v6  ;;  %v6298_v43 = vunpack.i.l.bf16 %v6297_v6  ;;  %v6303_v55 = vunpack.i.l.bf16 %v6302_v48  ;;  %v6304_v3 = vunpack.i.h.bf16 %v6302_v48 }
 0x733   :  { %v4733_v17 = vsel %vm4730_vm13, %v4716_v10, %v6298_v43  ;;  %v4734_v60 = vsel %vm4730_vm13, %v4717_v40, %v6299_v24 }
 0x734   :  { %v6307_v59 = vpop.permute.xlu0 %6306  ;;  %v4750_v61 = vsel %vm4747_vm14, %v4733_v17, %v6303_v55  ;;  %v6312_v57 = vpop.permute.xlu1 %6311  ;;  %v4751_v37 = vsel %vm4747_vm14, %v4734_v60, %v6304_v3 }
 0x735   :  { %v6308_v51 = vunpack.i.l.bf16 %v6307_v59  ;;  %4896 = vmatmul.mubr.f32.gmra.mrb[68].mxu0 %v4750_v61  ;;  %v6313_v33 = vunpack.i.l.bf16 %v6312_v57  ;;  %v6309_v22 = vunpack.i.h.bf16 %v6307_v59  ;;  %v6314_v5 = vunpack.i.h.bf16 %v6312_v57 }
 0x736   :  { %5580 = vmatprep.mubr.msk.f32.mxu0 %vm4049_vm12, %v10110_v62 }
 0x737   :  { %v4650_v1 = vsel %vm4049_vm12, %v10068_v21, %v6308_v51  ;;  %v4651_v62 = vsel %vm4049_vm12, %v10080_v20, %v6309_v22 }
 0x738   :  { %v6317_v30 = vpop.permute.xlu0 %6316  ;;  %v6322_v27 = vpop.permute.xlu1 %6321  ;;  %v4667_v36 = vsel %vm4662_vm0, %v4650_v1, %v6313_v33  ;;  %v4668_v24 = vsel %vm4662_vm0, %v4651_v62, %v6314_v5 }
 0x739   :  { %v6318_v16 = vunpack.i.l.bf16 %v6317_v30  ;;  %4901 = vmatmul.mubr.f32.gmra.mrb[70].mxu0 %v4751_v37  ;;  %v6323_v63 = vunpack.i.l.bf16 %v6322_v27  ;;  %v6319_v44 = vunpack.i.h.bf16 %v6317_v30  ;;  %v6324_v48 = vunpack.i.h.bf16 %v6322_v27 }
 0x73a   :  { %5581 = vmatprep.mubr.msk.f32.mxu0 %vm4049_vm12, %v10128_v54 }
 0x73b   :  { %v4684_v11 = vsel %vm4679_vm6, %v4667_v36, %v6318_v16  ;;  %v4685_v10 = vsel %vm4679_vm6, %v4668_v24, %v6319_v44 }
 0x73c   :  { %v6327_v21 = vpop.permute.xlu0 %6326  ;;  %v6332_v6 = vpop.permute.xlu1 %6331  ;;  %v4701_v55 = vsel %vm4696_vm4, %v4684_v11, %v6323_v63  ;;  %v4702_v51 = vsel %vm4696_vm4, %v4685_v10, %v6324_v48  ;;  %v4640_v10 = vrot.slane %v10148_v18, 2 }
 0x73d   :  { %v6328_v23 = vunpack.i.l.bf16 %v6327_v21  ;;  %v6333_v43 = vunpack.i.l.bf16 %v6332_v6  ;;  %v6329_v17 = vunpack.i.h.bf16 %v6327_v21  ;;  %v6334_v61 = vunpack.i.h.bf16 %v6332_v6 }
 0x73f   :  { %v4718_v54 = vsel %vm4713_vm10, %v4701_v55, %v6328_v23  ;;  %v4719_v22 = vsel %vm4713_vm10, %v4702_v51, %v6329_v17 }
 0x740   :  { %v6337_v3 = vpop.permute.xlu0 %6336  ;;  %v6342_v59 = vpop.permute.xlu1 %6341  ;;  %v4735_v57 = vsel %vm4730_vm13, %v4718_v54, %v6333_v43  ;;  %v4736_v36 = vsel %vm4730_vm13, %v4719_v22, %v6334_v61 }
 0x741   :  { %v6338_v20 = vunpack.i.l.bf16 %v6337_v3  ;;  %v6343_v40 = vunpack.i.l.bf16 %v6342_v59  ;;  %v6339_v60 = vunpack.i.h.bf16 %v6337_v3  ;;  %v6344_v1 = vunpack.i.h.bf16 %v6342_v59 }
 0x743   :  { %v4752_v33 = vsel %vm4747_vm14, %v4735_v57, %v6338_v20  ;;  %v4652_v5 = vsel %vm4049_vm12, %v10102_v41, %v6343_v40  ;;  %v4753_v44 = vsel %vm4747_vm14, %v4736_v36, %v6339_v60  ;;  %v4653_v11 = vsel %vm4049_vm12, %v10121_v4, %v6344_v1 }
 0x744   :  { %v6347_v30 = vpop.permute.xlu0 %6346  ;;  %4906 = vmatmul.mubr.f32.gmra.mrb[72].mxu0 %v4752_v33  ;;  %v6352_v37 = vpop.permute.xlu1 %6351  ;;  %v4641_v4 = vrot.slane %v10150_v42, 2 }
 0x745   :  { %v6349_v27 = vunpack.i.h.bf16 %v6347_v30  ;;  %v6348_v16 = vunpack.i.l.bf16 %v6347_v30  ;;  %5582 = vmatprep.mubr.msk.f32.mxu0 %vm4049_vm12, %v10146_v38  ;;  %v6353_v63 = vunpack.i.l.bf16 %v6352_v37  ;;  %v6354_v21 = vunpack.i.h.bf16 %v6352_v37 }
 0x746   :  { %v4642_v60 = vsel %vm798_vm3, %v4640_v10, %v4641_v4 }
 0x747   :  { %v4669_v62 = vsel %vm4662_vm0, %v4652_v5, %v6348_v16  ;;  %v4670_v23 = vsel %vm4662_vm0, %v4653_v11, %v6349_v27 }
 0x748   :  { %v6357_v6 = vpop.permute.xlu0 %6356  ;;  %4911 = vmatmul.mubr.f32.gmra.mrb[74].mxu0 %v4753_v44  ;;  %v6362_v48 = vpop.permute.xlu1 %6361  ;;  %v4686_v43 = vsel %vm4679_vm6, %v4669_v62, %v6353_v63  ;;  %v4687_v54 = vsel %vm4679_vm6, %v4670_v23, %v6354_v21 }
 0x749   :  { %v6359_v38 = vunpack.i.h.bf16 %v6357_v6  ;;  %v6358_v24 = vunpack.i.l.bf16 %v6357_v6  ;;  %5583 = vmatprep.mubr.msk.f32.mxu0 %vm4049_vm12, %v10167_v19  ;;  %v6363_v41 = vunpack.i.l.bf16 %v6362_v48  ;;  %v6364_v17 = vunpack.i.h.bf16 %v6362_v48 }
 0x74b   :  { %v4703_v55 = vsel %vm4696_vm4, %v4686_v43, %v6358_v24  ;;  %v4704_v59 = vsel %vm4696_vm4, %v4687_v54, %v6359_v38 }
 0x74c   :  { %v6367_v3 = vpop.permute.xlu0 %6366  ;;  %v6372_v20 = vpop.permute.xlu1 %6371  ;;  %v4720_v19 = vsel %vm4713_vm10, %v4703_v55, %v6363_v41  ;;  %v4721_v22 = vsel %vm4713_vm10, %v4704_v59, %v6364_v17 }
 0x74d   :  { %v6369_v61 = vunpack.i.h.bf16 %v6367_v3  ;;  %v6368_v40 = vunpack.i.l.bf16 %v6367_v3  ;;  %v6373_v57 = vunpack.i.l.bf16 %v6372_v20  ;;  %v6374_v33 = vunpack.i.h.bf16 %v6372_v20 }
 0x74f   :  { %v4737_v51 = vsel %vm4730_vm13, %v4720_v19, %v6368_v40  ;;  %v4738_v37 = vsel %vm4730_vm13, %v4721_v22, %v6369_v61 }
 0x750   :  { %v6377_v18 = vpop.permute.xlu0 %6376  ;;  %v4754_v42 = vsel %vm4747_vm14, %v4737_v51, %v6373_v57  ;;  %v6382_v1 = vpop.permute.xlu1 %6381  ;;  %v4755_v36 = vsel %vm4747_vm14, %v4738_v37, %v6374_v33 }
 0x751   :  { %v6378_v30 = vunpack.i.l.bf16 %v6377_v18  ;;  %4916 = vmatmul.mubr.f32.gmra.mrb[76].mxu0 %v4754_v42  ;;  %v6383_v27 = vunpack.i.l.bf16 %v6382_v1  ;;  %v6379_v16 = vunpack.i.h.bf16 %v6377_v18  ;;  %v6384_v11 = vunpack.i.h.bf16 %v6382_v1 }
 0x752   :  { %5584 = vmatprep.mubr.msk.f32.mxu0 %vm4049_vm12, %v4642_v60 }
 0x753   :  { %v4654_v5 = vsel %vm4049_vm12, %v10162_v45, %v6378_v30  ;;  %v4655_v23 = vsel %vm4049_vm12, %v10169_v25, %v6379_v16 }
 0x754   :  { %v6387_v63 = vpop.permute.xlu0 %6386  ;;  %v6392_v62 = vpop.permute.xlu1 %6391  ;;  %v4671_v6 = vsel %vm4662_vm0, %v4654_v5, %v6383_v27  ;;  %v4672_v55 = vsel %vm4662_vm0, %v4655_v23, %v6384_v11 }
 0x755   :  { %v6388_v44 = vunpack.i.l.bf16 %v6387_v63  ;;  %4921 = vmatmul.mubr.f32.gmra.mrb[78].mxu0 %v4755_v36  ;;  %v6393_v21 = vunpack.i.l.bf16 %v6392_v62  ;;  %v6389_v48 = vunpack.i.h.bf16 %v6387_v63  ;;  %v6394_v43 = vunpack.i.h.bf16 %v6392_v62 }
 0x756   :  { %5585 = vmatprep.mubr.msk.f32.mxu0 %vm4049_vm12, %v10201_v28 }
 0x757   :  { %v4688_v38 = vsel %vm4679_vm6, %v4671_v6, %v6388_v44  ;;  %v4689_v17 = vsel %vm4679_vm6, %v4672_v55, %v6389_v48 }
 0x758   :  { %v6397_v45 = vpop.permute.xlu0 %6396  ;;  %v6402_v24 = vpop.permute.xlu1 %6401  ;;  %v4705_v4 = vsel %vm4696_vm4, %v4688_v38, %v6393_v21  ;;  %v4706_v57 = vsel %vm4696_vm4, %v4689_v17, %v6394_v43 }
 0x759   :  { %v6398_v41 = vunpack.i.l.bf16 %v6397_v45  ;;  %v6403_v10 = vunpack.i.l.bf16 %v6402_v24  ;;  %v6399_v54 = vunpack.i.h.bf16 %v6397_v45  ;;  %v6404_v20 = vunpack.i.h.bf16 %v6402_v24 }
 0x75b   :  { %v4722_v28 = vsel %vm4713_vm10, %v4705_v4, %v6398_v41  ;;  %v4723_v60 = vsel %vm4713_vm10, %v4706_v57, %v6399_v54 }
 0x75c   :  { %v6407_v3 = vpop.permute.xlu0 %6406  ;;  %v6412_v59 = vpop.permute.xlu1 %6411  ;;  %v4739_v40 = vsel %vm4730_vm13, %v4722_v28, %v6403_v10  ;;  %v4740_v27 = vsel %vm4730_vm13, %v4723_v60, %v6404_v20 }
 0x75d   :  { %v6408_v25 = vunpack.i.l.bf16 %v6407_v3  ;;  %v6413_v61 = vunpack.i.l.bf16 %v6412_v59  ;;  %v6409_v19 = vunpack.i.h.bf16 %v6407_v3  ;;  %v6414_v33 = vunpack.i.h.bf16 %v6412_v59 }
 0x75f   :  { %v4756_v51 = vsel %vm4747_vm14, %v4739_v40, %v6408_v25  ;;  %v4656_v30 = vsel %vm4049_vm12, %v10182_v53, %v6413_v61  ;;  %v4757_v5 = vsel %vm4747_vm14, %v4740_v27, %v6409_v19  ;;  %v4657_v63 = vsel %vm4049_vm12, %v10195_v49, %v6414_v33 }
 0x760   :  { %v6417_v18 = vpop.permute.xlu0 %6416  ;;  %4926 = vmatmul.mubr.f32.gmra.mrb[80].mxu0 %v4756_v51  ;;  %v6422_v42 = vpop.permute.xlu1 %6421 }
 0x761   :  { %v6419_v22 = vunpack.i.h.bf16 %v6417_v18  ;;  %v6418_v1 = vunpack.i.l.bf16 %v6417_v18  ;;  %5586 = vmatprep.mubr.msk.f32.mxu0 %vm4049_vm12, %v10216_v7  ;;  %v6423_v37 = vunpack.i.l.bf16 %v6422_v42  ;;  %v6424_v36 = vunpack.i.h.bf16 %v6422_v42 }
 0x763   :  { %v4673_v16 = vsel %vm4662_vm0, %v4656_v30, %v6418_v1  ;;  %v4674_v44 = vsel %vm4662_vm0, %v4657_v63, %v6419_v22 }
 0x764   :  { %v6427_v62 = vpop.permute.xlu0 %6426  ;;  %4931 = vmatmul.mubr.f32.gmra.mrb[82].mxu0 %v4757_v5  ;;  %v6432_v11 = vpop.permute.xlu1 %6431  ;;  %v4690_v6 = vsel %vm4679_vm6, %v4673_v16, %v6423_v37  ;;  %v4691_v38 = vsel %vm4679_vm6, %v4674_v44, %v6424_v36 }
 0x765   :  { %v6429_v7 = vunpack.i.h.bf16 %v6427_v62  ;;  %v6428_v21 = vunpack.i.l.bf16 %v6427_v62  ;;  %5587 = vmatprep.mubr.msk.f32.mxu0 %vm4049_vm12, %v10231_v35  ;;  %v6433_v53 = vunpack.i.l.bf16 %v6432_v11  ;;  %v6434_v48 = vunpack.i.h.bf16 %v6432_v11 }
 0x767   :  { %v4707_v23 = vsel %vm4696_vm4, %v4690_v6, %v6428_v21  ;;  %v4708_v45 = vsel %vm4696_vm4, %v4691_v38, %v6429_v7 }
 0x768   :  { %v6437_v49 = vpop.permute.xlu0 %6436  ;;  %v6442_v24 = vpop.permute.xlu1 %6441  ;;  %v4724_v10 = vsel %vm4713_vm10, %v4707_v23, %v6433_v53  ;;  %v4725_v28 = vsel %vm4713_vm10, %v4708_v45, %v6434_v48 }
 0x769   :  { %v6439_v41 = vunpack.i.h.bf16 %v6437_v49  ;;  %v6438_v43 = vunpack.i.l.bf16 %v6437_v49  ;;  %v6443_v55 = vunpack.i.l.bf16 %v6442_v24  ;;  %v6444_v35 = vunpack.i.h.bf16 %v6442_v24 }
 0x76b   :  { %v4741_v4 = vsel %vm4730_vm13, %v4724_v10, %v6438_v43  ;;  %v4742_v25 = vsel %vm4730_vm13, %v4725_v28, %v6439_v41  ;;  %v4643_v28 = vrot.slane %v10289_v12, 2 }
 0x76c   :  { %v6447_v17 = vpop.permute.xlu0 %6446  ;;  %v4758_v54 = vsel %vm4747_vm14, %v4741_v4, %v6443_v55  ;;  %v6452_v3 = vpop.permute.xlu1 %6451  ;;  %v4759_v19 = vsel %vm4747_vm14, %v4742_v25, %v6444_v35 }
 0x76d   :  { %v6448_v59 = vunpack.i.l.bf16 %v6447_v17  ;;  %4936 = vmatmul.mubr.f32.gmra.mrb[84].mxu0 %v4758_v54  ;;  %v6453_v20 = vunpack.i.l.bf16 %v6452_v3  ;;  %v6449_v61 = vunpack.i.h.bf16 %v6447_v17  ;;  %v6454_v33 = vunpack.i.h.bf16 %v6452_v3 }
 0x76e   :  { %5588 = vmatprep.mubr.msk.f32.mxu0 %vm4049_vm12, %v10247_v15 }
 0x76f   :  { %v4658_v40 = vsel %vm4049_vm12, %v10212_v39, %v6448_v59  ;;  %v4659_v15 = vsel %vm4049_vm12, %v10222_v52, %v6449_v61 }
 0x770   :  { %v6457_v57 = vpop.permute.xlu0 %6456  ;;  %v6462_v51 = vpop.permute.xlu1 %6461  ;;  %v4675_v42 = vsel %vm4662_vm0, %v4658_v40, %v6453_v20  ;;  %v4676_v16 = vsel %vm4662_vm0, %v4659_v15, %v6454_v33 }
 0x771   :  { %v6458_v60 = vunpack.i.l.bf16 %v6457_v57  ;;  %4941 = vmatmul.mubr.f32.gmra.mrb[86].mxu0 %v4759_v19  ;;  %v6463_v18 = vunpack.i.l.bf16 %v6462_v51  ;;  %v6459_v22 = vunpack.i.h.bf16 %v6457_v57  ;;  %v6464_v27 = vunpack.i.h.bf16 %v6462_v51 }
 0x772   :  { %5589 = vmatprep.mubr.msk.f32.mxu0 %vm4049_vm12, %v10262_v50 }
 0x773   :  { %v4692_v1 = vsel %vm4679_vm6, %v4675_v42, %v6458_v60  ;;  %v4693_v36 = vsel %vm4679_vm6, %v4676_v16, %v6459_v22 }
 0x774   :  { %v6467_v39 = vpop.permute.xlu0 %6466  ;;  %v6472_v30 = vpop.permute.xlu1 %6471  ;;  %v4709_v63 = vsel %vm4696_vm4, %v4692_v1, %v6463_v18  ;;  %v4710_v6 = vsel %vm4696_vm4, %v4693_v36, %v6464_v27 }
 0x775   :  { %v6468_v37 = vunpack.i.l.bf16 %v6467_v39  ;;  %v6473_v5 = vunpack.i.l.bf16 %v6472_v30  ;;  %v6469_v62 = vunpack.i.h.bf16 %v6467_v39  ;;  %v6474_v7 = vunpack.i.h.bf16 %v6472_v30 }
 0x776   :  { %v3631_v30 = vsel %vm3599_vm1, 1.0, %v6518_v2  ;;  %vm5196_vm1 = vcmask 31744  }
 0x777   :  { %v4726_v50 = vsel %vm4713_vm10, %v4709_v63, %v6468_v37  ;;  %v4727_v38 = vsel %vm4713_vm10, %v4710_v6, %v6469_v62  ;;  %6001 = vmatprep.mubr.msk.f32.mxu1 %vm4696_vm4, %v3631_v30  ;;  %v10476_v37 = vld [vmem:[%s10588_s4] ss:$0 sm:$0xff] }
 0x778   :  { %v6477_v44 = vpop.permute.xlu0 %6476  ;;  %v6482_v11 = vpop.permute.xlu1 %6481  ;;  %v4743_v53 = vsel %vm4730_vm13, %v4726_v50, %v6473_v5  ;;  %v4744_v55 = vsel %vm4730_vm13, %v4727_v38, %v6474_v7 }
 0x779   :  { %v6478_v52 = vunpack.i.l.bf16 %v6477_v44  ;;  %v6483_v21 = vunpack.i.l.bf16 %v6482_v11  ;;  %v6479_v23 = vunpack.i.h.bf16 %v6477_v44  ;;  %v6484_v10 = vunpack.i.h.bf16 %v6482_v11 }
 0x77b   :  { %v4760_v48 = vsel %vm4747_vm14, %v4743_v53, %v6478_v52  ;;  %v4660_v41 = vsel %vm4049_vm12, %v10241_v14, %v6483_v21  ;;  %v4761_v35 = vsel %vm4747_vm14, %v4744_v55, %v6479_v23  ;;  %v4644_v14 = vrot.slane %v10291_v58, 2 }
 0x77c   :  { %v6487_v49 = vpop.permute.xlu0 %6486  ;;  %4946 = vmatmul.mubr.f32.gmra.mrb[88].mxu0 %v4760_v48  ;;  %v6492_v45 = vpop.permute.xlu1 %6491  ;;  %v4661_v25 = vsel %vm4049_vm12, %v10256_v32, %v6484_v10 }
 0x77d   :  { %v6488_v24 = vunpack.i.l.bf16 %v6487_v49  ;;  %5590 = vmatprep.mubr.msk.f32.mxu0 %vm4049_vm12, %v10276_v9  ;;  %v6493_v43 = vunpack.i.l.bf16 %v6492_v45  ;;  %v6489_v17 = vunpack.i.h.bf16 %v6487_v49  ;;  %v6494_v20 = vunpack.i.h.bf16 %v6492_v45 }
 0x77f   :  { %v4677_v4 = vsel %vm4662_vm0, %v4660_v41, %v6488_v24  ;;  %v4678_v40 = vsel %vm4662_vm0, %v4661_v25, %v6489_v17 }
 0x780   :  { %v6497_v54 = vpop.permute.xlu0 %6496  ;;  %4951 = vmatmul.mubr.f32.gmra.mrb[90].mxu0 %v4761_v35  ;;  %v4515_v3 = vpop.permute.xlu1 %4514  ;;  %v4694_v9 = vsel %vm4679_vm6, %v4677_v4, %v6493_v43  ;;  %v4695_v33 = vsel %vm4679_vm6, %v4678_v40, %v6494_v20 }
 0x781   :  { %v6498_v59 = vunpack.i.l.bf16 %v6497_v54  ;;  %5591 = vmatprep.mubr.msk.f32.mxu0 %vm4049_vm12, %v10298_v47  ;;  %v6499_v57 = vunpack.i.h.bf16 %v6497_v54  ;;  %v4645_v47 = vsel %vm798_vm3, %v4643_v28, %v4644_v14  ;;  %vm5209_vm3 = vcmask 1043456  }
 0x783   :  { %v4711_v61 = vsel %vm4696_vm4, %v4694_v9, %v6498_v59  ;;  %v4712_v18 = vsel %vm4696_vm4, %v4695_v33, %v6499_v57 }
 0x784   :  { %v4565_v19 = vpop.permute.xlu0 %4564  ;;  %v4728_v12 = vsel %vm4713_vm10, %v4711_v61, %v4515_v3  ;;  %v4621_v51 = vpop.permute.xlu1 %4620 }
 0x785   :  { %v4745_v60 = vsel %vm4730_vm13, %v4728_v12, %v4565_v19 }
 0x786   :  { %v4762_v58 = vsel %vm4747_vm14, %v4745_v60, %v4621_v51 }
 0x787   :  { %4956 = vmatmul.mubr.f32.gmra.mrb[92].mxu0 %v4762_v58 }
 0x788   :  { %v4517_v32 = vpop.permute.xlu0 %4516  ;;  %5592 = vmatprep.mubr.msk.f32.mxu0 %vm4049_vm12, %v4645_v47  ;;  %v4567_v15 = vpop.permute.xlu1 %4566 }
 0x789   :  { %v4729_v42 = vsel %vm4713_vm10, %v4712_v18, %v4517_v32 }
 0x78a   :  { %v4746_v22 = vsel %vm4730_vm13, %v4729_v42, %v4567_v15 }
 0x78c   :  { %v4623_v1 = vpop.permute.xlu0 %4622 }
 0x78d   :  { %v4763_v39 = vsel %vm4747_vm14, %v4746_v22, %v4623_v1 }
 0x78e   :  { %4961 = vmatmul.mubr.f32.gmra.mrb[94].mxu0 %v4763_v39 }
 0x7fb   :  { %v4887_v27 = vpop.f32.mrb[64].mxu0 }
 0x7fc   :  { %v4889_v16 = vpop.f32.mrb[65].mxu0  ;;  %v4888_v5 = vadd.f32 %v10476_v37, %v4887_v27 }
 0x7fe   :  { %v4966_v50 = vmax.f32 %v4888_v5, 0.0 }
 0x7ff   :  { %v4892_v63 = vpop.f32.mrb[66].mxu0 }
 0x800   :  { %v4893_v36 = vadd.f32 %v10476_v37, %v4892_v63  ;;  %v4894_v62 = vpop.f32.mrb[67].mxu0 }
 0x802   :  { %v4967_v44 = vmax.f32 %v4893_v36, 0.0 }
 0x804   :  { %v4982_v11 = vmax.f32 %v4966_v50, %v4967_v44 }
 0x808   :  { %v4897_v26 = vpop.f32.mrb[68].mxu0 }
 0x809   :  { %v4899_v52 = vpop.f32.mrb[69].mxu0  ;;  %v4898_v7 = vadd.f32 %v10476_v37, %v4897_v26 }
 0x80b   :  { %v4968_v23 = vmax.f32 %v4898_v7, 0.0 }
 0x80c   :  { %v4902_v21 = vpop.f32.mrb[70].mxu0 }
 0x80d   :  { %v4903_v53 = vadd.f32 %v10476_v37, %v4902_v21  ;;  %v4904_v6 = vpop.f32.mrb[71].mxu0 }
 0x80f   :  { %v4969_v48 = vmax.f32 %v4903_v53, 0.0 }
 0x811   :  { %v4983_v38 = vmax.f32 %v4968_v23, %v4969_v48 }
 0x813   :  { %v10482_v49 = vpack.c.bf16 %v4983_v38, %v4982_v11 }
 0x815   :  { %6161 = vmatprep.subr.bf16.mxu1 %v10482_v49 }
 0x816   :  { %6163 = vmatpush3.bf16.msra.mxu1 %v10482_v49 }
 0x817   :  { %v4907_v45 = vpop.f32.mrb[72].mxu0 }
 0x818   :  { %v4909_v24 = vpop.f32.mrb[73].mxu0  ;;  %v4908_v41 = vadd.f32 %v10476_v37, %v4907_v45 }
 0x81a   :  { %v4970_v4 = vmax.f32 %v4908_v41, 0.0 }
 0x81b   :  { %v4912_v43 = vpop.f32.mrb[74].mxu0 }
 0x81c   :  { %v4913_v55 = vadd.f32 %v10476_v37, %v4912_v43  ;;  %v4914_v10 = vpop.f32.mrb[75].mxu0 }
 0x81d   :  { %v3635_v10 = vsel %vm3603_vm7, 1.0, %v6518_v2 }
 0x81e   :  { %v4971_v35 = vmax.f32 %v4913_v55, 0.0  ;;  %v3633_v55 = vsel %vm3601_vm5, 1.0, %v6518_v2 }
 0x820   :  { %v4984_v17 = vmax.f32 %v4970_v4, %v4971_v35  ;;  %v5306_v35 = vld [vmem:[%s10590_s7 + $0x20] sm:$0xff] }
 0x824   :  { %v4917_v54 = vpop.f32.mrb[76].mxu0 }
 0x825   :  { %v4919_v28 = vpop.f32.mrb[77].mxu0  ;;  %v4918_v3 = vadd.f32 %v10476_v37, %v4917_v54 }
 0x827   :  { %v4972_v25 = vmax.f32 %v4918_v3, 0.0 }
 0x828   :  { %v4922_v59 = vpop.f32.mrb[78].mxu0 }
 0x829   :  { %v4923_v14 = vadd.f32 %v10476_v37, %v4922_v59  ;;  %v4924_v9 = vpop.f32.mrb[79].mxu0 }
 0x82b   :  { %v4973_v20 = vmax.f32 %v4923_v14, 0.0 }
 0x82d   :  { %v4985_v61 = vmax.f32 %v4972_v25, %v4973_v20 }
 0x82f   :  { %v6164_v40 = vpack.c.bf16 %v4985_v61, %v4984_v17  ;;  %v5307_v17 = vld [vmem:[%s10590_s7 + $0x28] sm:$0xff] }
 0x830   :  { %v6200_v54 = vpack.c.bf16 %v5307_v17, %v5306_v35 }
 0x831   :  { %6165 = vmatprep.subr.bf16.mxu1 %v6164_v40 }
 0x832   :  { %6167 = vmatpush3.bf16.msra.mxu1 %v6164_v40 }
 0x833   :  { %v4927_v57 = vpop.f32.mrb[80].mxu0 }
 0x834   :  { %v4929_v19 = vpop.f32.mrb[81].mxu0  ;;  %v4928_v12 = vadd.f32 %v10476_v37, %v4927_v57 }
 0x836   :  { %v4974_v58 = vmax.f32 %v4928_v12, 0.0 }
 0x837   :  { %v4932_v51 = vpop.f32.mrb[82].mxu0 }
 0x838   :  { %v4933_v60 = vadd.f32 %v10476_v37, %v4932_v51  ;;  %v4934_v47 = vpop.f32.mrb[83].mxu0  ;;  %v5308_v51 = vld [vmem:[%s10590_s7 + $0x30] sm:$0xff] }
 0x83a   :  { %v4975_v33 = vmax.f32 %v4933_v60, 0.0  ;;  %v5309_v60 = vld [vmem:[%s10590_s7 + $0x38] sm:$0xff] }
 0x83b   :  { %v6204_v47 = vpack.c.bf16 %v5309_v60, %v5308_v51 }
 0x83c   :  { %v4986_v32 = vmax.f32 %v4974_v58, %v4975_v33  ;;  %v5601_v58 = vld [vmem:[%s10591_s6] ss:$0 sm:$0xff] }
 0x840   :  { %v4937_v18 = vpop.f32.mrb[84].mxu0 }
 0x841   :  { %v4939_v42 = vpop.f32.mrb[85].mxu0  ;;  %v4938_v15 = vadd.f32 %v10476_v37, %v4937_v18 }
 0x843   :  { %v4976_v30 = vmax.f32 %v4938_v15, 0.0 }
 0x844   :  { %v4942_v22 = vpop.f32.mrb[86].mxu0 }
 0x845   :  { %v4943_v1 = vadd.f32 %v10476_v37, %v4942_v22  ;;  %v4944_v39 = vpop.f32.mrb[87].mxu0 }
 0x847   :  { %v4977_v27 = vmax.f32 %v4943_v1, 0.0 }
 0x849   :  { %v4987_v16 = vmax.f32 %v4976_v30, %v4977_v27 }
 0x84b   :  { %v6168_v5 = vpack.c.bf16 %v4987_v16, %v4986_v32 }
 0x84d   :  { %6169 = vmatprep.subr.bf16.mxu1 %v6168_v5 }
 0x84e   :  { %6171 = vmatpush3.bf16.msra.mxu1 %v6168_v5 }
 0x84f   :  { %v4947_v63 = vpop.f32.mrb[88].mxu0 }
 0x850   :  { %v4949_v36 = vpop.f32.mrb[89].mxu0  ;;  %v4948_v62 = vadd.f32 %v10476_v37, %v4947_v63  ;;  %v5607_v63 = vld [vmem:[%s10592_s8] ss:$0 sm:$0xff] }
 0x852   :  { %v4978_v26 = vmax.f32 %v4948_v62, 0.0 }
 0x853   :  { %v4952_v50 = vpop.f32.mrb[90].mxu0 }
 0x854   :  { %v4953_v44 = vadd.f32 %v10476_v37, %v4952_v50  ;;  %v4954_v11 = vpop.f32.mrb[91].mxu0 }
 0x856   :  { %v4979_v52 = vmax.f32 %v4953_v44, 0.0 }
 0x858   :  { %v4988_v7 = vmax.f32 %v4978_v26, %v4979_v52 }
 0x85a   :  { %v4957_v21 = vpop.f32.mrb[92].mxu0 }
 0x85b   :  { %v4959_v53 = vpop.f32.mrb[93].mxu0  ;;  %v4958_v6 = vadd.f32 %v10476_v37, %v4957_v21 }
 0x85d   :  { %v4980_v45 = vmax.f32 %v4958_v6, 0.0 }
 0x861   :  { %v4962_v23 = vpop.f32.mrb[94].mxu0 }
 0x862   :  { %v4963_v48 = vadd.f32 %v10476_v37, %v4962_v23  ;;  %v4964_v38 = vpop.f32.mrb[95].mxu0  ;;  %v3711_v37 = vsel %vm3679_vm15, 1.0, %v6518_v2  ;;  %v5304_v2 = vld [vmem:[%s10590_s7 + $0x10] sm:$0xff] }
 0x863   :  { %v6196_v4 = vpack.c.bf16 %v5305_v34, %v5304_v2 }
 0x864   :  { %v4981_v24 = vmax.f32 %v4963_v48, 0.0 }
 0x866   :  { %v4989_v41 = vmax.f32 %v4980_v45, %v4981_v24 }
 0x868   :  { %v6172_v43 = vpack.c.bf16 %v4989_v41, %v4988_v7 }
 0x86a   :  { %6173 = vmatprep.subr.bf16.mxu1 %v6172_v43 }
 0x86b   :  { %6175 = vmatpush3.bf16.msra.mxu1 %v6172_v43 }
 0x86c   :  { %6177 = vmatprep.subr.bf16.mxu1 %v10482_v49 }
 0x86e   :  { %6002 = vmatmul.mubr.msk.f32.vlgmr.msra.gmra.mrb[64].mxu1 %vm4696_vm4, %v3633_v55 }
 0x86f   :  { %6179 = vmatpush3.bf16.msra.mxu1 %v10482_v49  ;;  %6004 = vmatprep.mubr.msk.f32.mxu1 %vm4696_vm4, %v3635_v10  ;;  %v5303_v49 = vld [vmem:[%s10590_s7 + $0x8] sm:$0xff] }
 0x870   :  { %6181 = vmatprep.subr.bf16.mxu1 %v6164_v40  ;;  %v6192_v0 = vpack.c.bf16 %v5303_v49, %v5302_v13 }
 0x872   :  { %6005 = vmatmul.mubr.msk.f32.gmra.mrb[66].mxu1 %vm4696_vm4, %v3637_v46  ;;  %6193 = vmatprep.subr.bf16.mxu0 %v6192_v0 }
 0x873   :  { %6183 = vmatpush3.bf16.msra.mxu1 %v6164_v40  ;;  %6023 = vmatprep.mubr.msk.f32.mxu1 %vm4696_vm4, %v3711_v37 }
 0x874   :  { %6185 = vmatprep.subr.bf16.mxu1 %v6168_v5  ;;  %6195 = vmatpush3.bf16.msra.mxu0 %v6192_v0 }
 0x875   :  { %6197 = vmatprep.subr.bf16.mxu0 %v6196_v4 }
 0x877   :  { %6187 = vmatpush3.bf16.msra.mxu1 %v6168_v5 }
 0x878   :  { %6189 = vmatprep.subr.bf16.mxu1 %v6172_v43  ;;  %6199 = vmatpush3.bf16.msra.mxu0 %v6196_v4 }
 0x879   :  { %6201 = vmatprep.subr.bf16.mxu0 %v6200_v54 }
 0x87b   :  { %6191 = vmatpush3.bf16.msra.mxu1 %v6172_v43 }
 0x87c   :  { %6029 = vmatprep.subr.msk.mxu1 %vm5209_vm3, %v5188_v29  ;;  %6203 = vmatpush3.bf16.msra.mxu0 %v6200_v54 }
 0x87d   :  { %6205 = vmatprep.subr.bf16.mxu0 %v6204_v47 }
 0x87e   :  { %6024 = vmatmul.mubr.msk.f32.vlgmr.msra.gmra.mrb[68].mxu1 %vm4696_vm4, %v3713_v56 }
 0x87f   :  { %6026 = vmatprep.mubr.msk.f32.mxu1 %vm4696_vm4, %v3715_v31  ;;  %6030 = vmatpush3.msk.msra.mxu1 %vm5209_vm3, %v5188_v29 }
 0x880   :  { %6208 = vmatprep.subr.bf16.mxu1 %v6192_v0  ;;  %6207 = vmatpush3.bf16.msra.mxu0 %v6204_v47 }
 0x882   :  { %6027 = vmatmul.mubr.msk.f32.gmra.mrb[70].mxu1 %vm4696_vm4, %v3717_v8 }
 0x941   :  { %v6003_v28 = vpop.f32.mrb[64].mxu1 }
 0x942   :  { %v5068_v3 = vpop.f32.mrb[65].mxu1 }
 0x945   :  { %v6006_v59 = vpop.f32.mrb[66].mxu1 }
 0x946   :  { %v5078_v14 = vpop.f32.mrb[67].mxu1 }
 0x951   :  { %v6025_v9 = vpop.f32.mrb[68].mxu1 }
 0x952   :  { %v5185_v25 = vmax.f32 %v6003_v28, %v6025_v9  ;;  %v5165_v20 = vpop.f32.mrb[69].mxu1 }
 0x953   :  { %v5184_v61 = vmax.f32 %v5068_v3, %v5165_v20 }
 0x955   :  { %v6028_v40 = vpop.f32.mrb[70].mxu1  ;;  %6031 = vmatprep.mubr.msk.f32.mxu1 %vm5196_vm1, %v5184_v61 }
 0x956   :  { %v5187_v57 = vmax.f32 %v6006_v59, %v6028_v40  ;;  %v5175_v19 = vpop.f32.mrb[71].mxu1  ;;  %6032 = vmatmul.mubr.msk.f32.vlgmr.msra.gmra.mrb[72].mxu1 %vm5196_vm1, %v5185_v25 }
 0x957   :  { %v5186_v12 = vmax.f32 %v5078_v14, %v5175_v19  ;;  %6212 = vmatpush3.bf16.msra.mxu1 %v6192_v0 }
 0x958   :  { %6209 = vmatprep.subr.bf16.mxu1 %v6196_v4 }
 0x959   :  { %6034 = vmatprep.mubr.msk.f32.mxu1 %vm5196_vm1, %v5186_v12 }
 0x95a   :  { %6035 = vmatmul.mubr.msk.f32.gmra.mrb[74].mxu1 %vm5196_vm1, %v5187_v57 }
 0x95b   :  { %6213 = vmatpush3.bf16.msra.mxu1 %v6196_v4 }
 0x95c   :  { %6210 = vmatprep.subr.bf16.mxu1 %v6200_v54 }
 0x95f   :  { %6214 = vmatpush3.bf16.msra.mxu1 %v6200_v54 }
 0x960   :  { %6211 = vmatprep.subr.bf16.mxu1 %v6204_v47 }
 0x963   :  { %6215 = vmatpush3.bf16.msra.mxu1 %v6204_v47 }
 0xa29   :  { %v6033_v33 = vpop.f32.mrb[72].mxu1 }
 0xa2a   :  { %v5285_v32 = vadd.f32 %v6033_v33, %v5601_v58  ;;  %v5279_v18 = vpop.f32.mrb[73].mxu1 }
 0xa2b   :  { %v5280_v42 = vadd.f32 %v5601_v58, %v5279_v18 }
 0xa2c   :  { %v5299_v1 = vmax.f32 %v5285_v32, 0.0 }
 0xa2d   :  { %v5298_v15 = vmax.f32 %v5280_v42, 0.0  ;;  %v6036_v22 = vpop.f32.mrb[74].mxu1 }
 0xa2e   :  { %v5295_v39 = vadd.f32 %v6036_v22, %v5601_v58  ;;  %v5289_v30 = vpop.f32.mrb[75].mxu1 }
 0xa2f   :  { %v5290_v27 = vadd.f32 %v5601_v58, %v5289_v30  ;;  %6053 = vmatprep.mubr.msk.f32.mxu0 %vm4696_vm4, %v5298_v15 }
 0xa30   :  { %6054 = vmatmul.mubr.msk.f32.vlgmr.msra.gmra.mrb[96].mxu0 %vm4696_vm4, %v5299_v1  ;;  %v5301_v5 = vmax.f32 %v5295_v39, 0.0 }
 0xa31   :  { %v5300_v16 = vmax.f32 %v5290_v27, 0.0 }
 0xa33   :  { %6056 = vmatprep.mubr.msk.f32.mxu1 %vm4696_vm4, %v5300_v16 }
 0xa34   :  { %6057 = vmatmul.mubr.msk.f32.vlgmr.msra.gmra.mrb[76].mxu1 %vm4696_vm4, %v5301_v5 }
 0xb03   :  { %v6055_v36 = vpop.f32.mrb[96].mxu0 }
 0xb04   :  { %v5401_v62 = vadd.f32 %v6055_v36, %v5607_v63  ;;  %v5395_v50 = vpop.f32.mrb[97].mxu0 }
 0xb05   :  { %v5396_v44 = vadd.f32 %v5607_v63, %v5395_v50 }
 0xb06   :  { %v5415_v11 = vsub.f32 0.0, %v5401_v62 }
 0xb07   :  { %v5414_v26 = vsub.f32 0.0, %v5396_v44  ;;  %v6058_v52 = vpop.f32.mrb[76].mxu1 }
 0xb08   :  { %v5420_v7 = vmul.f32 1.442695, %v5415_v11  ;;  %v5411_v21 = vadd.f32 %v6058_v52, %v5607_v63  ;;  %v5405_v53 = vpop.f32.mrb[77].mxu1 }
 0xb09   :  { %v5418_v6 = vmul.f32 1.442695, %v5414_v26  ;;  %v5406_v23 = vadd.f32 %v5607_v63, %v5405_v53 }
 0xb0a   :  { %6500 = vpow2.f32 %v5420_v7  ;;  %v5417_v48 = vsub.f32 0.0, %v5411_v21 }
 0xb0b   :  { %6502 = vpow2.f32 %v5418_v6  ;;  %v5416_v38 = vsub.f32 0.0, %v5406_v23 }
 0xb0c   :  { %v5424_v45 = vmul.f32 1.442695, %v5417_v48 }
 0xb0d   :  { %v5422_v24 = vmul.f32 1.442695, %v5416_v38 }
 0xb0e   :  { %6504 = vpow2.f32 %v5424_v45 }
 0xb0f   :  { %6506 = vpow2.f32 %v5422_v24 }
 0xb14   :  { %v6501_v41 = vpop.eup %6500 }
 0xb15   :  { %v6503_v43 = vpop.eup %6502  ;;  %v5427_v55 = vadd.f32 1.0, %v6501_v41 }
 0xb16   :  { %v5426_v10 = vadd.f32 1.0, %v6503_v43 }
 0xb17   :  { %6508 = vrcp.f32 %v5427_v55 }
 0xb18   :  { %v6505_v46 = vpop.eup %6504  ;;  %6510 = vrcp.f32 %v5426_v10 }
 0xb19   :  { %v6507_v37 = vpop.eup %6506  ;;  %v5429_v56 = vadd.f32 1.0, %v6505_v46 }
 0xb1a   :  { %v5428_v31 = vadd.f32 1.0, %v6507_v37 }
 0xb1b   :  { %6512 = vrcp.f32 %v5429_v56 }
 0xb1c   :  { %6514 = vrcp.f32 %v5428_v31 }
 0xb21   :  { %v6509_v8 = vpop.eup %6508 }
 0xb22   :  { %v6511_v29 = vpop.eup %6510  ;;  %5439 = vst [vmem:[%s10593_s9 + $0x8] sm:$0xff] %v6509_v8 }
 0xb23   :  { %5438 = vst [vmem:[%s10593_s9] sm:$0xff] %v6511_v29 }
 0xb25   :  { %v6513_v13 = vpop.eup %6512 }
 0xb26   :  { %v6515_v49 = vpop.eup %6514  ;;  %5441 = vst [vmem:[%s10593_s9 + $0x18] sm:$0xff] %v6513_v13 }
 0xb27   :  { %5440 = vst [vmem:[%s10593_s9 + $0x10] sm:$0xff] %v6515_v49 }

</bundles_post_ra>
